<compile_context>
chip_gen: v7x
topology: tpu7x:2x2x1
jax: 0.10.0
libtpu: 0.0.40
codegen_flags: <defaults>
</compile_context>

<pallas_src>
import functools

import numpy as np
import jax
import jax.numpy as jnp
from jax.experimental import pallas as pl
from jax.experimental.pallas import tpu as pltpu

_VMEM_LIMIT = 48 * 1024 * 1024   # < v7x 64 MiB physical, > default scoped
_MM_TM = 256                     # M tile for matmul / highway kernels


# --------------------------------------------------------------------------
# small helpers
# --------------------------------------------------------------------------
def _round_up(x, m):
    return (x + m - 1) // m * m


def _pad_axis(x, axis, target):
    pad = target - x.shape[axis]
    if pad <= 0:
        return x
    widths = [(0, 0)] * x.ndim
    widths[axis] = (0, pad)
    return jnp.pad(x, widths)


def _pick_tile(dim, cands=(512, 256, 128)):
    for c in cands:
        if dim % c == 0:
            return c
    return dim


# --------------------------------------------------------------------------
# Pallas kernel 1: tiled matmul with fused (relu +) per-column affine epilogue
# --------------------------------------------------------------------------
def _matmul_kernel(a_ref, b_ref, scale_ref, shift_ref, o_ref, acc_ref, *, relu):
    @pl.when(pl.program_id(2) == 0)
    def _():
        acc_ref[...] = jnp.zeros_like(acc_ref)

    acc_ref[...] += jnp.dot(a_ref[...], b_ref[...],
                            preferred_element_type=jnp.float32)

    @pl.when(pl.program_id(2) == pl.num_programs(2) - 1)
    def _():
        y = acc_ref[...]
        if relu:
            y = jnp.maximum(y, 0.0)
        o_ref[...] = (y * scale_ref[...] + shift_ref[...]).astype(o_ref.dtype)


def pallas_matmul(a, wp, relu=False, out_dtype=jnp.bfloat16):
    """a: (M, K_logical); wp: prepped dense weight dict. Returns (M, N_logical)."""
    M = a.shape[0]
    Kp, Np = wp['w'].shape
    a = _pad_axis(a.astype(jnp.bfloat16), 1, Kp)
    tm = min(_MM_TM, _round_up(M, 8))
    Mp = _round_up(M, tm)
    a = _pad_axis(a, 0, Mp)
    tn = _pick_tile(Np)
    tk = _pick_tile(Kp)
    out = pl.pallas_call(
        functools.partial(_matmul_kernel, relu=relu),
        out_shape=jax.ShapeDtypeStruct((Mp, Np), out_dtype),
        grid=(Mp // tm, Np // tn, Kp // tk),
        in_specs=[pl.BlockSpec((tm, tk), lambda i, j, k: (i, k)),
                  pl.BlockSpec((tk, tn), lambda i, j, k: (k, j)),
                  pl.BlockSpec((1, tn), lambda i, j, k: (0, j)),
                  pl.BlockSpec((1, tn), lambda i, j, k: (0, j))],
        out_specs=pl.BlockSpec((tm, tn), lambda i, j, k: (i, j)),
        scratch_shapes=[pltpu.VMEM((tm, tn), jnp.float32)],
        compiler_params=pltpu.CompilerParams(
            dimension_semantics=("parallel", "parallel", "arbitrary"),
            vmem_limit_bytes=_VMEM_LIMIT),
    )(a, wp['w'], wp['scale'], wp['shift'])
    return out[:M, :wp['n']]


# --------------------------------------------------------------------------
# Pallas kernel 2: Conv1d with in-kernel tap loop, fused ReLU + BN affine
# --------------------------------------------------------------------------
def _conv_kernel(x_ref, w_ref, scale_ref, shift_ref, o_ref, *, relu):
    # x_ref: (1, T_in, Cin_p), w_ref: (K, Cin_p, tn), o_ref: (1, T_out_p, tn)
    ktaps = w_ref.shape[0]
    t_out = o_ref.shape[1]
    acc = jnp.zeros((t_out, o_ref.shape[2]), jnp.float32)
    for k in range(ktaps):                       # unrolled tap loop (no im2col)
        acc = acc + jnp.dot(x_ref[0, k:k + t_out, :], w_ref[k],
                            preferred_element_type=jnp.float32)
    if relu:
        acc = jnp.maximum(acc, 0.0)
    o_ref[0] = (acc * scale_ref[...] + shift_ref[...]).astype(o_ref.dtype)


def pallas_conv(x, wp, relu, out_dtype=jnp.bfloat16):
    """Fused Conv1d(+ReLU)(+BN-eval affine).  x: (B, T, Cin_logical)."""
    B, T, _ = x.shape
    ktaps, cin_p, Np = wp['w'].shape
    P = wp['pad_left']
    t_out_p = _round_up(T, 8)
    t_in = _round_up(t_out_p + ktaps - 1, 8)
    x = _pad_axis(x.astype(jnp.bfloat16), 2, cin_p)
    x = jnp.pad(x, ((0, 0), (P, t_in - P - T), (0, 0)))
    tn = _pick_tile(Np, (256, 128))
    out = pl.pallas_call(
        functools.partial(_conv_kernel, relu=relu),
        out_shape=jax.ShapeDtypeStruct((B, t_out_p, Np), out_dtype),
        grid=(B, Np // tn),
        in_specs=[pl.BlockSpec((1, t_in, cin_p), lambda b, j: (b, 0, 0)),
                  pl.BlockSpec((ktaps, cin_p, tn), lambda b, j: (0, 0, j)),
                  pl.BlockSpec((1, tn), lambda b, j: (0, j)),
                  pl.BlockSpec((1, tn), lambda b, j: (0, j))],
        out_specs=pl.BlockSpec((1, t_out_p, tn), lambda b, j: (b, 0, j)),
        compiler_params=pltpu.CompilerParams(
            dimension_semantics=("parallel", "parallel"),
            vmem_limit_bytes=_VMEM_LIMIT),
    )(x, wp['w'], wp['scale'], wp['shift'])
    return out[:, :T, :wp['n']]


# --------------------------------------------------------------------------
# Pallas kernel 3: fused highway stack (all layers, W1||W2 in one dot)
# --------------------------------------------------------------------------
def _highway_kernel(x_ref, w_ref, b_ref, o_ref):
    x = x_ref[...].astype(jnp.float32)
    cp = x.shape[1]
    for l in range(w_ref.shape[0]):
        y = jnp.dot(x.astype(jnp.bfloat16), w_ref[l],
                    preferred_element_type=jnp.float32) + b_ref[l]
        g = jax.nn.sigmoid(y[:, cp:])
        x = g * jnp.maximum(y[:, :cp], 0.0) + (1.0 - g) * x
    o_ref[...] = x.astype(o_ref.dtype)


def pallas_highway_stack(x, hp):
    B, T, C = x.shape
    cp, L = hp['cp'], hp['layers']
    M = B * T
    x2 = _pad_axis(x.reshape(M, C).astype(jnp.bfloat16), 1, cp)
    tm = min(_MM_TM, _round_up(M, 8))
    Mp = _round_up(M, tm)
    x2 = _pad_axis(x2, 0, Mp)
    out = pl.pallas_call(
        _highway_kernel,
        out_shape=jax.ShapeDtypeStruct((Mp, cp), jnp.bfloat16),
        grid=(Mp // tm,),
        in_specs=[pl.BlockSpec((tm, cp), lambda i: (i, 0)),
                  pl.BlockSpec((L, cp, 2 * cp), lambda i: (0, 0, 0)),
                  pl.BlockSpec((L, 1, 2 * cp), lambda i: (0, 0, 0))],
        out_specs=pl.BlockSpec((tm, cp), lambda i: (i, 0)),
        compiler_params=pltpu.CompilerParams(
            dimension_semantics=("parallel",),
            vmem_limit_bytes=_VMEM_LIMIT),
    )(x2, hp['w'], hp['b'])
    return out[:M, :C].reshape(B, T, C)


# --------------------------------------------------------------------------
# Pallas kernels 4/5: bidirectional GRU / LSTM recurrences
#   - both directions batched, weights resident in VMEM,
#   - hidden state in VMEM scratch across time-chunk grid steps.
# --------------------------------------------------------------------------
def _gru_rec_kernel(gi_ref, whh_ref, bhh_ref, o_ref, h_scr):
    hp = h_scr.shape[-1]

    @pl.when(pl.program_id(0) == 0)
    def _():
        h_scr[...] = jnp.zeros_like(h_scr)

    def step(t, carry):
        gt = gi_ref[t]                                      # (2, Bp, 3Hp) f32
        outs = []
        for d in range(2):
            h = h_scr[d]
            gh = jnp.dot(h.astype(jnp.bfloat16), whh_ref[d],
                         preferred_element_type=jnp.float32) + bhh_ref[d]
            gi = gt[d]
            r = jax.nn.sigmoid(gi[:, :hp] + gh[:, :hp])
            z = jax.nn.sigmoid(gi[:, hp:2 * hp] + gh[:, hp:2 * hp])
            n = jnp.tanh(gi[:, 2 * hp:] + r * gh[:, 2 * hp:])
            h_new = (1.0 - z) * n + z * h
            h_scr[d] = h_new
            outs.append(h_new)
        o_ref[t] = jnp.stack(outs, axis=0).astype(o_ref.dtype)
        return carry

    jax.lax.fori_loop(0, gi_ref.shape[0], step, 0)


def _lstm_rec_kernel(gi_ref, whh_ref, o_ref, h_scr, c_scr):
    hp = h_scr.shape[-1]

    @pl.when(pl.program_id(0) == 0)
    def _():
        h_scr[...] = jnp.zeros_like(h_scr)
        c_scr[...] = jnp.zeros_like(c_scr)

    def step(t, carry):
        gt = gi_ref[t]                                      # (2, Bp, 4Hp) f32
        outs = []
        for d in range(2):
            h = h_scr[d]
            c = c_scr[d]
            g = jnp.dot(h.astype(jnp.bfloat16), whh_ref[d],
                        preferred_element_type=jnp.float32) + gt[d]
            i = jax.nn.sigmoid(g[:, :hp])
            f = jax.nn.sigmoid(g[:, hp:2 * hp])
            gg = jnp.tanh(g[:, 2 * hp:3 * hp])
            o = jax.nn.sigmoid(g[:, 3 * hp:])
            c_new = f * c + i * gg
            h_new = o * jnp.tanh(c_new)
            h_scr[d] = h_new
            c_scr[d] = c_new
            outs.append(h_new)
        o_ref[t] = jnp.stack(outs, axis=0).astype(o_ref.dtype)
        return carry

    jax.lax.fori_loop(0, gi_ref.shape[0], step, 0)


def _birnn_pack(x, wih, gates, hp_):
    """Wide (fwd|bwd) input projection + pack to (Tp, 2, Bp, gates*Hp)."""
    B, T, _ = x.shape
    gi = pallas_matmul(x.reshape(B * T, -1), wih, out_dtype=jnp.float32)
    gi = gi.reshape(B, T, 2, gates * hp_).transpose(2, 1, 0, 3)   # (2, T, B, G)
    gi = jnp.stack([gi[0], gi[1][::-1]], axis=1)                  # (T, 2, B, G)
    Bp = _round_up(B, 8)
    tt = min(128, T)
    Tp = _round_up(T, tt)
    gi = jnp.pad(gi, ((0, Tp - T), (0, 0), (0, Bp - B), (0, 0)))
    return gi, Bp, Tp, tt


def _birnn_unpack(ys, B, T, H):
    fwd = ys[:T, 0, :B, :H]
    bwd = ys[:T, 1, :B, :H][::-1]
    return jnp.concatenate([fwd, bwd], axis=-1).transpose(1, 0, 2)   # (B, T, 2H)


def bigru(x, p):
    B, T, _ = x.shape
    H, Hp = p['h'], p['hp']
    gi, Bp, Tp, tt = _birnn_pack(x, p['wih'], 3, Hp)
    ys = pl.pallas_call(
        _gru_rec_kernel,
        out_shape=jax.ShapeDtypeStruct((Tp, 2, Bp, Hp), jnp.bfloat16),
        grid=(Tp // tt,),
        in_specs=[pl.BlockSpec((tt, 2, Bp, 3 * Hp), lambda c: (c, 0, 0, 0)),
                  pl.BlockSpec((2, Hp, 3 * Hp), lambda c: (0, 0, 0)),
                  pl.BlockSpec((2, 1, 3 * Hp), lambda c: (0, 0, 0))],
        out_specs=pl.BlockSpec((tt, 2, Bp, Hp), lambda c: (c, 0, 0, 0)),
        scratch_shapes=[pltpu.VMEM((2, Bp, Hp), jnp.float32)],
        compiler_params=pltpu.CompilerParams(
            dimension_semantics=("arbitrary",),
            vmem_limit_bytes=_VMEM_LIMIT),
    )(gi, p['whh'], p['bhh'])
    return _birnn_unpack(ys, B, T, H)


def bilstm(x, p):
    B, T, _ = x.shape
    H, Hp = p['h'], p['hp']
    gi, Bp, Tp, tt = _birnn_pack(x, p['wih'], 4, Hp)
    ys = pl.pallas_call(
        _lstm_rec_kernel,
        out_shape=jax.ShapeDtypeStruct((Tp, 2, Bp, Hp), jnp.bfloat16),
        grid=(Tp // tt,),
        in_specs=[pl.BlockSpec((tt, 2, Bp, 4 * Hp), lambda c: (c, 0, 0, 0)),
                  pl.BlockSpec((2, Hp, 4 * Hp), lambda c: (0, 0, 0))],
        out_specs=pl.BlockSpec((tt, 2, Bp, Hp), lambda c: (c, 0, 0, 0)),
        scratch_shapes=[pltpu.VMEM((2, Bp, Hp), jnp.float32),
                        pltpu.VMEM((2, Bp, Hp), jnp.float32)],
        compiler_params=pltpu.CompilerParams(
            dimension_semantics=("arbitrary",),
            vmem_limit_bytes=_VMEM_LIMIT),
    )(gi, p['whh'])
    return _birnn_unpack(ys, B, T, H)


# --------------------------------------------------------------------------
# XLA-side glue (tiny ops kept off the MXU by design)
# --------------------------------------------------------------------------
def pitch_proj_jnp(pitch, w, b):
    """torch Conv1d(1, pitch_emb, 3, padding=1): 3-tap FMA on the VPU."""
    T = pitch.shape[1]
    p = jnp.pad(pitch.astype(jnp.float32), ((0, 0), (1, 1)))
    taps = jnp.stack([p[:, 0:T], p[:, 1:T + 1], p[:, 2:T + 2]], axis=-1)  # (B,T,3)
    return jnp.einsum('btj,cj->btc', taps, w[:, 0, :]) + b


def length_regulate(x, dur, t_mel):
    """LengthRegulator.expand: x (B, L, C), dur (B, L) int -> (B, t_mel, C)."""
    dur = jnp.maximum(dur, 0)
    cs = jnp.cumsum(dur, axis=1)
    t = jnp.arange(t_mel)
    idx = jnp.sum(cs[:, None, :] <= t[None, :, None], axis=-1)
    idx = jnp.clip(idx, 0, x.shape[1] - 1)
    return jnp.take_along_axis(x, idx[:, :, None], axis=1)


def pad_time(x, max_len):
    """x: (B, C, T) -> slice/pad time axis to max_len with -11.5129."""
    x = x[:, :, :max_len]
    pad = max_len - x.shape[2]
    return jnp.pad(x, ((0, 0), (0, 0), (0, pad)), constant_values=-11.5129)


# --------------------------------------------------------------------------
# model blocks
# --------------------------------------------------------------------------
def cbhg(x, p):
    """x: (B, T, C_in) -> (B, T, 2*channels)."""
    B, T, _ = x.shape
    residual = x
    # whole conv bank in ONE lane-dense Pallas call (weights packed per tap)
    cb = pallas_conv(x, p['bank'], relu=True)                  # (B, T, K*channels)
    # MaxPool1d(kernel=2, stride=1, padding=1) trimmed to seq_len
    left = jnp.pad(cb, ((0, 0), (1, 0), (0, 0)),
                   constant_values=-jnp.inf)[:, :T, :]
    pooled = jnp.maximum(cb, left)
    h = pallas_conv(pooled, p['proj1'], relu=True)
    h = pallas_conv(h, p['proj2'], relu=False)
    h = h.astype(jnp.float32) + residual
    if p['pre_highway'] is not None:
        h = pallas_matmul(h.reshape(B * T, -1), p['pre_highway']).reshape(B, T, -1)
    if p['highways']['layers'] > 0:
        h = pallas_highway_stack(h, p['highways'])
    return bigru(h, p['rnn'])


def series_predictor_head(h, rnn_p, lin_w, lin_b, alpha=1.0):
    """BiGRU + Linear(2H -> 1) done as a VPU reduction (no padded MXU tile)."""
    h = bigru(h, rnn_p)
    y = jnp.einsum('btc,c->bt', h.astype(jnp.float32),
                   lin_w[0].astype(jnp.float32)) + lin_b[0]
    return y / alpha


def forward_tacotron(pr, x_ids, mel, dur, mel_lens, pitch, *, t_mel):
    x = pr['embedding'][x_ids]                                    # (B, T, E)

    # --- SeriesPredictors: first convs of both predictors fused in one call ---
    h1 = pallas_conv(x, pr['pred_conv1'], relu=True)
    cd = pr['pred_conv1_split']
    hd, hpp = h1[..., :cd], h1[..., cd:]
    # TODO(synk): conv2/conv3 + GRU of the two predictors could be batched too
    #             when their dims match; kept as separate fused calls here.
    hd = pallas_conv(hd, pr['dur_pred']['conv2'], relu=True)
    hd = pallas_conv(hd, pr['dur_pred']['conv3'], relu=True)
    dur_hat = series_predictor_head(hd, pr['dur_pred']['rnn'],
                                    pr['dur_pred']['lin_w'],
                                    pr['dur_pred']['lin_b'])      # (B, T)
    hpp = pallas_conv(hpp, pr['pitch_pred']['conv2'], relu=True)
    hpp = pallas_conv(hpp, pr['pitch_pred']['conv3'], relu=True)
    pitch_hat = series_predictor_head(hpp, pr['pitch_pred']['rnn'],
                                      pr['pitch_pred']['lin_w'],
                                      pr['pitch_pred']['lin_b'])[:, None, :]  # (B,1,T)

    # --- prenet CBHG ---
    h = cbhg(x, pr['prenet'])                                     # (B, T, 2*prenet)

    # --- pitch projection (Cin=1, k=3): tiny, stays on the VPU via XLA ---
    ppj = pitch_proj_jnp(pitch, pr['pitch_proj_w'], pr['pitch_proj_b'])
    h = jnp.concatenate([h.astype(jnp.float32), ppj], axis=-1)

    # --- length regulator + zero beyond mel_lens ---
    h = length_regulate(h, dur, t_mel)                            # (B, t_mel, C)
    mask = (jnp.arange(t_mel)[None, :] < mel_lens[:, None])[:, :, None]
    h = h * mask.astype(h.dtype)

    # --- BiLSTM + projection to mels ---
    h = bilstm(h, pr['lstm'])                                     # (B, t_mel, 2*rnn)
    B = h.shape[0]
    y = pallas_matmul(h.reshape(B * t_mel, -1), pr['lin'],
                      out_dtype=jnp.float32).reshape(B, t_mel, -1)

    # --- postnet CBHG + projection ---
    post = cbhg(y, pr['postnet'])
    post = pallas_matmul(post.reshape(B * t_mel, -1), pr['post_proj'],
                         out_dtype=jnp.float32).reshape(B, t_mel, -1)

    max_len = mel.shape[2]
    y_out = pad_time(jnp.transpose(y, (0, 2, 1)), max_len)        # (B, n_mels, max)
    post_out = pad_time(jnp.transpose(post, (0, 2, 1)), max_len)
    return y_out, post_out, dur_hat, pitch_hat


# --------------------------------------------------------------------------
# one-time weight packing (outside jit): bf16, 128-lane padded, BN folded
# --------------------------------------------------------------------------
def _prep_dense(w_kn, bias=None, scale=None, shift=None):
    w = np.asarray(w_kn, np.float32)
    K, N = w.shape
    Kp, Np = _round_up(K, 128), _round_up(N, 128)
    W = np.zeros((Kp, Np), np.float32)
    W[:K, :N] = w
    sc = np.zeros((1, Np), np.float32)
    sh = np.zeros((1, Np), np.float32)
    sc[0, :N] = 1.0 if scale is None else np.asarray(scale, np.float32)
    if shift is not None:
        sh[0, :N] = np.asarray(shift, np.float32)
    elif bias is not None:
        sh[0, :N] = np.asarray(bias, np.float32)
    return {'w': jnp.asarray(W, jnp.bfloat16), 'scale': jnp.asarray(sc),
            'shift': jnp.asarray(sh), 'n': N, 'k': K}


def _prep_conv_group(convs):
    """Pack one or more convs that share the same input into one (K,Cin,N) weight."""
    cin = int(np.asarray(convs[0]['w']).shape[1])
    kmax = max(int(np.asarray(c['w']).shape[2]) for c in convs)
    P = kmax // 2
    n_log = sum(int(np.asarray(c['w']).shape[0]) for c in convs)
    Np = _round_up(n_log, 128)
    cin_p = _round_up(cin, 128)
    W = np.zeros((kmax, cin_p, Np), np.float32)
    sc = np.zeros((1, Np), np.float32)
    sh = np.zeros((1, Np), np.float32)
    off_n = 0
    for c in convs:
        w = np.asarray(c['w'], np.float32)            # (Cout, Cin, k)
        cout, cin_c, k = w.shape
        off_k = P - k // 2                            # align taps to unified pad P
        W[off_k:off_k + k, :cin_c, off_n:off_n + cout] = np.transpose(w, (2, 1, 0))
        sc[0, off_n:off_n + cout] = np.asarray(c['scale'], np.float32)
        sh[0, off_n:off_n + cout] = np.asarray(c['shift'], np.float32)
        off_n += cout
    return {'w': jnp.asarray(W, jnp.bfloat16), 'scale': jnp.asarray(sc),
            'shift': jnp.asarray(sh), 'n': n_log, 'pad_left': P}


def _prep_highways(hws, channels):
    c = channels
    cp = _round_up(c, 128)
    L = max(len(hws), 1)
    W = np.zeros((L, cp, 2 * cp), np.float32)
    Bv = np.zeros((L, 1, 2 * cp), np.float32)
    for l, hw in enumerate(hws):
        W[l, :c, :c] = np.asarray(hw['w1'], np.float32).T
        W[l, :c, cp:cp + c] = np.asarray(hw['w2'], np.float32).T
        Bv[l, 0, :c] = np.asarray(hw['b1'], np.float32)
        Bv[l, 0, cp:cp + c] = np.asarray(hw['b2'], np.float32)
    return {'w': jnp.asarray(W, jnp.bfloat16), 'b': jnp.asarray(Bv),
            'c': c, 'cp': cp, 'layers': len(hws)}


def _prep_bigru(p):
    w_ih0 = np.asarray(p['fwd']['w_ih'], np.float32)
    input_size = w_ih0.shape[1]
    h = np.asarray(p['fwd']['w_hh'], np.float32).shape[1]
    hp = _round_up(h, 128)
    gw = 3
    Wih = np.zeros((input_size, 2 * gw * hp), np.float32)
    bih = np.zeros((2 * gw * hp,), np.float32)
    Whh = np.zeros((2, hp, gw * hp), np.float32)
    Bhh = np.zeros((2, 1, gw * hp), np.float32)
    for d, dp in enumerate((p['fwd'], p['bwd'])):
        wih = np.asarray(dp['w_ih'], np.float32)
        whh = np.asarray(dp['w_hh'], np.float32)
        b_ih = np.asarray(dp['b_ih'], np.float32)
        b_hh = np.asarray(dp['b_hh'], np.float32)
        for g in range(gw):
            col = d * gw * hp + g * hp
            Wih[:, col:col + h] = wih[g * h:(g + 1) * h, :].T
            bih[col:col + h] = b_ih[g * h:(g + 1) * h]
            Whh[d, :h, g * hp:g * hp + h] = whh[g * h:(g + 1) * h, :].T
            Bhh[d, 0, g * hp:g * hp + h] = b_hh[g * h:(g + 1) * h]
    return {'wih': _prep_dense(Wih, bias=bih),
            'whh': jnp.asarray(Whh, jnp.bfloat16),
            'bhh': jnp.asarray(Bhh), 'h': h, 'hp': hp}


def _prep_bilstm(p):
    w_ih0 = np.asarray(p['fwd']['w_ih'], np.float32)
    input_size = w_ih0.shape[1]
    h = np.asarray(p['fwd']['w_hh'], np.float32).shape[1]
    hp = _round_up(h, 128)
    gw = 4
    Wih = np.zeros((input_size, 2 * gw * hp), np.float32)
    bih = np.zeros((2 * gw * hp,), np.float32)
    Whh = np.zeros((2, hp, gw * hp), np.float32)
    for d, dp in enumerate((p['fwd'], p['bwd'])):
        wih = np.asarray(dp['w_ih'], np.float32)
        whh = np.asarray(dp['w_hh'], np.float32)
        b = np.asarray(dp['b_ih'], np.float32) + np.asarray(dp['b_hh'], np.float32)
        for g in range(gw):
            col = d * gw * hp + g * hp
            Wih[:, col:col + h] = wih[g * h:(g + 1) * h, :].T
            bih[col:col + h] = b[g * h:(g + 1) * h]
            Whh[d, :h, g * hp:g * hp + h] = whh[g * h:(g + 1) * h, :].T
    return {'wih': _prep_dense(Wih, bias=bih),
            'whh': jnp.asarray(Whh, jnp.bfloat16), 'h': h, 'hp': hp}


def prepare_params(params):
    dp, pp = params['dur_pred'], params['pitch_pred']

    def prep_pred_tail(sp):
        return {'conv2': _prep_conv_group([sp['convs'][1]]),
                'conv3': _prep_conv_group([sp['convs'][2]]),
                'rnn': _prep_bigru(sp['rnn']),
                'lin_w': jnp.asarray(sp['lin_w'], jnp.float32),
                'lin_b': jnp.asarray(sp['lin_b'], jnp.float32)}

    def prep_cbhg(cp):
        channels = int(np.asarray(cp['rnn']['fwd']['w_hh']).shape[1])
        pre = None
        if cp['pre_highway_w'] is not None:
            pre = _prep_dense(np.asarray(cp['pre_highway_w'], np.float32).T)
        return {'bank': _prep_conv_group(cp['bank']),
                'proj1': _prep_conv_group([cp['proj1']]),
                'proj2': _prep_conv_group([cp['proj2']]),
                'pre_highway': pre,
                'highways': _prep_highways(cp['highways'], channels),
                'rnn': _prep_bigru(cp['rnn'])}

    return {
        'embedding': jnp.asarray(params['embedding'], jnp.float32),
        # first convs of both SeriesPredictors fused (shared input x)
        'pred_conv1': _prep_conv_group([dp['convs'][0], pp['convs'][0]]),
        'pred_conv1_split': int(np.asarray(dp['convs'][0]['w']).shape[0]),
        'dur_pred': prep_pred_tail(dp),
        'pitch_pred': prep_pred_tail(pp),
        'prenet': prep_cbhg(params['prenet']),
        'pitch_proj_w': jnp.asarray(params['pitch_proj_w'], jnp.float32),
        'pitch_proj_b': jnp.asarray(params['pitch_proj_b'], jnp.float32),
        'lstm': _prep_bilstm(params['lstm']),
        'lin': _prep_dense(np.asarray(params['lin_w'], np.float32).T,
                           bias=np.asarray(params['lin_b'], np.float32)),
        'post_proj': _prep_dense(np.asarray(params['post_proj_w'], np.float32).T),
        'postnet': prep_cbhg(params['postnet']),
    }


# --------------------------------------------------------------------------
# deterministic torch-layout parameter initialisation
# --------------------------------------------------------------------------
class Gen:
    def __init__(self, key):
        self.key = key

    def normal(self, shape, scale=0.1):
        self.key, sub = jax.random.split(self.key)
        return scale * jax.random.normal(sub, shape, jnp.float32)


def init_bn_conv(gen, cin, cout, k):
    w = gen.normal((cout, cin, k), scale=1.0 / np.sqrt(cin * k))
    gamma = 1.0 + gen.normal((cout,))
    beta = gen.normal((cout,))
    mean = gen.normal((cout,))
    var = 1.0 + jnp.abs(gen.normal((cout,)))
    scale = gamma / jnp.sqrt(var + 1e-5)
    shift = beta - mean * scale
    return {'w': w, 'scale': scale, 'shift': shift}


def init_gru(gen, input_size, hidden):
    def one():
        return {'w_ih': gen.normal((3 * hidden, input_size)),
                'w_hh': gen.normal((3 * hidden, hidden)),
                'b_ih': gen.normal((3 * hidden,)),
                'b_hh': gen.normal((3 * hidden,))}
    return {'fwd': one(), 'bwd': one()}


def init_lstm(gen, input_size, hidden):
    def one():
        return {'w_ih': gen.normal((4 * hidden, input_size)),
                'w_hh': gen.normal((4 * hidden, hidden)),
                'b_ih': gen.normal((4 * hidden,)),
                'b_hh': gen.normal((4 * hidden,))}
    return {'fwd': one(), 'bwd': one()}


def init_series_predictor(gen, in_dims, conv_dims, rnn_dims):
    return {'convs': [init_bn_conv(gen, in_dims, conv_dims, 5),
                      init_bn_conv(gen, conv_dims, conv_dims, 5),
                      init_bn_conv(gen, conv_dims, conv_dims, 5)],
            'rnn': init_gru(gen, conv_dims, rnn_dims),
            'lin_w': gen.normal((1, 2 * rnn_dims)),
            'lin_b': gen.normal((1,))}


def init_cbhg(gen, K, in_channels, channels, proj_channels, num_highways):
    bank = [init_bn_conv(gen, in_channels, channels, k) for k in range(1, K + 1)]
    proj1 = init_bn_conv(gen, K * channels, proj_channels[0], 3)
    proj2 = init_bn_conv(gen, proj_channels[0], proj_channels[1], 3)
    pre_hw = None
    if proj_channels[-1] != channels:
        pre_hw = gen.normal((channels, proj_channels[-1]))
    highways = [{'w1': gen.normal((channels, channels)),
                 'b1': jnp.zeros((channels,), jnp.float32),   # W1.bias.fill_(0.)
                 'w2': gen.normal((channels, channels)),
                 'b2': gen.normal((channels,))}
                for _ in range(num_highways)]
    return {'bank': bank, 'proj1': proj1, 'proj2': proj2,
            'pre_highway_w': pre_hw, 'highways': highways,
            'rnn': init_gru(gen, channels, channels)}


def init_forward_tacotron(key, *, embed_dims, num_chars, durpred_conv_dims,
                          durpred_rnn_dims, pitch_conv_dims, pitch_rnn_dims,
                          pitch_emb_dims, rnn_dim, prenet_k, prenet_dims,
                          postnet_k, postnet_dims, highways, n_mels):
    gen = Gen(key)
    return {
        'embedding': gen.normal((num_chars, embed_dims), scale=1.0),
        'dur_pred': init_series_predictor(gen, embed_dims, durpred_conv_dims,
                                          durpred_rnn_dims),
        'pitch_pred': init_series_predictor(gen, embed_dims, pitch_conv_dims,
                                            pitch_rnn_dims),
        'prenet': init_cbhg(gen, prenet_k, embed_dims, prenet_dims,
                            [prenet_dims, embed_dims], highways),
        'pitch_proj_w': gen.normal((pitch_emb_dims, 1, 3)),
        'pitch_proj_b': gen.normal((pitch_emb_dims,)),
        'lstm': init_lstm(gen, 2 * prenet_dims + pitch_emb_dims, rnn_dim),
        'lin_w': gen.normal((n_mels, 2 * rnn_dim)),
        'lin_b': gen.normal((n_mels,)),
        'postnet': init_cbhg(gen, postnet_k, n_mels, postnet_dims,
                             [postnet_dims, n_mels], highways),
        'post_proj_w': gen.normal((n_mels, 2 * postnet_dims)),
    }


# --------------------------------------------------------------------------
if __name__ == "__main__":
    B, T = 2, 8
    num_chars, embed_dims = 12, 32
    durpred_conv_dims, durpred_rnn_dims = 32, 16
    pitch_conv_dims, pitch_rnn_dims, pitch_emb_dims = 32, 16, 8
    rnn_dim, prenet_k, prenet_dims = 32, 4, 48
    postnet_k, postnet_dims, highways_n, n_mels = 4, 32, 2, 20

    key = jax.random.PRNGKey(0)
    k_param, k_x, k_mel, k_pitch = jax.random.split(key, 4)

    params = init_forward_tacotron(
        k_param, embed_dims=embed_dims, num_chars=num_chars,
        durpred_conv_dims=durpred_conv_dims, durpred_rnn_dims=durpred_rnn_dims,
        pitch_conv_dims=pitch_conv_dims, pitch_rnn_dims=pitch_rnn_dims,
        pitch_emb_dims=pitch_emb_dims, rnn_dim=rnn_dim, prenet_k=prenet_k,
        prenet_dims=prenet_dims, postnet_k=postnet_k, postnet_dims=postnet_dims,
        highways=highways_n, n_mels=n_mels)
    prepped = prepare_params(params)

    # inputs
    x_ids = jax.random.randint(k_x, (B, T), 0, num_chars)
    dur = jnp.array([[2, 1, 0, 3, 2, 1, 2, 1],
                     [1, 2, 2, 1, 0, 3, 1, 2]], jnp.int32)      # totals = 12, 12
    # output frame count is data-dependent -> computed host-side (static shape)
    t_mel = int(np.max(np.cumsum(np.maximum(np.asarray(dur), 0), axis=1)))
    mel = jax.random.normal(k_mel, (B, n_mels, 16), jnp.float32)
    mel_lens = jnp.array([12, 9], jnp.int32)
    pitch = jax.random.normal(k_pitch, (B, T), jnp.float32)

    fwd_fn = jax.jit(lambda a, b, c, d, e: forward_tacotron(
        prepped, a, b, c, d, e, t_mel=t_mel))

    y, y_post, dur_hat, pitch_hat = fwd_fn(x_ids, mel, dur, mel_lens, pitch)
    jax.block_until_ready((y, y_post, dur_hat, pitch_hat))

    assert y.shape == (B, n_mels, mel.shape[2])
    assert y_post.shape == (B, n_mels, mel.shape[2])
    assert dur_hat.shape == (B, T)
    assert pitch_hat.shape == (B, 1, T)
    for arr in (y, y_post, dur_hat, pitch_hat):
        assert np.all(np.isfinite(np.asarray(arr, np.float32)))
    print("KERNEL_OK")
</pallas_src>

<mosaic_0001>
module attributes {stable_mosaic.version = 11 : i64} {
  func.func @_conv_kernel(%arg0: i32, %arg1: i32, %arg2: memref<1x16x128xbf16, #tpu.memory_space<vmem>>, %arg3: memref<4x128x256xbf16, #tpu.memory_space<vmem>>, %arg4: memref<1x256xf32, #tpu.memory_space<vmem>>, %arg5: memref<1x256xf32, #tpu.memory_space<vmem>>, %arg6: memref<1x8x256xbf16, #tpu.memory_space<vmem>>) attributes {dimension_semantics = [#tpu.dimension_semantics<parallel>, #tpu.dimension_semantics<parallel>], iteration_bounds = array<i64: 2, 1>, scalar_prefetch = 0 : i64, scratch_operands = 0 : i64, tpu.core_type = #tpu.core_type<tc>, window_params = [{transform_indices = @transform_0, window_bounds = array<i64: 1, 16, 128>}, {transform_indices = @transform_1, window_bounds = array<i64: 4, 128, 256>}, {transform_indices = @transform_2, window_bounds = array<i64: 1, 256>}, {transform_indices = @transform_3, window_bounds = array<i64: 1, 256>}, {transform_indices = @transform_4, window_bounds = array<i64: 1, 8, 256>}]} {
    %cst = arith.constant 0.000000e+00 : f32
    %0 = vector.broadcast %cst : f32 to vector<8x256xf32>
    %c0 = arith.constant 0 : index
    %c0_0 = arith.constant 0 : index
    %c0_1 = arith.constant 0 : index
    %1 = vector.load %arg2[%c0, %c0_0, %c0_1] : memref<1x16x128xbf16, #tpu.memory_space<vmem>>, vector<1x8x128xbf16>
    %2 = vector.shape_cast %1 : vector<1x8x128xbf16> to vector<8x128xbf16>
    %c0_2 = arith.constant 0 : index
    %c0_3 = arith.constant 0 : index
    %c0_4 = arith.constant 0 : index
    %3 = vector.load %arg3[%c0_2, %c0_3, %c0_4] : memref<4x128x256xbf16, #tpu.memory_space<vmem>>, vector<1x128x256xbf16>
    %4 = vector.shape_cast %3 : vector<1x128x256xbf16> to vector<128x256xbf16>
    %cst_5 = arith.constant dense<0.000000e+00> : vector<8x256xf32>
    %5 = tpu.matmul %2, %4, %cst_5 {dimension_numbers = #tpu.dot_dimension_numbers<[1], [0], [0], [1], [0, 0, 1, 1], [], []>} : vector<8x128xbf16>, vector<128x256xbf16>, vector<8x256xf32> -> vector<8x256xf32>
    %6 = arith.addf %0, %5 : vector<8x256xf32>
    %c0_6 = arith.constant 0 : index
    %c1 = arith.constant 1 : index
    %c0_7 = arith.constant 0 : index
    %7 = vector.load %arg2[%c0_6, %c1, %c0_7] : memref<1x16x128xbf16, #tpu.memory_space<vmem>>, vector<1x8x128xbf16>
    %8 = vector.shape_cast %7 : vector<1x8x128xbf16> to vector<8x128xbf16>
    %c1_8 = arith.constant 1 : index
    %c0_9 = arith.constant 0 : index
    %c0_10 = arith.constant 0 : index
    %9 = vector.load %arg3[%c1_8, %c0_9, %c0_10] : memref<4x128x256xbf16, #tpu.memory_space<vmem>>, vector<1x128x256xbf16>
    %10 = vector.shape_cast %9 : vector<1x128x256xbf16> to vector<128x256xbf16>
    %cst_11 = arith.constant dense<0.000000e+00> : vector<8x256xf32>
    %11 = tpu.matmul %8, %10, %cst_11 {dimension_numbers = #tpu.dot_dimension_numbers<[1], [0], [0], [1], [0, 0, 1, 1], [], []>} : vector<8x128xbf16>, vector<128x256xbf16>, vector<8x256xf32> -> vector<8x256xf32>
    %12 = arith.addf %6, %11 : vector<8x256xf32>
    %c0_12 = arith.constant 0 : index
    %c2 = arith.constant 2 : index
    %c0_13 = arith.constant 0 : index
    %13 = vector.load %arg2[%c0_12, %c2, %c0_13] : memref<1x16x128xbf16, #tpu.memory_space<vmem>>, vector<1x8x128xbf16>
    %14 = vector.shape_cast %13 : vector<1x8x128xbf16> to vector<8x128xbf16>
    %c2_14 = arith.constant 2 : index
    %c0_15 = arith.constant 0 : index
    %c0_16 = arith.constant 0 : index
    %15 = vector.load %arg3[%c2_14, %c0_15, %c0_16] : memref<4x128x256xbf16, #tpu.memory_space<vmem>>, vector<1x128x256xbf16>
    %16 = vector.shape_cast %15 : vector<1x128x256xbf16> to vector<128x256xbf16>
    %cst_17 = arith.constant dense<0.000000e+00> : vector<8x256xf32>
    %17 = tpu.matmul %14, %16, %cst_17 {dimension_numbers = #tpu.dot_dimension_numbers<[1], [0], [0], [1], [0, 0, 1, 1], [], []>} : vector<8x128xbf16>, vector<128x256xbf16>, vector<8x256xf32> -> vector<8x256xf32>
    %18 = arith.addf %12, %17 : vector<8x256xf32>
    %c0_18 = arith.constant 0 : index
    %c3 = arith.constant 3 : index
    %c0_19 = arith.constant 0 : index
    %19 = vector.load %arg2[%c0_18, %c3, %c0_19] : memref<1x16x128xbf16, #tpu.memory_space<vmem>>, vector<1x8x128xbf16>
    %20 = vector.shape_cast %19 : vector<1x8x128xbf16> to vector<8x128xbf16>
    %c3_20 = arith.constant 3 : index
    %c0_21 = arith.constant 0 : index
    %c0_22 = arith.constant 0 : index
    %21 = vector.load %arg3[%c3_20, %c0_21, %c0_22] : memref<4x128x256xbf16, #tpu.memory_space<vmem>>, vector<1x128x256xbf16>
    %22 = vector.shape_cast %21 : vector<1x128x256xbf16> to vector<128x256xbf16>
    %cst_23 = arith.constant dense<0.000000e+00> : vector<8x256xf32>
    %23 = tpu.matmul %20, %22, %cst_23 {dimension_numbers = #tpu.dot_dimension_numbers<[1], [0], [0], [1], [0, 0, 1, 1], [], []>} : vector<8x128xbf16>, vector<128x256xbf16>, vector<8x256xf32> -> vector<8x256xf32>
    %24 = arith.addf %18, %23 : vector<8x256xf32>
    %cst_24 = arith.constant 0.000000e+00 : f32
    %25 = vector.broadcast %cst_24 : f32 to vector<8x256xf32>
    %26 = arith.maximumf %24, %25 : vector<8x256xf32>
    %c0_25 = arith.constant 0 : index
    %c0_26 = arith.constant 0 : index
    %27 = vector.load %arg4[%c0_25, %c0_26] : memref<1x256xf32, #tpu.memory_space<vmem>>, vector<1x256xf32>
    %28 = vector.broadcast %27 : vector<1x256xf32> to vector<8x256xf32>
    %29 = arith.mulf %26, %28 : vector<8x256xf32>
    %c0_27 = arith.constant 0 : index
    %c0_28 = arith.constant 0 : index
    %30 = vector.load %arg5[%c0_27, %c0_28] : memref<1x256xf32, #tpu.memory_space<vmem>>, vector<1x256xf32>
    %31 = vector.broadcast %30 : vector<1x256xf32> to vector<8x256xf32>
    %32 = arith.addf %29, %31 : vector<8x256xf32>
    %33 = arith.truncf %32 : vector<8x256xf32> to vector<8x256xbf16>
    %c0_29 = arith.constant 0 : index
    %c0_30 = arith.constant 0 : index
    %c0_31 = arith.constant 0 : index
    %34 = vector.load %arg6[%c0_29, %c0_30, %c0_31] : memref<1x8x256xbf16, #tpu.memory_space<vmem>>, vector<1x8x256xbf16>
    %35 = vector.shape_cast %34 : vector<1x8x256xbf16> to vector<8x256xbf16>
    %36 = vector.shape_cast %33 : vector<8x256xbf16> to vector<1x8x256xbf16>
    tpu.vector_store %arg6[%c0_29, %c0_30, %c0_31], %36 {strides = array<i32>} : memref<1x8x256xbf16, #tpu.memory_space<vmem>>, vector<1x8x256xbf16>,
    return
  }
  func.func @transform_0(%arg0: i32, %arg1: i32) -> (i32, i32, i32) {
    %c0_i32 = arith.constant 0 : i32
    %c0_i32_0 = arith.constant 0 : i32
    %c0_i32_1 = arith.constant 0 : i32
    return %arg0, %c0_i32, %c0_i32_0 : i32, i32, i32
  }
  func.func @transform_1(%arg0: i32, %arg1: i32) -> (i32, i32, i32) {
    %c0_i32 = arith.constant 0 : i32
    %c0_i32_0 = arith.constant 0 : i32
    %c0_i32_1 = arith.constant 0 : i32
    return %c0_i32, %c0_i32_0, %arg1 : i32, i32, i32
  }
  func.func @transform_2(%arg0: i32, %arg1: i32) -> (i32, i32) {
    %c0_i32 = arith.constant 0 : i32
    %c0_i32_0 = arith.constant 0 : i32
    return %c0_i32, %arg1 : i32, i32
  }
  func.func @transform_3(%arg0: i32, %arg1: i32) -> (i32, i32) {
    %c0_i32 = arith.constant 0 : i32
    %c0_i32_0 = arith.constant 0 : i32
    return %c0_i32, %arg1 : i32, i32
  }
  func.func @transform_4(%arg0: i32, %arg1: i32) -> (i32, i32, i32) {
    %c0_i32 = arith.constant 0 : i32
    %c0_i32_0 = arith.constant 0 : i32
    return %arg0, %c0_i32, %arg1 : i32, i32, i32
  }
}

module attributes {stable_mosaic.version = 11 : i64} {
  func.func @_conv_kernel(%arg0: i32, %arg1: i32, %arg2: memref<1x16x256xbf16, #tpu.memory_space<vmem>>, %arg3: memref<3x256x128xbf16, #tpu.memory_space<vmem>>, %arg4: memref<1x128xf32, #tpu.memory_space<vmem>>, %arg5: memref<1x128xf32, #tpu.memory_space<vmem>>, %arg6: memref<1x8x128xbf16, #tpu.memory_space<vmem>>) attributes {dimension_semantics = [#tpu.dimension_semantics<parallel>, #tpu.dimension_semantics<parallel>], iteration_bounds = array<i64: 2, 1>, scalar_prefetch = 0 : i64, scratch_operands = 0 : i64, tpu.core_type = #tpu.core_type<tc>, window_params = [{transform_indices = @transform_0, window_bounds = array<i64: 1, 16, 256>}, {transform_indices = @transform_1, window_bounds = array<i64: 3, 256, 128>}, {transform_indices = @transform_2, window_bounds = array<i64: 1, 128>}, {transform_indices = @transform_3, window_bounds = array<i64: 1, 128>}, {transform_indices = @transform_4, window_bounds = array<i64: 1, 8, 128>}]} {
    %cst = arith.constant 0.000000e+00 : f32
    %0 = vector.broadcast %cst : f32 to vector<8x128xf32>
    %c0 = arith.constant 0 : index
    %c0_0 = arith.constant 0 : index
    %c0_1 = arith.constant 0 : index
    %1 = vector.load %arg2[%c0, %c0_0, %c0_1] : memref<1x16x256xbf16, #tpu.memory_space<vmem>>, vector<1x8x256xbf16>
    %2 = vector.shape_cast %1 : vector<1x8x256xbf16> to vector<8x256xbf16>
    %c0_2 = arith.constant 0 : index
    %c0_3 = arith.constant 0 : index
    %c0_4 = arith.constant 0 : index
    %3 = vector.load %arg3[%c0_2, %c0_3, %c0_4] : memref<3x256x128xbf16, #tpu.memory_space<vmem>>, vector<1x256x128xbf16>
    %4 = vector.shape_cast %3 : vector<1x256x128xbf16> to vector<256x128xbf16>
    %cst_5 = arith.constant dense<0.000000e+00> : vector<8x128xf32>
    %5 = tpu.matmul %2, %4, %cst_5 {dimension_numbers = #tpu.dot_dimension_numbers<[1], [0], [0], [1], [0, 0, 1, 1], [], []>} : vector<8x256xbf16>, vector<256x128xbf16>, vector<8x128xf32> -> vector<8x128xf32>
    %6 = arith.addf %0, %5 : vector<8x128xf32>
    %c0_6 = arith.constant 0 : index
    %c1 = arith.constant 1 : index
    %c0_7 = arith.constant 0 : index
    %7 = vector.load %arg2[%c0_6, %c1, %c0_7] : memref<1x16x256xbf16, #tpu.memory_space<vmem>>, vector<1x8x256xbf16>
    %8 = vector.shape_cast %7 : vector<1x8x256xbf16> to vector<8x256xbf16>
    %c1_8 = arith.constant 1 : index
    %c0_9 = arith.constant 0 : index
    %c0_10 = arith.constant 0 : index
    %9 = vector.load %arg3[%c1_8, %c0_9, %c0_10] : memref<3x256x128xbf16, #tpu.memory_space<vmem>>, vector<1x256x128xbf16>
    %10 = vector.shape_cast %9 : vector<1x256x128xbf16> to vector<256x128xbf16>
    %cst_11 = arith.constant dense<0.000000e+00> : vector<8x128xf32>
    %11 = tpu.matmul %8, %10, %cst_11 {dimension_numbers = #tpu.dot_dimension_numbers<[1], [0], [0], [1], [0, 0, 1, 1], [], []>} : vector<8x256xbf16>, vector<256x128xbf16>, vector<8x128xf32> -> vector<8x128xf32>
    %12 = arith.addf %6, %11 : vector<8x128xf32>
    %c0_12 = arith.constant 0 : index
    %c2 = arith.constant 2 : index
    %c0_13 = arith.constant 0 : index
    %13 = vector.load %arg2[%c0_12, %c2, %c0_13] : memref<1x16x256xbf16, #tpu.memory_space<vmem>>, vector<1x8x256xbf16>
    %14 = vector.shape_cast %13 : vector<1x8x256xbf16> to vector<8x256xbf16>
    %c2_14 = arith.constant 2 : index
    %c0_15 = arith.constant 0 : index
    %c0_16 = arith.constant 0 : index
    %15 = vector.load %arg3[%c2_14, %c0_15, %c0_16] : memref<3x256x128xbf16, #tpu.memory_space<vmem>>, vector<1x256x128xbf16>
    %16 = vector.shape_cast %15 : vector<1x256x128xbf16> to vector<256x128xbf16>
    %cst_17 = arith.constant dense<0.000000e+00> : vector<8x128xf32>
    %17 = tpu.matmul %14, %16, %cst_17 {dimension_numbers = #tpu.dot_dimension_numbers<[1], [0], [0], [1], [0, 0, 1, 1], [], []>} : vector<8x256xbf16>, vector<256x128xbf16>, vector<8x128xf32> -> vector<8x128xf32>
    %18 = arith.addf %12, %17 : vector<8x128xf32>
    %cst_18 = arith.constant 0.000000e+00 : f32
    %19 = vector.broadcast %cst_18 : f32 to vector<8x128xf32>
    %20 = arith.maximumf %18, %19 : vector<8x128xf32>
    %c0_19 = arith.constant 0 : index
    %c0_20 = arith.constant 0 : index
    %21 = vector.load %arg4[%c0_19, %c0_20] : memref<1x128xf32, #tpu.memory_space<vmem>>, vector<1x128xf32>
    %22 = vector.broadcast %21 : vector<1x128xf32> to vector<8x128xf32>
    %23 = arith.mulf %20, %22 : vector<8x128xf32>
    %c0_21 = arith.constant 0 : index
    %c0_22 = arith.constant 0 : index
    %24 = vector.load %arg5[%c0_21, %c0_22] : memref<1x128xf32, #tpu.memory_space<vmem>>, vector<1x128xf32>
    %25 = vector.broadcast %24 : vector<1x128xf32> to vector<8x128xf32>
    %26 = arith.addf %23, %25 : vector<8x128xf32>
    %27 = arith.truncf %26 : vector<8x128xf32> to vector<8x128xbf16>
    %c0_23 = arith.constant 0 : index
    %c0_24 = arith.constant 0 : index
    %c0_25 = arith.constant 0 : index
    %28 = vector.load %arg6[%c0_23, %c0_24, %c0_25] : memref<1x8x128xbf16, #tpu.memory_space<vmem>>, vector<1x8x128xbf16>
    %29 = vector.shape_cast %28 : vector<1x8x128xbf16> to vector<8x128xbf16>
    %30 = vector.shape_cast %27 : vector<8x128xbf16> to vector<1x8x128xbf16>
    tpu.vector_store %arg6[%c0_23, %c0_24, %c0_25], %30 {strides = array<i32>} : memref<1x8x128xbf16, #tpu.memory_space<vmem>>, vector<1x8x128xbf16>,
    return
  }
  func.func @transform_0(%arg0: i32, %arg1: i32) -> (i32, i32, i32) {
    %c0_i32 = arith.constant 0 : i32
    %c0_i32_0 = arith.constant 0 : i32
    %c0_i32_1 = arith.constant 0 : i32
    return %arg0, %c0_i32, %c0_i32_0 : i32, i32, i32
  }
  func.func @transform_1(%arg0: i32, %arg1: i32) -> (i32, i32, i32) {
    %c0_i32 = arith.constant 0 : i32
    %c0_i32_0 = arith.constant 0 : i32
    %c0_i32_1 = arith.constant 0 : i32
    return %c0_i32, %c0_i32_0, %arg1 : i32, i32, i32
  }
  func.func @transform_2(%arg0: i32, %arg1: i32) -> (i32, i32) {
    %c0_i32 = arith.constant 0 : i32
    %c0_i32_0 = arith.constant 0 : i32
    return %c0_i32, %arg1 : i32, i32
  }
  func.func @transform_3(%arg0: i32, %arg1: i32) -> (i32, i32) {
    %c0_i32 = arith.constant 0 : i32
    %c0_i32_0 = arith.constant 0 : i32
    return %c0_i32, %arg1 : i32, i32
  }
  func.func @transform_4(%arg0: i32, %arg1: i32) -> (i32, i32, i32) {
    %c0_i32 = arith.constant 0 : i32
    %c0_i32_0 = arith.constant 0 : i32
    return %arg0, %c0_i32, %arg1 : i32, i32, i32
  }
}

module attributes {stable_mosaic.version = 11 : i64} {
  func.func @_conv_kernel(%arg0: i32, %arg1: i32, %arg2: memref<1x16x128xbf16, #tpu.memory_space<vmem>>, %arg3: memref<3x128x128xbf16, #tpu.memory_space<vmem>>, %arg4: memref<1x128xf32, #tpu.memory_space<vmem>>, %arg5: memref<1x128xf32, #tpu.memory_space<vmem>>, %arg6: memref<1x8x128xbf16, #tpu.memory_space<vmem>>) attributes {dimension_semantics = [#tpu.dimension_semantics<parallel>, #tpu.dimension_semantics<parallel>], iteration_bounds = array<i64: 2, 1>, scalar_prefetch = 0 : i64, scratch_operands = 0 : i64, tpu.core_type = #tpu.core_type<tc>, window_params = [{transform_indices = @transform_0, window_bounds = array<i64: 1, 16, 128>}, {transform_indices = @transform_1, window_bounds = array<i64: 3, 128, 128>}, {transform_indices = @transform_2, window_bounds = array<i64: 1, 128>}, {transform_indices = @transform_3, window_bounds = array<i64: 1, 128>}, {transform_indices = @transform_4, window_bounds = array<i64: 1, 8, 128>}]} {
    %cst = arith.constant 0.000000e+00 : f32
    %0 = vector.broadcast %cst : f32 to vector<8x128xf32>
    %c0 = arith.constant 0 : index
    %c0_0 = arith.constant 0 : index
    %c0_1 = arith.constant 0 : index
    %1 = vector.load %arg2[%c0, %c0_0, %c0_1] : memref<1x16x128xbf16, #tpu.memory_space<vmem>>, vector<1x8x128xbf16>
    %2 = vector.shape_cast %1 : vector<1x8x128xbf16> to vector<8x128xbf16>
    %c0_2 = arith.constant 0 : index
    %c0_3 = arith.constant 0 : index
    %c0_4 = arith.constant 0 : index
    %3 = vector.load %arg3[%c0_2, %c0_3, %c0_4] : memref<3x128x128xbf16, #tpu.memory_space<vmem>>, vector<1x128x128xbf16>
    %4 = vector.shape_cast %3 : vector<1x128x128xbf16> to vector<128x128xbf16>
    %cst_5 = arith.constant dense<0.000000e+00> : vector<8x128xf32>
    %5 = tpu.matmul %2, %4, %cst_5 {dimension_numbers = #tpu.dot_dimension_numbers<[1], [0], [0], [1], [0, 0, 1, 1], [], []>} : vector<8x128xbf16>, vector<128x128xbf16>, vector<8x128xf32> -> vector<8x128xf32>
    %6 = arith.addf %0, %5 : vector<8x128xf32>
    %c0_6 = arith.constant 0 : index
    %c1 = arith.constant 1 : index
    %c0_7 = arith.constant 0 : index
    %7 = vector.load %arg2[%c0_6, %c1, %c0_7] : memref<1x16x128xbf16, #tpu.memory_space<vmem>>, vector<1x8x128xbf16>
    %8 = vector.shape_cast %7 : vector<1x8x128xbf16> to vector<8x128xbf16>
    %c1_8 = arith.constant 1 : index
    %c0_9 = arith.constant 0 : index
    %c0_10 = arith.constant 0 : index
    %9 = vector.load %arg3[%c1_8, %c0_9, %c0_10] : memref<3x128x128xbf16, #tpu.memory_space<vmem>>, vector<1x128x128xbf16>
    %10 = vector.shape_cast %9 : vector<1x128x128xbf16> to vector<128x128xbf16>
    %cst_11 = arith.constant dense<0.000000e+00> : vector<8x128xf32>
    %11 = tpu.matmul %8, %10, %cst_11 {dimension_numbers = #tpu.dot_dimension_numbers<[1], [0], [0], [1], [0, 0, 1, 1], [], []>} : vector<8x128xbf16>, vector<128x128xbf16>, vector<8x128xf32> -> vector<8x128xf32>
    %12 = arith.addf %6, %11 : vector<8x128xf32>
    %c0_12 = arith.constant 0 : index
    %c2 = arith.constant 2 : index
    %c0_13 = arith.constant 0 : index
    %13 = vector.load %arg2[%c0_12, %c2, %c0_13] : memref<1x16x128xbf16, #tpu.memory_space<vmem>>, vector<1x8x128xbf16>
    %14 = vector.shape_cast %13 : vector<1x8x128xbf16> to vector<8x128xbf16>
    %c2_14 = arith.constant 2 : index
    %c0_15 = arith.constant 0 : index
    %c0_16 = arith.constant 0 : index
    %15 = vector.load %arg3[%c2_14, %c0_15, %c0_16] : memref<3x128x128xbf16, #tpu.memory_space<vmem>>, vector<1x128x128xbf16>
    %16 = vector.shape_cast %15 : vector<1x128x128xbf16> to vector<128x128xbf16>
    %cst_17 = arith.constant dense<0.000000e+00> : vector<8x128xf32>
    %17 = tpu.matmul %14, %16, %cst_17 {dimension_numbers = #tpu.dot_dimension_numbers<[1], [0], [0], [1], [0, 0, 1, 1], [], []>} : vector<8x128xbf16>, vector<128x128xbf16>, vector<8x128xf32> -> vector<8x128xf32>
    %18 = arith.addf %12, %17 : vector<8x128xf32>
    %c0_18 = arith.constant 0 : index
    %c0_19 = arith.constant 0 : index
    %19 = vector.load %arg4[%c0_18, %c0_19] : memref<1x128xf32, #tpu.memory_space<vmem>>, vector<1x128xf32>
    %20 = vector.broadcast %19 : vector<1x128xf32> to vector<8x128xf32>
    %21 = arith.mulf %18, %20 : vector<8x128xf32>
    %c0_20 = arith.constant 0 : index
    %c0_21 = arith.constant 0 : index
    %22 = vector.load %arg5[%c0_20, %c0_21] : memref<1x128xf32, #tpu.memory_space<vmem>>, vector<1x128xf32>
    %23 = vector.broadcast %22 : vector<1x128xf32> to vector<8x128xf32>
    %24 = arith.addf %21, %23 : vector<8x128xf32>
    %25 = arith.truncf %24 : vector<8x128xf32> to vector<8x128xbf16>
    %c0_22 = arith.constant 0 : index
    %c0_23 = arith.constant 0 : index
    %c0_24 = arith.constant 0 : index
    %26 = vector.load %arg6[%c0_22, %c0_23, %c0_24] : memref<1x8x128xbf16, #tpu.memory_space<vmem>>, vector<1x8x128xbf16>
    %27 = vector.shape_cast %26 : vector<1x8x128xbf16> to vector<8x128xbf16>
    %28 = vector.shape_cast %25 : vector<8x128xbf16> to vector<1x8x128xbf16>
    tpu.vector_store %arg6[%c0_22, %c0_23, %c0_24], %28 {strides = array<i32>} : memref<1x8x128xbf16, #tpu.memory_space<vmem>>, vector<1x8x128xbf16>,
    return
  }
  func.func @transform_0(%arg0: i32, %arg1: i32) -> (i32, i32, i32) {
    %c0_i32 = arith.constant 0 : i32
    %c0_i32_0 = arith.constant 0 : i32
    %c0_i32_1 = arith.constant 0 : i32
    return %arg0, %c0_i32, %c0_i32_0 : i32, i32, i32
  }
  func.func @transform_1(%arg0: i32, %arg1: i32) -> (i32, i32, i32) {
    %c0_i32 = arith.constant 0 : i32
    %c0_i32_0 = arith.constant 0 : i32
    %c0_i32_1 = arith.constant 0 : i32
    return %c0_i32, %c0_i32_0, %arg1 : i32, i32, i32
  }
  func.func @transform_2(%arg0: i32, %arg1: i32) -> (i32, i32) {
    %c0_i32 = arith.constant 0 : i32
    %c0_i32_0 = arith.constant 0 : i32
    return %c0_i32, %arg1 : i32, i32
  }
  func.func @transform_3(%arg0: i32, %arg1: i32) -> (i32, i32) {
    %c0_i32 = arith.constant 0 : i32
    %c0_i32_0 = arith.constant 0 : i32
    return %c0_i32, %arg1 : i32, i32
  }
  func.func @transform_4(%arg0: i32, %arg1: i32) -> (i32, i32, i32) {
    %c0_i32 = arith.constant 0 : i32
    %c0_i32_0 = arith.constant 0 : i32
    return %arg0, %c0_i32, %arg1 : i32, i32, i32
  }
}

module attributes {stable_mosaic.version = 11 : i64} {
  func.func @_matmul_kernel(%arg0: i32, %arg1: i32, %arg2: i32, %arg3: memref<16x128xbf16, #tpu.memory_space<vmem>>, %arg4: memref<128x128xbf16, #tpu.memory_space<vmem>>, %arg5: memref<1x128xf32, #tpu.memory_space<vmem>>, %arg6: memref<1x128xf32, #tpu.memory_space<vmem>>, %arg7: memref<16x128xbf16, #tpu.memory_space<vmem>>, %arg8: memref<16x128xf32, #tpu.memory_space<vmem>>) attributes {dimension_semantics = [#tpu.dimension_semantics<parallel>, #tpu.dimension_semantics<parallel>, #tpu.dimension_semantics<arbitrary>], iteration_bounds = array<i64: 1, 1, 1>, scalar_prefetch = 0 : i64, scratch_operands = 1 : i64, tpu.core_type = #tpu.core_type<tc>, window_params = [{transform_indices = @transform_0, window_bounds = array<i64: 16, 128>}, {transform_indices = @transform_1, window_bounds = array<i64: 128, 128>}, {transform_indices = @transform_2, window_bounds = array<i64: 1, 128>}, {transform_indices = @transform_3, window_bounds = array<i64: 1, 128>}, {transform_indices = @transform_4, window_bounds = array<i64: 16, 128>}]} {
    %c0_i32 = arith.constant 0 : i32
    %0 = arith.cmpi eq, %arg2, %c0_i32 : i32
    %1 = arith.extui %0 : i1 to i32
    %c0_i32_0 = arith.constant 0 : i32
    %2 = arith.cmpi ne, %1, %c0_i32_0 : i32
    scf.if %2 {
      %cst_10 = arith.constant 0.000000e+00 : f32
      %12 = vector.broadcast %cst_10 : f32 to vector<16x128xf32>
      %c0_11 = arith.constant 0 : index
      %c0_12 = arith.constant 0 : index
      %13 = vector.load %arg8[%c0_11, %c0_12] : memref<16x128xf32, #tpu.memory_space<vmem>>, vector<16x128xf32>
      tpu.vector_store %arg8[%c0_11, %c0_12], %12 {strides = array<i32>} : memref<16x128xf32, #tpu.memory_space<vmem>>, vector<16x128xf32>,
    } else {
    }
    %c0 = arith.constant 0 : index
    %c0_1 = arith.constant 0 : index
    %3 = vector.load %arg8[%c0, %c0_1] : memref<16x128xf32, #tpu.memory_space<vmem>>, vector<16x128xf32>
    %c0_2 = arith.constant 0 : index
    %c0_3 = arith.constant 0 : index
    %4 = vector.load %arg3[%c0_2, %c0_3] : memref<16x128xbf16, #tpu.memory_space<vmem>>, vector<16x128xbf16>
    %c0_4 = arith.constant 0 : index
    %c0_5 = arith.constant 0 : index
    %5 = vector.load %arg4[%c0_4, %c0_5] : memref<128x128xbf16, #tpu.memory_space<vmem>>, vector<128x128xbf16>
    %cst = arith.constant dense<0.000000e+00> : vector<16x128xf32>
    %6 = tpu.matmul %4, %5, %cst {dimension_numbers = #tpu.dot_dimension_numbers<[1], [0], [0], [1], [0, 0, 1, 1], [], []>} : vector<16x128xbf16>, vector<128x128xbf16>, vector<16x128xf32> -> vector<16x128xf32>
    %7 = arith.addf %3, %6 : vector<16x128xf32>
    %c0_6 = arith.constant 0 : index
    %c0_7 = arith.constant 0 : index
    %8 = vector.load %arg8[%c0_6, %c0_7] : memref<16x128xf32, #tpu.memory_space<vmem>>, vector<16x128xf32>
    tpu.vector_store %arg8[%c0_6, %c0_7], %7 {strides = array<i32>} : memref<16x128xf32, #tpu.memory_space<vmem>>, vector<16x128xf32>,
    %c0_i32_8 = arith.constant 0 : i32
    %9 = arith.cmpi eq, %arg2, %c0_i32_8 : i32
    %10 = arith.extui %9 : i1 to i32
    %c0_i32_9 = arith.constant 0 : i32
    %11 = arith.cmpi ne, %10, %c0_i32_9 : i32
    scf.if %11 {
      %c0_10 = arith.constant 0 : index
      %c0_11 = arith.constant 0 : index
      %12 = vector.load %arg8[%c0_10, %c0_11] : memref<16x128xf32, #tpu.memory_space<vmem>>, vector<16x128xf32>
      %c0_12 = arith.constant 0 : index
      %c0_13 = arith.constant 0 : index
      %13 = vector.load %arg5[%c0_12, %c0_13] : memref<1x128xf32, #tpu.memory_space<vmem>>, vector<1x128xf32>
      %14 = vector.broadcast %13 : vector<1x128xf32> to vector<16x128xf32>
      %15 = arith.mulf %12, %14 : vector<16x128xf32>
      %c0_14 = arith.constant 0 : index
      %c0_15 = arith.constant 0 : index
      %16 = vector.load %arg6[%c0_14, %c0_15] : memref<1x128xf32, #tpu.memory_space<vmem>>, vector<1x128xf32>
      %17 = vector.broadcast %16 : vector<1x128xf32> to vector<16x128xf32>
      %18 = arith.addf %15, %17 : vector<16x128xf32>
      %19 = arith.truncf %18 : vector<16x128xf32> to vector<16x128xbf16>
      %c0_16 = arith.constant 0 : index
      %c0_17 = arith.constant 0 : index
      %20 = vector.load %arg7[%c0_16, %c0_17] : memref<16x128xbf16, #tpu.memory_space<vmem>>, vector<16x128xbf16>
      tpu.vector_store %arg7[%c0_16, %c0_17], %19 {strides = array<i32>} : memref<16x128xbf16, #tpu.memory_space<vmem>>, vector<16x128xbf16>,
    } else {
    }
    return
  }
  func.func @transform_0(%arg0: i32, %arg1: i32, %arg2: i32) -> (i32, i32) {
    %c0_i32 = arith.constant 0 : i32
    return %arg0, %arg2 : i32, i32
  }
  func.func @transform_1(%arg0: i32, %arg1: i32, %arg2: i32) -> (i32, i32) {
    %c0_i32 = arith.constant 0 : i32
    return %arg2, %arg1 : i32, i32
  }
  func.func @transform_2(%arg0: i32, %arg1: i32, %arg2: i32) -> (i32, i32) {
    %c0_i32 = arith.constant 0 : i32
    %c0_i32_0 = arith.constant 0 : i32
    return %c0_i32, %arg1 : i32, i32
  }
  func.func @transform_3(%arg0: i32, %arg1: i32, %arg2: i32) -> (i32, i32) {
    %c0_i32 = arith.constant 0 : i32
    %c0_i32_0 = arith.constant 0 : i32
    return %c0_i32, %arg1 : i32, i32
  }
  func.func @transform_4(%arg0: i32, %arg1: i32, %arg2: i32) -> (i32, i32) {
    %c0_i32 = arith.constant 0 : i32
    return %arg0, %arg1 : i32, i32
  }
}

module attributes {stable_mosaic.version = 11 : i64} {
  func.func @_highway_kernel(%arg0: i32, %arg1: memref<16x128xbf16, #tpu.memory_space<vmem>>, %arg2: memref<2x128x256xbf16, #tpu.memory_space<vmem>>, %arg3: memref<2x1x256xf32, #tpu.memory_space<vmem>>, %arg4: memref<16x128xbf16, #tpu.memory_space<vmem>>) attributes {dimension_semantics = [#tpu.dimension_semantics<parallel>], iteration_bounds = array<i64: 1>, scalar_prefetch = 0 : i64, scratch_operands = 0 : i64, tpu.core_type = #tpu.core_type<tc>, window_params = [{transform_indices = @transform_0, window_bounds = array<i64: 16, 128>}, {pipeline_mode = #tpu.pipeline_mode<synchronous>, transform_indices = @transform_1, window_bounds = array<i64: 2, 128, 256>}, {pipeline_mode = #tpu.pipeline_mode<synchronous>, transform_indices = @transform_2, window_bounds = array<i64: 2, 1, 256>}, {transform_indices = @transform_3, window_bounds = array<i64: 16, 128>}]} {
    %c0 = arith.constant 0 : index
    %c0_0 = arith.constant 0 : index
    %0 = vector.load %arg1[%c0, %c0_0] : memref<16x128xbf16, #tpu.memory_space<vmem>>, vector<16x128xbf16>
    %1 = arith.extf %0 : vector<16x128xbf16> to vector<16x128xf32>
    %2 = arith.truncf %1 : vector<16x128xf32> to vector<16x128xbf16>
    %c0_1 = arith.constant 0 : index
    %c0_2 = arith.constant 0 : index
    %c0_3 = arith.constant 0 : index
    %3 = vector.load %arg2[%c0_1, %c0_2, %c0_3] : memref<2x128x256xbf16, #tpu.memory_space<vmem>>, vector<1x128x256xbf16>
    %4 = vector.shape_cast %3 : vector<1x128x256xbf16> to vector<128x256xbf16>
    %cst = arith.constant dense<0.000000e+00> : vector<16x256xf32>
    %5 = tpu.matmul %2, %4, %cst {dimension_numbers = #tpu.dot_dimension_numbers<[1], [0], [0], [1], [0, 0, 1, 1], [], []>} : vector<16x128xbf16>, vector<128x256xbf16>, vector<16x256xf32> -> vector<16x256xf32>
    %c0_4 = arith.constant 0 : index
    %c0_5 = arith.constant 0 : index
    %c0_6 = arith.constant 0 : index
    %6 = vector.load %arg3[%c0_4, %c0_5, %c0_6] : memref<2x1x256xf32, #tpu.memory_space<vmem>>, vector<1x1x256xf32>
    %7 = vector.shape_cast %6 : vector<1x1x256xf32> to vector<1x256xf32>
    %8 = vector.broadcast %7 : vector<1x256xf32> to vector<16x256xf32>
    %9 = arith.addf %5, %8 : vector<16x256xf32>
    %10 = vector.extract_strided_slice %9 {offsets = [0, 128], sizes = [16, 128], strides = [1, 1]} : vector<16x256xf32> to vector<16x128xf32>
    %11 = arith.negf %10 : vector<16x128xf32>
    %12 = math.exp %11 : vector<16x128xf32>
    %cst_7 = arith.constant 1.000000e+00 : f32
    %13 = vector.broadcast %cst_7 : f32 to vector<16x128xf32>
    %14 = arith.addf %13, %12 : vector<16x128xf32>
    %15 = arith.divf %13, %14 : vector<16x128xf32>
    %16 = vector.extract_strided_slice %9 {offsets = [0, 0], sizes = [16, 128], strides = [1, 1]} : vector<16x256xf32> to vector<16x128xf32>
    %cst_8 = arith.constant 0.000000e+00 : f32
    %17 = vector.broadcast %cst_8 : f32 to vector<16x128xf32>
    %18 = arith.maximumf %16, %17 : vector<16x128xf32>
    %19 = arith.mulf %15, %18 : vector<16x128xf32>
    %cst_9 = arith.constant 1.000000e+00 : f32
    %20 = vector.broadcast %cst_9 : f32 to vector<16x128xf32>
    %21 = arith.subf %20, %15 : vector<16x128xf32>
    %22 = arith.mulf %21, %1 : vector<16x128xf32>
    %23 = arith.addf %19, %22 : vector<16x128xf32>
    %24 = arith.truncf %23 : vector<16x128xf32> to vector<16x128xbf16>
    %c1 = arith.constant 1 : index
    %c0_10 = arith.constant 0 : index
    %c0_11 = arith.constant 0 : index
    %25 = vector.load %arg2[%c1, %c0_10, %c0_11] : memref<2x128x256xbf16, #tpu.memory_space<vmem>>, vector<1x128x256xbf16>
    %26 = vector.shape_cast %25 : vector<1x128x256xbf16> to vector<128x256xbf16>
    %cst_12 = arith.constant dense<0.000000e+00> : vector<16x256xf32>
    %27 = tpu.matmul %24, %26, %cst_12 {dimension_numbers = #tpu.dot_dimension_numbers<[1], [0], [0], [1], [0, 0, 1, 1], [], []>} : vector<16x128xbf16>, vector<128x256xbf16>, vector<16x256xf32> -> vector<16x256xf32>
    %c1_13 = arith.constant 1 : index
    %c0_14 = arith.constant 0 : index
    %c0_15 = arith.constant 0 : index
    %28 = vector.load %arg3[%c1_13, %c0_14, %c0_15] : memref<2x1x256xf32, #tpu.memory_space<vmem>>, vector<1x1x256xf32>
    %29 = vector.shape_cast %28 : vector<1x1x256xf32> to vector<1x256xf32>
    %30 = vector.broadcast %29 : vector<1x256xf32> to vector<16x256xf32>
    %31 = arith.addf %27, %30 : vector<16x256xf32>
    %32 = vector.extract_strided_slice %31 {offsets = [0, 128], sizes = [16, 128], strides = [1, 1]} : vector<16x256xf32> to vector<16x128xf32>
    %33 = arith.negf %32 : vector<16x128xf32>
    %34 = math.exp %33 : vector<16x128xf32>
    %cst_16 = arith.constant 1.000000e+00 : f32
    %35 = vector.broadcast %cst_16 : f32 to vector<16x128xf32>
    %36 = arith.addf %35, %34 : vector<16x128xf32>
    %37 = arith.divf %35, %36 : vector<16x128xf32>
    %38 = vector.extract_strided_slice %31 {offsets = [0, 0], sizes = [16, 128], strides = [1, 1]} : vector<16x256xf32> to vector<16x128xf32>
    %cst_17 = arith.constant 0.000000e+00 : f32
    %39 = vector.broadcast %cst_17 : f32 to vector<16x128xf32>
    %40 = arith.maximumf %38, %39 : vector<16x128xf32>
    %41 = arith.mulf %37, %40 : vector<16x128xf32>
    %cst_18 = arith.constant 1.000000e+00 : f32
    %42 = vector.broadcast %cst_18 : f32 to vector<16x128xf32>
    %43 = arith.subf %42, %37 : vector<16x128xf32>
    %44 = arith.mulf %43, %23 : vector<16x128xf32>
    %45 = arith.addf %41, %44 : vector<16x128xf32>
    %46 = arith.truncf %45 : vector<16x128xf32> to vector<16x128xbf16>
    %c0_19 = arith.constant 0 : index
    %c0_20 = arith.constant 0 : index
    %47 = vector.load %arg4[%c0_19, %c0_20] : memref<16x128xbf16, #tpu.memory_space<vmem>>, vector<16x128xbf16>
    tpu.vector_store %arg4[%c0_19, %c0_20], %46 {strides = array<i32>} : memref<16x128xbf16, #tpu.memory_space<vmem>>, vector<16x128xbf16>,
    return
  }
  func.func @transform_0(%arg0: i32) -> (i32, i32) {
    %c0_i32 = arith.constant 0 : i32
    %c0_i32_0 = arith.constant 0 : i32
    return %arg0, %c0_i32 : i32, i32
  }
  func.func @transform_1(%arg0: i32) -> (i32, i32, i32) {
    %c0_i32 = arith.constant 0 : i32
    %c0_i32_0 = arith.constant 0 : i32
    %c0_i32_1 = arith.constant 0 : i32
    %c0_i32_2 = arith.constant 0 : i32
    return %c0_i32, %c0_i32_0, %c0_i32_1 : i32, i32, i32
  }
  func.func @transform_2(%arg0: i32) -> (i32, i32, i32) {
    %c0_i32 = arith.constant 0 : i32
    %c0_i32_0 = arith.constant 0 : i32
    %c0_i32_1 = arith.constant 0 : i32
    %c0_i32_2 = arith.constant 0 : i32
    return %c0_i32, %c0_i32_0, %c0_i32_1 : i32, i32, i32
  }
  func.func @transform_3(%arg0: i32) -> (i32, i32) {
    %c0_i32 = arith.constant 0 : i32
    %c0_i32_0 = arith.constant 0 : i32
    return %arg0, %c0_i32 : i32, i32
  }
}

module attributes {stable_mosaic.version = 11 : i64} {
  func.func @_matmul_kernel(%arg0: i32, %arg1: i32, %arg2: i32, %arg3: memref<16x128xbf16, #tpu.memory_space<vmem>>, %arg4: memref<128x256xbf16, #tpu.memory_space<vmem>>, %arg5: memref<1x256xf32, #tpu.memory_space<vmem>>, %arg6: memref<1x256xf32, #tpu.memory_space<vmem>>, %arg7: memref<16x256xf32, #tpu.memory_space<vmem>>, %arg8: memref<16x256xf32, #tpu.memory_space<vmem>>) attributes {dimension_semantics = [#tpu.dimension_semantics<parallel>, #tpu.dimension_semantics<parallel>, #tpu.dimension_semantics<arbitrary>], iteration_bounds = array<i64: 1, 3, 1>, scalar_prefetch = 0 : i64, scratch_operands = 1 : i64, tpu.core_type = #tpu.core_type<tc>, window_params = [{transform_indices = @transform_0, window_bounds = array<i64: 16, 128>}, {transform_indices = @transform_1, window_bounds = array<i64: 128, 256>}, {transform_indices = @transform_2, window_bounds = array<i64: 1, 256>}, {transform_indices = @transform_3, window_bounds = array<i64: 1, 256>}, {transform_indices = @transform_4, window_bounds = array<i64: 16, 256>}]} {
    %c0_i32 = arith.constant 0 : i32
    %0 = arith.cmpi eq, %arg2, %c0_i32 : i32
    %1 = arith.extui %0 : i1 to i32
    %c0_i32_0 = arith.constant 0 : i32
    %2 = arith.cmpi ne, %1, %c0_i32_0 : i32
    scf.if %2 {
      %cst_10 = arith.constant 0.000000e+00 : f32
      %12 = vector.broadcast %cst_10 : f32 to vector<16x256xf32>
      %c0_11 = arith.constant 0 : index
      %c0_12 = arith.constant 0 : index
      %13 = vector.load %arg8[%c0_11, %c0_12] : memref<16x256xf32, #tpu.memory_space<vmem>>, vector<16x256xf32>
      tpu.vector_store %arg8[%c0_11, %c0_12], %12 {strides = array<i32>} : memref<16x256xf32, #tpu.memory_space<vmem>>, vector<16x256xf32>,
    } else {
    }
    %c0 = arith.constant 0 : index
    %c0_1 = arith.constant 0 : index
    %3 = vector.load %arg8[%c0, %c0_1] : memref<16x256xf32, #tpu.memory_space<vmem>>, vector<16x256xf32>
    %c0_2 = arith.constant 0 : index
    %c0_3 = arith.constant 0 : index
    %4 = vector.load %arg3[%c0_2, %c0_3] : memref<16x128xbf16, #tpu.memory_space<vmem>>, vector<16x128xbf16>
    %c0_4 = arith.constant 0 : index
    %c0_5 = arith.constant 0 : index
    %5 = vector.load %arg4[%c0_4, %c0_5] : memref<128x256xbf16, #tpu.memory_space<vmem>>, vector<128x256xbf16>
    %cst = arith.constant dense<0.000000e+00> : vector<16x256xf32>
    %6 = tpu.matmul %4, %5, %cst {dimension_numbers = #tpu.dot_dimension_numbers<[1], [0], [0], [1], [0, 0, 1, 1], [], []>} : vector<16x128xbf16>, vector<128x256xbf16>, vector<16x256xf32> -> vector<16x256xf32>
    %7 = arith.addf %3, %6 : vector<16x256xf32>
    %c0_6 = arith.constant 0 : index
    %c0_7 = arith.constant 0 : index
    %8 = vector.load %arg8[%c0_6, %c0_7] : memref<16x256xf32, #tpu.memory_space<vmem>>, vector<16x256xf32>
    tpu.vector_store %arg8[%c0_6, %c0_7], %7 {strides = array<i32>} : memref<16x256xf32, #tpu.memory_space<vmem>>, vector<16x256xf32>,
    %c0_i32_8 = arith.constant 0 : i32
    %9 = arith.cmpi eq, %arg2, %c0_i32_8 : i32
    %10 = arith.extui %9 : i1 to i32
    %c0_i32_9 = arith.constant 0 : i32
    %11 = arith.cmpi ne, %10, %c0_i32_9 : i32
    scf.if %11 {
      %c0_10 = arith.constant 0 : index
      %c0_11 = arith.constant 0 : index
      %12 = vector.load %arg8[%c0_10, %c0_11] : memref<16x256xf32, #tpu.memory_space<vmem>>, vector<16x256xf32>
      %c0_12 = arith.constant 0 : index
      %c0_13 = arith.constant 0 : index
      %13 = vector.load %arg5[%c0_12, %c0_13] : memref<1x256xf32, #tpu.memory_space<vmem>>, vector<1x256xf32>
      %14 = vector.broadcast %13 : vector<1x256xf32> to vector<16x256xf32>
      %15 = arith.mulf %12, %14 : vector<16x256xf32>
      %c0_14 = arith.constant 0 : index
      %c0_15 = arith.constant 0 : index
      %16 = vector.load %arg6[%c0_14, %c0_15] : memref<1x256xf32, #tpu.memory_space<vmem>>, vector<1x256xf32>
      %17 = vector.broadcast %16 : vector<1x256xf32> to vector<16x256xf32>
      %18 = arith.addf %15, %17 : vector<16x256xf32>
      %c0_16 = arith.constant 0 : index
      %c0_17 = arith.constant 0 : index
      %19 = vector.load %arg7[%c0_16, %c0_17] : memref<16x256xf32, #tpu.memory_space<vmem>>, vector<16x256xf32>
      tpu.vector_store %arg7[%c0_16, %c0_17], %18 {strides = array<i32>} : memref<16x256xf32, #tpu.memory_space<vmem>>, vector<16x256xf32>,
    } else {
    }
    return
  }
  func.func @transform_0(%arg0: i32, %arg1: i32, %arg2: i32) -> (i32, i32) {
    %c0_i32 = arith.constant 0 : i32
    return %arg0, %arg2 : i32, i32
  }
  func.func @transform_1(%arg0: i32, %arg1: i32, %arg2: i32) -> (i32, i32) {
    %c0_i32 = arith.constant 0 : i32
    return %arg2, %arg1 : i32, i32
  }
  func.func @transform_2(%arg0: i32, %arg1: i32, %arg2: i32) -> (i32, i32) {
    %c0_i32 = arith.constant 0 : i32
    %c0_i32_0 = arith.constant 0 : i32
    return %c0_i32, %arg1 : i32, i32
  }
  func.func @transform_3(%arg0: i32, %arg1: i32, %arg2: i32) -> (i32, i32) {
    %c0_i32 = arith.constant 0 : i32
    %c0_i32_0 = arith.constant 0 : i32
    return %c0_i32, %arg1 : i32, i32
  }
  func.func @transform_4(%arg0: i32, %arg1: i32, %arg2: i32) -> (i32, i32) {
    %c0_i32 = arith.constant 0 : i32
    return %arg0, %arg1 : i32, i32
  }
}

module attributes {stable_mosaic.version = 11 : i64} {
  func.func @_gru_rec_kernel(%arg0: i32, %arg1: memref<8x2x8x384xf32, #tpu.memory_space<vmem>>, %arg2: memref<2x128x384xbf16, #tpu.memory_space<vmem>>, %arg3: memref<2x1x384xf32, #tpu.memory_space<vmem>>, %arg4: memref<8x2x8x128xbf16, #tpu.memory_space<vmem>>, %arg5: memref<2x8x128xf32, #tpu.memory_space<vmem>>) attributes {dimension_semantics = [#tpu.dimension_semantics<arbitrary>], iteration_bounds = array<i64: 1>, scalar_prefetch = 0 : i64, scratch_operands = 1 : i64, tpu.core_type = #tpu.core_type<tc>, window_params = [{transform_indices = @transform_0, window_bounds = array<i64: 8, 2, 8, 384>}, {pipeline_mode = #tpu.pipeline_mode<synchronous>, transform_indices = @transform_1, window_bounds = array<i64: 2, 128, 384>}, {pipeline_mode = #tpu.pipeline_mode<synchronous>, transform_indices = @transform_2, window_bounds = array<i64: 2, 1, 384>}, {transform_indices = @transform_3, window_bounds = array<i64: 8, 2, 8, 128>}]} {
    %c0_i32 = arith.constant 0 : i32
    %0 = arith.cmpi eq, %arg0, %c0_i32 : i32
    %1 = arith.extui %0 : i1 to i32
    %c0_i32_0 = arith.constant 0 : i32
    %2 = arith.cmpi ne, %1, %c0_i32_0 : i32
    scf.if %2 {
      %cst = arith.constant 0.000000e+00 : f32
      %4 = vector.broadcast %cst : f32 to vector<2x8x128xf32>
      %c0 = arith.constant 0 : index
      %c0_3 = arith.constant 0 : index
      %c0_4 = arith.constant 0 : index
      %5 = vector.load %arg5[%c0, %c0_3, %c0_4] : memref<2x8x128xf32, #tpu.memory_space<vmem>>, vector<2x8x128xf32>
      tpu.vector_store %arg5[%c0, %c0_3, %c0_4], %4 {strides = array<i32>} : memref<2x8x128xf32, #tpu.memory_space<vmem>>, vector<2x8x128xf32>,
    } else {
    }
    %c0_i32_1 = arith.constant 0 : i32
    %c8_i32 = arith.constant 8 : i32
    %3 = arith.addi %c0_i32_1, %c8_i32 : i32
    %c1_i32 = arith.constant 1 : i32
    scf.for %arg6 = %c0_i32_1 to %3 step %c1_i32  : i32 {
      %4 = arith.index_cast %arg6 : i32 to index
      %c0 = arith.constant 0 : index
      %c0_3 = arith.constant 0 : index
      %c0_4 = arith.constant 0 : index
      %5 = vector.load %arg1[%4, %c0, %c0_3, %c0_4] : memref<8x2x8x384xf32, #tpu.memory_space<vmem>>, vector<1x2x8x384xf32>
      %6 = vector.shape_cast %5 : vector<1x2x8x384xf32> to vector<2x8x384xf32>
      %c0_5 = arith.constant 0 : index
      %c0_6 = arith.constant 0 : index
      %c0_7 = arith.constant 0 : index
      %7 = vector.load %arg5[%c0_5, %c0_6, %c0_7] : memref<2x8x128xf32, #tpu.memory_space<vmem>>, vector<1x8x128xf32>
      %8 = vector.shape_cast %7 : vector<1x8x128xf32> to vector<8x128xf32>
      %9 = arith.truncf %8 : vector<8x128xf32> to vector<8x128xbf16>
      %c0_8 = arith.constant 0 : index
      %c0_9 = arith.constant 0 : index
      %c0_10 = arith.constant 0 : index
      %10 = vector.load %arg2[%c0_8, %c0_9, %c0_10] : memref<2x128x384xbf16, #tpu.memory_space<vmem>>, vector<1x128x384xbf16>
      %11 = vector.shape_cast %10 : vector<1x128x384xbf16> to vector<128x384xbf16>
      %cst = arith.constant dense<0.000000e+00> : vector<8x384xf32>
      %12 = tpu.matmul %9, %11, %cst {dimension_numbers = #tpu.dot_dimension_numbers<[1], [0], [0], [1], [0, 0, 1, 1], [], []>} : vector<8x128xbf16>, vector<128x384xbf16>, vector<8x384xf32> -> vector<8x384xf32>
      %c0_11 = arith.constant 0 : index
      %c0_12 = arith.constant 0 : index
      %c0_13 = arith.constant 0 : index
      %13 = vector.load %arg3[%c0_11, %c0_12, %c0_13] : memref<2x1x384xf32, #tpu.memory_space<vmem>>, vector<1x1x384xf32>
      %14 = vector.shape_cast %13 : vector<1x1x384xf32> to vector<1x384xf32>
      %15 = vector.broadcast %14 : vector<1x384xf32> to vector<8x384xf32>
      %16 = arith.addf %12, %15 : vector<8x384xf32>
      %17 = vector.extract_strided_slice %6 {offsets = [0, 0, 0], sizes = [1, 8, 384], strides = [1, 1, 1]} : vector<2x8x384xf32> to vector<1x8x384xf32>
      %18 = vector.shape_cast %17 : vector<1x8x384xf32> to vector<8x384xf32>
      %19 = vector.extract_strided_slice %18 {offsets = [0, 0], sizes = [8, 128], strides = [1, 1]} : vector<8x384xf32> to vector<8x128xf32>
      %20 = vector.extract_strided_slice %16 {offsets = [0, 0], sizes = [8, 128], strides = [1, 1]} : vector<8x384xf32> to vector<8x128xf32>
      %21 = arith.addf %19, %20 : vector<8x128xf32>
      %22 = arith.negf %21 : vector<8x128xf32>
      %23 = math.exp %22 : vector<8x128xf32>
      %cst_14 = arith.constant 1.000000e+00 : f32
      %24 = vector.broadcast %cst_14 : f32 to vector<8x128xf32>
      %25 = arith.addf %24, %23 : vector<8x128xf32>
      %26 = arith.divf %24, %25 : vector<8x128xf32>
      %27 = vector.extract_strided_slice %18 {offsets = [0, 128], sizes = [8, 128], strides = [1, 1]} : vector<8x384xf32> to vector<8x128xf32>
      %28 = vector.extract_strided_slice %16 {offsets = [0, 128], sizes = [8, 128], strides = [1, 1]} : vector<8x384xf32> to vector<8x128xf32>
      %29 = arith.addf %27, %28 : vector<8x128xf32>
      %30 = arith.negf %29 : vector<8x128xf32>
      %31 = math.exp %30 : vector<8x128xf32>
      %cst_15 = arith.constant 1.000000e+00 : f32
      %32 = vector.broadcast %cst_15 : f32 to vector<8x128xf32>
      %33 = arith.addf %32, %31 : vector<8x128xf32>
      %34 = arith.divf %32, %33 : vector<8x128xf32>
      %35 = vector.extract_strided_slice %18 {offsets = [0, 256], sizes = [8, 128], strides = [1, 1]} : vector<8x384xf32> to vector<8x128xf32>
      %36 = vector.extract_strided_slice %16 {offsets = [0, 256], sizes = [8, 128], strides = [1, 1]} : vector<8x384xf32> to vector<8x128xf32>
      %37 = arith.mulf %26, %36 : vector<8x128xf32>
      %38 = arith.addf %35, %37 : vector<8x128xf32>
      %39 = math.tanh %38 : vector<8x128xf32>
      %cst_16 = arith.constant 1.000000e+00 : f32
      %40 = vector.broadcast %cst_16 : f32 to vector<8x128xf32>
      %41 = arith.subf %40, %34 : vector<8x128xf32>
      %42 = arith.mulf %41, %39 : vector<8x128xf32>
      %43 = arith.mulf %34, %8 : vector<8x128xf32>
      %44 = arith.addf %42, %43 : vector<8x128xf32>
      %c0_17 = arith.constant 0 : index
      %c0_18 = arith.constant 0 : index
      %c0_19 = arith.constant 0 : index
      %45 = vector.load %arg5[%c0_17, %c0_18, %c0_19] : memref<2x8x128xf32, #tpu.memory_space<vmem>>, vector<1x8x128xf32>
      %46 = vector.shape_cast %45 : vector<1x8x128xf32> to vector<8x128xf32>
      %47 = vector.shape_cast %44 : vector<8x128xf32> to vector<1x8x128xf32>
      tpu.vector_store %arg5[%c0_17, %c0_18, %c0_19], %47 {strides = array<i32>} : memref<2x8x128xf32, #tpu.memory_space<vmem>>, vector<1x8x128xf32>,
      %c1 = arith.constant 1 : index
      %c0_20 = arith.constant 0 : index
      %c0_21 = arith.constant 0 : index
      %48 = vector.load %arg5[%c1, %c0_20, %c0_21] : memref<2x8x128xf32, #tpu.memory_space<vmem>>, vector<1x8x128xf32>
      %49 = vector.shape_cast %48 : vector<1x8x128xf32> to vector<8x128xf32>
      %50 = arith.truncf %49 : vector<8x128xf32> to vector<8x128xbf16>
      %c1_22 = arith.constant 1 : index
      %c0_23 = arith.constant 0 : index
      %c0_24 = arith.constant 0 : index
      %51 = vector.load %arg2[%c1_22, %c0_23, %c0_24] : memref<2x128x384xbf16, #tpu.memory_space<vmem>>, vector<1x128x384xbf16>
      %52 = vector.shape_cast %51 : vector<1x128x384xbf16> to vector<128x384xbf16>
      %cst_25 = arith.constant dense<0.000000e+00> : vector<8x384xf32>
      %53 = tpu.matmul %50, %52, %cst_25 {dimension_numbers = #tpu.dot_dimension_numbers<[1], [0], [0], [1], [0, 0, 1, 1], [], []>} : vector<8x128xbf16>, vector<128x384xbf16>, vector<8x384xf32> -> vector<8x384xf32>
      %c1_26 = arith.constant 1 : index
      %c0_27 = arith.constant 0 : index
      %c0_28 = arith.constant 0 : index
      %54 = vector.load %arg3[%c1_26, %c0_27, %c0_28] : memref<2x1x384xf32, #tpu.memory_space<vmem>>, vector<1x1x384xf32>
      %55 = vector.shape_cast %54 : vector<1x1x384xf32> to vector<1x384xf32>
      %56 = vector.broadcast %55 : vector<1x384xf32> to vector<8x384xf32>
      %57 = arith.addf %53, %56 : vector<8x384xf32>
      %58 = vector.extract_strided_slice %6 {offsets = [1, 0, 0], sizes = [1, 8, 384], strides = [1, 1, 1]} : vector<2x8x384xf32> to vector<1x8x384xf32>
      %59 = vector.shape_cast %58 : vector<1x8x384xf32> to vector<8x384xf32>
      %60 = vector.extract_strided_slice %59 {offsets = [0, 0], sizes = [8, 128], strides = [1, 1]} : vector<8x384xf32> to vector<8x128xf32>
      %61 = vector.extract_strided_slice %57 {offsets = [0, 0], sizes = [8, 128], strides = [1, 1]} : vector<8x384xf32> to vector<8x128xf32>
      %62 = arith.addf %60, %61 : vector<8x128xf32>
      %63 = arith.negf %62 : vector<8x128xf32>
      %64 = math.exp %63 : vector<8x128xf32>
      %cst_29 = arith.constant 1.000000e+00 : f32
      %65 = vector.broadcast %cst_29 : f32 to vector<8x128xf32>
      %66 = arith.addf %65, %64 : vector<8x128xf32>
      %67 = arith.divf %65, %66 : vector<8x128xf32>
      %68 = vector.extract_strided_slice %59 {offsets = [0, 128], sizes = [8, 128], strides = [1, 1]} : vector<8x384xf32> to vector<8x128xf32>
      %69 = vector.extract_strided_slice %57 {offsets = [0, 128], sizes = [8, 128], strides = [1, 1]} : vector<8x384xf32> to vector<8x128xf32>
      %70 = arith.addf %68, %69 : vector<8x128xf32>
      %71 = arith.negf %70 : vector<8x128xf32>
      %72 = math.exp %71 : vector<8x128xf32>
      %cst_30 = arith.constant 1.000000e+00 : f32
      %73 = vector.broadcast %cst_30 : f32 to vector<8x128xf32>
      %74 = arith.addf %73, %72 : vector<8x128xf32>
      %75 = arith.divf %73, %74 : vector<8x128xf32>
      %76 = vector.extract_strided_slice %59 {offsets = [0, 256], sizes = [8, 128], strides = [1, 1]} : vector<8x384xf32> to vector<8x128xf32>
      %77 = vector.extract_strided_slice %57 {offsets = [0, 256], sizes = [8, 128], strides = [1, 1]} : vector<8x384xf32> to vector<8x128xf32>
      %78 = arith.mulf %67, %77 : vector<8x128xf32>
      %79 = arith.addf %76, %78 : vector<8x128xf32>
      %80 = math.tanh %79 : vector<8x128xf32>
      %cst_31 = arith.constant 1.000000e+00 : f32
      %81 = vector.broadcast %cst_31 : f32 to vector<8x128xf32>
      %82 = arith.subf %81, %75 : vector<8x128xf32>
      %83 = arith.mulf %82, %80 : vector<8x128xf32>
      %84 = arith.mulf %75, %49 : vector<8x128xf32>
      %85 = arith.addf %83, %84 : vector<8x128xf32>
      %c1_32 = arith.constant 1 : index
      %c0_33 = arith.constant 0 : index
      %c0_34 = arith.constant 0 : index
      %86 = vector.load %arg5[%c1_32, %c0_33, %c0_34] : memref<2x8x128xf32, #tpu.memory_space<vmem>>, vector<1x8x128xf32>
      %87 = vector.shape_cast %86 : vector<1x8x128xf32> to vector<8x128xf32>
      %88 = vector.shape_cast %85 : vector<8x128xf32> to vector<1x8x128xf32>
      tpu.vector_store %arg5[%c1_32, %c0_33, %c0_34], %88 {strides = array<i32>} : memref<2x8x128xf32, #tpu.memory_space<vmem>>, vector<1x8x128xf32>,
      %89 = vector.shape_cast %44 : vector<8x128xf32> to vector<1x8x128xf32>
      %90 = vector.shape_cast %85 : vector<8x128xf32> to vector<1x8x128xf32>
      %91 = tpu.concatenate %89, %90 in 0 : vector<1x8x128xf32>, vector<1x8x128xf32> -> vector<2x8x128xf32>
      %92 = arith.truncf %91 : vector<2x8x128xf32> to vector<2x8x128xbf16>
      %93 = arith.index_cast %arg6 : i32 to index
      %c0_35 = arith.constant 0 : index
      %c0_36 = arith.constant 0 : index
      %c0_37 = arith.constant 0 : index
      %94 = vector.load %arg4[%93, %c0_35, %c0_36, %c0_37] : memref<8x2x8x128xbf16, #tpu.memory_space<vmem>>, vector<1x2x8x128xbf16>
      %95 = vector.shape_cast %94 : vector<1x2x8x128xbf16> to vector<2x8x128xbf16>
      %96 = vector.shape_cast %92 : vector<2x8x128xbf16> to vector<1x2x8x128xbf16>
      tpu.vector_store %arg4[%93, %c0_35, %c0_36, %c0_37], %96 {strides = array<i32>} : memref<8x2x8x128xbf16, #tpu.memory_space<vmem>>, vector<1x2x8x128xbf16>,
    }
    %c8_i32_2 = arith.constant 8 : i32
    return
  }
  func.func @transform_0(%arg0: i32) -> (i32, i32, i32, i32) {
    %c0_i32 = arith.constant 0 : i32
    %c0_i32_0 = arith.constant 0 : i32
    %c0_i32_1 = arith.constant 0 : i32
    %c0_i32_2 = arith.constant 0 : i32
    return %arg0, %c0_i32, %c0_i32_0, %c0_i32_1 : i32, i32, i32, i32
  }
  func.func @transform_1(%arg0: i32) -> (i32, i32, i32) {
    %c0_i32 = arith.constant 0 : i32
    %c0_i32_0 = arith.constant 0 : i32
    %c0_i32_1 = arith.constant 0 : i32
    %c0_i32_2 = arith.constant 0 : i32
    return %c0_i32, %c0_i32_0, %c0_i32_1 : i32, i32, i32
  }
  func.func @transform_2(%arg0: i32) -> (i32, i32, i32) {
    %c0_i32 = arith.constant 0 : i32
    %c0_i32_0 = arith.constant 0 : i32
    %c0_i32_1 = arith.constant 0 : i32
    %c0_i32_2 = arith.constant 0 : i32
    return %c0_i32, %c0_i32_0, %c0_i32_1 : i32, i32, i32
  }
  func.func @transform_3(%arg0: i32) -> (i32, i32, i32, i32) {
    %c0_i32 = arith.constant 0 : i32
    %c0_i32_0 = arith.constant 0 : i32
    %c0_i32_1 = arith.constant 0 : i32
    %c0_i32_2 = arith.constant 0 : i32
    return %arg0, %c0_i32, %c0_i32_0, %c0_i32_1 : i32, i32, i32, i32
  }
}

module attributes {stable_mosaic.version = 11 : i64} {
  func.func @_matmul_kernel(%arg0: i32, %arg1: i32, %arg2: i32, %arg3: memref<24x128xbf16, #tpu.memory_space<vmem>>, %arg4: memref<128x512xbf16, #tpu.memory_space<vmem>>, %arg5: memref<1x512xf32, #tpu.memory_space<vmem>>, %arg6: memref<1x512xf32, #tpu.memory_space<vmem>>, %arg7: memref<24x512xf32, #tpu.memory_space<vmem>>, %arg8: memref<24x512xf32, #tpu.memory_space<vmem>>) attributes {dimension_semantics = [#tpu.dimension_semantics<parallel>, #tpu.dimension_semantics<parallel>, #tpu.dimension_semantics<arbitrary>], iteration_bounds = array<i64: 1, 2, 1>, scalar_prefetch = 0 : i64, scratch_operands = 1 : i64, tpu.core_type = #tpu.core_type<tc>, window_params = [{transform_indices = @transform_0, window_bounds = array<i64: 24, 128>}, {transform_indices = @transform_1, window_bounds = array<i64: 128, 512>}, {transform_indices = @transform_2, window_bounds = array<i64: 1, 512>}, {transform_indices = @transform_3, window_bounds = array<i64: 1, 512>}, {transform_indices = @transform_4, window_bounds = array<i64: 24, 512>}]} {
    %c0_i32 = arith.constant 0 : i32
    %0 = arith.cmpi eq, %arg2, %c0_i32 : i32
    %1 = arith.extui %0 : i1 to i32
    %c0_i32_0 = arith.constant 0 : i32
    %2 = arith.cmpi ne, %1, %c0_i32_0 : i32
    scf.if %2 {
      %cst_10 = arith.constant 0.000000e+00 : f32
      %12 = vector.broadcast %cst_10 : f32 to vector<24x512xf32>
      %c0_11 = arith.constant 0 : index
      %c0_12 = arith.constant 0 : index
      %13 = vector.load %arg8[%c0_11, %c0_12] : memref<24x512xf32, #tpu.memory_space<vmem>>, vector<24x512xf32>
      tpu.vector_store %arg8[%c0_11, %c0_12], %12 {strides = array<i32>} : memref<24x512xf32, #tpu.memory_space<vmem>>, vector<24x512xf32>,
    } else {
    }
    %c0 = arith.constant 0 : index
    %c0_1 = arith.constant 0 : index
    %3 = vector.load %arg8[%c0, %c0_1] : memref<24x512xf32, #tpu.memory_space<vmem>>, vector<24x512xf32>
    %c0_2 = arith.constant 0 : index
    %c0_3 = arith.constant 0 : index
    %4 = vector.load %arg3[%c0_2, %c0_3] : memref<24x128xbf16, #tpu.memory_space<vmem>>, vector<24x128xbf16>
    %c0_4 = arith.constant 0 : index
    %c0_5 = arith.constant 0 : index
    %5 = vector.load %arg4[%c0_4, %c0_5] : memref<128x512xbf16, #tpu.memory_space<vmem>>, vector<128x512xbf16>
    %cst = arith.constant dense<0.000000e+00> : vector<24x512xf32>
    %6 = tpu.matmul %4, %5, %cst {dimension_numbers = #tpu.dot_dimension_numbers<[1], [0], [0], [1], [0, 0, 1, 1], [], []>} : vector<24x128xbf16>, vector<128x512xbf16>, vector<24x512xf32> -> vector<24x512xf32>
    %7 = arith.addf %3, %6 : vector<24x512xf32>
    %c0_6 = arith.constant 0 : index
    %c0_7 = arith.constant 0 : index
    %8 = vector.load %arg8[%c0_6, %c0_7] : memref<24x512xf32, #tpu.memory_space<vmem>>, vector<24x512xf32>
    tpu.vector_store %arg8[%c0_6, %c0_7], %7 {strides = array<i32>} : memref<24x512xf32, #tpu.memory_space<vmem>>, vector<24x512xf32>,
    %c0_i32_8 = arith.constant 0 : i32
    %9 = arith.cmpi eq, %arg2, %c0_i32_8 : i32
    %10 = arith.extui %9 : i1 to i32
    %c0_i32_9 = arith.constant 0 : i32
    %11 = arith.cmpi ne, %10, %c0_i32_9 : i32
    scf.if %11 {
      %c0_10 = arith.constant 0 : index
      %c0_11 = arith.constant 0 : index
      %12 = vector.load %arg8[%c0_10, %c0_11] : memref<24x512xf32, #tpu.memory_space<vmem>>, vector<24x512xf32>
      %c0_12 = arith.constant 0 : index
      %c0_13 = arith.constant 0 : index
      %13 = vector.load %arg5[%c0_12, %c0_13] : memref<1x512xf32, #tpu.memory_space<vmem>>, vector<1x512xf32>
      %14 = vector.broadcast %13 : vector<1x512xf32> to vector<24x512xf32>
      %15 = arith.mulf %12, %14 : vector<24x512xf32>
      %c0_14 = arith.constant 0 : index
      %c0_15 = arith.constant 0 : index
      %16 = vector.load %arg6[%c0_14, %c0_15] : memref<1x512xf32, #tpu.memory_space<vmem>>, vector<1x512xf32>
      %17 = vector.broadcast %16 : vector<1x512xf32> to vector<24x512xf32>
      %18 = arith.addf %15, %17 : vector<24x512xf32>
      %c0_16 = arith.constant 0 : index
      %c0_17 = arith.constant 0 : index
      %19 = vector.load %arg7[%c0_16, %c0_17] : memref<24x512xf32, #tpu.memory_space<vmem>>, vector<24x512xf32>
      tpu.vector_store %arg7[%c0_16, %c0_17], %18 {strides = array<i32>} : memref<24x512xf32, #tpu.memory_space<vmem>>, vector<24x512xf32>,
    } else {
    }
    return
  }
  func.func @transform_0(%arg0: i32, %arg1: i32, %arg2: i32) -> (i32, i32) {
    %c0_i32 = arith.constant 0 : i32
    return %arg0, %arg2 : i32, i32
  }
  func.func @transform_1(%arg0: i32, %arg1: i32, %arg2: i32) -> (i32, i32) {
    %c0_i32 = arith.constant 0 : i32
    return %arg2, %arg1 : i32, i32
  }
  func.func @transform_2(%arg0: i32, %arg1: i32, %arg2: i32) -> (i32, i32) {
    %c0_i32 = arith.constant 0 : i32
    %c0_i32_0 = arith.constant 0 : i32
    return %c0_i32, %arg1 : i32, i32
  }
  func.func @transform_3(%arg0: i32, %arg1: i32, %arg2: i32) -> (i32, i32) {
    %c0_i32 = arith.constant 0 : i32
    %c0_i32_0 = arith.constant 0 : i32
    return %c0_i32, %arg1 : i32, i32
  }
  func.func @transform_4(%arg0: i32, %arg1: i32, %arg2: i32) -> (i32, i32) {
    %c0_i32 = arith.constant 0 : i32
    return %arg0, %arg1 : i32, i32
  }
}

module attributes {stable_mosaic.version = 11 : i64} {
  func.func @_lstm_rec_kernel(%arg0: i32, %arg1: memref<12x2x8x512xf32, #tpu.memory_space<vmem>>, %arg2: memref<2x128x512xbf16, #tpu.memory_space<vmem>>, %arg3: memref<12x2x8x128xbf16, #tpu.memory_space<vmem>>, %arg4: memref<2x8x128xf32, #tpu.memory_space<vmem>>, %arg5: memref<2x8x128xf32, #tpu.memory_space<vmem>>) attributes {dimension_semantics = [#tpu.dimension_semantics<arbitrary>], iteration_bounds = array<i64: 1>, scalar_prefetch = 0 : i64, scratch_operands = 2 : i64, tpu.core_type = #tpu.core_type<tc>, window_params = [{transform_indices = @transform_0, window_bounds = array<i64: 12, 2, 8, 512>}, {pipeline_mode = #tpu.pipeline_mode<synchronous>, transform_indices = @transform_1, window_bounds = array<i64: 2, 128, 512>}, {transform_indices = @transform_2, window_bounds = array<i64: 12, 2, 8, 128>}]} {
    %c0_i32 = arith.constant 0 : i32
    %0 = arith.cmpi eq, %arg0, %c0_i32 : i32
    %1 = arith.extui %0 : i1 to i32
    %c0_i32_0 = arith.constant 0 : i32
    %2 = arith.cmpi ne, %1, %c0_i32_0 : i32
    scf.if %2 {
      %cst = arith.constant 0.000000e+00 : f32
      %4 = vector.broadcast %cst : f32 to vector<2x8x128xf32>
      %c0 = arith.constant 0 : index
      %c0_3 = arith.constant 0 : index
      %c0_4 = arith.constant 0 : index
      %5 = vector.load %arg4[%c0, %c0_3, %c0_4] : memref<2x8x128xf32, #tpu.memory_space<vmem>>, vector<2x8x128xf32>
      tpu.vector_store %arg4[%c0, %c0_3, %c0_4], %4 {strides = array<i32>} : memref<2x8x128xf32, #tpu.memory_space<vmem>>, vector<2x8x128xf32>,
      %cst_5 = arith.constant 0.000000e+00 : f32
      %6 = vector.broadcast %cst_5 : f32 to vector<2x8x128xf32>
      %c0_6 = arith.constant 0 : index
      %c0_7 = arith.constant 0 : index
      %c0_8 = arith.constant 0 : index
      %7 = vector.load %arg5[%c0_6, %c0_7, %c0_8] : memref<2x8x128xf32, #tpu.memory_space<vmem>>, vector<2x8x128xf32>
      tpu.vector_store %arg5[%c0_6, %c0_7, %c0_8], %6 {strides = array<i32>} : memref<2x8x128xf32, #tpu.memory_space<vmem>>, vector<2x8x128xf32>,
    } else {
    }
    %c0_i32_1 = arith.constant 0 : i32
    %c12_i32 = arith.constant 12 : i32
    %3 = arith.addi %c0_i32_1, %c12_i32 : i32
    %c1_i32 = arith.constant 1 : i32
    scf.for %arg6 = %c0_i32_1 to %3 step %c1_i32  : i32 {
      %4 = arith.index_cast %arg6 : i32 to index
      %c0 = arith.constant 0 : index
      %c0_3 = arith.constant 0 : index
      %c0_4 = arith.constant 0 : index
      %5 = vector.load %arg1[%4, %c0, %c0_3, %c0_4] : memref<12x2x8x512xf32, #tpu.memory_space<vmem>>, vector<1x2x8x512xf32>
      %6 = vector.shape_cast %5 : vector<1x2x8x512xf32> to vector<2x8x512xf32>
      %c0_5 = arith.constant 0 : index
      %c0_6 = arith.constant 0 : index
      %c0_7 = arith.constant 0 : index
      %7 = vector.load %arg4[%c0_5, %c0_6, %c0_7] : memref<2x8x128xf32, #tpu.memory_space<vmem>>, vector<1x8x128xf32>
      %8 = vector.shape_cast %7 : vector<1x8x128xf32> to vector<8x128xf32>
      %c0_8 = arith.constant 0 : index
      %c0_9 = arith.constant 0 : index
      %c0_10 = arith.constant 0 : index
      %9 = vector.load %arg5[%c0_8, %c0_9, %c0_10] : memref<2x8x128xf32, #tpu.memory_space<vmem>>, vector<1x8x128xf32>
      %10 = vector.shape_cast %9 : vector<1x8x128xf32> to vector<8x128xf32>
      %11 = arith.truncf %8 : vector<8x128xf32> to vector<8x128xbf16>
      %c0_11 = arith.constant 0 : index
      %c0_12 = arith.constant 0 : index
      %c0_13 = arith.constant 0 : index
      %12 = vector.load %arg2[%c0_11, %c0_12, %c0_13] : memref<2x128x512xbf16, #tpu.memory_space<vmem>>, vector<1x128x512xbf16>
      %13 = vector.shape_cast %12 : vector<1x128x512xbf16> to vector<128x512xbf16>
      %cst = arith.constant dense<0.000000e+00> : vector<8x512xf32>
      %14 = tpu.matmul %11, %13, %cst {dimension_numbers = #tpu.dot_dimension_numbers<[1], [0], [0], [1], [0, 0, 1, 1], [], []>} : vector<8x128xbf16>, vector<128x512xbf16>, vector<8x512xf32> -> vector<8x512xf32>
      %15 = vector.extract_strided_slice %6 {offsets = [0, 0, 0], sizes = [1, 8, 512], strides = [1, 1, 1]} : vector<2x8x512xf32> to vector<1x8x512xf32>
      %16 = vector.shape_cast %15 : vector<1x8x512xf32> to vector<8x512xf32>
      %17 = arith.addf %14, %16 : vector<8x512xf32>
      %18 = vector.extract_strided_slice %17 {offsets = [0, 0], sizes = [8, 128], strides = [1, 1]} : vector<8x512xf32> to vector<8x128xf32>
      %19 = arith.negf %18 : vector<8x128xf32>
      %20 = math.exp %19 : vector<8x128xf32>
      %cst_14 = arith.constant 1.000000e+00 : f32
      %21 = vector.broadcast %cst_14 : f32 to vector<8x128xf32>
      %22 = arith.addf %21, %20 : vector<8x128xf32>
      %23 = arith.divf %21, %22 : vector<8x128xf32>
      %24 = vector.extract_strided_slice %17 {offsets = [0, 128], sizes = [8, 128], strides = [1, 1]} : vector<8x512xf32> to vector<8x128xf32>
      %25 = arith.negf %24 : vector<8x128xf32>
      %26 = math.exp %25 : vector<8x128xf32>
      %cst_15 = arith.constant 1.000000e+00 : f32
      %27 = vector.broadcast %cst_15 : f32 to vector<8x128xf32>
      %28 = arith.addf %27, %26 : vector<8x128xf32>
      %29 = arith.divf %27, %28 : vector<8x128xf32>
      %30 = vector.extract_strided_slice %17 {offsets = [0, 256], sizes = [8, 128], strides = [1, 1]} : vector<8x512xf32> to vector<8x128xf32>
      %31 = math.tanh %30 : vector<8x128xf32>
      %32 = vector.extract_strided_slice %17 {offsets = [0, 384], sizes = [8, 128], strides = [1, 1]} : vector<8x512xf32> to vector<8x128xf32>
      %33 = arith.negf %32 : vector<8x128xf32>
      %34 = math.exp %33 : vector<8x128xf32>
      %cst_16 = arith.constant 1.000000e+00 : f32
      %35 = vector.broadcast %cst_16 : f32 to vector<8x128xf32>
      %36 = arith.addf %35, %34 : vector<8x128xf32>
      %37 = arith.divf %35, %36 : vector<8x128xf32>
      %38 = arith.mulf %29, %10 : vector<8x128xf32>
      %39 = arith.mulf %23, %31 : vector<8x128xf32>
      %40 = arith.addf %38, %39 : vector<8x128xf32>
      %41 = math.tanh %40 : vector<8x128xf32>
      %42 = arith.mulf %37, %41 : vector<8x128xf32>
      %c0_17 = arith.constant 0 : index
      %c0_18 = arith.constant 0 : index
      %c0_19 = arith.constant 0 : index
      %43 = vector.load %arg4[%c0_17, %c0_18, %c0_19] : memref<2x8x128xf32, #tpu.memory_space<vmem>>, vector<1x8x128xf32>
      %44 = vector.shape_cast %43 : vector<1x8x128xf32> to vector<8x128xf32>
      %45 = vector.shape_cast %42 : vector<8x128xf32> to vector<1x8x128xf32>
      tpu.vector_store %arg4[%c0_17, %c0_18, %c0_19], %45 {strides = array<i32>} : memref<2x8x128xf32, #tpu.memory_space<vmem>>, vector<1x8x128xf32>,
      %c0_20 = arith.constant 0 : index
      %c0_21 = arith.constant 0 : index
      %c0_22 = arith.constant 0 : index
      %46 = vector.load %arg5[%c0_20, %c0_21, %c0_22] : memref<2x8x128xf32, #tpu.memory_space<vmem>>, vector<1x8x128xf32>
      %47 = vector.shape_cast %46 : vector<1x8x128xf32> to vector<8x128xf32>
      %48 = vector.shape_cast %40 : vector<8x128xf32> to vector<1x8x128xf32>
      tpu.vector_store %arg5[%c0_20, %c0_21, %c0_22], %48 {strides = array<i32>} : memref<2x8x128xf32, #tpu.memory_space<vmem>>, vector<1x8x128xf32>,
      %c1 = arith.constant 1 : index
      %c0_23 = arith.constant 0 : index
      %c0_24 = arith.constant 0 : index
      %49 = vector.load %arg4[%c1, %c0_23, %c0_24] : memref<2x8x128xf32, #tpu.memory_space<vmem>>, vector<1x8x128xf32>
      %50 = vector.shape_cast %49 : vector<1x8x128xf32> to vector<8x128xf32>
      %c1_25 = arith.constant 1 : index
      %c0_26 = arith.constant 0 : index
      %c0_27 = arith.constant 0 : index
      %51 = vector.load %arg5[%c1_25, %c0_26, %c0_27] : memref<2x8x128xf32, #tpu.memory_space<vmem>>, vector<1x8x128xf32>
      %52 = vector.shape_cast %51 : vector<1x8x128xf32> to vector<8x128xf32>
      %53 = arith.truncf %50 : vector<8x128xf32> to vector<8x128xbf16>
      %c1_28 = arith.constant 1 : index
      %c0_29 = arith.constant 0 : index
      %c0_30 = arith.constant 0 : index
      %54 = vector.load %arg2[%c1_28, %c0_29, %c0_30] : memref<2x128x512xbf16, #tpu.memory_space<vmem>>, vector<1x128x512xbf16>
      %55 = vector.shape_cast %54 : vector<1x128x512xbf16> to vector<128x512xbf16>
      %cst_31 = arith.constant dense<0.000000e+00> : vector<8x512xf32>
      %56 = tpu.matmul %53, %55, %cst_31 {dimension_numbers = #tpu.dot_dimension_numbers<[1], [0], [0], [1], [0, 0, 1, 1], [], []>} : vector<8x128xbf16>, vector<128x512xbf16>, vector<8x512xf32> -> vector<8x512xf32>
      %57 = vector.extract_strided_slice %6 {offsets = [1, 0, 0], sizes = [1, 8, 512], strides = [1, 1, 1]} : vector<2x8x512xf32> to vector<1x8x512xf32>
      %58 = vector.shape_cast %57 : vector<1x8x512xf32> to vector<8x512xf32>
      %59 = arith.addf %56, %58 : vector<8x512xf32>
      %60 = vector.extract_strided_slice %59 {offsets = [0, 0], sizes = [8, 128], strides = [1, 1]} : vector<8x512xf32> to vector<8x128xf32>
      %61 = arith.negf %60 : vector<8x128xf32>
      %62 = math.exp %61 : vector<8x128xf32>
      %cst_32 = arith.constant 1.000000e+00 : f32
      %63 = vector.broadcast %cst_32 : f32 to vector<8x128xf32>
      %64 = arith.addf %63, %62 : vector<8x128xf32>
      %65 = arith.divf %63, %64 : vector<8x128xf32>
      %66 = vector.extract_strided_slice %59 {offsets = [0, 128], sizes = [8, 128], strides = [1, 1]} : vector<8x512xf32> to vector<8x128xf32>
      %67 = arith.negf %66 : vector<8x128xf32>
      %68 = math.exp %67 : vector<8x128xf32>
      %cst_33 = arith.constant 1.000000e+00 : f32
      %69 = vector.broadcast %cst_33 : f32 to vector<8x128xf32>
      %70 = arith.addf %69, %68 : vector<8x128xf32>
      %71 = arith.divf %69, %70 : vector<8x128xf32>
      %72 = vector.extract_strided_slice %59 {offsets = [0, 256], sizes = [8, 128], strides = [1, 1]} : vector<8x512xf32> to vector<8x128xf32>
      %73 = math.tanh %72 : vector<8x128xf32>
      %74 = vector.extract_strided_slice %59 {offsets = [0, 384], sizes = [8, 128], strides = [1, 1]} : vector<8x512xf32> to vector<8x128xf32>
      %75 = arith.negf %74 : vector<8x128xf32>
      %76 = math.exp %75 : vector<8x128xf32>
      %cst_34 = arith.constant 1.000000e+00 : f32
      %77 = vector.broadcast %cst_34 : f32 to vector<8x128xf32>
      %78 = arith.addf %77, %76 : vector<8x128xf32>
      %79 = arith.divf %77, %78 : vector<8x128xf32>
      %80 = arith.mulf %71, %52 : vector<8x128xf32>
      %81 = arith.mulf %65, %73 : vector<8x128xf32>
      %82 = arith.addf %80, %81 : vector<8x128xf32>
      %83 = math.tanh %82 : vector<8x128xf32>
      %84 = arith.mulf %79, %83 : vector<8x128xf32>
      %c1_35 = arith.constant 1 : index
      %c0_36 = arith.constant 0 : index
      %c0_37 = arith.constant 0 : index
      %85 = vector.load %arg4[%c1_35, %c0_36, %c0_37] : memref<2x8x128xf32, #tpu.memory_space<vmem>>, vector<1x8x128xf32>
      %86 = vector.shape_cast %85 : vector<1x8x128xf32> to vector<8x128xf32>
      %87 = vector.shape_cast %84 : vector<8x128xf32> to vector<1x8x128xf32>
      tpu.vector_store %arg4[%c1_35, %c0_36, %c0_37], %87 {strides = array<i32>} : memref<2x8x128xf32, #tpu.memory_space<vmem>>, vector<1x8x128xf32>,
      %c1_38 = arith.constant 1 : index
      %c0_39 = arith.constant 0 : index
      %c0_40 = arith.constant 0 : index
      %88 = vector.load %arg5[%c1_38, %c0_39, %c0_40] : memref<2x8x128xf32, #tpu.memory_space<vmem>>, vector<1x8x128xf32>
      %89 = vector.shape_cast %88 : vector<1x8x128xf32> to vector<8x128xf32>
      %90 = vector.shape_cast %82 : vector<8x128xf32> to vector<1x8x128xf32>
      tpu.vector_store %arg5[%c1_38, %c0_39, %c0_40], %90 {strides = array<i32>} : memref<2x8x128xf32, #tpu.memory_space<vmem>>, vector<1x8x128xf32>,
      %91 = vector.shape_cast %42 : vector<8x128xf32> to vector<1x8x128xf32>
      %92 = vector.shape_cast %84 : vector<8x128xf32> to vector<1x8x128xf32>
      %93 = tpu.concatenate %91, %92 in 0 : vector<1x8x128xf32>, vector<1x8x128xf32> -> vector<2x8x128xf32>
      %94 = arith.truncf %93 : vector<2x8x128xf32> to vector<2x8x128xbf16>
      %95 = arith.index_cast %arg6 : i32 to index
      %c0_41 = arith.constant 0 : index
      %c0_42 = arith.constant 0 : index
      %c0_43 = arith.constant 0 : index
      %96 = vector.load %arg3[%95, %c0_41, %c0_42, %c0_43] : memref<12x2x8x128xbf16, #tpu.memory_space<vmem>>, vector<1x2x8x128xbf16>
      %97 = vector.shape_cast %96 : vector<1x2x8x128xbf16> to vector<2x8x128xbf16>
      %98 = vector.shape_cast %94 : vector<2x8x128xbf16> to vector<1x2x8x128xbf16>
      tpu.vector_store %arg3[%95, %c0_41, %c0_42, %c0_43], %98 {strides = array<i32>} : memref<12x2x8x128xbf16, #tpu.memory_space<vmem>>, vector<1x2x8x128xbf16>,
    }
    %c12_i32_2 = arith.constant 12 : i32
    return
  }
  func.func @transform_0(%arg0: i32) -> (i32, i32, i32, i32) {
    %c0_i32 = arith.constant 0 : i32
    %c0_i32_0 = arith.constant 0 : i32
    %c0_i32_1 = arith.constant 0 : i32
    %c0_i32_2 = arith.constant 0 : i32
    return %arg0, %c0_i32, %c0_i32_0, %c0_i32_1 : i32, i32, i32, i32
  }
  func.func @transform_1(%arg0: i32) -> (i32, i32, i32) {
    %c0_i32 = arith.constant 0 : i32
    %c0_i32_0 = arith.constant 0 : i32
    %c0_i32_1 = arith.constant 0 : i32
    %c0_i32_2 = arith.constant 0 : i32
    return %c0_i32, %c0_i32_0, %c0_i32_1 : i32, i32, i32
  }
  func.func @transform_2(%arg0: i32) -> (i32, i32, i32, i32) {
    %c0_i32 = arith.constant 0 : i32
    %c0_i32_0 = arith.constant 0 : i32
    %c0_i32_1 = arith.constant 0 : i32
    %c0_i32_2 = arith.constant 0 : i32
    return %arg0, %c0_i32, %c0_i32_0, %c0_i32_1 : i32, i32, i32, i32
  }
}

module attributes {stable_mosaic.version = 11 : i64} {
  func.func @_matmul_kernel(%arg0: i32, %arg1: i32, %arg2: i32, %arg3: memref<24x128xbf16, #tpu.memory_space<vmem>>, %arg4: memref<128x128xbf16, #tpu.memory_space<vmem>>, %arg5: memref<1x128xf32, #tpu.memory_space<vmem>>, %arg6: memref<1x128xf32, #tpu.memory_space<vmem>>, %arg7: memref<24x128xf32, #tpu.memory_space<vmem>>, %arg8: memref<24x128xf32, #tpu.memory_space<vmem>>) attributes {dimension_semantics = [#tpu.dimension_semantics<parallel>, #tpu.dimension_semantics<parallel>, #tpu.dimension_semantics<arbitrary>], iteration_bounds = array<i64: 1, 1, 1>, scalar_prefetch = 0 : i64, scratch_operands = 1 : i64, tpu.core_type = #tpu.core_type<tc>, window_params = [{transform_indices = @transform_0, window_bounds = array<i64: 24, 128>}, {transform_indices = @transform_1, window_bounds = array<i64: 128, 128>}, {transform_indices = @transform_2, window_bounds = array<i64: 1, 128>}, {transform_indices = @transform_3, window_bounds = array<i64: 1, 128>}, {transform_indices = @transform_4, window_bounds = array<i64: 24, 128>}]} {
    %c0_i32 = arith.constant 0 : i32
    %0 = arith.cmpi eq, %arg2, %c0_i32 : i32
    %1 = arith.extui %0 : i1 to i32
    %c0_i32_0 = arith.constant 0 : i32
    %2 = arith.cmpi ne, %1, %c0_i32_0 : i32
    scf.if %2 {
      %cst_10 = arith.constant 0.000000e+00 : f32
      %12 = vector.broadcast %cst_10 : f32 to vector<24x128xf32>
      %c0_11 = arith.constant 0 : index
      %c0_12 = arith.constant 0 : index
      %13 = vector.load %arg8[%c0_11, %c0_12] : memref<24x128xf32, #tpu.memory_space<vmem>>, vector<24x128xf32>
      tpu.vector_store %arg8[%c0_11, %c0_12], %12 {strides = array<i32>} : memref<24x128xf32, #tpu.memory_space<vmem>>, vector<24x128xf32>,
    } else {
    }
    %c0 = arith.constant 0 : index
    %c0_1 = arith.constant 0 : index
    %3 = vector.load %arg8[%c0, %c0_1] : memref<24x128xf32, #tpu.memory_space<vmem>>, vector<24x128xf32>
    %c0_2 = arith.constant 0 : index
    %c0_3 = arith.constant 0 : index
    %4 = vector.load %arg3[%c0_2, %c0_3] : memref<24x128xbf16, #tpu.memory_space<vmem>>, vector<24x128xbf16>
    %c0_4 = arith.constant 0 : index
    %c0_5 = arith.constant 0 : index
    %5 = vector.load %arg4[%c0_4, %c0_5] : memref<128x128xbf16, #tpu.memory_space<vmem>>, vector<128x128xbf16>
    %cst = arith.constant dense<0.000000e+00> : vector<24x128xf32>
    %6 = tpu.matmul %4, %5, %cst {dimension_numbers = #tpu.dot_dimension_numbers<[1], [0], [0], [1], [0, 0, 1, 1], [], []>} : vector<24x128xbf16>, vector<128x128xbf16>, vector<24x128xf32> -> vector<24x128xf32>
    %7 = arith.addf %3, %6 : vector<24x128xf32>
    %c0_6 = arith.constant 0 : index
    %c0_7 = arith.constant 0 : index
    %8 = vector.load %arg8[%c0_6, %c0_7] : memref<24x128xf32, #tpu.memory_space<vmem>>, vector<24x128xf32>
    tpu.vector_store %arg8[%c0_6, %c0_7], %7 {strides = array<i32>} : memref<24x128xf32, #tpu.memory_space<vmem>>, vector<24x128xf32>,
    %c0_i32_8 = arith.constant 0 : i32
    %9 = arith.cmpi eq, %arg2, %c0_i32_8 : i32
    %10 = arith.extui %9 : i1 to i32
    %c0_i32_9 = arith.constant 0 : i32
    %11 = arith.cmpi ne, %10, %c0_i32_9 : i32
    scf.if %11 {
      %c0_10 = arith.constant 0 : index
      %c0_11 = arith.constant 0 : index
      %12 = vector.load %arg8[%c0_10, %c0_11] : memref<24x128xf32, #tpu.memory_space<vmem>>, vector<24x128xf32>
      %c0_12 = arith.constant 0 : index
      %c0_13 = arith.constant 0 : index
      %13 = vector.load %arg5[%c0_12, %c0_13] : memref<1x128xf32, #tpu.memory_space<vmem>>, vector<1x128xf32>
      %14 = vector.broadcast %13 : vector<1x128xf32> to vector<24x128xf32>
      %15 = arith.mulf %12, %14 : vector<24x128xf32>
      %c0_14 = arith.constant 0 : index
      %c0_15 = arith.constant 0 : index
      %16 = vector.load %arg6[%c0_14, %c0_15] : memref<1x128xf32, #tpu.memory_space<vmem>>, vector<1x128xf32>
      %17 = vector.broadcast %16 : vector<1x128xf32> to vector<24x128xf32>
      %18 = arith.addf %15, %17 : vector<24x128xf32>
      %c0_16 = arith.constant 0 : index
      %c0_17 = arith.constant 0 : index
      %19 = vector.load %arg7[%c0_16, %c0_17] : memref<24x128xf32, #tpu.memory_space<vmem>>, vector<24x128xf32>
      tpu.vector_store %arg7[%c0_16, %c0_17], %18 {strides = array<i32>} : memref<24x128xf32, #tpu.memory_space<vmem>>, vector<24x128xf32>,
    } else {
    }
    return
  }
  func.func @transform_0(%arg0: i32, %arg1: i32, %arg2: i32) -> (i32, i32) {
    %c0_i32 = arith.constant 0 : i32
    return %arg0, %arg2 : i32, i32
  }
  func.func @transform_1(%arg0: i32, %arg1: i32, %arg2: i32) -> (i32, i32) {
    %c0_i32 = arith.constant 0 : i32
    return %arg2, %arg1 : i32, i32
  }
  func.func @transform_2(%arg0: i32, %arg1: i32, %arg2: i32) -> (i32, i32) {
    %c0_i32 = arith.constant 0 : i32
    %c0_i32_0 = arith.constant 0 : i32
    return %c0_i32, %arg1 : i32, i32
  }
  func.func @transform_3(%arg0: i32, %arg1: i32, %arg2: i32) -> (i32, i32) {
    %c0_i32 = arith.constant 0 : i32
    %c0_i32_0 = arith.constant 0 : i32
    return %c0_i32, %arg1 : i32, i32
  }
  func.func @transform_4(%arg0: i32, %arg1: i32, %arg2: i32) -> (i32, i32) {
    %c0_i32 = arith.constant 0 : i32
    return %arg0, %arg1 : i32, i32
  }
}

module attributes {stable_mosaic.version = 11 : i64} {
  func.func @_conv_kernel(%arg0: i32, %arg1: i32, %arg2: memref<1x24x128xbf16, #tpu.memory_space<vmem>>, %arg3: memref<4x128x128xbf16, #tpu.memory_space<vmem>>, %arg4: memref<1x128xf32, #tpu.memory_space<vmem>>, %arg5: memref<1x128xf32, #tpu.memory_space<vmem>>, %arg6: memref<1x16x128xbf16, #tpu.memory_space<vmem>>) attributes {dimension_semantics = [#tpu.dimension_semantics<parallel>, #tpu.dimension_semantics<parallel>], iteration_bounds = array<i64: 2, 1>, scalar_prefetch = 0 : i64, scratch_operands = 0 : i64, tpu.core_type = #tpu.core_type<tc>, window_params = [{transform_indices = @transform_0, window_bounds = array<i64: 1, 24, 128>}, {transform_indices = @transform_1, window_bounds = array<i64: 4, 128, 128>}, {transform_indices = @transform_2, window_bounds = array<i64: 1, 128>}, {transform_indices = @transform_3, window_bounds = array<i64: 1, 128>}, {transform_indices = @transform_4, window_bounds = array<i64: 1, 16, 128>}]} {
    %cst = arith.constant 0.000000e+00 : f32
    %0 = vector.broadcast %cst : f32 to vector<16x128xf32>
    %c0 = arith.constant 0 : index
    %c0_0 = arith.constant 0 : index
    %c0_1 = arith.constant 0 : index
    %1 = vector.load %arg2[%c0, %c0_0, %c0_1] : memref<1x24x128xbf16, #tpu.memory_space<vmem>>, vector<1x16x128xbf16>
    %2 = vector.shape_cast %1 : vector<1x16x128xbf16> to vector<16x128xbf16>
    %c0_2 = arith.constant 0 : index
    %c0_3 = arith.constant 0 : index
    %c0_4 = arith.constant 0 : index
    %3 = vector.load %arg3[%c0_2, %c0_3, %c0_4] : memref<4x128x128xbf16, #tpu.memory_space<vmem>>, vector<1x128x128xbf16>
    %4 = vector.shape_cast %3 : vector<1x128x128xbf16> to vector<128x128xbf16>
    %cst_5 = arith.constant dense<0.000000e+00> : vector<16x128xf32>
    %5 = tpu.matmul %2, %4, %cst_5 {dimension_numbers = #tpu.dot_dimension_numbers<[1], [0], [0], [1], [0, 0, 1, 1], [], []>} : vector<16x128xbf16>, vector<128x128xbf16>, vector<16x128xf32> -> vector<16x128xf32>
    %6 = arith.addf %0, %5 : vector<16x128xf32>
    %c0_6 = arith.constant 0 : index
    %c1 = arith.constant 1 : index
    %c0_7 = arith.constant 0 : index
    %7 = vector.load %arg2[%c0_6, %c1, %c0_7] : memref<1x24x128xbf16, #tpu.memory_space<vmem>>, vector<1x16x128xbf16>
    %8 = vector.shape_cast %7 : vector<1x16x128xbf16> to vector<16x128xbf16>
    %c1_8 = arith.constant 1 : index
    %c0_9 = arith.constant 0 : index
    %c0_10 = arith.constant 0 : index
    %9 = vector.load %arg3[%c1_8, %c0_9, %c0_10] : memref<4x128x128xbf16, #tpu.memory_space<vmem>>, vector<1x128x128xbf16>
    %10 = vector.shape_cast %9 : vector<1x128x128xbf16> to vector<128x128xbf16>
    %cst_11 = arith.constant dense<0.000000e+00> : vector<16x128xf32>
    %11 = tpu.matmul %8, %10, %cst_11 {dimension_numbers = #tpu.dot_dimension_numbers<[1], [0], [0], [1], [0, 0, 1, 1], [], []>} : vector<16x128xbf16>, vector<128x128xbf16>, vector<16x128xf32> -> vector<16x128xf32>
    %12 = arith.addf %6, %11 : vector<16x128xf32>
    %c0_12 = arith.constant 0 : index
    %c2 = arith.constant 2 : index
    %c0_13 = arith.constant 0 : index
    %13 = vector.load %arg2[%c0_12, %c2, %c0_13] : memref<1x24x128xbf16, #tpu.memory_space<vmem>>, vector<1x16x128xbf16>
    %14 = vector.shape_cast %13 : vector<1x16x128xbf16> to vector<16x128xbf16>
    %c2_14 = arith.constant 2 : index
    %c0_15 = arith.constant 0 : index
    %c0_16 = arith.constant 0 : index
    %15 = vector.load %arg3[%c2_14, %c0_15, %c0_16] : memref<4x128x128xbf16, #tpu.memory_space<vmem>>, vector<1x128x128xbf16>
    %16 = vector.shape_cast %15 : vector<1x128x128xbf16> to vector<128x128xbf16>
    %cst_17 = arith.constant dense<0.000000e+00> : vector<16x128xf32>
    %17 = tpu.matmul %14, %16, %cst_17 {dimension_numbers = #tpu.dot_dimension_numbers<[1], [0], [0], [1], [0, 0, 1, 1], [], []>} : vector<16x128xbf16>, vector<128x128xbf16>, vector<16x128xf32> -> vector<16x128xf32>
    %18 = arith.addf %12, %17 : vector<16x128xf32>
    %c0_18 = arith.constant 0 : index
    %c3 = arith.constant 3 : index
    %c0_19 = arith.constant 0 : index
    %19 = vector.load %arg2[%c0_18, %c3, %c0_19] : memref<1x24x128xbf16, #tpu.memory_space<vmem>>, vector<1x16x128xbf16>
    %20 = vector.shape_cast %19 : vector<1x16x128xbf16> to vector<16x128xbf16>
    %c3_20 = arith.constant 3 : index
    %c0_21 = arith.constant 0 : index
    %c0_22 = arith.constant 0 : index
    %21 = vector.load %arg3[%c3_20, %c0_21, %c0_22] : memref<4x128x128xbf16, #tpu.memory_space<vmem>>, vector<1x128x128xbf16>
    %22 = vector.shape_cast %21 : vector<1x128x128xbf16> to vector<128x128xbf16>
    %cst_23 = arith.constant dense<0.000000e+00> : vector<16x128xf32>
    %23 = tpu.matmul %20, %22, %cst_23 {dimension_numbers = #tpu.dot_dimension_numbers<[1], [0], [0], [1], [0, 0, 1, 1], [], []>} : vector<16x128xbf16>, vector<128x128xbf16>, vector<16x128xf32> -> vector<16x128xf32>
    %24 = arith.addf %18, %23 : vector<16x128xf32>
    %cst_24 = arith.constant 0.000000e+00 : f32
    %25 = vector.broadcast %cst_24 : f32 to vector<16x128xf32>
    %26 = arith.maximumf %24, %25 : vector<16x128xf32>
    %c0_25 = arith.constant 0 : index
    %c0_26 = arith.constant 0 : index
    %27 = vector.load %arg4[%c0_25, %c0_26] : memref<1x128xf32, #tpu.memory_space<vmem>>, vector<1x128xf32>
    %28 = vector.broadcast %27 : vector<1x128xf32> to vector<16x128xf32>
    %29 = arith.mulf %26, %28 : vector<16x128xf32>
    %c0_27 = arith.constant 0 : index
    %c0_28 = arith.constant 0 : index
    %30 = vector.load %arg5[%c0_27, %c0_28] : memref<1x128xf32, #tpu.memory_space<vmem>>, vector<1x128xf32>
    %31 = vector.broadcast %30 : vector<1x128xf32> to vector<16x128xf32>
    %32 = arith.addf %29, %31 : vector<16x128xf32>
    %33 = arith.truncf %32 : vector<16x128xf32> to vector<16x128xbf16>
    %c0_29 = arith.constant 0 : index
    %c0_30 = arith.constant 0 : index
    %c0_31 = arith.constant 0 : index
    %34 = vector.load %arg6[%c0_29, %c0_30, %c0_31] : memref<1x16x128xbf16, #tpu.memory_space<vmem>>, vector<1x16x128xbf16>
    %35 = vector.shape_cast %34 : vector<1x16x128xbf16> to vector<16x128xbf16>
    %36 = vector.shape_cast %33 : vector<16x128xbf16> to vector<1x16x128xbf16>
    tpu.vector_store %arg6[%c0_29, %c0_30, %c0_31], %36 {strides = array<i32>} : memref<1x16x128xbf16, #tpu.memory_space<vmem>>, vector<1x16x128xbf16>,
    return
  }
  func.func @transform_0(%arg0: i32, %arg1: i32) -> (i32, i32, i32) {
    %c0_i32 = arith.constant 0 : i32
    %c0_i32_0 = arith.constant 0 : i32
    %c0_i32_1 = arith.constant 0 : i32
    return %arg0, %c0_i32, %c0_i32_0 : i32, i32, i32
  }
  func.func @transform_1(%arg0: i32, %arg1: i32) -> (i32, i32, i32) {
    %c0_i32 = arith.constant 0 : i32
    %c0_i32_0 = arith.constant 0 : i32
    %c0_i32_1 = arith.constant 0 : i32
    return %c0_i32, %c0_i32_0, %arg1 : i32, i32, i32
  }
  func.func @transform_2(%arg0: i32, %arg1: i32) -> (i32, i32) {
    %c0_i32 = arith.constant 0 : i32
    %c0_i32_0 = arith.constant 0 : i32
    return %c0_i32, %arg1 : i32, i32
  }
  func.func @transform_3(%arg0: i32, %arg1: i32) -> (i32, i32) {
    %c0_i32 = arith.constant 0 : i32
    %c0_i32_0 = arith.constant 0 : i32
    return %c0_i32, %arg1 : i32, i32
  }
  func.func @transform_4(%arg0: i32, %arg1: i32) -> (i32, i32, i32) {
    %c0_i32 = arith.constant 0 : i32
    %c0_i32_0 = arith.constant 0 : i32
    return %arg0, %c0_i32, %arg1 : i32, i32, i32
  }
}

module attributes {stable_mosaic.version = 11 : i64} {
  func.func @_conv_kernel(%arg0: i32, %arg1: i32, %arg2: memref<1x24x128xbf16, #tpu.memory_space<vmem>>, %arg3: memref<3x128x128xbf16, #tpu.memory_space<vmem>>, %arg4: memref<1x128xf32, #tpu.memory_space<vmem>>, %arg5: memref<1x128xf32, #tpu.memory_space<vmem>>, %arg6: memref<1x16x128xbf16, #tpu.memory_space<vmem>>) attributes {dimension_semantics = [#tpu.dimension_semantics<parallel>, #tpu.dimension_semantics<parallel>], iteration_bounds = array<i64: 2, 1>, scalar_prefetch = 0 : i64, scratch_operands = 0 : i64, tpu.core_type = #tpu.core_type<tc>, window_params = [{transform_indices = @transform_0, window_bounds = array<i64: 1, 24, 128>}, {transform_indices = @transform_1, window_bounds = array<i64: 3, 128, 128>}, {transform_indices = @transform_2, window_bounds = array<i64: 1, 128>}, {transform_indices = @transform_3, window_bounds = array<i64: 1, 128>}, {transform_indices = @transform_4, window_bounds = array<i64: 1, 16, 128>}]} {
    %cst = arith.constant 0.000000e+00 : f32
    %0 = vector.broadcast %cst : f32 to vector<16x128xf32>
    %c0 = arith.constant 0 : index
    %c0_0 = arith.constant 0 : index
    %c0_1 = arith.constant 0 : index
    %1 = vector.load %arg2[%c0, %c0_0, %c0_1] : memref<1x24x128xbf16, #tpu.memory_space<vmem>>, vector<1x16x128xbf16>
    %2 = vector.shape_cast %1 : vector<1x16x128xbf16> to vector<16x128xbf16>
    %c0_2 = arith.constant 0 : index
    %c0_3 = arith.constant 0 : index
    %c0_4 = arith.constant 0 : index
    %3 = vector.load %arg3[%c0_2, %c0_3, %c0_4] : memref<3x128x128xbf16, #tpu.memory_space<vmem>>, vector<1x128x128xbf16>
    %4 = vector.shape_cast %3 : vector<1x128x128xbf16> to vector<128x128xbf16>
    %cst_5 = arith.constant dense<0.000000e+00> : vector<16x128xf32>
    %5 = tpu.matmul %2, %4, %cst_5 {dimension_numbers = #tpu.dot_dimension_numbers<[1], [0], [0], [1], [0, 0, 1, 1], [], []>} : vector<16x128xbf16>, vector<128x128xbf16>, vector<16x128xf32> -> vector<16x128xf32>
    %6 = arith.addf %0, %5 : vector<16x128xf32>
    %c0_6 = arith.constant 0 : index
    %c1 = arith.constant 1 : index
    %c0_7 = arith.constant 0 : index
    %7 = vector.load %arg2[%c0_6, %c1, %c0_7] : memref<1x24x128xbf16, #tpu.memory_space<vmem>>, vector<1x16x128xbf16>
    %8 = vector.shape_cast %7 : vector<1x16x128xbf16> to vector<16x128xbf16>
    %c1_8 = arith.constant 1 : index
    %c0_9 = arith.constant 0 : index
    %c0_10 = arith.constant 0 : index
    %9 = vector.load %arg3[%c1_8, %c0_9, %c0_10] : memref<3x128x128xbf16, #tpu.memory_space<vmem>>, vector<1x128x128xbf16>
    %10 = vector.shape_cast %9 : vector<1x128x128xbf16> to vector<128x128xbf16>
    %cst_11 = arith.constant dense<0.000000e+00> : vector<16x128xf32>
    %11 = tpu.matmul %8, %10, %cst_11 {dimension_numbers = #tpu.dot_dimension_numbers<[1], [0], [0], [1], [0, 0, 1, 1], [], []>} : vector<16x128xbf16>, vector<128x128xbf16>, vector<16x128xf32> -> vector<16x128xf32>
    %12 = arith.addf %6, %11 : vector<16x128xf32>
    %c0_12 = arith.constant 0 : index
    %c2 = arith.constant 2 : index
    %c0_13 = arith.constant 0 : index
    %13 = vector.load %arg2[%c0_12, %c2, %c0_13] : memref<1x24x128xbf16, #tpu.memory_space<vmem>>, vector<1x16x128xbf16>
    %14 = vector.shape_cast %13 : vector<1x16x128xbf16> to vector<16x128xbf16>
    %c2_14 = arith.constant 2 : index
    %c0_15 = arith.constant 0 : index
    %c0_16 = arith.constant 0 : index
    %15 = vector.load %arg3[%c2_14, %c0_15, %c0_16] : memref<3x128x128xbf16, #tpu.memory_space<vmem>>, vector<1x128x128xbf16>
    %16 = vector.shape_cast %15 : vector<1x128x128xbf16> to vector<128x128xbf16>
    %cst_17 = arith.constant dense<0.000000e+00> : vector<16x128xf32>
    %17 = tpu.matmul %14, %16, %cst_17 {dimension_numbers = #tpu.dot_dimension_numbers<[1], [0], [0], [1], [0, 0, 1, 1], [], []>} : vector<16x128xbf16>, vector<128x128xbf16>, vector<16x128xf32> -> vector<16x128xf32>
    %18 = arith.addf %12, %17 : vector<16x128xf32>
    %cst_18 = arith.constant 0.000000e+00 : f32
    %19 = vector.broadcast %cst_18 : f32 to vector<16x128xf32>
    %20 = arith.maximumf %18, %19 : vector<16x128xf32>
    %c0_19 = arith.constant 0 : index
    %c0_20 = arith.constant 0 : index
    %21 = vector.load %arg4[%c0_19, %c0_20] : memref<1x128xf32, #tpu.memory_space<vmem>>, vector<1x128xf32>
    %22 = vector.broadcast %21 : vector<1x128xf32> to vector<16x128xf32>
    %23 = arith.mulf %20, %22 : vector<16x128xf32>
    %c0_21 = arith.constant 0 : index
    %c0_22 = arith.constant 0 : index
    %24 = vector.load %arg5[%c0_21, %c0_22] : memref<1x128xf32, #tpu.memory_space<vmem>>, vector<1x128xf32>
    %25 = vector.broadcast %24 : vector<1x128xf32> to vector<16x128xf32>
    %26 = arith.addf %23, %25 : vector<16x128xf32>
    %27 = arith.truncf %26 : vector<16x128xf32> to vector<16x128xbf16>
    %c0_23 = arith.constant 0 : index
    %c0_24 = arith.constant 0 : index
    %c0_25 = arith.constant 0 : index
    %28 = vector.load %arg6[%c0_23, %c0_24, %c0_25] : memref<1x16x128xbf16, #tpu.memory_space<vmem>>, vector<1x16x128xbf16>
    %29 = vector.shape_cast %28 : vector<1x16x128xbf16> to vector<16x128xbf16>
    %30 = vector.shape_cast %27 : vector<16x128xbf16> to vector<1x16x128xbf16>
    tpu.vector_store %arg6[%c0_23, %c0_24, %c0_25], %30 {strides = array<i32>} : memref<1x16x128xbf16, #tpu.memory_space<vmem>>, vector<1x16x128xbf16>,
    return
  }
  func.func @transform_0(%arg0: i32, %arg1: i32) -> (i32, i32, i32) {
    %c0_i32 = arith.constant 0 : i32
    %c0_i32_0 = arith.constant 0 : i32
    %c0_i32_1 = arith.constant 0 : i32
    return %arg0, %c0_i32, %c0_i32_0 : i32, i32, i32
  }
  func.func @transform_1(%arg0: i32, %arg1: i32) -> (i32, i32, i32) {
    %c0_i32 = arith.constant 0 : i32
    %c0_i32_0 = arith.constant 0 : i32
    %c0_i32_1 = arith.constant 0 : i32
    return %c0_i32, %c0_i32_0, %arg1 : i32, i32, i32
  }
  func.func @transform_2(%arg0: i32, %arg1: i32) -> (i32, i32) {
    %c0_i32 = arith.constant 0 : i32
    %c0_i32_0 = arith.constant 0 : i32
    return %c0_i32, %arg1 : i32, i32
  }
  func.func @transform_3(%arg0: i32, %arg1: i32) -> (i32, i32) {
    %c0_i32 = arith.constant 0 : i32
    %c0_i32_0 = arith.constant 0 : i32
    return %c0_i32, %arg1 : i32, i32
  }
  func.func @transform_4(%arg0: i32, %arg1: i32) -> (i32, i32, i32) {
    %c0_i32 = arith.constant 0 : i32
    %c0_i32_0 = arith.constant 0 : i32
    return %arg0, %c0_i32, %arg1 : i32, i32, i32
  }
}

module attributes {stable_mosaic.version = 11 : i64} {
  func.func @_conv_kernel(%arg0: i32, %arg1: i32, %arg2: memref<1x24x128xbf16, #tpu.memory_space<vmem>>, %arg3: memref<3x128x128xbf16, #tpu.memory_space<vmem>>, %arg4: memref<1x128xf32, #tpu.memory_space<vmem>>, %arg5: memref<1x128xf32, #tpu.memory_space<vmem>>, %arg6: memref<1x16x128xbf16, #tpu.memory_space<vmem>>) attributes {dimension_semantics = [#tpu.dimension_semantics<parallel>, #tpu.dimension_semantics<parallel>], iteration_bounds = array<i64: 2, 1>, scalar_prefetch = 0 : i64, scratch_operands = 0 : i64, tpu.core_type = #tpu.core_type<tc>, window_params = [{transform_indices = @transform_0, window_bounds = array<i64: 1, 24, 128>}, {transform_indices = @transform_1, window_bounds = array<i64: 3, 128, 128>}, {transform_indices = @transform_2, window_bounds = array<i64: 1, 128>}, {transform_indices = @transform_3, window_bounds = array<i64: 1, 128>}, {transform_indices = @transform_4, window_bounds = array<i64: 1, 16, 128>}]} {
    %cst = arith.constant 0.000000e+00 : f32
    %0 = vector.broadcast %cst : f32 to vector<16x128xf32>
    %c0 = arith.constant 0 : index
    %c0_0 = arith.constant 0 : index
    %c0_1 = arith.constant 0 : index
    %1 = vector.load %arg2[%c0, %c0_0, %c0_1] : memref<1x24x128xbf16, #tpu.memory_space<vmem>>, vector<1x16x128xbf16>
    %2 = vector.shape_cast %1 : vector<1x16x128xbf16> to vector<16x128xbf16>
    %c0_2 = arith.constant 0 : index
    %c0_3 = arith.constant 0 : index
    %c0_4 = arith.constant 0 : index
    %3 = vector.load %arg3[%c0_2, %c0_3, %c0_4] : memref<3x128x128xbf16, #tpu.memory_space<vmem>>, vector<1x128x128xbf16>
    %4 = vector.shape_cast %3 : vector<1x128x128xbf16> to vector<128x128xbf16>
    %cst_5 = arith.constant dense<0.000000e+00> : vector<16x128xf32>
    %5 = tpu.matmul %2, %4, %cst_5 {dimension_numbers = #tpu.dot_dimension_numbers<[1], [0], [0], [1], [0, 0, 1, 1], [], []>} : vector<16x128xbf16>, vector<128x128xbf16>, vector<16x128xf32> -> vector<16x128xf32>
    %6 = arith.addf %0, %5 : vector<16x128xf32>
    %c0_6 = arith.constant 0 : index
    %c1 = arith.constant 1 : index
    %c0_7 = arith.constant 0 : index
    %7 = vector.load %arg2[%c0_6, %c1, %c0_7] : memref<1x24x128xbf16, #tpu.memory_space<vmem>>, vector<1x16x128xbf16>
    %8 = vector.shape_cast %7 : vector<1x16x128xbf16> to vector<16x128xbf16>
    %c1_8 = arith.constant 1 : index
    %c0_9 = arith.constant 0 : index
    %c0_10 = arith.constant 0 : index
    %9 = vector.load %arg3[%c1_8, %c0_9, %c0_10] : memref<3x128x128xbf16, #tpu.memory_space<vmem>>, vector<1x128x128xbf16>
    %10 = vector.shape_cast %9 : vector<1x128x128xbf16> to vector<128x128xbf16>
    %cst_11 = arith.constant dense<0.000000e+00> : vector<16x128xf32>
    %11 = tpu.matmul %8, %10, %cst_11 {dimension_numbers = #tpu.dot_dimension_numbers<[1], [0], [0], [1], [0, 0, 1, 1], [], []>} : vector<16x128xbf16>, vector<128x128xbf16>, vector<16x128xf32> -> vector<16x128xf32>
    %12 = arith.addf %6, %11 : vector<16x128xf32>
    %c0_12 = arith.constant 0 : index
    %c2 = arith.constant 2 : index
    %c0_13 = arith.constant 0 : index
    %13 = vector.load %arg2[%c0_12, %c2, %c0_13] : memref<1x24x128xbf16, #tpu.memory_space<vmem>>, vector<1x16x128xbf16>
    %14 = vector.shape_cast %13 : vector<1x16x128xbf16> to vector<16x128xbf16>
    %c2_14 = arith.constant 2 : index
    %c0_15 = arith.constant 0 : index
    %c0_16 = arith.constant 0 : index
    %15 = vector.load %arg3[%c2_14, %c0_15, %c0_16] : memref<3x128x128xbf16, #tpu.memory_space<vmem>>, vector<1x128x128xbf16>
    %16 = vector.shape_cast %15 : vector<1x128x128xbf16> to vector<128x128xbf16>
    %cst_17 = arith.constant dense<0.000000e+00> : vector<16x128xf32>
    %17 = tpu.matmul %14, %16, %cst_17 {dimension_numbers = #tpu.dot_dimension_numbers<[1], [0], [0], [1], [0, 0, 1, 1], [], []>} : vector<16x128xbf16>, vector<128x128xbf16>, vector<16x128xf32> -> vector<16x128xf32>
    %18 = arith.addf %12, %17 : vector<16x128xf32>
    %c0_18 = arith.constant 0 : index
    %c0_19 = arith.constant 0 : index
    %19 = vector.load %arg4[%c0_18, %c0_19] : memref<1x128xf32, #tpu.memory_space<vmem>>, vector<1x128xf32>
    %20 = vector.broadcast %19 : vector<1x128xf32> to vector<16x128xf32>
    %21 = arith.mulf %18, %20 : vector<16x128xf32>
    %c0_20 = arith.constant 0 : index
    %c0_21 = arith.constant 0 : index
    %22 = vector.load %arg5[%c0_20, %c0_21] : memref<1x128xf32, #tpu.memory_space<vmem>>, vector<1x128xf32>
    %23 = vector.broadcast %22 : vector<1x128xf32> to vector<16x128xf32>
    %24 = arith.addf %21, %23 : vector<16x128xf32>
    %25 = arith.truncf %24 : vector<16x128xf32> to vector<16x128xbf16>
    %c0_22 = arith.constant 0 : index
    %c0_23 = arith.constant 0 : index
    %c0_24 = arith.constant 0 : index
    %26 = vector.load %arg6[%c0_22, %c0_23, %c0_24] : memref<1x16x128xbf16, #tpu.memory_space<vmem>>, vector<1x16x128xbf16>
    %27 = vector.shape_cast %26 : vector<1x16x128xbf16> to vector<16x128xbf16>
    %28 = vector.shape_cast %25 : vector<16x128xbf16> to vector<1x16x128xbf16>
    tpu.vector_store %arg6[%c0_22, %c0_23, %c0_24], %28 {strides = array<i32>} : memref<1x16x128xbf16, #tpu.memory_space<vmem>>, vector<1x16x128xbf16>,
    return
  }
  func.func @transform_0(%arg0: i32, %arg1: i32) -> (i32, i32, i32) {
    %c0_i32 = arith.constant 0 : i32
    %c0_i32_0 = arith.constant 0 : i32
    %c0_i32_1 = arith.constant 0 : i32
    return %arg0, %c0_i32, %c0_i32_0 : i32, i32, i32
  }
  func.func @transform_1(%arg0: i32, %arg1: i32) -> (i32, i32, i32) {
    %c0_i32 = arith.constant 0 : i32
    %c0_i32_0 = arith.constant 0 : i32
    %c0_i32_1 = arith.constant 0 : i32
    return %c0_i32, %c0_i32_0, %arg1 : i32, i32, i32
  }
  func.func @transform_2(%arg0: i32, %arg1: i32) -> (i32, i32) {
    %c0_i32 = arith.constant 0 : i32
    %c0_i32_0 = arith.constant 0 : i32
    return %c0_i32, %arg1 : i32, i32
  }
  func.func @transform_3(%arg0: i32, %arg1: i32) -> (i32, i32) {
    %c0_i32 = arith.constant 0 : i32
    %c0_i32_0 = arith.constant 0 : i32
    return %c0_i32, %arg1 : i32, i32
  }
  func.func @transform_4(%arg0: i32, %arg1: i32) -> (i32, i32, i32) {
    %c0_i32 = arith.constant 0 : i32
    %c0_i32_0 = arith.constant 0 : i32
    return %arg0, %c0_i32, %arg1 : i32, i32, i32
  }
}

module attributes {stable_mosaic.version = 11 : i64} {
  func.func @_matmul_kernel(%arg0: i32, %arg1: i32, %arg2: i32, %arg3: memref<24x128xbf16, #tpu.memory_space<vmem>>, %arg4: memref<128x128xbf16, #tpu.memory_space<vmem>>, %arg5: memref<1x128xf32, #tpu.memory_space<vmem>>, %arg6: memref<1x128xf32, #tpu.memory_space<vmem>>, %arg7: memref<24x128xbf16, #tpu.memory_space<vmem>>, %arg8: memref<24x128xf32, #tpu.memory_space<vmem>>) attributes {dimension_semantics = [#tpu.dimension_semantics<parallel>, #tpu.dimension_semantics<parallel>, #tpu.dimension_semantics<arbitrary>], iteration_bounds = array<i64: 1, 1, 1>, scalar_prefetch = 0 : i64, scratch_operands = 1 : i64, tpu.core_type = #tpu.core_type<tc>, window_params = [{transform_indices = @transform_0, window_bounds = array<i64: 24, 128>}, {transform_indices = @transform_1, window_bounds = array<i64: 128, 128>}, {transform_indices = @transform_2, window_bounds = array<i64: 1, 128>}, {transform_indices = @transform_3, window_bounds = array<i64: 1, 128>}, {transform_indices = @transform_4, window_bounds = array<i64: 24, 128>}]} {
    %c0_i32 = arith.constant 0 : i32
    %0 = arith.cmpi eq, %arg2, %c0_i32 : i32
    %1 = arith.extui %0 : i1 to i32
    %c0_i32_0 = arith.constant 0 : i32
    %2 = arith.cmpi ne, %1, %c0_i32_0 : i32
    scf.if %2 {
      %cst_10 = arith.constant 0.000000e+00 : f32
      %12 = vector.broadcast %cst_10 : f32 to vector<24x128xf32>
      %c0_11 = arith.constant 0 : index
      %c0_12 = arith.constant 0 : index
      %13 = vector.load %arg8[%c0_11, %c0_12] : memref<24x128xf32, #tpu.memory_space<vmem>>, vector<24x128xf32>
      tpu.vector_store %arg8[%c0_11, %c0_12], %12 {strides = array<i32>} : memref<24x128xf32, #tpu.memory_space<vmem>>, vector<24x128xf32>,
    } else {
    }
    %c0 = arith.constant 0 : index
    %c0_1 = arith.constant 0 : index
    %3 = vector.load %arg8[%c0, %c0_1] : memref<24x128xf32, #tpu.memory_space<vmem>>, vector<24x128xf32>
    %c0_2 = arith.constant 0 : index
    %c0_3 = arith.constant 0 : index
    %4 = vector.load %arg3[%c0_2, %c0_3] : memref<24x128xbf16, #tpu.memory_space<vmem>>, vector<24x128xbf16>
    %c0_4 = arith.constant 0 : index
    %c0_5 = arith.constant 0 : index
    %5 = vector.load %arg4[%c0_4, %c0_5] : memref<128x128xbf16, #tpu.memory_space<vmem>>, vector<128x128xbf16>
    %cst = arith.constant dense<0.000000e+00> : vector<24x128xf32>
    %6 = tpu.matmul %4, %5, %cst {dimension_numbers = #tpu.dot_dimension_numbers<[1], [0], [0], [1], [0, 0, 1, 1], [], []>} : vector<24x128xbf16>, vector<128x128xbf16>, vector<24x128xf32> -> vector<24x128xf32>
    %7 = arith.addf %3, %6 : vector<24x128xf32>
    %c0_6 = arith.constant 0 : index
    %c0_7 = arith.constant 0 : index
    %8 = vector.load %arg8[%c0_6, %c0_7] : memref<24x128xf32, #tpu.memory_space<vmem>>, vector<24x128xf32>
    tpu.vector_store %arg8[%c0_6, %c0_7], %7 {strides = array<i32>} : memref<24x128xf32, #tpu.memory_space<vmem>>, vector<24x128xf32>,
    %c0_i32_8 = arith.constant 0 : i32
    %9 = arith.cmpi eq, %arg2, %c0_i32_8 : i32
    %10 = arith.extui %9 : i1 to i32
    %c0_i32_9 = arith.constant 0 : i32
    %11 = arith.cmpi ne, %10, %c0_i32_9 : i32
    scf.if %11 {
      %c0_10 = arith.constant 0 : index
      %c0_11 = arith.constant 0 : index
      %12 = vector.load %arg8[%c0_10, %c0_11] : memref<24x128xf32, #tpu.memory_space<vmem>>, vector<24x128xf32>
      %c0_12 = arith.constant 0 : index
      %c0_13 = arith.constant 0 : index
      %13 = vector.load %arg5[%c0_12, %c0_13] : memref<1x128xf32, #tpu.memory_space<vmem>>, vector<1x128xf32>
      %14 = vector.broadcast %13 : vector<1x128xf32> to vector<24x128xf32>
      %15 = arith.mulf %12, %14 : vector<24x128xf32>
      %c0_14 = arith.constant 0 : index
      %c0_15 = arith.constant 0 : index
      %16 = vector.load %arg6[%c0_14, %c0_15] : memref<1x128xf32, #tpu.memory_space<vmem>>, vector<1x128xf32>
      %17 = vector.broadcast %16 : vector<1x128xf32> to vector<24x128xf32>
      %18 = arith.addf %15, %17 : vector<24x128xf32>
      %19 = arith.truncf %18 : vector<24x128xf32> to vector<24x128xbf16>
      %c0_16 = arith.constant 0 : index
      %c0_17 = arith.constant 0 : index
      %20 = vector.load %arg7[%c0_16, %c0_17] : memref<24x128xbf16, #tpu.memory_space<vmem>>, vector<24x128xbf16>
      tpu.vector_store %arg7[%c0_16, %c0_17], %19 {strides = array<i32>} : memref<24x128xbf16, #tpu.memory_space<vmem>>, vector<24x128xbf16>,
    } else {
    }
    return
  }
  func.func @transform_0(%arg0: i32, %arg1: i32, %arg2: i32) -> (i32, i32) {
    %c0_i32 = arith.constant 0 : i32
    return %arg0, %arg2 : i32, i32
  }
  func.func @transform_1(%arg0: i32, %arg1: i32, %arg2: i32) -> (i32, i32) {
    %c0_i32 = arith.constant 0 : i32
    return %arg2, %arg1 : i32, i32
  }
  func.func @transform_2(%arg0: i32, %arg1: i32, %arg2: i32) -> (i32, i32) {
    %c0_i32 = arith.constant 0 : i32
    %c0_i32_0 = arith.constant 0 : i32
    return %c0_i32, %arg1 : i32, i32
  }
  func.func @transform_3(%arg0: i32, %arg1: i32, %arg2: i32) -> (i32, i32) {
    %c0_i32 = arith.constant 0 : i32
    %c0_i32_0 = arith.constant 0 : i32
    return %c0_i32, %arg1 : i32, i32
  }
  func.func @transform_4(%arg0: i32, %arg1: i32, %arg2: i32) -> (i32, i32) {
    %c0_i32 = arith.constant 0 : i32
    return %arg0, %arg1 : i32, i32
  }
}

module attributes {stable_mosaic.version = 11 : i64} {
  func.func @_highway_kernel(%arg0: i32, %arg1: memref<24x128xbf16, #tpu.memory_space<vmem>>, %arg2: memref<2x128x256xbf16, #tpu.memory_space<vmem>>, %arg3: memref<2x1x256xf32, #tpu.memory_space<vmem>>, %arg4: memref<24x128xbf16, #tpu.memory_space<vmem>>) attributes {dimension_semantics = [#tpu.dimension_semantics<parallel>], iteration_bounds = array<i64: 1>, scalar_prefetch = 0 : i64, scratch_operands = 0 : i64, tpu.core_type = #tpu.core_type<tc>, window_params = [{transform_indices = @transform_0, window_bounds = array<i64: 24, 128>}, {pipeline_mode = #tpu.pipeline_mode<synchronous>, transform_indices = @transform_1, window_bounds = array<i64: 2, 128, 256>}, {pipeline_mode = #tpu.pipeline_mode<synchronous>, transform_indices = @transform_2, window_bounds = array<i64: 2, 1, 256>}, {transform_indices = @transform_3, window_bounds = array<i64: 24, 128>}]} {
    %c0 = arith.constant 0 : index
    %c0_0 = arith.constant 0 : index
    %0 = vector.load %arg1[%c0, %c0_0] : memref<24x128xbf16, #tpu.memory_space<vmem>>, vector<24x128xbf16>
    %1 = arith.extf %0 : vector<24x128xbf16> to vector<24x128xf32>
    %2 = arith.truncf %1 : vector<24x128xf32> to vector<24x128xbf16>
    %c0_1 = arith.constant 0 : index
    %c0_2 = arith.constant 0 : index
    %c0_3 = arith.constant 0 : index
    %3 = vector.load %arg2[%c0_1, %c0_2, %c0_3] : memref<2x128x256xbf16, #tpu.memory_space<vmem>>, vector<1x128x256xbf16>
    %4 = vector.shape_cast %3 : vector<1x128x256xbf16> to vector<128x256xbf16>
    %cst = arith.constant dense<0.000000e+00> : vector<24x256xf32>
    %5 = tpu.matmul %2, %4, %cst {dimension_numbers = #tpu.dot_dimension_numbers<[1], [0], [0], [1], [0, 0, 1, 1], [], []>} : vector<24x128xbf16>, vector<128x256xbf16>, vector<24x256xf32> -> vector<24x256xf32>
    %c0_4 = arith.constant 0 : index
    %c0_5 = arith.constant 0 : index
    %c0_6 = arith.constant 0 : index
    %6 = vector.load %arg3[%c0_4, %c0_5, %c0_6] : memref<2x1x256xf32, #tpu.memory_space<vmem>>, vector<1x1x256xf32>
    %7 = vector.shape_cast %6 : vector<1x1x256xf32> to vector<1x256xf32>
    %8 = vector.broadcast %7 : vector<1x256xf32> to vector<24x256xf32>
    %9 = arith.addf %5, %8 : vector<24x256xf32>
    %10 = vector.extract_strided_slice %9 {offsets = [0, 128], sizes = [24, 128], strides = [1, 1]} : vector<24x256xf32> to vector<24x128xf32>
    %11 = arith.negf %10 : vector<24x128xf32>
    %12 = math.exp %11 : vector<24x128xf32>
    %cst_7 = arith.constant 1.000000e+00 : f32
    %13 = vector.broadcast %cst_7 : f32 to vector<24x128xf32>
    %14 = arith.addf %13, %12 : vector<24x128xf32>
    %15 = arith.divf %13, %14 : vector<24x128xf32>
    %16 = vector.extract_strided_slice %9 {offsets = [0, 0], sizes = [24, 128], strides = [1, 1]} : vector<24x256xf32> to vector<24x128xf32>
    %cst_8 = arith.constant 0.000000e+00 : f32
    %17 = vector.broadcast %cst_8 : f32 to vector<24x128xf32>
    %18 = arith.maximumf %16, %17 : vector<24x128xf32>
    %19 = arith.mulf %15, %18 : vector<24x128xf32>
    %cst_9 = arith.constant 1.000000e+00 : f32
    %20 = vector.broadcast %cst_9 : f32 to vector<24x128xf32>
    %21 = arith.subf %20, %15 : vector<24x128xf32>
    %22 = arith.mulf %21, %1 : vector<24x128xf32>
    %23 = arith.addf %19, %22 : vector<24x128xf32>
    %24 = arith.truncf %23 : vector<24x128xf32> to vector<24x128xbf16>
    %c1 = arith.constant 1 : index
    %c0_10 = arith.constant 0 : index
    %c0_11 = arith.constant 0 : index
    %25 = vector.load %arg2[%c1, %c0_10, %c0_11] : memref<2x128x256xbf16, #tpu.memory_space<vmem>>, vector<1x128x256xbf16>
    %26 = vector.shape_cast %25 : vector<1x128x256xbf16> to vector<128x256xbf16>
    %cst_12 = arith.constant dense<0.000000e+00> : vector<24x256xf32>
    %27 = tpu.matmul %24, %26, %cst_12 {dimension_numbers = #tpu.dot_dimension_numbers<[1], [0], [0], [1], [0, 0, 1, 1], [], []>} : vector<24x128xbf16>, vector<128x256xbf16>, vector<24x256xf32> -> vector<24x256xf32>
    %c1_13 = arith.constant 1 : index
    %c0_14 = arith.constant 0 : index
    %c0_15 = arith.constant 0 : index
    %28 = vector.load %arg3[%c1_13, %c0_14, %c0_15] : memref<2x1x256xf32, #tpu.memory_space<vmem>>, vector<1x1x256xf32>
    %29 = vector.shape_cast %28 : vector<1x1x256xf32> to vector<1x256xf32>
    %30 = vector.broadcast %29 : vector<1x256xf32> to vector<24x256xf32>
    %31 = arith.addf %27, %30 : vector<24x256xf32>
    %32 = vector.extract_strided_slice %31 {offsets = [0, 128], sizes = [24, 128], strides = [1, 1]} : vector<24x256xf32> to vector<24x128xf32>
    %33 = arith.negf %32 : vector<24x128xf32>
    %34 = math.exp %33 : vector<24x128xf32>
    %cst_16 = arith.constant 1.000000e+00 : f32
    %35 = vector.broadcast %cst_16 : f32 to vector<24x128xf32>
    %36 = arith.addf %35, %34 : vector<24x128xf32>
    %37 = arith.divf %35, %36 : vector<24x128xf32>
    %38 = vector.extract_strided_slice %31 {offsets = [0, 0], sizes = [24, 128], strides = [1, 1]} : vector<24x256xf32> to vector<24x128xf32>
    %cst_17 = arith.constant 0.000000e+00 : f32
    %39 = vector.broadcast %cst_17 : f32 to vector<24x128xf32>
    %40 = arith.maximumf %38, %39 : vector<24x128xf32>
    %41 = arith.mulf %37, %40 : vector<24x128xf32>
    %cst_18 = arith.constant 1.000000e+00 : f32
    %42 = vector.broadcast %cst_18 : f32 to vector<24x128xf32>
    %43 = arith.subf %42, %37 : vector<24x128xf32>
    %44 = arith.mulf %43, %23 : vector<24x128xf32>
    %45 = arith.addf %41, %44 : vector<24x128xf32>
    %46 = arith.truncf %45 : vector<24x128xf32> to vector<24x128xbf16>
    %c0_19 = arith.constant 0 : index
    %c0_20 = arith.constant 0 : index
    %47 = vector.load %arg4[%c0_19, %c0_20] : memref<24x128xbf16, #tpu.memory_space<vmem>>, vector<24x128xbf16>
    tpu.vector_store %arg4[%c0_19, %c0_20], %46 {strides = array<i32>} : memref<24x128xbf16, #tpu.memory_space<vmem>>, vector<24x128xbf16>,
    return
  }
  func.func @transform_0(%arg0: i32) -> (i32, i32) {
    %c0_i32 = arith.constant 0 : i32
    %c0_i32_0 = arith.constant 0 : i32
    return %arg0, %c0_i32 : i32, i32
  }
  func.func @transform_1(%arg0: i32) -> (i32, i32, i32) {
    %c0_i32 = arith.constant 0 : i32
    %c0_i32_0 = arith.constant 0 : i32
    %c0_i32_1 = arith.constant 0 : i32
    %c0_i32_2 = arith.constant 0 : i32
    return %c0_i32, %c0_i32_0, %c0_i32_1 : i32, i32, i32
  }
  func.func @transform_2(%arg0: i32) -> (i32, i32, i32) {
    %c0_i32 = arith.constant 0 : i32
    %c0_i32_0 = arith.constant 0 : i32
    %c0_i32_1 = arith.constant 0 : i32
    %c0_i32_2 = arith.constant 0 : i32
    return %c0_i32, %c0_i32_0, %c0_i32_1 : i32, i32, i32
  }
  func.func @transform_3(%arg0: i32) -> (i32, i32) {
    %c0_i32 = arith.constant 0 : i32
    %c0_i32_0 = arith.constant 0 : i32
    return %arg0, %c0_i32 : i32, i32
  }
}

module attributes {stable_mosaic.version = 11 : i64} {
  func.func @_matmul_kernel(%arg0: i32, %arg1: i32, %arg2: i32, %arg3: memref<24x128xbf16, #tpu.memory_space<vmem>>, %arg4: memref<128x256xbf16, #tpu.memory_space<vmem>>, %arg5: memref<1x256xf32, #tpu.memory_space<vmem>>, %arg6: memref<1x256xf32, #tpu.memory_space<vmem>>, %arg7: memref<24x256xf32, #tpu.memory_space<vmem>>, %arg8: memref<24x256xf32, #tpu.memory_space<vmem>>) attributes {dimension_semantics = [#tpu.dimension_semantics<parallel>, #tpu.dimension_semantics<parallel>, #tpu.dimension_semantics<arbitrary>], iteration_bounds = array<i64: 1, 3, 1>, scalar_prefetch = 0 : i64, scratch_operands = 1 : i64, tpu.core_type = #tpu.core_type<tc>, window_params = [{transform_indices = @transform_0, window_bounds = array<i64: 24, 128>}, {transform_indices = @transform_1, window_bounds = array<i64: 128, 256>}, {transform_indices = @transform_2, window_bounds = array<i64: 1, 256>}, {transform_indices = @transform_3, window_bounds = array<i64: 1, 256>}, {transform_indices = @transform_4, window_bounds = array<i64: 24, 256>}]} {
    %c0_i32 = arith.constant 0 : i32
    %0 = arith.cmpi eq, %arg2, %c0_i32 : i32
    %1 = arith.extui %0 : i1 to i32
    %c0_i32_0 = arith.constant 0 : i32
    %2 = arith.cmpi ne, %1, %c0_i32_0 : i32
    scf.if %2 {
      %cst_10 = arith.constant 0.000000e+00 : f32
      %12 = vector.broadcast %cst_10 : f32 to vector<24x256xf32>
      %c0_11 = arith.constant 0 : index
      %c0_12 = arith.constant 0 : index
      %13 = vector.load %arg8[%c0_11, %c0_12] : memref<24x256xf32, #tpu.memory_space<vmem>>, vector<24x256xf32>
      tpu.vector_store %arg8[%c0_11, %c0_12], %12 {strides = array<i32>} : memref<24x256xf32, #tpu.memory_space<vmem>>, vector<24x256xf32>,
    } else {
    }
    %c0 = arith.constant 0 : index
    %c0_1 = arith.constant 0 : index
    %3 = vector.load %arg8[%c0, %c0_1] : memref<24x256xf32, #tpu.memory_space<vmem>>, vector<24x256xf32>
    %c0_2 = arith.constant 0 : index
    %c0_3 = arith.constant 0 : index
    %4 = vector.load %arg3[%c0_2, %c0_3] : memref<24x128xbf16, #tpu.memory_space<vmem>>, vector<24x128xbf16>
    %c0_4 = arith.constant 0 : index
    %c0_5 = arith.constant 0 : index
    %5 = vector.load %arg4[%c0_4, %c0_5] : memref<128x256xbf16, #tpu.memory_space<vmem>>, vector<128x256xbf16>
    %cst = arith.constant dense<0.000000e+00> : vector<24x256xf32>
    %6 = tpu.matmul %4, %5, %cst {dimension_numbers = #tpu.dot_dimension_numbers<[1], [0], [0], [1], [0, 0, 1, 1], [], []>} : vector<24x128xbf16>, vector<128x256xbf16>, vector<24x256xf32> -> vector<24x256xf32>
    %7 = arith.addf %3, %6 : vector<24x256xf32>
    %c0_6 = arith.constant 0 : index
    %c0_7 = arith.constant 0 : index
    %8 = vector.load %arg8[%c0_6, %c0_7] : memref<24x256xf32, #tpu.memory_space<vmem>>, vector<24x256xf32>
    tpu.vector_store %arg8[%c0_6, %c0_7], %7 {strides = array<i32>} : memref<24x256xf32, #tpu.memory_space<vmem>>, vector<24x256xf32>,
    %c0_i32_8 = arith.constant 0 : i32
    %9 = arith.cmpi eq, %arg2, %c0_i32_8 : i32
    %10 = arith.extui %9 : i1 to i32
    %c0_i32_9 = arith.constant 0 : i32
    %11 = arith.cmpi ne, %10, %c0_i32_9 : i32
    scf.if %11 {
      %c0_10 = arith.constant 0 : index
      %c0_11 = arith.constant 0 : index
      %12 = vector.load %arg8[%c0_10, %c0_11] : memref<24x256xf32, #tpu.memory_space<vmem>>, vector<24x256xf32>
      %c0_12 = arith.constant 0 : index
      %c0_13 = arith.constant 0 : index
      %13 = vector.load %arg5[%c0_12, %c0_13] : memref<1x256xf32, #tpu.memory_space<vmem>>, vector<1x256xf32>
      %14 = vector.broadcast %13 : vector<1x256xf32> to vector<24x256xf32>
      %15 = arith.mulf %12, %14 : vector<24x256xf32>
      %c0_14 = arith.constant 0 : index
      %c0_15 = arith.constant 0 : index
      %16 = vector.load %arg6[%c0_14, %c0_15] : memref<1x256xf32, #tpu.memory_space<vmem>>, vector<1x256xf32>
      %17 = vector.broadcast %16 : vector<1x256xf32> to vector<24x256xf32>
      %18 = arith.addf %15, %17 : vector<24x256xf32>
      %c0_16 = arith.constant 0 : index
      %c0_17 = arith.constant 0 : index
      %19 = vector.load %arg7[%c0_16, %c0_17] : memref<24x256xf32, #tpu.memory_space<vmem>>, vector<24x256xf32>
      tpu.vector_store %arg7[%c0_16, %c0_17], %18 {strides = array<i32>} : memref<24x256xf32, #tpu.memory_space<vmem>>, vector<24x256xf32>,
    } else {
    }
    return
  }
  func.func @transform_0(%arg0: i32, %arg1: i32, %arg2: i32) -> (i32, i32) {
    %c0_i32 = arith.constant 0 : i32
    return %arg0, %arg2 : i32, i32
  }
  func.func @transform_1(%arg0: i32, %arg1: i32, %arg2: i32) -> (i32, i32) {
    %c0_i32 = arith.constant 0 : i32
    return %arg2, %arg1 : i32, i32
  }
  func.func @transform_2(%arg0: i32, %arg1: i32, %arg2: i32) -> (i32, i32) {
    %c0_i32 = arith.constant 0 : i32
    %c0_i32_0 = arith.constant 0 : i32
    return %c0_i32, %arg1 : i32, i32
  }
  func.func @transform_3(%arg0: i32, %arg1: i32, %arg2: i32) -> (i32, i32) {
    %c0_i32 = arith.constant 0 : i32
    %c0_i32_0 = arith.constant 0 : i32
    return %c0_i32, %arg1 : i32, i32
  }
  func.func @transform_4(%arg0: i32, %arg1: i32, %arg2: i32) -> (i32, i32) {
    %c0_i32 = arith.constant 0 : i32
    return %arg0, %arg1 : i32, i32
  }
}

module attributes {stable_mosaic.version = 11 : i64} {
  func.func @_gru_rec_kernel(%arg0: i32, %arg1: memref<12x2x8x384xf32, #tpu.memory_space<vmem>>, %arg2: memref<2x128x384xbf16, #tpu.memory_space<vmem>>, %arg3: memref<2x1x384xf32, #tpu.memory_space<vmem>>, %arg4: memref<12x2x8x128xbf16, #tpu.memory_space<vmem>>, %arg5: memref<2x8x128xf32, #tpu.memory_space<vmem>>) attributes {dimension_semantics = [#tpu.dimension_semantics<arbitrary>], iteration_bounds = array<i64: 1>, scalar_prefetch = 0 : i64, scratch_operands = 1 : i64, tpu.core_type = #tpu.core_type<tc>, window_params = [{transform_indices = @transform_0, window_bounds = array<i64: 12, 2, 8, 384>}, {pipeline_mode = #tpu.pipeline_mode<synchronous>, transform_indices = @transform_1, window_bounds = array<i64: 2, 128, 384>}, {pipeline_mode = #tpu.pipeline_mode<synchronous>, transform_indices = @transform_2, window_bounds = array<i64: 2, 1, 384>}, {transform_indices = @transform_3, window_bounds = array<i64: 12, 2, 8, 128>}]} {
    %c0_i32 = arith.constant 0 : i32
    %0 = arith.cmpi eq, %arg0, %c0_i32 : i32
    %1 = arith.extui %0 : i1 to i32
    %c0_i32_0 = arith.constant 0 : i32
    %2 = arith.cmpi ne, %1, %c0_i32_0 : i32
    scf.if %2 {
      %cst = arith.constant 0.000000e+00 : f32
      %4 = vector.broadcast %cst : f32 to vector<2x8x128xf32>
      %c0 = arith.constant 0 : index
      %c0_3 = arith.constant 0 : index
      %c0_4 = arith.constant 0 : index
      %5 = vector.load %arg5[%c0, %c0_3, %c0_4] : memref<2x8x128xf32, #tpu.memory_space<vmem>>, vector<2x8x128xf32>
      tpu.vector_store %arg5[%c0, %c0_3, %c0_4], %4 {strides = array<i32>} : memref<2x8x128xf32, #tpu.memory_space<vmem>>, vector<2x8x128xf32>,
    } else {
    }
    %c0_i32_1 = arith.constant 0 : i32
    %c12_i32 = arith.constant 12 : i32
    %3 = arith.addi %c0_i32_1, %c12_i32 : i32
    %c1_i32 = arith.constant 1 : i32
    scf.for %arg6 = %c0_i32_1 to %3 step %c1_i32  : i32 {
      %4 = arith.index_cast %arg6 : i32 to index
      %c0 = arith.constant 0 : index
      %c0_3 = arith.constant 0 : index
      %c0_4 = arith.constant 0 : index
      %5 = vector.load %arg1[%4, %c0, %c0_3, %c0_4] : memref<12x2x8x384xf32, #tpu.memory_space<vmem>>, vector<1x2x8x384xf32>
      %6 = vector.shape_cast %5 : vector<1x2x8x384xf32> to vector<2x8x384xf32>
      %c0_5 = arith.constant 0 : index
      %c0_6 = arith.constant 0 : index
      %c0_7 = arith.constant 0 : index
      %7 = vector.load %arg5[%c0_5, %c0_6, %c0_7] : memref<2x8x128xf32, #tpu.memory_space<vmem>>, vector<1x8x128xf32>
      %8 = vector.shape_cast %7 : vector<1x8x128xf32> to vector<8x128xf32>
      %9 = arith.truncf %8 : vector<8x128xf32> to vector<8x128xbf16>
      %c0_8 = arith.constant 0 : index
      %c0_9 = arith.constant 0 : index
      %c0_10 = arith.constant 0 : index
      %10 = vector.load %arg2[%c0_8, %c0_9, %c0_10] : memref<2x128x384xbf16, #tpu.memory_space<vmem>>, vector<1x128x384xbf16>
      %11 = vector.shape_cast %10 : vector<1x128x384xbf16> to vector<128x384xbf16>
      %cst = arith.constant dense<0.000000e+00> : vector<8x384xf32>
      %12 = tpu.matmul %9, %11, %cst {dimension_numbers = #tpu.dot_dimension_numbers<[1], [0], [0], [1], [0, 0, 1, 1], [], []>} : vector<8x128xbf16>, vector<128x384xbf16>, vector<8x384xf32> -> vector<8x384xf32>
      %c0_11 = arith.constant 0 : index
      %c0_12 = arith.constant 0 : index
      %c0_13 = arith.constant 0 : index
      %13 = vector.load %arg3[%c0_11, %c0_12, %c0_13] : memref<2x1x384xf32, #tpu.memory_space<vmem>>, vector<1x1x384xf32>
      %14 = vector.shape_cast %13 : vector<1x1x384xf32> to vector<1x384xf32>
      %15 = vector.broadcast %14 : vector<1x384xf32> to vector<8x384xf32>
      %16 = arith.addf %12, %15 : vector<8x384xf32>
      %17 = vector.extract_strided_slice %6 {offsets = [0, 0, 0], sizes = [1, 8, 384], strides = [1, 1, 1]} : vector<2x8x384xf32> to vector<1x8x384xf32>
      %18 = vector.shape_cast %17 : vector<1x8x384xf32> to vector<8x384xf32>
      %19 = vector.extract_strided_slice %18 {offsets = [0, 0], sizes = [8, 128], strides = [1, 1]} : vector<8x384xf32> to vector<8x128xf32>
      %20 = vector.extract_strided_slice %16 {offsets = [0, 0], sizes = [8, 128], strides = [1, 1]} : vector<8x384xf32> to vector<8x128xf32>
      %21 = arith.addf %19, %20 : vector<8x128xf32>
      %22 = arith.negf %21 : vector<8x128xf32>
      %23 = math.exp %22 : vector<8x128xf32>
      %cst_14 = arith.constant 1.000000e+00 : f32
      %24 = vector.broadcast %cst_14 : f32 to vector<8x128xf32>
      %25 = arith.addf %24, %23 : vector<8x128xf32>
      %26 = arith.divf %24, %25 : vector<8x128xf32>
      %27 = vector.extract_strided_slice %18 {offsets = [0, 128], sizes = [8, 128], strides = [1, 1]} : vector<8x384xf32> to vector<8x128xf32>
      %28 = vector.extract_strided_slice %16 {offsets = [0, 128], sizes = [8, 128], strides = [1, 1]} : vector<8x384xf32> to vector<8x128xf32>
      %29 = arith.addf %27, %28 : vector<8x128xf32>
      %30 = arith.negf %29 : vector<8x128xf32>
      %31 = math.exp %30 : vector<8x128xf32>
      %cst_15 = arith.constant 1.000000e+00 : f32
      %32 = vector.broadcast %cst_15 : f32 to vector<8x128xf32>
      %33 = arith.addf %32, %31 : vector<8x128xf32>
      %34 = arith.divf %32, %33 : vector<8x128xf32>
      %35 = vector.extract_strided_slice %18 {offsets = [0, 256], sizes = [8, 128], strides = [1, 1]} : vector<8x384xf32> to vector<8x128xf32>
      %36 = vector.extract_strided_slice %16 {offsets = [0, 256], sizes = [8, 128], strides = [1, 1]} : vector<8x384xf32> to vector<8x128xf32>
      %37 = arith.mulf %26, %36 : vector<8x128xf32>
      %38 = arith.addf %35, %37 : vector<8x128xf32>
      %39 = math.tanh %38 : vector<8x128xf32>
      %cst_16 = arith.constant 1.000000e+00 : f32
      %40 = vector.broadcast %cst_16 : f32 to vector<8x128xf32>
      %41 = arith.subf %40, %34 : vector<8x128xf32>
      %42 = arith.mulf %41, %39 : vector<8x128xf32>
      %43 = arith.mulf %34, %8 : vector<8x128xf32>
      %44 = arith.addf %42, %43 : vector<8x128xf32>
      %c0_17 = arith.constant 0 : index
      %c0_18 = arith.constant 0 : index
      %c0_19 = arith.constant 0 : index
      %45 = vector.load %arg5[%c0_17, %c0_18, %c0_19] : memref<2x8x128xf32, #tpu.memory_space<vmem>>, vector<1x8x128xf32>
      %46 = vector.shape_cast %45 : vector<1x8x128xf32> to vector<8x128xf32>
      %47 = vector.shape_cast %44 : vector<8x128xf32> to vector<1x8x128xf32>
      tpu.vector_store %arg5[%c0_17, %c0_18, %c0_19], %47 {strides = array<i32>} : memref<2x8x128xf32, #tpu.memory_space<vmem>>, vector<1x8x128xf32>,
      %c1 = arith.constant 1 : index
      %c0_20 = arith.constant 0 : index
      %c0_21 = arith.constant 0 : index
      %48 = vector.load %arg5[%c1, %c0_20, %c0_21] : memref<2x8x128xf32, #tpu.memory_space<vmem>>, vector<1x8x128xf32>
      %49 = vector.shape_cast %48 : vector<1x8x128xf32> to vector<8x128xf32>
      %50 = arith.truncf %49 : vector<8x128xf32> to vector<8x128xbf16>
      %c1_22 = arith.constant 1 : index
      %c0_23 = arith.constant 0 : index
      %c0_24 = arith.constant 0 : index
      %51 = vector.load %arg2[%c1_22, %c0_23, %c0_24] : memref<2x128x384xbf16, #tpu.memory_space<vmem>>, vector<1x128x384xbf16>
      %52 = vector.shape_cast %51 : vector<1x128x384xbf16> to vector<128x384xbf16>
      %cst_25 = arith.constant dense<0.000000e+00> : vector<8x384xf32>
      %53 = tpu.matmul %50, %52, %cst_25 {dimension_numbers = #tpu.dot_dimension_numbers<[1], [0], [0], [1], [0, 0, 1, 1], [], []>} : vector<8x128xbf16>, vector<128x384xbf16>, vector<8x384xf32> -> vector<8x384xf32>
      %c1_26 = arith.constant 1 : index
      %c0_27 = arith.constant 0 : index
      %c0_28 = arith.constant 0 : index
      %54 = vector.load %arg3[%c1_26, %c0_27, %c0_28] : memref<2x1x384xf32, #tpu.memory_space<vmem>>, vector<1x1x384xf32>
      %55 = vector.shape_cast %54 : vector<1x1x384xf32> to vector<1x384xf32>
      %56 = vector.broadcast %55 : vector<1x384xf32> to vector<8x384xf32>
      %57 = arith.addf %53, %56 : vector<8x384xf32>
      %58 = vector.extract_strided_slice %6 {offsets = [1, 0, 0], sizes = [1, 8, 384], strides = [1, 1, 1]} : vector<2x8x384xf32> to vector<1x8x384xf32>
      %59 = vector.shape_cast %58 : vector<1x8x384xf32> to vector<8x384xf32>
      %60 = vector.extract_strided_slice %59 {offsets = [0, 0], sizes = [8, 128], strides = [1, 1]} : vector<8x384xf32> to vector<8x128xf32>
      %61 = vector.extract_strided_slice %57 {offsets = [0, 0], sizes = [8, 128], strides = [1, 1]} : vector<8x384xf32> to vector<8x128xf32>
      %62 = arith.addf %60, %61 : vector<8x128xf32>
      %63 = arith.negf %62 : vector<8x128xf32>
      %64 = math.exp %63 : vector<8x128xf32>
      %cst_29 = arith.constant 1.000000e+00 : f32
      %65 = vector.broadcast %cst_29 : f32 to vector<8x128xf32>
      %66 = arith.addf %65, %64 : vector<8x128xf32>
      %67 = arith.divf %65, %66 : vector<8x128xf32>
      %68 = vector.extract_strided_slice %59 {offsets = [0, 128], sizes = [8, 128], strides = [1, 1]} : vector<8x384xf32> to vector<8x128xf32>
      %69 = vector.extract_strided_slice %57 {offsets = [0, 128], sizes = [8, 128], strides = [1, 1]} : vector<8x384xf32> to vector<8x128xf32>
      %70 = arith.addf %68, %69 : vector<8x128xf32>
      %71 = arith.negf %70 : vector<8x128xf32>
      %72 = math.exp %71 : vector<8x128xf32>
      %cst_30 = arith.constant 1.000000e+00 : f32
      %73 = vector.broadcast %cst_30 : f32 to vector<8x128xf32>
      %74 = arith.addf %73, %72 : vector<8x128xf32>
      %75 = arith.divf %73, %74 : vector<8x128xf32>
      %76 = vector.extract_strided_slice %59 {offsets = [0, 256], sizes = [8, 128], strides = [1, 1]} : vector<8x384xf32> to vector<8x128xf32>
      %77 = vector.extract_strided_slice %57 {offsets = [0, 256], sizes = [8, 128], strides = [1, 1]} : vector<8x384xf32> to vector<8x128xf32>
      %78 = arith.mulf %67, %77 : vector<8x128xf32>
      %79 = arith.addf %76, %78 : vector<8x128xf32>
      %80 = math.tanh %79 : vector<8x128xf32>
      %cst_31 = arith.constant 1.000000e+00 : f32
      %81 = vector.broadcast %cst_31 : f32 to vector<8x128xf32>
      %82 = arith.subf %81, %75 : vector<8x128xf32>
      %83 = arith.mulf %82, %80 : vector<8x128xf32>
      %84 = arith.mulf %75, %49 : vector<8x128xf32>
      %85 = arith.addf %83, %84 : vector<8x128xf32>
      %c1_32 = arith.constant 1 : index
      %c0_33 = arith.constant 0 : index
      %c0_34 = arith.constant 0 : index
      %86 = vector.load %arg5[%c1_32, %c0_33, %c0_34] : memref<2x8x128xf32, #tpu.memory_space<vmem>>, vector<1x8x128xf32>
      %87 = vector.shape_cast %86 : vector<1x8x128xf32> to vector<8x128xf32>
      %88 = vector.shape_cast %85 : vector<8x128xf32> to vector<1x8x128xf32>
      tpu.vector_store %arg5[%c1_32, %c0_33, %c0_34], %88 {strides = array<i32>} : memref<2x8x128xf32, #tpu.memory_space<vmem>>, vector<1x8x128xf32>,
      %89 = vector.shape_cast %44 : vector<8x128xf32> to vector<1x8x128xf32>
      %90 = vector.shape_cast %85 : vector<8x128xf32> to vector<1x8x128xf32>
      %91 = tpu.concatenate %89, %90 in 0 : vector<1x8x128xf32>, vector<1x8x128xf32> -> vector<2x8x128xf32>
      %92 = arith.truncf %91 : vector<2x8x128xf32> to vector<2x8x128xbf16>
      %93 = arith.index_cast %arg6 : i32 to index
      %c0_35 = arith.constant 0 : index
      %c0_36 = arith.constant 0 : index
      %c0_37 = arith.constant 0 : index
      %94 = vector.load %arg4[%93, %c0_35, %c0_36, %c0_37] : memref<12x2x8x128xbf16, #tpu.memory_space<vmem>>, vector<1x2x8x128xbf16>
      %95 = vector.shape_cast %94 : vector<1x2x8x128xbf16> to vector<2x8x128xbf16>
      %96 = vector.shape_cast %92 : vector<2x8x128xbf16> to vector<1x2x8x128xbf16>
      tpu.vector_store %arg4[%93, %c0_35, %c0_36, %c0_37], %96 {strides = array<i32>} : memref<12x2x8x128xbf16, #tpu.memory_space<vmem>>, vector<1x2x8x128xbf16>,
    }
    %c12_i32_2 = arith.constant 12 : i32
    return
  }
  func.func @transform_0(%arg0: i32) -> (i32, i32, i32, i32) {
    %c0_i32 = arith.constant 0 : i32
    %c0_i32_0 = arith.constant 0 : i32
    %c0_i32_1 = arith.constant 0 : i32
    %c0_i32_2 = arith.constant 0 : i32
    return %arg0, %c0_i32, %c0_i32_0, %c0_i32_1 : i32, i32, i32, i32
  }
  func.func @transform_1(%arg0: i32) -> (i32, i32, i32) {
    %c0_i32 = arith.constant 0 : i32
    %c0_i32_0 = arith.constant 0 : i32
    %c0_i32_1 = arith.constant 0 : i32
    %c0_i32_2 = arith.constant 0 : i32
    return %c0_i32, %c0_i32_0, %c0_i32_1 : i32, i32, i32
  }
  func.func @transform_2(%arg0: i32) -> (i32, i32, i32) {
    %c0_i32 = arith.constant 0 : i32
    %c0_i32_0 = arith.constant 0 : i32
    %c0_i32_1 = arith.constant 0 : i32
    %c0_i32_2 = arith.constant 0 : i32
    return %c0_i32, %c0_i32_0, %c0_i32_1 : i32, i32, i32
  }
  func.func @transform_3(%arg0: i32) -> (i32, i32, i32, i32) {
    %c0_i32 = arith.constant 0 : i32
    %c0_i32_0 = arith.constant 0 : i32
    %c0_i32_1 = arith.constant 0 : i32
    %c0_i32_2 = arith.constant 0 : i32
    return %arg0, %c0_i32, %c0_i32_0, %c0_i32_1 : i32, i32, i32, i32
  }
}

module attributes {stable_mosaic.version = 11 : i64} {
  func.func @_conv_kernel(%arg0: i32, %arg1: i32, %arg2: memref<1x16x128xbf16, #tpu.memory_space<vmem>>, %arg3: memref<5x128x128xbf16, #tpu.memory_space<vmem>>, %arg4: memref<1x128xf32, #tpu.memory_space<vmem>>, %arg5: memref<1x128xf32, #tpu.memory_space<vmem>>, %arg6: memref<1x8x128xbf16, #tpu.memory_space<vmem>>) attributes {dimension_semantics = [#tpu.dimension_semantics<parallel>, #tpu.dimension_semantics<parallel>], iteration_bounds = array<i64: 2, 1>, scalar_prefetch = 0 : i64, scratch_operands = 0 : i64, tpu.core_type = #tpu.core_type<tc>, window_params = [{transform_indices = @transform_0, window_bounds = array<i64: 1, 16, 128>}, {transform_indices = @transform_1, window_bounds = array<i64: 5, 128, 128>}, {transform_indices = @transform_2, window_bounds = array<i64: 1, 128>}, {transform_indices = @transform_3, window_bounds = array<i64: 1, 128>}, {transform_indices = @transform_4, window_bounds = array<i64: 1, 8, 128>}]} {
    %cst = arith.constant 0.000000e+00 : f32
    %0 = vector.broadcast %cst : f32 to vector<8x128xf32>
    %c0 = arith.constant 0 : index
    %c0_0 = arith.constant 0 : index
    %c0_1 = arith.constant 0 : index
    %1 = vector.load %arg2[%c0, %c0_0, %c0_1] : memref<1x16x128xbf16, #tpu.memory_space<vmem>>, vector<1x8x128xbf16>
    %2 = vector.shape_cast %1 : vector<1x8x128xbf16> to vector<8x128xbf16>
    %c0_2 = arith.constant 0 : index
    %c0_3 = arith.constant 0 : index
    %c0_4 = arith.constant 0 : index
    %3 = vector.load %arg3[%c0_2, %c0_3, %c0_4] : memref<5x128x128xbf16, #tpu.memory_space<vmem>>, vector<1x128x128xbf16>
    %4 = vector.shape_cast %3 : vector<1x128x128xbf16> to vector<128x128xbf16>
    %cst_5 = arith.constant dense<0.000000e+00> : vector<8x128xf32>
    %5 = tpu.matmul %2, %4, %cst_5 {dimension_numbers = #tpu.dot_dimension_numbers<[1], [0], [0], [1], [0, 0, 1, 1], [], []>} : vector<8x128xbf16>, vector<128x128xbf16>, vector<8x128xf32> -> vector<8x128xf32>
    %6 = arith.addf %0, %5 : vector<8x128xf32>
    %c0_6 = arith.constant 0 : index
    %c1 = arith.constant 1 : index
    %c0_7 = arith.constant 0 : index
    %7 = vector.load %arg2[%c0_6, %c1, %c0_7] : memref<1x16x128xbf16, #tpu.memory_space<vmem>>, vector<1x8x128xbf16>
    %8 = vector.shape_cast %7 : vector<1x8x128xbf16> to vector<8x128xbf16>
    %c1_8 = arith.constant 1 : index
    %c0_9 = arith.constant 0 : index
    %c0_10 = arith.constant 0 : index
    %9 = vector.load %arg3[%c1_8, %c0_9, %c0_10] : memref<5x128x128xbf16, #tpu.memory_space<vmem>>, vector<1x128x128xbf16>
    %10 = vector.shape_cast %9 : vector<1x128x128xbf16> to vector<128x128xbf16>
    %cst_11 = arith.constant dense<0.000000e+00> : vector<8x128xf32>
    %11 = tpu.matmul %8, %10, %cst_11 {dimension_numbers = #tpu.dot_dimension_numbers<[1], [0], [0], [1], [0, 0, 1, 1], [], []>} : vector<8x128xbf16>, vector<128x128xbf16>, vector<8x128xf32> -> vector<8x128xf32>
    %12 = arith.addf %6, %11 : vector<8x128xf32>
    %c0_12 = arith.constant 0 : index
    %c2 = arith.constant 2 : index
    %c0_13 = arith.constant 0 : index
    %13 = vector.load %arg2[%c0_12, %c2, %c0_13] : memref<1x16x128xbf16, #tpu.memory_space<vmem>>, vector<1x8x128xbf16>
    %14 = vector.shape_cast %13 : vector<1x8x128xbf16> to vector<8x128xbf16>
    %c2_14 = arith.constant 2 : index
    %c0_15 = arith.constant 0 : index
    %c0_16 = arith.constant 0 : index
    %15 = vector.load %arg3[%c2_14, %c0_15, %c0_16] : memref<5x128x128xbf16, #tpu.memory_space<vmem>>, vector<1x128x128xbf16>
    %16 = vector.shape_cast %15 : vector<1x128x128xbf16> to vector<128x128xbf16>
    %cst_17 = arith.constant dense<0.000000e+00> : vector<8x128xf32>
    %17 = tpu.matmul %14, %16, %cst_17 {dimension_numbers = #tpu.dot_dimension_numbers<[1], [0], [0], [1], [0, 0, 1, 1], [], []>} : vector<8x128xbf16>, vector<128x128xbf16>, vector<8x128xf32> -> vector<8x128xf32>
    %18 = arith.addf %12, %17 : vector<8x128xf32>
    %c0_18 = arith.constant 0 : index
    %c3 = arith.constant 3 : index
    %c0_19 = arith.constant 0 : index
    %19 = vector.load %arg2[%c0_18, %c3, %c0_19] : memref<1x16x128xbf16, #tpu.memory_space<vmem>>, vector<1x8x128xbf16>
    %20 = vector.shape_cast %19 : vector<1x8x128xbf16> to vector<8x128xbf16>
    %c3_20 = arith.constant 3 : index
    %c0_21 = arith.constant 0 : index
    %c0_22 = arith.constant 0 : index
    %21 = vector.load %arg3[%c3_20, %c0_21, %c0_22] : memref<5x128x128xbf16, #tpu.memory_space<vmem>>, vector<1x128x128xbf16>
    %22 = vector.shape_cast %21 : vector<1x128x128xbf16> to vector<128x128xbf16>
    %cst_23 = arith.constant dense<0.000000e+00> : vector<8x128xf32>
    %23 = tpu.matmul %20, %22, %cst_23 {dimension_numbers = #tpu.dot_dimension_numbers<[1], [0], [0], [1], [0, 0, 1, 1], [], []>} : vector<8x128xbf16>, vector<128x128xbf16>, vector<8x128xf32> -> vector<8x128xf32>
    %24 = arith.addf %18, %23 : vector<8x128xf32>
    %c0_24 = arith.constant 0 : index
    %c4 = arith.constant 4 : index
    %c0_25 = arith.constant 0 : index
    %25 = vector.load %arg2[%c0_24, %c4, %c0_25] : memref<1x16x128xbf16, #tpu.memory_space<vmem>>, vector<1x8x128xbf16>
    %26 = vector.shape_cast %25 : vector<1x8x128xbf16> to vector<8x128xbf16>
    %c4_26 = arith.constant 4 : index
    %c0_27 = arith.constant 0 : index
    %c0_28 = arith.constant 0 : index
    %27 = vector.load %arg3[%c4_26, %c0_27, %c0_28] : memref<5x128x128xbf16, #tpu.memory_space<vmem>>, vector<1x128x128xbf16>
    %28 = vector.shape_cast %27 : vector<1x128x128xbf16> to vector<128x128xbf16>
    %cst_29 = arith.constant dense<0.000000e+00> : vector<8x128xf32>
    %29 = tpu.matmul %26, %28, %cst_29 {dimension_numbers = #tpu.dot_dimension_numbers<[1], [0], [0], [1], [0, 0, 1, 1], [], []>} : vector<8x128xbf16>, vector<128x128xbf16>, vector<8x128xf32> -> vector<8x128xf32>
    %30 = arith.addf %24, %29 : vector<8x128xf32>
    %cst_30 = arith.constant 0.000000e+00 : f32
    %31 = vector.broadcast %cst_30 : f32 to vector<8x128xf32>
    %32 = arith.maximumf %30, %31 : vector<8x128xf32>
    %c0_31 = arith.constant 0 : index
    %c0_32 = arith.constant 0 : index
    %33 = vector.load %arg4[%c0_31, %c0_32] : memref<1x128xf32, #tpu.memory_space<vmem>>, vector<1x128xf32>
    %34 = vector.broadcast %33 : vector<1x128xf32> to vector<8x128xf32>
    %35 = arith.mulf %32, %34 : vector<8x128xf32>
    %c0_33 = arith.constant 0 : index
    %c0_34 = arith.constant 0 : index
    %36 = vector.load %arg5[%c0_33, %c0_34] : memref<1x128xf32, #tpu.memory_space<vmem>>, vector<1x128xf32>
    %37 = vector.broadcast %36 : vector<1x128xf32> to vector<8x128xf32>
    %38 = arith.addf %35, %37 : vector<8x128xf32>
    %39 = arith.truncf %38 : vector<8x128xf32> to vector<8x128xbf16>
    %c0_35 = arith.constant 0 : index
    %c0_36 = arith.constant 0 : index
    %c0_37 = arith.constant 0 : index
    %40 = vector.load %arg6[%c0_35, %c0_36, %c0_37] : memref<1x8x128xbf16, #tpu.memory_space<vmem>>, vector<1x8x128xbf16>
    %41 = vector.shape_cast %40 : vector<1x8x128xbf16> to vector<8x128xbf16>
    %42 = vector.shape_cast %39 : vector<8x128xbf16> to vector<1x8x128xbf16>
    tpu.vector_store %arg6[%c0_35, %c0_36, %c0_37], %42 {strides = array<i32>} : memref<1x8x128xbf16, #tpu.memory_space<vmem>>, vector<1x8x128xbf16>,
    return
  }
  func.func @transform_0(%arg0: i32, %arg1: i32) -> (i32, i32, i32) {
    %c0_i32 = arith.constant 0 : i32
    %c0_i32_0 = arith.constant 0 : i32
    %c0_i32_1 = arith.constant 0 : i32
    return %arg0, %c0_i32, %c0_i32_0 : i32, i32, i32
  }
  func.func @transform_1(%arg0: i32, %arg1: i32) -> (i32, i32, i32) {
    %c0_i32 = arith.constant 0 : i32
    %c0_i32_0 = arith.constant 0 : i32
    %c0_i32_1 = arith.constant 0 : i32
    return %c0_i32, %c0_i32_0, %arg1 : i32, i32, i32
  }
  func.func @transform_2(%arg0: i32, %arg1: i32) -> (i32, i32) {
    %c0_i32 = arith.constant 0 : i32
    %c0_i32_0 = arith.constant 0 : i32
    return %c0_i32, %arg1 : i32, i32
  }
  func.func @transform_3(%arg0: i32, %arg1: i32) -> (i32, i32) {
    %c0_i32 = arith.constant 0 : i32
    %c0_i32_0 = arith.constant 0 : i32
    return %c0_i32, %arg1 : i32, i32
  }
  func.func @transform_4(%arg0: i32, %arg1: i32) -> (i32, i32, i32) {
    %c0_i32 = arith.constant 0 : i32
    %c0_i32_0 = arith.constant 0 : i32
    return %arg0, %c0_i32, %arg1 : i32, i32, i32
  }
}

</mosaic_0001>

<bundles_post_ra>
// kernel: _lambda_.38
= control target key start
LH: loop header
LB: loop body
LE: loop exit
PB: predicated region body
PF: predicated region fallthrough
CT: control target
= control target key end

     0   :  { %s997_s15 = smov 0   ;;  %s999_s16 = smov 0   ;;  %s1152_s0 = inlined_call_operand.vmem [shape: bf16[2,16,128], index: 0, kind: input, shape index: {}]   ;;  %s1153_s1 = inlined_call_operand.vmem [shape: bf16[3,128,128], index: 1, kind: input, shape index: {}]   ;;  %s1154_s2 = inlined_call_operand.vmem [shape: f32[1,128], index: 2, kind: input, shape index: {}]   ;;  %s1155_s3 = inlined_call_operand.vmem [shape: f32[1,128], index: 3, kind: input, shape index: {}]   ;;  %s1156_s4 = inlined_call_operand.vmem [shape: bf16[2,8,128], index: 4, kind: output, shape index: {}]  }
   0x1   :  { %s1001_s17 = smov 0  }
   0x2 LB: > { %s26_s18 = sadd.s32 1, %s964_s16  ;;  %p735_p0 = scmp.ge.s32.totalorder %s968_s17, 1  ;;  %s968_s17 = sphi %s1001_s17, %s14_s17   ;;  %s964_s16 = sphi %s999_s16, %s1158_s16   ;;  %s960_s15 = sphi %s997_s15, %s1157_s15  }
   0x3   : > { %p28_p1 = scmp.ge.s32.totalorder %s26_s18, 2  ;;  %p201_p2 = scmp.lt.s32.totalorder %s968_s17, 3 }
   0x5   : > { %s1160_s18 = smov (%p28_p1, %s26_s18), 0  ;;  %p202_p3 = pnand %p735_p0, %p201_p2 }
   0x6   : > { %v920_v0 = vld [vmem:[%s1153_s1] sm:$0xff] (!%p202_p3)   ;;  %v970_v1 = vmov (!%p202_p3), 0.0   ;;  %v921_v2 = vld [vmem:[%s1153_s1 + $0x8] sm:$0xff] (!%p202_p3)   ;;  %vm971_vm0 = vmmov (!%p202_p3), 0   ;;  %v922_v3 = vld [vmem:[%s1153_s1 + $0x10] sm:$0xff] (!%p202_p3)   ;;  %p239_p4 = scmp.lt.s32.totalorder (!%p202_p3), %s960_s15, 1 }
   0x7   : > { %205 = sbr.rel (%p202_p3) target bundleno = 292 (0x124), region = 36  ;;  %849 = vmatprep.subr.bf16.mxu0 (!%p202_p3), %v970_v1  ;;  %829 = vmatprep.subr.bf16.mxu1 (!%p202_p3), %v970_v1  ;;  %v928_v4 = vld [vmem:[%s1153_s1 + $0x40] sm:$0xff] (!%p202_p3)   ;;  %v923_v5 = vld [vmem:[%s1153_s1 + $0x18] sm:$0xff] (!%p202_p3)   ;;  %v930_v6 = vld [vmem:[%s1153_s1 + $0x48] sm:$0xff] (!%p202_p3)  }
   0x8   : > { %850 = vmatpush3.bf16.msra.mxu0 (!%p202_p3), %v920_v0  ;;  %865 = vmatprep.mubr.msk.bf16.mxu0 (!%p202_p3), %vm971_vm0, %v970_v1  ;;  %v924_v7 = vld [vmem:[%s1153_s1 + $0x20] sm:$0xff] (!%p202_p3)   ;;  %v932_v8 = vld [vmem:[%s1153_s1 + $0x50] sm:$0xff] (!%p202_p3)   ;;  %v925_v9 = vld [vmem:[%s1153_s1 + $0x28] sm:$0xff] (!%p202_p3)  }
   0x9   : > { %851 = vmatprep.subr.bf16.mxu0 (!%p202_p3), %v970_v1  ;;  %845 = vmatprep.mubr.msk.bf16.mxu1 (!%p202_p3), %vm971_vm0, %v970_v1  ;;  %v934_v10 = vld [vmem:[%s1153_s1 + $0x58] sm:$0xff] (!%p202_p3)   ;;  %v926_v11 = vld [vmem:[%s1153_s1 + $0x30] sm:$0xff] (!%p202_p3)   ;;  %v936_v12 = vld [vmem:[%s1153_s1 + $0x60] sm:$0xff] (!%p202_p3)  }
   0xa   : > { %830 = vmatpush3.bf16.msra.mxu1 (!%p202_p3), %v928_v4  ;;  %v927_v16 = vld [vmem:[%s1153_s1 + $0x38] sm:$0xff] (!%p202_p3)   ;;  %v938_v17 = vld [vmem:[%s1153_s1 + $0x68] sm:$0xff] (!%p202_p3)   ;;  %v929_v20 = vld [vmem:[%s1153_s1 + $0x80] sm:$0xff] (!%p202_p3)  }
   0xb   : > { %831 = vmatprep.subr.bf16.mxu1 (!%p202_p3), %v970_v1  ;;  %v940_v21 = vld [vmem:[%s1153_s1 + $0x70] sm:$0xff] (!%p202_p3)   ;;  %v931_v24 = vld [vmem:[%s1153_s1 + $0x88] sm:$0xff] (!%p202_p3)   ;;  %v942_v25 = vld [vmem:[%s1153_s1 + $0x78] sm:$0xff] (!%p202_p3)  }
   0xc   : > { %852 = vmatpush3.bf16.msra.mxu0 (!%p202_p3), %v921_v2  ;;  %v933_v27 = vld [vmem:[%s1153_s1 + $0x90] sm:$0xff] (!%p202_p3)   ;;  %v935_v28 = vld [vmem:[%s1153_s1 + $0x98] sm:$0xff] (!%p202_p3)   ;;  %v937_v29 = vld [vmem:[%s1153_s1 + $0xa0] sm:$0xff] (!%p202_p3)  }
   0xd   : > { %853 = vmatprep.subr.bf16.mxu0 (!%p202_p3), %v970_v1  ;;  %v939_v30 = vld [vmem:[%s1153_s1 + $0xa8] sm:$0xff] (!%p202_p3)   ;;  %v941_v31 = vld [vmem:[%s1153_s1 + $0xb0] sm:$0xff] (!%p202_p3)   ;;  %v944_v34 = vld [vmem:[%s1153_s1 + $0xb8] sm:$0xff] (!%p202_p3)  }
   0xe   : > { %832 = vmatpush3.bf16.msra.mxu1 %v930_v6  ;;  %s1162_s15 = smov (!%p239_p4, %s960_s15), 1  ;;  %v797_v41 = vld [vmem:[%s1154_s2] ss:$0 sm:$0xff] }
   0xf   : > { %833 = vmatprep.subr.bf16.mxu1 %v970_v1  ;;  %s801_s13 = sshll.u32 %s1162_s15, 3  ;;  %v798_v44 = vld [vmem:[%s1155_s3] ss:$0 sm:$0xff]  ;;  %s738_s5 = sshll.u32 %s1162_s15, 2 }
  0x10   : > { %854 = vmatpush3.bf16.msra.mxu0 %v922_v3  ;;  %s1072_s22 = scalar_lea.vmem %s1152_s0, %s801_s13  ;;  %s260_s8 = scalar_lea.vmem %s1156_s4, %s738_s5 }
  0x11   : > { %855 = vmatprep.subr.bf16.mxu0 %v970_v1  ;;  %v279_v13 = vld [vmem:[%s1072_s22] sm:$0xf]  ;;  %v280_v14 = vld [vmem:[%s1072_s22 + $0x4] sm:$0x1] }
  0x12   : > { %834 = vmatpush3.bf16.msra.mxu1 %v932_v8  ;;  %v755_v15 = vcombine.low %v279_v13, %v280_v14  ;;  %v262_v19 = vld [vmem:[%s1072_s22] sm:$0xf] }
  0x13   : > { %835 = vmatprep.subr.bf16.mxu1 %v970_v1  ;;  %v487_v32 = vld [vmem:[%s1072_s22] sm:$0xe] }
  0x14   : > { %856 = vmatpush3.bf16.msra.mxu0 %v923_v5  ;;  %v306_v18 = vshll.u32 %v755_v15, 16  ;;  %v304_v22 = vshrl.u32 %v755_v15, 16  ;;  %v788_v33 = vcombine.low %v487_v32, %v280_v14 }
  0x15   : > { %857 = vmatprep.subr.bf16.mxu0 %v970_v1 }
  0x16   : > { %836 = vmatpush3.bf16.msra.mxu1 %v934_v10  ;;  %v308_v23 = vrot.slane %v306_v18, 1  ;;  %v508_v35 = vrot.slane %v788_v33, 1 }
  0x17   : > { %837 = vmatprep.subr.bf16.mxu1 %v970_v1 }
  0x18   : > { %858 = vmatpush3.bf16.msra.mxu0 %v924_v7  ;;  %v309_v26 = vor.u32 %v308_v23, %v304_v22 }
  0x19   : > { %859 = vmatprep.subr.bf16.mxu0 %v970_v1 }
  0x1a   : > { %838 = vmatpush3.bf16.msra.mxu1 %v936_v12 }
  0x1b   : > { %839 = vmatprep.subr.bf16.mxu1 %v970_v1 }
  0x1c   : > { %860 = vmatpush3.bf16.msra.mxu0 %v925_v9 }
  0x1d   : > { %861 = vmatprep.subr.bf16.mxu0 %v970_v1 }
  0x1e   : > { %840 = vmatpush3.bf16.msra.mxu1 %v938_v17 }
  0x1f   : > { %841 = vmatprep.subr.bf16.mxu1 %v970_v1 }
  0x20   : > { %862 = vmatpush3.bf16.msra.mxu0 %v926_v11 }
  0x21   : > { %863 = vmatprep.subr.bf16.mxu0 %v970_v1 }
  0x22   : > { %842 = vmatpush3.bf16.msra.mxu1 %v940_v21 }
  0x23   : > { %843 = vmatprep.subr.bf16.mxu1 %v970_v1 }
  0x24   : > { %864 = vmatpush3.bf16.msra.mxu0 %v927_v16 }
  0x25   : > { %869 = vmatprep.subr.bf16.mxu0 %v970_v1 }
  0x26   : > { %844 = vmatpush3.bf16.msra.mxu1 %v942_v25 }
  0x27   : > { %866 = vmatmul.mubr.bf16.vlgmr.msra.gmra.mrb[0].mxu0 %v262_v19 }
  0x28   : > { %870 = vmatpush3.bf16.msra.mxu0 %v929_v20  ;;  %885 = vmatprep.mubr.msk.bf16.mxu0 %vm971_vm0, %v970_v1 }
  0x29   : > { %871 = vmatprep.subr.bf16.mxu0 %v970_v1  ;;  %846 = vmatmul.mubr.bf16.vlgmr.msra.gmra.mrb[0].mxu1 %v309_v26 }
  0x2c   : > { %872 = vmatpush3.bf16.msra.mxu0 %v931_v24 }
  0x2d   : > { %873 = vmatprep.subr.bf16.mxu0 %v970_v1 }
  0x30   : > { %874 = vmatpush3.bf16.msra.mxu0 %v933_v27 }
  0x31   : > { %875 = vmatprep.subr.bf16.mxu0 %v970_v1 }
  0x34   : > { %876 = vmatpush3.bf16.msra.mxu0 %v935_v28 }
  0x35   : > { %877 = vmatprep.subr.bf16.mxu0 %v970_v1 }
  0x38   : > { %878 = vmatpush3.bf16.msra.mxu0 %v937_v29 }
  0x39   : > { %879 = vmatprep.subr.bf16.mxu0 %v970_v1 }
  0x3c   : > { %880 = vmatpush3.bf16.msra.mxu0 %v939_v30 }
  0x3d   : > { %881 = vmatprep.subr.bf16.mxu0 %v970_v1 }
  0x40   : > { %882 = vmatpush3.bf16.msra.mxu0 %v941_v31 }
  0x41   : > { %883 = vmatprep.subr.bf16.mxu0 %v970_v1 }
  0x44   : > { %884 = vmatpush3.bf16.msra.mxu0 %v944_v34 }
  0x47   : > { %886 = vmatmul.mubr.bf16.vlgmr.msra.gmra.mrb[0].mxu0 %v508_v35 }
  0xfc   : > { %v393_v36 = vpop.f32.mrb[0].mxu1 }
  0xfd   : > { %v847_v37 = vpop.f32.mrb[1].mxu1 }
  0xfe   : > { %v396_v38 = vpop.f32.mrb[2].mxu1 }
  0xff   : > { %v848_v39 = vpop.f32.mrb[3].mxu1 }
 0x11a   : > { %v592_v40 = vpop.f32.mrb[0].mxu0 }
 0x11b   : > { %v889_v42 = vadd.f32 %v592_v40, %v393_v36  ;;  %v887_v43 = vpop.f32.mrb[1].mxu0 }
 0x11c   : > { %v595_v45 = vpop.f32.mrb[2].mxu0 }
 0x11d   : > { %v606_v46 = vmul.f32 %v889_v42, %v797_v41  ;;  %v888_v47 = vpop.f32.mrb[3].mxu0 }
 0x11f   : > { %v614_v48 = vadd.f32 %v798_v44, %v606_v46 }
 0x121   : > { %v615_v49 = vpack.c.bf16 %v614_v48, %v614_v48 }
 0x123   : > { %616 = vst [vmem:[%s260_s8] sm:$0xf] %v615_v49 }
 0x124 PF: > { %s14_s17 = sadd.s32 1, %s968_s17   ;;  %s1157_s15 = smov %s964_s16 }
 0x125   : > { %p11_p5 = scmp.ge.s32.totalorder %s14_s17, 4   ;;  %s1158_s16 = smov %s1160_s18 }
 0x127   :  { %13 = sbr.rel (!%p11_p5) target bundleno = 2 (0x2), region = 77 }

// kernel: _lambda_.37
= control target key start
LH: loop header
LB: loop body
LE: loop exit
PB: predicated region body
PF: predicated region fallthrough
CT: control target
= control target key end

     0   :  { %s1270_s15 = smov 0   ;;  %s1272_s16 = smov 0   ;;  %s1466_s0 = inlined_call_operand.vmem [shape: bf16[2,16,256], index: 0, kind: input, shape index: {}]   ;;  %s1467_s1 = inlined_call_operand.vmem [shape: bf16[3,256,128], index: 1, kind: input, shape index: {}]   ;;  %s1468_s2 = inlined_call_operand.vmem [shape: f32[1,128], index: 2, kind: input, shape index: {}]   ;;  %s1469_s3 = inlined_call_operand.vmem [shape: f32[1,128], index: 3, kind: input, shape index: {}]   ;;  %s1470_s4 = inlined_call_operand.vmem [shape: bf16[2,8,128], index: 4, kind: output, shape index: {}]  }
   0x1   :  { %s1274_s17 = smov 0  }
   0x2 LB: > { %s26_s18 = sadd.s32 1, %s1239_s16  ;;  %p950_p0 = scmp.ge.s32.totalorder %s1243_s17, 1  ;;  %s1243_s17 = sphi %s1274_s17, %s14_s17   ;;  %s1239_s16 = sphi %s1272_s16, %s1472_s16   ;;  %s1235_s15 = sphi %s1270_s15, %s1471_s15  }
   0x3   : > { %p28_p1 = scmp.ge.s32.totalorder %s26_s18, 2  ;;  %p201_p2 = scmp.lt.s32.totalorder %s1243_s17, 3 }
   0x5   : > { %s1474_s18 = smov (%p28_p1, %s26_s18), 0  ;;  %p202_p3 = pnand %p950_p0, %p201_p2 }
   0x6   : > { %v1167_v0 = vld [vmem:[%s1467_s1 + $0xc0] sm:$0xff] (!%p202_p3)   ;;  %v1171_v4 = vld [vmem:[%s1467_s1 + $0xc8] sm:$0xff] (!%p202_p3)   ;;  %v1175_v8 = vld [vmem:[%s1467_s1 + $0xd0] sm:$0xff] (!%p202_p3)   ;;  %p239_p4 = scmp.lt.s32.totalorder (!%p202_p3), %s1235_s15, 1 }
   0x7   : > { %205 = sbr.rel (%p202_p3) target bundleno = 298 (0x12a), region = 36  ;;  %v1168_v1 = vld [vmem:[%s1467_s1 + $0x40] sm:$0xff] (!%p202_p3)   ;;  %1077 = vmatprep.subr.bf16.mxu0 (!%p202_p3), %v1167_v0  ;;  %v1172_v5 = vld [vmem:[%s1467_s1 + $0x48] sm:$0xff] (!%p202_p3)   ;;  %v1176_v9 = vld [vmem:[%s1467_s1 + $0x50] sm:$0xff] (!%p202_p3)  }
   0x8   : > { %v1169_v2 = vld [vmem:[%s1467_s1 + $0x80] sm:$0xff] (!%p202_p3)   ;;  %1099 = vmatprep.subr.bf16.mxu1 (!%p202_p3), %v1168_v1  ;;  %v1173_v6 = vld [vmem:[%s1467_s1 + $0x88] sm:$0xff] (!%p202_p3)   ;;  %v1177_v10 = vld [vmem:[%s1467_s1 + $0x90] sm:$0xff] (!%p202_p3)  }
   0x9   : > { %v1170_v3 = vld [vmem:[%s1467_s1] sm:$0xff] (!%p202_p3)   ;;  %1078 = vmatpush3.bf16.msra.mxu0 (!%p202_p3), %v1169_v2  ;;  %v1174_v7 = vld [vmem:[%s1467_s1 + $0x8] sm:$0xff] (!%p202_p3)   ;;  %v1178_v11 = vld [vmem:[%s1467_s1 + $0x10] sm:$0xff] (!%p202_p3)  }
   0xa   : > { %1100 = vmatpush3.bf16.msra.mxu1 (!%p202_p3), %v1170_v3  ;;  %1079 = vmatprep.subr.bf16.mxu0 (!%p202_p3), %v1171_v4  ;;  %v1179_v12 = vld [vmem:[%s1467_s1 + $0xd8] sm:$0xff] (!%p202_p3)   ;;  %v1183_v16 = vld [vmem:[%s1467_s1 + $0xe0] sm:$0xff] (!%p202_p3)   ;;  %v1187_v20 = vld [vmem:[%s1467_s1 + $0xe8] sm:$0xff] (!%p202_p3)  }
   0xb   : > { %1101 = vmatprep.subr.bf16.mxu1 (!%p202_p3), %v1172_v5  ;;  %v1180_v13 = vld [vmem:[%s1467_s1 + $0x58] sm:$0xff] (!%p202_p3)   ;;  %v1184_v17 = vld [vmem:[%s1467_s1 + $0x60] sm:$0xff] (!%p202_p3)   ;;  %v1188_v21 = vld [vmem:[%s1467_s1 + $0x68] sm:$0xff] (!%p202_p3)  }
   0xc   : > { %v1181_v14 = vld [vmem:[%s1467_s1 + $0x98] sm:$0xff] (!%p202_p3)   ;;  %v1185_v18 = vld [vmem:[%s1467_s1 + $0xa0] sm:$0xff] (!%p202_p3)   ;;  %v1189_v22 = vld [vmem:[%s1467_s1 + $0xa8] sm:$0xff] (!%p202_p3)  }
   0xd   : > { %1080 = vmatpush3.bf16.msra.mxu0 (!%p202_p3), %v1173_v6  ;;  %v1182_v15 = vld [vmem:[%s1467_s1 + $0x18] sm:$0xff] (!%p202_p3)   ;;  %v1186_v19 = vld [vmem:[%s1467_s1 + $0x20] sm:$0xff] (!%p202_p3)   ;;  %v1190_v23 = vld [vmem:[%s1467_s1 + $0x28] sm:$0xff] (!%p202_p3)  }
   0xe   : > { %1102 = vmatpush3.bf16.msra.mxu1 %v1174_v7  ;;  %1081 = vmatprep.subr.bf16.mxu0 %v1175_v8  ;;  %s1476_s15 = smov (!%p239_p4, %s1235_s15), 1  ;;  %v1191_v24 = vld [vmem:[%s1467_s1 + $0xf0] sm:$0xff]   ;;  %v1195_v28 = vld [vmem:[%s1467_s1 + $0xf8] sm:$0xff]   ;;  %v1203_v38 = vld [vmem:[%s1467_s1 + $0x140] sm:$0xff]  }
   0xf   : > { %1103 = vmatprep.subr.bf16.mxu1 %v1176_v9  ;;  %v1192_v25 = vld [vmem:[%s1467_s1 + $0x70] sm:$0xff]   ;;  %s1076_s29 = sshll.u32 %s1476_s15, 4  ;;  %v1196_v29 = vld [vmem:[%s1467_s1 + $0x78] sm:$0xff]   ;;  %v1204_v47 = vld [vmem:[%s1467_s1 + $0x100] sm:$0xff]   ;;  %s953_s9 = sshll.u32 %s1476_s15, 2 }
  0x10   : > { %v1193_v26 = vld [vmem:[%s1467_s1 + $0xb0] sm:$0xff]   ;;  %s1388_s12 = scalar_lea.vmem %s1466_s0, %s1076_s29  ;;  %v1197_v30 = vld [vmem:[%s1467_s1 + $0xb8] sm:$0xff]   ;;  %v1205_v48 = vld [vmem:[%s1467_s1 + $0x148] sm:$0xff]   ;;  %s260_s13 = scalar_lea.vmem %s1470_s4, %s953_s9 }
  0x11   : > { %1082 = vmatpush3.bf16.msra.mxu0 %v1177_v10  ;;  %v1194_v27 = vld [vmem:[%s1467_s1 + $0x30] sm:$0xff]   ;;  %v1198_v31 = vld [vmem:[%s1467_s1 + $0x38] sm:$0xff]   ;;  %v295_v32 = vld [vmem:[%s1388_s12] sm:$0xff] }
  0x12   : > { %1104 = vmatpush3.bf16.msra.mxu1 %v1178_v11  ;;  %1083 = vmatprep.subr.bf16.mxu0 %v1179_v12  ;;  %v296_v33 = vld [vmem:[%s1388_s12 + $0x8] sm:$0x11]  ;;  %v1004_v36 = vcombine.low %v295_v32, %v295_v32  ;;  %v1005_v37 = vcombine.high %v295_v32, %v295_v32  ;;  %v1207_v50 = vld [vmem:[%s1467_s1 + $0x150] sm:$0xff]   ;;  %v1209_v52 = vld [vmem:[%s1467_s1 + $0x158] sm:$0xff]  }
  0x13   : > { %1105 = vmatprep.subr.bf16.mxu1 %v1180_v13  ;;  %v986_v34 = vcombine.low %v295_v32, %v296_v33  ;;  %v987_v35 = vcombine.high %v295_v32, %v296_v33  ;;  %v1206_v49 = vld [vmem:[%s1467_s1 + $0x108] sm:$0xff]   ;;  %v1208_v51 = vld [vmem:[%s1467_s1 + $0x110] sm:$0xff]   ;;  %v633_v53 = vld [vmem:[%s1388_s12] sm:$0xee] }
  0x14   : > { %625 = vmatprep.mubr.bf16.mxu1 %v1005_v37  ;;  %v1055_v54 = vcombine.high %v633_v53, %v296_v33  ;;  %v1210_v55 = vld [vmem:[%s1467_s1 + $0x118] sm:$0xff]   ;;  %v1211_v56 = vld [vmem:[%s1467_s1 + $0x160] sm:$0xff]   ;;  %v1213_v59 = vld [vmem:[%s1467_s1 + $0x168] sm:$0xff]   ;;  %v1054_v0 = vcombine.low %v633_v53, %v296_v33 }
  0x15   : > { %1084 = vmatpush3.bf16.msra.mxu0 %v1181_v14  ;;  %v346_v39 = vshrl.u32 %v987_v35, 16  ;;  %v348_v40 = vshll.u32 %v987_v35, 16  ;;  %v339_v41 = vshrl.u32 %v986_v34, 16  ;;  %v341_v42 = vshll.u32 %v986_v34, 16  ;;  %v1212_v58 = vld [vmem:[%s1467_s1 + $0x120] sm:$0xff]   ;;  %v1214_v60 = vld [vmem:[%s1467_s1 + $0x128] sm:$0xff]  }
  0x16   : > { %1106 = vmatpush3.bf16.msra.mxu1 %v1182_v15  ;;  %1085 = vmatprep.subr.bf16.mxu0 %v1183_v16  ;;  %v673_v57 = vrot.slane %v1055_v54, 1  ;;  %v1215_v61 = vld [vmem:[%s1467_s1 + $0x170] sm:$0xff]   ;;  %v1217_v63 = vld [vmem:[%s1467_s1 + $0x178] sm:$0xff]   ;;  %v672_v2 = vrot.slane %v1054_v0, 1 }
  0x17   : > { %1107 = vmatprep.subr.bf16.mxu1 %v1184_v17  ;;  %v350_v43 = vrot.slane %v348_v40, 1  ;;  %v343_v44 = vrot.slane %v341_v42, 1  ;;  %v1216_v62 = vld [vmem:[%s1467_s1 + $0x130] sm:$0xff]   ;;  %v1218_v1 = vld [vmem:[%s1467_s1 + $0x138] sm:$0xff]  }
  0x19   : > { %1086 = vmatpush3.bf16.msra.mxu0 %v1185_v18  ;;  %v351_v45 = vor.u32 %v350_v43, %v346_v39  ;;  %v344_v46 = vor.u32 %v343_v44, %v339_v41 }
  0x1a   : > { %1108 = vmatpush3.bf16.msra.mxu1 %v1186_v19  ;;  %1087 = vmatprep.subr.bf16.mxu0 %v1187_v20  ;;  %v1072_v20 = vld [vmem:[%s1468_s2] ss:$0 sm:$0xff] }
  0x1b   : > { %1109 = vmatprep.subr.bf16.mxu1 %v1188_v21  ;;  %482 = vmatprep.mubr.bf16.mxu0 %v351_v45 }
  0x1d   : > { %1088 = vmatpush3.bf16.msra.mxu0 %v1189_v22  ;;  %v1073_v22 = vld [vmem:[%s1469_s3] ss:$0 sm:$0xff] }
  0x1e   : > { %1110 = vmatpush3.bf16.msra.mxu1 %v1190_v23  ;;  %1089 = vmatprep.subr.bf16.mxu0 %v1191_v24 }
  0x1f   : > { %1111 = vmatprep.subr.bf16.mxu1 %v1192_v25 }
  0x21   : > { %1090 = vmatpush3.bf16.msra.mxu0 %v1193_v26 }
  0x22   : > { %1112 = vmatpush3.bf16.msra.mxu1 %v1194_v27  ;;  %1091 = vmatprep.subr.bf16.mxu0 %v1195_v28 }
  0x23   : > { %1113 = vmatprep.subr.bf16.mxu1 %v1196_v29 }
  0x25   : > { %1092 = vmatpush3.bf16.msra.mxu0 %v1197_v30 }
  0x26   : > { %1114 = vmatpush3.bf16.msra.mxu1 %v1198_v31  ;;  %1121 = vmatprep.subr.bf16.mxu0 %v1203_v38 }
  0x28   : > { %483 = vmatmul.mubr.bf16.vlgmr.msra.gmra.mrb[0].mxu0 %v344_v46 }
  0x29   : > { %626 = vmatmul.mubr.bf16.vlgmr.msra.gmra.mrb[0].mxu1 %v1004_v36  ;;  %1122 = vmatpush3.bf16.msra.mxu0 %v1204_v47 }
  0x2a   : > { %1123 = vmatprep.subr.bf16.mxu0 %v1205_v48  ;;  %804 = vmatprep.mubr.bf16.mxu0 %v673_v57 }
  0x2d   : > { %1124 = vmatpush3.bf16.msra.mxu0 %v1206_v49 }
  0x2e   : > { %1125 = vmatprep.subr.bf16.mxu0 %v1207_v50 }
  0x31   : > { %1126 = vmatpush3.bf16.msra.mxu0 %v1208_v51 }
  0x32   : > { %1127 = vmatprep.subr.bf16.mxu0 %v1209_v52 }
  0x35   : > { %1128 = vmatpush3.bf16.msra.mxu0 %v1210_v55 }
  0x36   : > { %1129 = vmatprep.subr.bf16.mxu0 %v1211_v56 }
  0x39   : > { %1130 = vmatpush3.bf16.msra.mxu0 %v1212_v58 }
  0x3a   : > { %1131 = vmatprep.subr.bf16.mxu0 %v1213_v59 }
  0x3d   : > { %1132 = vmatpush3.bf16.msra.mxu0 %v1214_v60 }
  0x3e   : > { %1133 = vmatprep.subr.bf16.mxu0 %v1215_v61 }
  0x41   : > { %1134 = vmatpush3.bf16.msra.mxu0 %v1216_v62 }
  0x42   : > { %1135 = vmatprep.subr.bf16.mxu0 %v1217_v63 }
  0x45   : > { %1136 = vmatpush3.bf16.msra.mxu0 %v1218_v1 }
  0x48   : > { %805 = vmatmul.mubr.bf16.vlgmr.msra.gmra.mrb[4].mxu0 %v672_v2 }
  0xfb   : > { %v1093_v8 = vpop.f32.mrb[0].mxu0 }
  0xfc   : > { %v1115_v3 = vpop.f32.mrb[0].mxu1  ;;  %v1094_v9 = vpop.f32.mrb[1].mxu0 }
  0xfd   : > { %v1116_v4 = vpop.f32.mrb[1].mxu1  ;;  %v1095_v10 = vadd.f32 %v1094_v9, %v1093_v8  ;;  %v1096_v11 = vpop.f32.mrb[2].mxu0 }
  0xfe   : > { %v1117_v5 = vadd.f32 %v1116_v4, %v1115_v3  ;;  %v1118_v6 = vpop.f32.mrb[2].mxu1  ;;  %v1097_v12 = vpop.f32.mrb[3].mxu0 }
  0xff   : > { %v1119_v7 = vpop.f32.mrb[3].mxu1 }
 0x100   : > { %v628_v13 = vadd.f32 %v1117_v5, %v1095_v10 }
 0x11b   : > { %v1137_v14 = vpop.f32.mrb[4].mxu0 }
 0x11c   : > { %v1138_v15 = vpop.f32.mrb[5].mxu0 }
 0x11d   : > { %v1139_v16 = vadd.f32 %v1138_v15, %v1137_v14  ;;  %v1140_v17 = vpop.f32.mrb[6].mxu0 }
 0x11e   : > { %v1141_v18 = vpop.f32.mrb[7].mxu0 }
 0x11f   : > { %v812_v19 = vadd.f32 %v1139_v16, %v628_v13 }
 0x121   : > { %v813_v21 = vmax.f32 %v812_v19, 0.0 }
 0x123   : > { %v821_v23 = vmul.f32 %v1072_v20, %v813_v21 }
 0x125   : > { %v829_v24 = vadd.f32 %v1073_v22, %v821_v23 }
 0x127   : > { %v830_v25 = vpack.c.bf16 %v829_v24, %v829_v24 }
 0x129   : > { %831 = vst [vmem:[%s260_s13] sm:$0xf] %v830_v25 }
 0x12a PF: > { %s14_s17 = sadd.s32 1, %s1243_s17   ;;  %s1471_s15 = smov %s1239_s16 }
 0x12b   : > { %p11_p5 = scmp.ge.s32.totalorder %s14_s17, 4   ;;  %s1472_s16 = smov %s1474_s18 }
 0x12d   :  { %13 = sbr.rel (!%p11_p5) target bundleno = 2 (0x2), region = 77 }

// kernel: _lambda_.39
= control target key start
LH: loop header
LB: loop body
LE: loop exit
PB: predicated region body
PF: predicated region fallthrough
CT: control target
= control target key end

     0   :  { %v240_v0 = vmov 0.0   ;;  %vm241_vm0 = vmmov 0   ;;  %s303_s1 = inlined_call_operand.vmem [shape: bf16[128,128], index: 1, kind: input, shape index: {}]   ;;  %s304_s0 = inlined_call_operand.vmem [shape: bf16[16,128], index: 0, kind: input, shape index: {}]   ;;  %s305_s2 = inlined_call_operand.vmem [shape: f32[1,128], index: 2, kind: input, shape index: {}]   ;;  %s306_s3 = inlined_call_operand.vmem [shape: f32[1,128], index: 3, kind: input, shape index: {}]   ;;  %s307_s4 = inlined_call_operand.vmem [shape: bf16[16,128], index: 4, kind: output, shape index: {}]  }
   0x1   :  { %209 = vmatprep.subr.bf16.mxu0 %v240_v0  ;;  %v231_v1 = vld [vmem:[%s303_s1] sm:$0xff]   ;;  %225 = vmatprep.mubr.msk.bf16.mxu0 %vm241_vm0, %v240_v0  ;;  %v232_v2 = vld [vmem:[%s303_s1 + $0x8] sm:$0xff]   ;;  %v233_v3 = vld [vmem:[%s303_s1 + $0x10] sm:$0xff]  }
   0x2   :  { %210 = vmatpush3.bf16.msra.mxu0 %v231_v1  ;;  %v234_v4 = vld [vmem:[%s303_s1 + $0x18] sm:$0xff]   ;;  %v235_v5 = vld [vmem:[%s303_s1 + $0x20] sm:$0xff]   ;;  %v236_v6 = vld [vmem:[%s303_s1 + $0x28] sm:$0xff]  }
   0x3   :  { %211 = vmatprep.subr.bf16.mxu0 %v240_v0  ;;  %v237_v7 = vld [vmem:[%s303_s1 + $0x30] sm:$0xff]   ;;  %v238_v8 = vld [vmem:[%s303_s1 + $0x38] sm:$0xff]   ;;  %v239_v9 = vld [vmem:[%s304_s0] sm:$0xff]  }
   0x4   :  { %v189_v10 = vld [vmem:[%s305_s2] ss:$0 sm:$0xff] }
   0x5   :  { %v190_v14 = vld [vmem:[%s306_s3] ss:$0 sm:$0xff] }
   0x6   :  { %212 = vmatpush3.bf16.msra.mxu0 %v232_v2 }
   0x7   :  { %213 = vmatprep.subr.bf16.mxu0 %v240_v0 }
   0xa   :  { %214 = vmatpush3.bf16.msra.mxu0 %v233_v3 }
   0xb   :  { %215 = vmatprep.subr.bf16.mxu0 %v240_v0 }
   0xe   :  { %216 = vmatpush3.bf16.msra.mxu0 %v234_v4 }
   0xf   :  { %217 = vmatprep.subr.bf16.mxu0 %v240_v0 }
  0x12   :  { %218 = vmatpush3.bf16.msra.mxu0 %v235_v5 }
  0x13   :  { %219 = vmatprep.subr.bf16.mxu0 %v240_v0 }
  0x16   :  { %220 = vmatpush3.bf16.msra.mxu0 %v236_v6 }
  0x17   :  { %221 = vmatprep.subr.bf16.mxu0 %v240_v0 }
  0x1a   :  { %222 = vmatpush3.bf16.msra.mxu0 %v237_v7 }
  0x1b   :  { %223 = vmatprep.subr.bf16.mxu0 %v240_v0 }
  0x1e   :  { %224 = vmatpush3.bf16.msra.mxu0 %v238_v8 }
  0x21   :  { %226 = vmatmul.mubr.bf16.vlgmr.msra.gmra.mrb[0].mxu0 %v239_v9 }
  0xf4   :  { %v132_v11 = vpop.f32.mrb[0].mxu0 }
  0xf5   :  { %v155_v12 = vmul.f32 %v189_v10, %v132_v11  ;;  %v227_v13 = vpop.f32.mrb[1].mxu0 }
  0xf6   :  { %v135_v15 = vpop.f32.mrb[2].mxu0 }
  0xf7   :  { %v156_v16 = vmul.f32 %v189_v10, %v135_v15  ;;  %v228_v17 = vpop.f32.mrb[3].mxu0  ;;  %v164_v18 = vadd.f32 %v190_v14, %v155_v12 }
  0xf9   :  { %v165_v19 = vadd.f32 %v190_v14, %v156_v16 }
  0xfb   :  { %v198_v20 = vpack.c.bf16 %v165_v19, %v164_v18 }
  0xfd   :  { %199 = vst [vmem:[%s307_s4] sm:$0xff] %v198_v20  }

// kernel: _lambda_.36
= control target key start
LH: loop header
LB: loop body
LE: loop exit
PB: predicated region body
PF: predicated region fallthrough
CT: control target
= control target key end

     0   :  { %s1348_s15 = smov 0   ;;  %s1350_s16 = smov 0   ;;  %s1605_s0 = inlined_call_operand.vmem [shape: bf16[2,16,128], index: 0, kind: input, shape index: {}]   ;;  %s1606_s1 = inlined_call_operand.vmem [shape: bf16[4,128,256], index: 1, kind: input, shape index: {}]   ;;  %s1607_s2 = inlined_call_operand.vmem [shape: f32[1,256], index: 2, kind: input, shape index: {}]   ;;  %s1608_s3 = inlined_call_operand.vmem [shape: f32[1,256], index: 3, kind: input, shape index: {}]   ;;  %s1609_s4 = inlined_call_operand.vmem [shape: bf16[2,8,256], index: 4, kind: output, shape index: {}]  }
   0x1   :  { %s1352_s17 = smov 0  }
   0x2 LB: > { %s26_s18 = sadd.s32 1, %s1316_s16  ;;  %p1038_p0 = scmp.ge.s32.totalorder %s1320_s17, 1  ;;  %s1320_s17 = sphi %s1352_s17, %s14_s17   ;;  %s1316_s16 = sphi %s1350_s16, %s1611_s16   ;;  %s1312_s15 = sphi %s1348_s15, %s1610_s15  }
   0x3   : > { %p28_p1 = scmp.ge.s32.totalorder %s26_s18, 2  ;;  %p207_p2 = scmp.lt.s32.totalorder %s1320_s17, 3 }
   0x5   : > { %s1613_s18 = smov (%p28_p1, %s26_s18), 0  ;;  %p208_p3 = pnand %p1038_p0, %p207_p2 }
   0x6   : > { %v1199_v0 = vld [vmem:[%s1606_s1 + $0x84] ss:$8 sps:$4 sm:$0xff] (!%p208_p3)   ;;  %v1322_v2 = vmov (!%p208_p3), 0   ;;  %v1203_v3 = vld [vmem:[%s1606_s1 + $0x80] ss:$8 sps:$4 sm:$0xff] (!%p208_p3)   ;;  %p250_p4 = scmp.lt.s32.totalorder (!%p208_p3), %s1312_s15, 1 }
   0x7   : > { %211 = sbr.rel (%p208_p3) target bundleno = 296 (0x128), region = 36  ;;  %v1201_v1 = vld [vmem:[%s1606_s1 + $0x104] ss:$8 sps:$4 sm:$0xff] (!%p208_p3)   ;;  %443 = vmatprep.mubr.bf16.mxu1 (!%p208_p3), %v1322_v2  ;;  %708 = vmatprep.mubr.bf16.mxu0 (!%p208_p3), %v1322_v2  ;;  %v1204_v4 = vld [vmem:[%s1606_s1 + $0x100] ss:$8 sps:$4 sm:$0xff] (!%p208_p3)  }
   0x8   : > { %411 = vmatprep.subr.bf16.mxu1 (!%p208_p3), %v1199_v0  ;;  %676 = vmatprep.subr.bf16.mxu0 (!%p208_p3), %v1201_v1  ;;  %v1205_v5 = vld [vmem:[%s1606_s1 + $0x94] ss:$8 sps:$4 sm:$0xff] (!%p208_p3)   ;;  %v1209_v7 = vld [vmem:[%s1606_s1 + $0x90] ss:$8 sps:$4 sm:$0xff] (!%p208_p3)   ;;  %v1211_v9 = vld [vmem:[%s1606_s1 + $0xa4] ss:$8 sps:$4 sm:$0xff] (!%p208_p3)  }
   0x9   : > { %412 = vmatpush1.bf16.msra.mxu1 (!%p208_p3), %v1203_v3  ;;  %677 = vmatpush1.bf16.msra.mxu0 (!%p208_p3), %v1204_v4  ;;  %v1207_v6 = vld [vmem:[%s1606_s1 + $0x114] ss:$8 sps:$4 sm:$0xff] (!%p208_p3)   ;;  %v1210_v8 = vld [vmem:[%s1606_s1 + $0x110] ss:$8 sps:$4 sm:$0xff] (!%p208_p3)   ;;  %v1213_v10 = vld [vmem:[%s1606_s1 + $0x124] ss:$8 sps:$4 sm:$0xff] (!%p208_p3)  }
   0xa   : > { %413 = vmatprep.subr.bf16.mxu1 (!%p208_p3), %v1205_v5  ;;  %678 = vmatprep.subr.bf16.mxu0 (!%p208_p3), %v1207_v6  ;;  %v1215_v11 = vld [vmem:[%s1606_s1 + $0xa0] ss:$8 sps:$4 sm:$0xff] (!%p208_p3)   ;;  %v1217_v13 = vld [vmem:[%s1606_s1 + $0xb4] ss:$8 sps:$4 sm:$0xff] (!%p208_p3)   ;;  %v1221_v15 = vld [vmem:[%s1606_s1 + $0xb0] ss:$8 sps:$4 sm:$0xff] (!%p208_p3)  }
   0xb   : > { %v1216_v12 = vld [vmem:[%s1606_s1 + $0x120] ss:$8 sps:$4 sm:$0xff] (!%p208_p3)   ;;  %v1219_v14 = vld [vmem:[%s1606_s1 + $0x134] ss:$8 sps:$4 sm:$0xff] (!%p208_p3)   ;;  %v1222_v16 = vld [vmem:[%s1606_s1 + $0x130] ss:$8 sps:$4 sm:$0xff] (!%p208_p3)  }
   0xc   : > { %v1223_v17 = vld [vmem:[%s1606_s1 + $0xc4] ss:$8 sps:$4 sm:$0xff] (!%p208_p3)   ;;  %v1227_v19 = vld [vmem:[%s1606_s1 + $0xc0] ss:$8 sps:$4 sm:$0xff] (!%p208_p3)   ;;  %v1229_v21 = vld [vmem:[%s1606_s1 + $0xd4] ss:$8 sps:$4 sm:$0xff] (!%p208_p3)  }
   0xd   : > { %414 = vmatpush1.bf16.msra.mxu1 (!%p208_p3), %v1209_v7  ;;  %679 = vmatpush1.bf16.msra.mxu0 (!%p208_p3), %v1210_v8  ;;  %v1225_v18 = vld [vmem:[%s1606_s1 + $0x144] ss:$8 sps:$4 sm:$0xff] (!%p208_p3)   ;;  %v1228_v20 = vld [vmem:[%s1606_s1 + $0x140] ss:$8 sps:$4 sm:$0xff] (!%p208_p3)   ;;  %v1231_v22 = vld [vmem:[%s1606_s1 + $0x154] ss:$8 sps:$4 sm:$0xff] (!%p208_p3)  }
   0xe   : > { %415 = vmatprep.subr.bf16.mxu1 %v1211_v9  ;;  %680 = vmatprep.subr.bf16.mxu0 %v1213_v10  ;;  %s1615_s15 = smov (!%p250_p4, %s1312_s15), 1  ;;  %v1233_v23 = vld [vmem:[%s1606_s1 + $0xd0] ss:$8 sps:$4 sm:$0xff]   ;;  %v1235_v25 = vld [vmem:[%s1606_s1 + $0xe4] ss:$8 sps:$4 sm:$0xff]  }
   0xf   : > { %s1161_s19 = sshll.u32 %s1615_s15, 3  ;;  %v1234_v24 = vld [vmem:[%s1606_s1 + $0x150] ss:$8 sps:$4 sm:$0xff]   ;;  %v1237_v26 = vld [vmem:[%s1606_s1 + $0x164] ss:$8 sps:$4 sm:$0xff]  }
  0x10   : > { %s1458_s30 = scalar_lea.vmem %s1605_s0, %s1161_s19  ;;  %v1239_v27 = vld [vmem:[%s1606_s1 + $0xe0] ss:$8 sps:$4 sm:$0xff]   ;;  %v1241_v29 = vld [vmem:[%s1606_s1 + $0xf4] ss:$8 sps:$4 sm:$0xff]   ;;  %v1245_v35 = vld [vmem:[%s1606_s1 + $0xf0] ss:$8 sps:$4 sm:$0xff]   ;;  %s279_s6 = scalar_lea.vmem %s1609_s4, %s1161_s19 }
  0x11   : > { %416 = vmatpush1.bf16.msra.mxu1 %v1215_v11  ;;  %681 = vmatpush1.bf16.msra.mxu0 %v1216_v12  ;;  %v1240_v28 = vld [vmem:[%s1606_s1 + $0x160] ss:$8 sps:$4 sm:$0xff]   ;;  %v300_v31 = vld [vmem:[%s1458_s30 + $0x4] sm:$0x1]  ;;  %v1243_v33 = vld [vmem:[%s1606_s1 + $0x174] ss:$8 sps:$4 sm:$0xff]  }
  0x12   : > { %417 = vmatprep.subr.bf16.mxu1 %v1217_v13  ;;  %682 = vmatprep.subr.bf16.mxu0 %v1219_v14  ;;  %v299_v30 = vld [vmem:[%s1458_s30] sm:$0xf]  ;;  %v1246_v39 = vld [vmem:[%s1606_s1 + $0x170] ss:$8 sps:$4 sm:$0xff]   ;;  %v1249_v40 = vld [vmem:[%s1606_s1 + $0x4] ss:$8 sps:$4 sm:$0xff]  }
  0x13   : > { %v1472_v32 = vld [vmem:[%s1458_s30] sm:$0xe]  ;;  %v1059_v34 = vcombine.low %v299_v30, %v300_v31  ;;  %v1252_v41 = vld [vmem:[%s1606_s1 + $0x184] ss:$8 sps:$4 sm:$0xff]   ;;  %v1258_v47 = vld [vmem:[%s1606_s1 + $0x14] ss:$8 sps:$4 sm:$0xff]  }
  0x14   : > { %v1108_v38 = vcombine.low %v1472_v32, %v300_v31  ;;  %v1247_v43 = vld [vmem:[%s1606_s1] ss:$8 sps:$4 sm:$0xff]   ;;  %v1261_v48 = vld [vmem:[%s1606_s1 + $0x194] ss:$8 sps:$4 sm:$0xff]   ;;  %v1256_v49 = vld [vmem:[%s1606_s1 + $0x10] ss:$8 sps:$4 sm:$0xff]  }
  0x15   : > { %418 = vmatpush1.bf16.msra.mxu1 %v1221_v15  ;;  %683 = vmatpush1.bf16.msra.mxu0 %v1222_v16  ;;  %v324_v36 = vshrl.u32 %v1059_v34, 16  ;;  %v326_v37 = vshll.u32 %v1059_v34, 16  ;;  %v1250_v46 = vld [vmem:[%s1606_s1 + $0x180] ss:$8 sps:$4 sm:$0xff]   ;;  %v1259_v50 = vld [vmem:[%s1606_s1 + $0x190] ss:$8 sps:$4 sm:$0xff]  }
  0x16   : > { %419 = vmatprep.subr.bf16.mxu1 %v1223_v17  ;;  %684 = vmatprep.subr.bf16.mxu0 %v1225_v18  ;;  %v594_v45 = vrot.slane %v1108_v38, 1  ;;  %v1264_v51 = vld [vmem:[%s1606_s1 + $0x24] ss:$8 sps:$4 sm:$0xff]   ;;  %v1262_v53 = vld [vmem:[%s1606_s1 + $0x20] ss:$8 sps:$4 sm:$0xff]  }
  0x17   : > { %v328_v42 = vrot.slane %v326_v37, 1  ;;  %v1267_v52 = vld [vmem:[%s1606_s1 + $0x1a4] ss:$8 sps:$4 sm:$0xff]   ;;  %v1265_v54 = vld [vmem:[%s1606_s1 + $0x1a0] ss:$8 sps:$4 sm:$0xff]  }
  0x18   : > { %v1270_v55 = vld [vmem:[%s1606_s1 + $0x34] ss:$8 sps:$4 sm:$0xff]   ;;  %v1268_v57 = vld [vmem:[%s1606_s1 + $0x30] ss:$8 sps:$4 sm:$0xff]   ;;  %v1276_v59 = vld [vmem:[%s1606_s1 + $0x44] ss:$8 sps:$4 sm:$0xff]  }
  0x19   : > { %420 = vmatpush1.bf16.msra.mxu1 %v1227_v19  ;;  %685 = vmatpush1.bf16.msra.mxu0 %v1228_v20  ;;  %v329_v44 = vor.u32 %v328_v42, %v324_v36  ;;  %v1273_v56 = vld [vmem:[%s1606_s1 + $0x1b4] ss:$8 sps:$4 sm:$0xff]   ;;  %v1271_v58 = vld [vmem:[%s1606_s1 + $0x1b0] ss:$8 sps:$4 sm:$0xff]   ;;  %v1279_v60 = vld [vmem:[%s1606_s1 + $0x1c4] ss:$8 sps:$4 sm:$0xff]   ;;  %v876_v19 = vlaneseq }
  0x1a   : > { %421 = vmatprep.subr.bf16.mxu1 %v1229_v21  ;;  %686 = vmatprep.subr.bf16.mxu0 %v1231_v22  ;;  %v719_v61 = vld [vmem:[%s1458_s30 + $0x4] sm:$0x3]  ;;  %v1274_v62 = vld [vmem:[%s1606_s1 + $0x40] ss:$8 sps:$4 sm:$0xff]   ;;  %v1282_v0 = vld [vmem:[%s1606_s1 + $0x54] ss:$8 sps:$4 sm:$0xff]  }
  0x1b   : > { %v1277_v63 = vld [vmem:[%s1606_s1 + $0x1c0] ss:$8 sps:$4 sm:$0xff]   ;;  %v1285_v1 = vld [vmem:[%s1606_s1 + $0x1d4] ss:$8 sps:$4 sm:$0xff]   ;;  %v1280_v3 = vld [vmem:[%s1606_s1 + $0x50] ss:$8 sps:$4 sm:$0xff]  }
  0x1c   : > { %v1283_v4 = vld [vmem:[%s1606_s1 + $0x1d0] ss:$8 sps:$4 sm:$0xff]   ;;  %v1288_v5 = vld [vmem:[%s1606_s1 + $0x64] ss:$8 sps:$4 sm:$0xff]   ;;  %v1286_v9 = vld [vmem:[%s1606_s1 + $0x60] ss:$8 sps:$4 sm:$0xff]  }
  0x1d   : > { %422 = vmatpush1.bf16.msra.mxu1 %v1233_v23  ;;  %687 = vmatpush1.bf16.msra.mxu0 %v1234_v24  ;;  %v1291_v6 = vld [vmem:[%s1606_s1 + $0x1e4] ss:$8 sps:$4 sm:$0xff]   ;;  %v1289_v10 = vld [vmem:[%s1606_s1 + $0x1e0] ss:$8 sps:$4 sm:$0xff]   ;;  %v1294_v11 = vld [vmem:[%s1606_s1 + $0x74] ss:$8 sps:$4 sm:$0xff]  }
  0x1e   : > { %423 = vmatprep.subr.bf16.mxu1 %v1235_v25  ;;  %688 = vmatprep.subr.bf16.mxu0 %v1237_v26  ;;  %v1297_v12 = vld [vmem:[%s1606_s1 + $0x1f4] ss:$8 sps:$4 sm:$0xff]   ;;  %v1292_v15 = vld [vmem:[%s1606_s1 + $0x70] ss:$8 sps:$4 sm:$0xff]   ;;  %v282_v18 = vld [vmem:[%s1458_s30] sm:$0xf] }
  0x1f   : > { %v1295_v16 = vld [vmem:[%s1606_s1 + $0x1f0] ss:$8 sps:$4 sm:$0xff]   ;;  %v877_v20 = vshrl.u32 %v876_v19, 7  ;;  %v874_v22 = vld [vmem:[%s1607_s2] sm:$0x3] }
  0x20   : > { %v888_v26 = vld [vmem:[%s1608_s3] sm:$0x3] }
  0x21   : > { %424 = vmatpush1.bf16.msra.mxu1 %v1239_v27  ;;  %689 = vmatpush1.bf16.msra.mxu0 %v1240_v28  ;;  %v878_v21 = vsub.s32 0, %v877_v20  ;;  %v882_v23 = vsub.s32 1, %v877_v20 }
  0x22   : > { %425 = vmatprep.subr.bf16.mxu1 %v1241_v29  ;;  %690 = vmatprep.subr.bf16.mxu0 %v1243_v33 }
  0x23   : > { %v879_v28 = vrot.slane %v874_v22, %v878_v21  ;;  %v893_v36 = vrot.slane %v888_v26, %v878_v21 }
  0x25   : > { %426 = vmatpush1.bf16.msra.mxu1 %v1245_v35  ;;  %691 = vmatpush1.bf16.msra.mxu0 %v1246_v39 }
  0x26   : > { %532 = vmatprep.subr.bf16.mxu1 %v1249_v40  ;;  %829 = vmatprep.subr.bf16.mxu0 %v1252_v41  ;;  %v897_v40 = vrot.slane %v888_v26, %v882_v23 }
  0x28   : > { %444 = vmatmul.mubr.bf16.vlgmr.msra.gmra.mrb[0].mxu1 %v329_v44  ;;  %709 = vmatmul.mubr.bf16.vlgmr.msra.gmra.mrb[0].mxu0 %v594_v45 }
  0x29   : > { %533 = vmatpush1.bf16.msra.mxu1 %v1247_v43  ;;  %830 = vmatpush1.bf16.msra.mxu0 %v1250_v46 }
  0x2a   : > { %534 = vmatprep.subr.bf16.mxu1 %v1258_v47  ;;  %831 = vmatprep.subr.bf16.mxu0 %v1261_v48 }
  0x2b   : > { %564 = vmatprep.mubr.bf16.mxu1 %v1322_v2  ;;  %861 = vmatprep.mubr.bf16.mxu0 %v1322_v2  ;;  %v1141_v2 = vcombine.low %v1472_v32, %v719_v61  ;;  %v883_v32 = vrot.slane %v874_v22, %v882_v23 }
  0x2d   : > { %535 = vmatpush1.bf16.msra.mxu1 %v1256_v49  ;;  %832 = vmatpush1.bf16.msra.mxu0 %v1259_v50  ;;  %v741_v7 = vshrl.u32 %v1141_v2, 16  ;;  %v744_v8 = vshll.u32 %v1141_v2, 16 }
  0x2e   : > { %536 = vmatprep.subr.bf16.mxu1 %v1264_v51  ;;  %833 = vmatprep.subr.bf16.mxu0 %v1267_v52 }
  0x2f   : > { %v743_v13 = vrot.slane %v741_v7, 1  ;;  %v746_v14 = vrot.slane %v744_v8, 2 }
  0x31   : > { %537 = vmatpush1.bf16.msra.mxu1 %v1262_v53  ;;  %834 = vmatpush1.bf16.msra.mxu0 %v1265_v54  ;;  %v747_v17 = vor.u32 %v746_v14, %v743_v13 }
  0x32   : > { %538 = vmatprep.subr.bf16.mxu1 %v1270_v55  ;;  %835 = vmatprep.subr.bf16.mxu0 %v1273_v56 }
  0x35   : > { %539 = vmatpush1.bf16.msra.mxu1 %v1268_v57  ;;  %836 = vmatpush1.bf16.msra.mxu0 %v1271_v58 }
  0x36   : > { %540 = vmatprep.subr.bf16.mxu1 %v1276_v59  ;;  %837 = vmatprep.subr.bf16.mxu0 %v1279_v60 }
  0x39   : > { %541 = vmatpush1.bf16.msra.mxu1 %v1274_v62  ;;  %838 = vmatpush1.bf16.msra.mxu0 %v1277_v63 }
  0x3a   : > { %542 = vmatprep.subr.bf16.mxu1 %v1282_v0  ;;  %839 = vmatprep.subr.bf16.mxu0 %v1285_v1 }
  0x3d   : > { %543 = vmatpush1.bf16.msra.mxu1 %v1280_v3  ;;  %840 = vmatpush1.bf16.msra.mxu0 %v1283_v4 }
  0x3e   : > { %544 = vmatprep.subr.bf16.mxu1 %v1288_v5  ;;  %841 = vmatprep.subr.bf16.mxu0 %v1291_v6 }
  0x41   : > { %545 = vmatpush1.bf16.msra.mxu1 %v1286_v9  ;;  %842 = vmatpush1.bf16.msra.mxu0 %v1289_v10 }
  0x42   : > { %546 = vmatprep.subr.bf16.mxu1 %v1294_v11  ;;  %843 = vmatprep.subr.bf16.mxu0 %v1297_v12 }
  0x45   : > { %547 = vmatpush1.bf16.msra.mxu1 %v1292_v15  ;;  %844 = vmatpush1.bf16.msra.mxu0 %v1295_v16 }
  0x48   : > { %565 = vmatmul.mubr.bf16.vlgmr.msra.gmra.mrb[0].mxu1 %v282_v18  ;;  %862 = vmatmul.mubr.bf16.vlgmr.msra.gmra.mrb[0].mxu0 %v747_v17 }
 0x11b   : > { %v566_v24 = vpop.f32.mrb[0].mxu1  ;;  %v863_v25 = vpop.f32.mrb[0].mxu0 }
 0x11c   : > { %v1164_v27 = vadd.f32 %v863_v25, %v566_v24  ;;  %v568_v29 = vpop.f32.mrb[1].mxu1  ;;  %v865_v30 = vpop.f32.mrb[1].mxu0 }
 0x11d   : > { %v1165_v31 = vadd.f32 %v865_v30, %v568_v29  ;;  %v570_v33 = vpop.f32.mrb[2].mxu1  ;;  %v867_v34 = vpop.f32.mrb[2].mxu0 }
 0x11e   : > { %v872_v35 = vmax.f32 %v1164_v27, 0.0  ;;  %v571_v37 = vpop.f32.mrb[3].mxu1  ;;  %v868_v38 = vpop.f32.mrb[3].mxu0 }
 0x11f   : > { %v873_v39 = vmax.f32 %v1165_v31, 0.0 }
 0x120   : > { %v886_v41 = vmul.f32 %v879_v28, %v872_v35 }
 0x121   : > { %v887_v42 = vmul.f32 %v883_v32, %v873_v39 }
 0x122   : > { %v900_v43 = vadd.f32 %v893_v36, %v886_v41 }
 0x123   : > { %v901_v44 = vadd.f32 %v897_v40, %v887_v42 }
 0x125   : > { %v1163_v45 = vpack.c.bf16 %v901_v44, %v900_v43 }
 0x127   : > { %910 = vst [vmem:[%s279_s6] sm:$0xff] %v1163_v45 }
 0x128 PF: > { %s14_s17 = sadd.s32 1, %s1320_s17   ;;  %s1610_s15 = smov %s1316_s16 }
 0x129   : > { %p11_p5 = scmp.ge.s32.totalorder %s14_s17, 4   ;;  %s1611_s16 = smov %s1613_s18 }
 0x12b   :  { %13 = sbr.rel (!%p11_p5) target bundleno = 2 (0x2), region = 78 }

// kernel: _lambda_.40
= control target key start
LH: loop header
LB: loop body
LE: loop exit
PB: predicated region body
PF: predicated region fallthrough
CT: control target
= control target key end

     0   :  { %v518_v1 = vmov 0   ;;  %v37_v34 = vlaneseq  ;;  %s652_s1 = inlined_call_operand.vmem [shape: bf16[2,128,256], index: 1, kind: input, shape index: {}]   ;;  %s653_s0 = inlined_call_operand.vmem [shape: bf16[16,128], index: 0, kind: input, shape index: {}]   ;;  %s654_s2 = inlined_call_operand.vmem [shape: f32[2,1,256], index: 2, kind: input, shape index: {}]   ;;  %s655_s3 = inlined_call_operand.vmem [shape: bf16[16,128], index: 3, kind: output, shape index: {}]  }
   0x1   :  { %v452_v0 = vld [vmem:[%s652_s1 + $0x4] ss:$8 sps:$4 sm:$0xff]   ;;  %165 = vmatprep.mubr.bf16.mxu0 %v518_v1  ;;  %341 = vmatprep.mubr.bf16.mxu1 %v518_v1  ;;  %v454_v2 = vld [vmem:[%s652_s1] ss:$8 sps:$4 sm:$0xff]   ;;  %v455_v3 = vld [vmem:[%s652_s1 + $0x14] ss:$8 sps:$4 sm:$0xff]  }
   0x2   :  { %133 = vmatprep.subr.bf16.mxu0 %v452_v0  ;;  %v457_v4 = vld [vmem:[%s652_s1 + $0x10] ss:$8 sps:$4 sm:$0xff]   ;;  %v458_v5 = vld [vmem:[%s652_s1 + $0x24] ss:$8 sps:$4 sm:$0xff]   ;;  %v460_v6 = vld [vmem:[%s652_s1 + $0x20] ss:$8 sps:$4 sm:$0xff]  }
   0x3   :  { %134 = vmatpush1.bf16.msra.mxu0 %v454_v2  ;;  %v461_v7 = vld [vmem:[%s652_s1 + $0x34] ss:$8 sps:$4 sm:$0xff]   ;;  %v463_v8 = vld [vmem:[%s652_s1 + $0x30] ss:$8 sps:$4 sm:$0xff]   ;;  %v464_v9 = vld [vmem:[%s652_s1 + $0x44] ss:$8 sps:$4 sm:$0xff]  }
   0x4   :  { %135 = vmatprep.subr.bf16.mxu0 %v455_v3  ;;  %v466_v10 = vld [vmem:[%s652_s1 + $0x40] ss:$8 sps:$4 sm:$0xff]   ;;  %v467_v11 = vld [vmem:[%s652_s1 + $0x54] ss:$8 sps:$4 sm:$0xff]   ;;  %v469_v12 = vld [vmem:[%s652_s1 + $0x50] ss:$8 sps:$4 sm:$0xff]  }
   0x5   :  { %v470_v13 = vld [vmem:[%s652_s1 + $0x64] ss:$8 sps:$4 sm:$0xff]   ;;  %v472_v14 = vld [vmem:[%s652_s1 + $0x60] ss:$8 sps:$4 sm:$0xff]   ;;  %v473_v15 = vld [vmem:[%s652_s1 + $0x74] ss:$8 sps:$4 sm:$0xff]  }
   0x6   :  { %v475_v16 = vld [vmem:[%s652_s1 + $0x70] ss:$8 sps:$4 sm:$0xff]   ;;  %v590_v17 = vld [vmem:[%s653_s0] sm:$0xff]   ;;  %v480_v20 = vld [vmem:[%s652_s1 + $0x94] ss:$8 sps:$4 sm:$0xff]   ;;  %v38_v35 = vshrl.u32 %v37_v34, 7 }
   0x7   :  { %136 = vmatpush1.bf16.msra.mxu0 %v457_v4  ;;  %v477_v18 = vld [vmem:[%s652_s1 + $0x84] ss:$8 sps:$4 sm:$0xff]   ;;  %v479_v19 = vld [vmem:[%s652_s1 + $0x80] ss:$8 sps:$4 sm:$0xff]   ;;  %v482_v21 = vld [vmem:[%s652_s1 + $0x90] ss:$8 sps:$4 sm:$0xff]   ;;  %v17_v55 = vunpack.c.l.bf16 %v590_v17  ;;  %v18_v58 = vunpack.c.h.bf16 %v590_v17 }
   0x8   :  { %137 = vmatprep.subr.bf16.mxu0 %v458_v5  ;;  %309 = vmatprep.subr.bf16.mxu1 %v477_v18  ;;  %v483_v22 = vld [vmem:[%s652_s1 + $0xa4] ss:$8 sps:$4 sm:$0xff]   ;;  %v485_v23 = vld [vmem:[%s652_s1 + $0xa0] ss:$8 sps:$4 sm:$0xff]   ;;  %v486_v24 = vld [vmem:[%s652_s1 + $0xb4] ss:$8 sps:$4 sm:$0xff]  }
   0x9   :  { %310 = vmatpush1.bf16.msra.mxu1 %v479_v19  ;;  %v488_v25 = vld [vmem:[%s652_s1 + $0xb0] ss:$8 sps:$4 sm:$0xff]   ;;  %v489_v26 = vld [vmem:[%s652_s1 + $0xc4] ss:$8 sps:$4 sm:$0xff]   ;;  %v491_v27 = vld [vmem:[%s652_s1 + $0xc0] ss:$8 sps:$4 sm:$0xff]  }
   0xa   :  { %311 = vmatprep.subr.bf16.mxu1 %v480_v20  ;;  %v492_v28 = vld [vmem:[%s652_s1 + $0xd4] ss:$8 sps:$4 sm:$0xff]   ;;  %v494_v29 = vld [vmem:[%s652_s1 + $0xd0] ss:$8 sps:$4 sm:$0xff]   ;;  %v495_v30 = vld [vmem:[%s652_s1 + $0xe4] ss:$8 sps:$4 sm:$0xff]  }
   0xb   :  { %138 = vmatpush1.bf16.msra.mxu0 %v460_v6  ;;  %v497_v31 = vld [vmem:[%s652_s1 + $0xe0] ss:$8 sps:$4 sm:$0xff]   ;;  %v498_v32 = vld [vmem:[%s652_s1 + $0xf4] ss:$8 sps:$4 sm:$0xff]   ;;  %v500_v33 = vld [vmem:[%s652_s1 + $0xf0] ss:$8 sps:$4 sm:$0xff]  }
   0xc   :  { %139 = vmatprep.subr.bf16.mxu0 %v461_v7  ;;  %v43_v36 = vsub.s32 1, %v38_v35  ;;  %v35_v37 = vld [vmem:[%s654_s2] sm:$0x3]  ;;  %v39_v48 = vsub.s32 0, %v38_v35  ;;  %v423_v6 = vld [vmem:[%s654_s2 + $0x2] sm:$0x3] }
   0xd   :  { %312 = vmatpush1.bf16.msra.mxu1 %v482_v21 }
   0xe   :  { %313 = vmatprep.subr.bf16.mxu1 %v483_v22  ;;  %v44_v38 = vrot.slane %v35_v37, %v43_v36  ;;  %v40_v52 = vrot.slane %v35_v37, %v39_v48  ;;  %v226_v7 = vrot.slane %v423_v6, %v43_v36  ;;  %v222_v20 = vrot.slane %v423_v6, %v39_v48 }
   0xf   :  { %140 = vmatpush1.bf16.msra.mxu0 %v463_v8 }
  0x10   :  { %141 = vmatprep.subr.bf16.mxu0 %v464_v9 }
  0x11   :  { %314 = vmatpush1.bf16.msra.mxu1 %v485_v23 }
  0x12   :  { %315 = vmatprep.subr.bf16.mxu1 %v486_v24 }
  0x13   :  { %142 = vmatpush1.bf16.msra.mxu0 %v466_v10 }
  0x14   :  { %143 = vmatprep.subr.bf16.mxu0 %v467_v11 }
  0x15   :  { %316 = vmatpush1.bf16.msra.mxu1 %v488_v25 }
  0x16   :  { %317 = vmatprep.subr.bf16.mxu1 %v489_v26 }
  0x17   :  { %144 = vmatpush1.bf16.msra.mxu0 %v469_v12 }
  0x18   :  { %145 = vmatprep.subr.bf16.mxu0 %v470_v13 }
  0x19   :  { %318 = vmatpush1.bf16.msra.mxu1 %v491_v27 }
  0x1a   :  { %319 = vmatprep.subr.bf16.mxu1 %v492_v28 }
  0x1b   :  { %146 = vmatpush1.bf16.msra.mxu0 %v472_v14 }
  0x1c   :  { %147 = vmatprep.subr.bf16.mxu0 %v473_v15 }
  0x1d   :  { %320 = vmatpush1.bf16.msra.mxu1 %v494_v29 }
  0x1e   :  { %321 = vmatprep.subr.bf16.mxu1 %v495_v30 }
  0x1f   :  { %148 = vmatpush1.bf16.msra.mxu0 %v475_v16 }
  0x21   :  { %322 = vmatpush1.bf16.msra.mxu1 %v497_v31 }
  0x22   :  { %166 = vmatmul.mubr.bf16.vlgmr.msra.gmra.mrb[0].mxu0 %v590_v17  ;;  %323 = vmatprep.subr.bf16.mxu1 %v498_v32 }
  0x25   :  { %324 = vmatpush1.bf16.msra.mxu1 %v500_v33 }
  0xf5   :  { %v167_v39 = vpop.f32.mrb[0].mxu0 }
  0xf6   :  { %v169_v40 = vpop.f32.mrb[1].mxu0  ;;  %v168_v53 = vadd.f32 %v167_v39, %v40_v52 }
  0xf7   :  { %v170_v41 = vadd.f32 %v169_v40, %v44_v38  ;;  %v171_v42 = vpop.f32.mrb[2].mxu0 }
  0xf8   :  { %v173_v43 = vpop.f32.mrb[3].mxu0  ;;  %v172_v54 = vadd.f32 %v171_v42, %v40_v52  ;;  %v188_v56 = vmax.f32 %v168_v53, 0.0 }
  0xf9   :  { %v405_v44 = vmul.f32 -1.442695, %v170_v41  ;;  %v174_v45 = vadd.f32 %v173_v43, %v44_v38 }
  0xfa   :  { %v189_v59 = vmax.f32 %v172_v54, 0.0 }
  0xfb   :  { %502 = vpow2.f32 %v405_v44  ;;  %v406_v46 = vmul.f32 -1.442695, %v174_v45 }
  0xfd   :  { %504 = vpow2.f32 %v406_v46 }
 0x105   :  { %v503_v47 = vpop.eup %502 }
 0x106   :  { %v182_v49 = vadd.f32 1.0, %v503_v47 }
 0x107   :  { %v505_v50 = vpop.eup %504 }
 0x108   :  { %506 = vrcp.f32 %v182_v49  ;;  %v183_v51 = vadd.f32 1.0, %v505_v50 }
 0x10a   :  { %508 = vrcp.f32 %v183_v51 }
 0x112   :  { %v507_v57 = vpop.eup %506 }
 0x113   :  { %v190_v60 = vmul.f32 %v507_v57, %v188_v56  ;;  %v192_v61 = vsub.f32 1.0, %v507_v57 }
 0x114   :  { %v509_v62 = vpop.eup %508 }
 0x115   :  { %v191_v63 = vmul.f32 %v509_v62, %v189_v59  ;;  %v193_v0 = vsub.f32 1.0, %v509_v62  ;;  %v194_v1 = vmul.f32 %v192_v61, %v17_v55 }
 0x117   :  { %v195_v2 = vmul.f32 %v193_v0, %v18_v58  ;;  %v196_v3 = vadd.f32 %v194_v1, %v190_v60 }
 0x119   :  { %v197_v4 = vadd.f32 %v195_v2, %v191_v63 }
 0x11b   :  { %v198_v5 = vpack.c.bf16 %v197_v4, %v196_v3 }
 0x11d   :  { %342 = vmatmul.mubr.bf16.vlgmr.msra.gmra.mrb[0].mxu1 %v198_v5 }
 0x1f0   :  { %v343_v8 = vpop.f32.mrb[0].mxu1 }
 0x1f1   :  { %v345_v9 = vpop.f32.mrb[1].mxu1  ;;  %v344_v21 = vadd.f32 %v343_v8, %v222_v20 }
 0x1f2   :  { %v346_v10 = vadd.f32 %v345_v9, %v226_v7  ;;  %v347_v11 = vpop.f32.mrb[2].mxu1 }
 0x1f3   :  { %v349_v12 = vpop.f32.mrb[3].mxu1  ;;  %v348_v22 = vadd.f32 %v347_v11, %v222_v20  ;;  %v364_v23 = vmax.f32 %v344_v21, 0.0 }
 0x1f4   :  { %v440_v13 = vmul.f32 -1.442695, %v346_v10  ;;  %v350_v14 = vadd.f32 %v349_v12, %v226_v7 }
 0x1f5   :  { %v365_v27 = vmax.f32 %v348_v22, 0.0 }
 0x1f6   :  { %510 = vpow2.f32 %v440_v13  ;;  %v441_v15 = vmul.f32 -1.442695, %v350_v14 }
 0x1f8   :  { %512 = vpow2.f32 %v441_v15 }
 0x200   :  { %v511_v16 = vpop.eup %510 }
 0x201   :  { %v358_v17 = vadd.f32 1.0, %v511_v16 }
 0x202   :  { %v513_v18 = vpop.eup %512 }
 0x203   :  { %514 = vrcp.f32 %v358_v17  ;;  %v359_v19 = vadd.f32 1.0, %v513_v18 }
 0x205   :  { %516 = vrcp.f32 %v359_v19 }
 0x20d   :  { %v515_v24 = vpop.eup %514 }
 0x20e   :  { %v366_v25 = vmul.f32 %v515_v24, %v364_v23  ;;  %v368_v26 = vsub.f32 1.0, %v515_v24 }
 0x20f   :  { %v517_v28 = vpop.eup %516 }
 0x210   :  { %v370_v29 = vmul.f32 %v368_v26, %v196_v3  ;;  %v367_v30 = vmul.f32 %v517_v28, %v365_v27  ;;  %v369_v31 = vsub.f32 1.0, %v517_v28 }
 0x212   :  { %v372_v32 = vadd.f32 %v370_v29, %v366_v25  ;;  %v371_v33 = vmul.f32 %v369_v31, %v197_v4 }
 0x214   :  { %v373_v34 = vadd.f32 %v371_v33, %v367_v30 }
 0x216   :  { %v449_v35 = vpack.c.bf16 %v373_v34, %v372_v32 }
 0x218   :  { %450 = vst [vmem:[%s655_s3] sm:$0xff] %v449_v35  }

// kernel: _lambda_.41
= control target key start
LH: loop header
LB: loop body
LE: loop exit
PB: predicated region body
PF: predicated region fallthrough
CT: control target
= control target key end

     0   :  { %s914_s15 = smov 0   ;;  %s916_s16 = smov 0   ;;  %s1018_s0 = inlined_call_operand.vmem [shape: bf16[16,128], index: 0, kind: input, shape index: {}]   ;;  %s1019_s1 = inlined_call_operand.vmem [shape: bf16[128,768], index: 1, kind: input, shape index: {}]   ;;  %s1020_s2 = inlined_call_operand.vmem [shape: f32[1,768], index: 2, kind: input, shape index: {}]   ;;  %s1021_s3 = inlined_call_operand.vmem [shape: f32[1,768], index: 3, kind: input, shape index: {}]   ;;  %s1022_s4 = inlined_call_operand.vmem [shape: f32[16,768], index: 4, kind: output, shape index: {}]  }
   0x1   :  { %s918_s17 = smov 0   ;;  %s920_s18 = smov 0  }
   0x2   :  { %s922_s19 = smov 0  }
   0x3 LB: > { %s29_s20 = sadd.s32 1, %s882_s18  ;;  %s745_s21 = sadd.s32 4294967295, %s886_s19   ;;  %s886_s19 = sphi %s922_s19, %s14_s19   ;;  %s882_s18 = sphi %s920_s18, %s1027_s18   ;;  %s878_s17 = sphi %s918_s17, %s1026_s17   ;;  %s874_s16 = sphi %s916_s16, %s1025_s16   ;;  %s870_s15 = sphi %s914_s15, %s1024_s15  }
   0x4   : > { %p31_p0 = scmp.ge.s32.totalorder %s29_s20, 3  ;;  %p77_p1 = scmp.ne.s32.totalorder %s874_s16, %s870_s15 }
   0x5   : > { %p78_p2 = scmp.eq.s32.totalorder %s886_s19, 0  ;;  %p161_p4 = scmp.eq.s32.totalorder %s745_s21, 2 }
   0x6   : > { %s1029_s20 = smov (%p31_p0, %s29_s20), 0  ;;  %s70_s23 = sadd.s32 1, %s874_s16 }
   0x7   : > { %p79_p3 = por %p78_p2, %p77_p1  ;;  %s66_s22 = ssub.s32 %s882_s18, %s1029_s20 }
   0x8   : > { %p68_p5 = scmp.eq.s32.totalorder %s66_s22, 0  ;;  %p949_p6 = por %p161_p4, %p77_p1 }
   0x9   : > { %p749_p7 = scmp.ge.s32.totalorder %s886_s19, 3 }
   0xa   : > { %s954_s25 = scalar_select %p68_p5, %s874_s16, %s70_s23  }
   0xb   : > { %195 = sbr.rel (%p749_p7) target bundleno = 30 (0x1e), region = 20 }
  0x12   : > { %198 = sbr.rel (!%p79_p3) target bundleno = 30 (0x1e), region = 24  ;;  %s200_s26 = sand.u32 (%p79_p3), 1, %s874_s16  }
  0x13   : > { %s780_s27 = sshll.u32 (%p79_p3), %s882_s18, 3  ;;  %s750_s28 = sshll.u32 (%p79_p3), %s200_s26, 7 }
  0x14   : > { %s962_s5 = scalar_lea.vmem (%p79_p3), %s1019_s1, %s780_s27  ;;  %s202_s6 = scalar_lea.vmem (%p79_p3), [#allocation3], %s750_s28 }
  0x15   : > { %v266_v0 = vld [vmem:[%s962_s5] sm:$0xff] (%p79_p3)  ;;  %v268_v1 = vld [vmem:[%s962_s5 + $0x18] sm:$0xff] (%p79_p3)  ;;  %v270_v2 = vld [vmem:[%s962_s5 + $0x30] sm:$0xff] (%p79_p3) }
  0x16   : > { %267 = vst [vmem:[%s202_s6] sm:$0xff] (%p79_p3), %v266_v0  ;;  %269 = vst [vmem:[%s202_s6 + $0x8] sm:$0xff] (%p79_p3), %v268_v1  ;;  %v272_v3 = vld [vmem:[%s962_s5 + $0x48] sm:$0xff] (%p79_p3)  ;;  %v274_v4 = vld [vmem:[%s962_s5 + $0x60] sm:$0xff] (%p79_p3) }
  0x17   : > { %271 = vst [vmem:[%s202_s6 + $0x10] sm:$0xff] (%p79_p3), %v270_v2  ;;  %v276_v5 = vld [vmem:[%s962_s5 + $0x78] sm:$0xff] (%p79_p3)  ;;  %273 = vst [vmem:[%s202_s6 + $0x18] sm:$0xff] (%p79_p3), %v272_v3  ;;  %v278_v6 = vld [vmem:[%s962_s5 + $0x90] sm:$0xff] (%p79_p3) }
  0x18   : > { %275 = vst [vmem:[%s202_s6 + $0x20] sm:$0xff] (%p79_p3), %v274_v4  ;;  %277 = vst [vmem:[%s202_s6 + $0x28] sm:$0xff] (%p79_p3), %v276_v5  ;;  %v280_v7 = vld [vmem:[%s962_s5 + $0xa8] sm:$0xff] (%p79_p3)  ;;  %v282_v8 = vld [vmem:[%s962_s5 + $0xc0] sm:$0xff] (%p79_p3) }
  0x19   : > { %279 = vst [vmem:[%s202_s6 + $0x30] sm:$0xff] %v278_v6  ;;  %281 = vst [vmem:[%s202_s6 + $0x38] sm:$0xff] %v280_v7  ;;  %v284_v9 = vld [vmem:[%s962_s5 + $0xd8] sm:$0xff]  ;;  %v286_v10 = vld [vmem:[%s962_s5 + $0xf0] sm:$0xff] }
  0x1a   : > { %283 = vst [vmem:[%s202_s6 + $0x40] sm:$0xff] %v282_v8  ;;  %v288_v11 = vld [vmem:[%s962_s5 + $0x108] sm:$0xff]  ;;  %285 = vst [vmem:[%s202_s6 + $0x48] sm:$0xff] %v284_v9  ;;  %v290_v12 = vld [vmem:[%s962_s5 + $0x120] sm:$0xff] }
  0x1b   : > { %287 = vst [vmem:[%s202_s6 + $0x50] sm:$0xff] %v286_v10  ;;  %289 = vst [vmem:[%s202_s6 + $0x58] sm:$0xff] %v288_v11  ;;  %v292_v13 = vld [vmem:[%s962_s5 + $0x138] sm:$0xff]  ;;  %v294_v14 = vld [vmem:[%s962_s5 + $0x150] sm:$0xff] }
  0x1c   : > { %291 = vst [vmem:[%s202_s6 + $0x60] sm:$0xff] %v290_v12  ;;  %293 = vst [vmem:[%s202_s6 + $0x68] sm:$0xff] %v292_v13  ;;  %v296_v15 = vld [vmem:[%s962_s5 + $0x168] sm:$0xff] }
  0x1d   : > { %295 = vst [vmem:[%s202_s6 + $0x70] sm:$0xff] %v294_v14  ;;  %297 = vst [vmem:[%s202_s6 + $0x78] sm:$0xff] %v296_v15 }
  0x1e PF: > { %p753_p8 = scmp.ge.s32.totalorder %s886_s19, 1  ;;  %p318_p9 = scmp.lt.s32.totalorder %s886_s19, 4 }
  0x20   : > { %p319_p10 = pnand %p753_p8, %p318_p9 }
  0x21   : > { %s325_s7 = sand.u32 (!%p319_p10), 1, %s870_s15   ;;  %v888_v16 = vmov (!%p319_p10), 0   ;;  %v847_v33 = vld [vmem:[%s1018_s0] sm:$0xff] (!%p319_p10)   ;;  %s756_s12 = sshll.u32 (!%p319_p10), %s878_s17, 1  ;;  %v565_v34 = vlaneseq (!%p319_p10) }
  0x22   : > { %322 = sbr.rel (%p319_p10) target bundleno = 297 (0x129), region = 70  ;;  %s754_s8 = sshll.u32 (!%p319_p10), %s325_s7, 7  ;;  %537 = vmatprep.mubr.bf16.mxu0 (!%p319_p10), %v888_v16 }
  0x23   : > { %s327_s9 = scalar_lea.vmem (!%p319_p10), [#allocation3], %s754_s8  ;;  %p377_p11 = scmp.lt.s32.totalorder (!%p319_p10), %s756_s12, 5  ;;  %v566_v35 = vshrl.u32 (!%p319_p10), %v565_v34, 7 }
  0x24   : > { %v823_v17 = vld [vmem:[%s327_s9 + $0x4] ss:$8 sps:$4 sm:$0xff] (!%p319_p10)   ;;  %v825_v18 = vld [vmem:[%s327_s9] ss:$8 sps:$4 sm:$0xff] (!%p319_p10)   ;;  %v826_v19 = vld [vmem:[%s327_s9 + $0x14] ss:$8 sps:$4 sm:$0xff] (!%p319_p10)  }
  0x25   : > { %505 = vmatprep.subr.bf16.mxu0 (!%p319_p10), %v823_v17  ;;  %v828_v20 = vld [vmem:[%s327_s9 + $0x10] ss:$8 sps:$4 sm:$0xff] (!%p319_p10)   ;;  %v829_v21 = vld [vmem:[%s327_s9 + $0x24] ss:$8 sps:$4 sm:$0xff] (!%p319_p10)   ;;  %v831_v22 = vld [vmem:[%s327_s9 + $0x20] ss:$8 sps:$4 sm:$0xff] (!%p319_p10)  }
  0x26   : > { %506 = vmatpush1.bf16.msra.mxu0 (!%p319_p10), %v825_v18  ;;  %v832_v23 = vld [vmem:[%s327_s9 + $0x34] ss:$8 sps:$4 sm:$0xff] (!%p319_p10)   ;;  %v834_v24 = vld [vmem:[%s327_s9 + $0x30] ss:$8 sps:$4 sm:$0xff] (!%p319_p10)   ;;  %v835_v25 = vld [vmem:[%s327_s9 + $0x44] ss:$8 sps:$4 sm:$0xff] (!%p319_p10)  }
  0x27   : > { %507 = vmatprep.subr.bf16.mxu0 (!%p319_p10), %v826_v19  ;;  %v837_v26 = vld [vmem:[%s327_s9 + $0x40] ss:$8 sps:$4 sm:$0xff] (!%p319_p10)   ;;  %v838_v27 = vld [vmem:[%s327_s9 + $0x54] ss:$8 sps:$4 sm:$0xff] (!%p319_p10)   ;;  %v840_v28 = vld [vmem:[%s327_s9 + $0x50] ss:$8 sps:$4 sm:$0xff] (!%p319_p10)  }
  0x28   : > { %v841_v29 = vld [vmem:[%s327_s9 + $0x64] ss:$8 sps:$4 sm:$0xff] (!%p319_p10)   ;;  %v843_v30 = vld [vmem:[%s327_s9 + $0x60] ss:$8 sps:$4 sm:$0xff] (!%p319_p10)   ;;  %v844_v31 = vld [vmem:[%s327_s9 + $0x74] ss:$8 sps:$4 sm:$0xff] (!%p319_p10)  }
  0x29   : > { %v846_v32 = vld [vmem:[%s327_s9 + $0x70] ss:$8 sps:$4 sm:$0xff]   ;;  %s1031_s12 = smov (!%p377_p11, %s756_s12), 5  ;;  %v567_v36 = vsub.s32 0, %v566_v35  ;;  %v571_v38 = vsub.s32 1, %v566_v35  ;;  %s755_s27 = sshll.u32 %s325_s7, 5 }
  0x2a   : > { %508 = vmatpush1.bf16.msra.mxu0 %v828_v20  ;;  %s379_s21 = scalar_lea.vmem %s1020_s2, %s1031_s12  ;;  %s384_s26 = scalar_lea.vmem %s1021_s3, %s1031_s12 }
  0x2b   : > { %509 = vmatprep.subr.bf16.mxu0 %v829_v21  ;;  %v563_v37 = vld [vmem:[%s379_s21] sm:$0x3]  ;;  %s364_s28 = scalar_lea.vmem [#allocation4], %s755_s27  ;;  %s781_s15 = sshll.u32 (%p949_p6), %s878_s17, 4 }
  0x2c   : > { %v579_v39 = vld [vmem:[%s384_s26] sm:$0x3]  ;;  %v568_v40 = vrot.slane %v563_v37, %v567_v36  ;;  %v572_v41 = vrot.slane %v563_v37, %v571_v38  ;;  %s611_s5 = scalar_lea.vmem (%p949_p6), %s1022_s4, %s781_s15 }
  0x2d   : > { %v584_v42 = vrot.slane %v579_v39, %v567_v36  ;;  %v588_v44 = vrot.slane %v579_v39, %v571_v38 }
  0x2e   : > { %510 = vmatpush1.bf16.msra.mxu0 %v831_v22 }
  0x2f   : > { %511 = vmatprep.subr.bf16.mxu0 %v832_v23 }
  0x32   : > { %512 = vmatpush1.bf16.msra.mxu0 %v834_v24 }
  0x33   : > { %513 = vmatprep.subr.bf16.mxu0 %v835_v25 }
  0x36   : > { %514 = vmatpush1.bf16.msra.mxu0 %v837_v26 }
  0x37   : > { %515 = vmatprep.subr.bf16.mxu0 %v838_v27 }
  0x3a   : > { %516 = vmatpush1.bf16.msra.mxu0 %v840_v28 }
  0x3b   : > { %517 = vmatprep.subr.bf16.mxu0 %v841_v29 }
  0x3e   : > { %518 = vmatpush1.bf16.msra.mxu0 %v843_v30 }
  0x3f   : > { %519 = vmatprep.subr.bf16.mxu0 %v844_v31 }
  0x42   : > { %520 = vmatpush1.bf16.msra.mxu0 %v846_v32 }
  0x45   : > { %538 = vmatmul.mubr.bf16.vlgmr.msra.gmra.mrb[0].mxu0 %v847_v33 }
 0x118   : > { %v539_v43 = vpop.f32.mrb[0].mxu0 }
 0x119   : > { %v575_v45 = vmul.f32 %v568_v40, %v539_v43  ;;  %v541_v46 = vpop.f32.mrb[1].mxu0 }
 0x11a   : > { %v576_v47 = vmul.f32 %v572_v41, %v541_v46  ;;  %v543_v48 = vpop.f32.mrb[2].mxu0  ;;  %605 = sbr.rel (!%p949_p6) target bundleno = 297 (0x129), region = 86 }
 0x11b   : > { %v591_v49 = vadd.f32 %v584_v42, %v575_v45  ;;  %v577_v50 = vmul.f32 %v568_v40, %v543_v48  ;;  %v545_v51 = vpop.f32.mrb[3].mxu0 }
 0x11c   : > { %v592_v52 = vadd.f32 %v588_v44, %v576_v47  ;;  %v578_v53 = vmul.f32 %v572_v41, %v545_v51 }
 0x11d   : > { %595 = vst [vmem:[%s364_s28] sm:$0xff] %v591_v49  ;;  %v593_v54 = vadd.f32 %v584_v42, %v577_v50 }
 0x11e   : > { %596 = vst [vmem:[%s364_s28 + $0x8] sm:$0xff] %v592_v52  ;;  %v594_v55 = vadd.f32 %v588_v44, %v578_v53 }
 0x11f   : > { %597 = vst [vmem:[%s364_s28 + $0x10] sm:$0xff] %v593_v54 }
 0x120   : > { %598 = vst [vmem:[%s364_s28 + $0x18] sm:$0xff] %v594_v55 }
 0x124   : > { %v624_v56 = vld [vmem:[%s364_s28] sm:$0xff] }
 0x125   : > { %v626_v57 = vld [vmem:[%s364_s28 + $0x8] sm:$0xff]  ;;  %625 = vst [vmem:[%s611_s5] sm:$0xff] %v624_v56 }
 0x126   : > { %v628_v58 = vld [vmem:[%s364_s28 + $0x10] sm:$0xff]  ;;  %627 = vst [vmem:[%s611_s5 + $0x8] sm:$0xff] %v626_v57 }
 0x127   : > { %v630_v59 = vld [vmem:[%s364_s28 + $0x18] sm:$0xff]  ;;  %629 = vst [vmem:[%s611_s5 + $0x30] sm:$0xff] %v628_v58 }
 0x128   : > { %631 = vst [vmem:[%s611_s5 + $0x38] sm:$0xff] %v630_v59 }
 0x129 PF: > { %s14_s19 = sadd.s32 1, %s886_s19   ;;  %s1024_s15 = smov %s874_s16 }
 0x12a   : > { %p11_p12 = scmp.ge.s32.totalorder %s14_s19, 5   ;;  %s1025_s16 = smov %s954_s25 }
 0x12b   : > { %s1026_s17 = smov %s882_s18  ;;  %s1027_s18 = smov %s1029_s20 }
 0x12c   :  { %13 = sbr.rel (!%p11_p12) target bundleno = 3 (0x3), region = 149 }

// kernel: _lambda_.42
= control target key start
LH: loop header
LB: loop body
LE: loop exit
PB: predicated region body
PF: predicated region fallthrough
CT: control target
= control target key end

     0   :  { %v880_v0 = vmov 0.0   ;;  %s904_s12 = smov 0   ;;  %s1113_s0 = inlined_call_operand.vmem [shape: f32[8,2,8,384], index: 0, kind: input, shape index: {}]   ;;  %s1114_s1 = inlined_call_operand.vmem [shape: bf16[2,128,384], index: 1, kind: input, shape index: {}]   ;;  %s1115_s2 = inlined_call_operand.vmem [shape: f32[2,1,384], index: 2, kind: input, shape index: {}]   ;;  %s1116_s3 = inlined_call_operand.vmem [shape: bf16[8,2,8,128], index: 3, kind: output, shape index: {}]  }
   0x1   :  { %19 = vst [vmem:[#allocation2] sm:$0xff] %v880_v0  ;;  %20 = vst [vmem:[#allocation2 + $0x8] sm:$0xff] %v880_v0 }
   0x2 LB: > { %v788_v1 = vld [vmem:[%s1114_s1 + $0x4] ss:$12 sps:$4 sm:$0xff]   ;;  %v790_v2 = vld [vmem:[%s1114_s1] ss:$12 sps:$4 sm:$0xff]   ;;  %v881_v3 = vmov 0.0   ;;  %v882_v4 = vmov 0   ;;  %v72_v55 = vlaneseq  ;;  %s878_s12 = sphi %s904_s12, %s26_s12  }
   0x3   : > { %736 = vmatprep.subr.bf16.mxu1 %v881_v3  ;;  %247 = vmatprep.mubr.bf16.mxu0 %v882_v4  ;;  %v791_v5 = vld [vmem:[%s1114_s1 + $0x1c] ss:$12 sps:$4 sm:$0xff]   ;;  %vm883_vm0 = vmmov 0   ;;  %v793_v6 = vld [vmem:[%s1114_s1 + $0x18] ss:$12 sps:$4 sm:$0xff]   ;;  %s711_s4 = smul.u32 48, %s878_s12 }
   0x4   : > { %215 = vmatprep.subr.bf16.mxu0 %v788_v1  ;;  %752 = vmatprep.mubr.msk.bf16.mxu1 %vm883_vm0, %v881_v3  ;;  %v794_v7 = vld [vmem:[%s1114_s1 + $0x34] ss:$12 sps:$4 sm:$0xff]   ;;  %v796_v8 = vld [vmem:[%s1114_s1 + $0x30] ss:$12 sps:$4 sm:$0xff]   ;;  %v797_v9 = vld [vmem:[%s1114_s1 + $0x4c] ss:$12 sps:$4 sm:$0xff]  }
   0x5   : > { %216 = vmatpush1.bf16.msra.mxu0 %v790_v2  ;;  %v809_v10 = vld [vmem:[%s1114_s1 + $0x8] ss:$12 sps:$4 sm:$0xff]   ;;  %v800_v12 = vld [vmem:[%s1114_s1 + $0x64] ss:$12 sps:$4 sm:$0xff]   ;;  %v813_v13 = vld [vmem:[%s1114_s1 + $0x20] ss:$12 sps:$4 sm:$0xff]   ;;  %s1092_s9 = scalar_lea.vmem %s1113_s0, %s711_s4 }
   0x6   : > { %217 = vmatprep.subr.bf16.mxu0 %v791_v5  ;;  %v799_v11 = vld [vmem:[%s1114_s1 + $0x48] ss:$12 sps:$4 sm:$0xff]   ;;  %737 = vmatpush3.bf16.msra.mxu1 %v809_v10  ;;  %v802_v14 = vld [vmem:[%s1114_s1 + $0x60] ss:$12 sps:$4 sm:$0xff]   ;;  %v817_v16 = vld [vmem:[%s1114_s1 + $0x38] ss:$12 sps:$4 sm:$0xff]  }
   0x7   : > { %738 = vmatprep.subr.bf16.mxu1 %v881_v3  ;;  %v803_v15 = vld [vmem:[%s1114_s1 + $0x7c] ss:$12 sps:$4 sm:$0xff]   ;;  %v805_v17 = vld [vmem:[%s1114_s1 + $0x78] ss:$12 sps:$4 sm:$0xff]   ;;  %v806_v18 = vld [vmem:[%s1114_s1 + $0x94] ss:$12 sps:$4 sm:$0xff]  }
   0x8   : > { %v821_v19 = vld [vmem:[%s1114_s1 + $0x50] ss:$12 sps:$4 sm:$0xff]   ;;  %v810_v21 = vld [vmem:[%s1114_s1 + $0xac] ss:$12 sps:$4 sm:$0xff]   ;;  %v825_v22 = vld [vmem:[%s1114_s1 + $0x68] ss:$12 sps:$4 sm:$0xff]  }
   0x9   : > { %218 = vmatpush1.bf16.msra.mxu0 %v793_v6  ;;  %v808_v20 = vld [vmem:[%s1114_s1 + $0x90] ss:$12 sps:$4 sm:$0xff]   ;;  %v812_v23 = vld [vmem:[%s1114_s1 + $0xa8] ss:$12 sps:$4 sm:$0xff]   ;;  %v979_v24 = vld [vmem:[#allocation2] sm:$0xff]  ;;  %v1081_v56 = vshrl.u32 %v72_v55, 7 }
   0xa   : > { %219 = vmatprep.subr.bf16.mxu0 %v794_v7  ;;  %739 = vmatpush3.bf16.msra.mxu1 %v813_v13  ;;  %v816_v25 = vld [vmem:[%s1114_s1 + $0xc4] ss:$12 sps:$4 sm:$0xff]   ;;  %v829_v26 = vld [vmem:[%s1114_s1 + $0x80] ss:$12 sps:$4 sm:$0xff]   ;;  %v37_v27 = vpack.c.bf16 %v979_v24, %v979_v24  ;;  %v820_v29 = vld [vmem:[%s1114_s1 + $0xdc] ss:$12 sps:$4 sm:$0xff]  }
   0xb   : > { %740 = vmatprep.subr.bf16.mxu1 %v881_v3  ;;  %v814_v28 = vld [vmem:[%s1114_s1 + $0xc0] ss:$12 sps:$4 sm:$0xff]   ;;  %v833_v30 = vld [vmem:[%s1114_s1 + $0x98] ss:$12 sps:$4 sm:$0xff]   ;;  %v837_v33 = vld [vmem:[%s1114_s1 + $0xb0] ss:$12 sps:$4 sm:$0xff]  }
   0xc   : > { %v818_v31 = vld [vmem:[%s1114_s1 + $0xd8] ss:$12 sps:$4 sm:$0xff]   ;;  %v824_v32 = vld [vmem:[%s1114_s1 + $0xf4] ss:$12 sps:$4 sm:$0xff]   ;;  %v822_v34 = vld [vmem:[%s1114_s1 + $0xf0] ss:$12 sps:$4 sm:$0xff]  }
   0xd   : > { %220 = vmatpush1.bf16.msra.mxu0 %v796_v8  ;;  %v828_v35 = vld [vmem:[%s1114_s1 + $0x10c] ss:$12 sps:$4 sm:$0xff]   ;;  %v841_v36 = vld [vmem:[%s1114_s1 + $0xc8] ss:$12 sps:$4 sm:$0xff]   ;;  %v832_v38 = vld [vmem:[%s1114_s1 + $0x124] ss:$12 sps:$4 sm:$0xff]  }
   0xe   : > { %221 = vmatprep.subr.bf16.mxu0 %v797_v9  ;;  %741 = vmatpush3.bf16.msra.mxu1 %v817_v16  ;;  %v826_v37 = vld [vmem:[%s1114_s1 + $0x108] ss:$12 sps:$4 sm:$0xff]   ;;  %v845_v39 = vld [vmem:[%s1114_s1 + $0xe0] ss:$12 sps:$4 sm:$0xff]   ;;  %v846_v42 = vld [vmem:[%s1114_s1 + $0xf8] ss:$12 sps:$4 sm:$0xff]  }
   0xf   : > { %742 = vmatprep.subr.bf16.mxu1 %v881_v3  ;;  %v830_v40 = vld [vmem:[%s1114_s1 + $0x120] ss:$12 sps:$4 sm:$0xff]   ;;  %v836_v41 = vld [vmem:[%s1114_s1 + $0x13c] ss:$12 sps:$4 sm:$0xff]   ;;  %v834_v43 = vld [vmem:[%s1114_s1 + $0x138] ss:$12 sps:$4 sm:$0xff]  }
  0x10   : > { %v840_v44 = vld [vmem:[%s1114_s1 + $0x154] ss:$12 sps:$4 sm:$0xff]   ;;  %v847_v45 = vld [vmem:[%s1114_s1 + $0x110] ss:$12 sps:$4 sm:$0xff]   ;;  %v844_v47 = vld [vmem:[%s1114_s1 + $0x16c] ss:$12 sps:$4 sm:$0xff]  }
  0x11   : > { %222 = vmatpush1.bf16.msra.mxu0 %v799_v11  ;;  %v838_v46 = vld [vmem:[%s1114_s1 + $0x150] ss:$12 sps:$4 sm:$0xff]   ;;  %v848_v48 = vld [vmem:[%s1114_s1 + $0x128] ss:$12 sps:$4 sm:$0xff]   ;;  %v849_v51 = vld [vmem:[%s1114_s1 + $0x140] ss:$12 sps:$4 sm:$0xff]  }
  0x12   : > { %223 = vmatprep.subr.bf16.mxu0 %v800_v12  ;;  %743 = vmatpush3.bf16.msra.mxu1 %v821_v19  ;;  %v842_v49 = vld [vmem:[%s1114_s1 + $0x168] ss:$12 sps:$4 sm:$0xff]   ;;  %v850_v53 = vld [vmem:[%s1114_s1 + $0x158] ss:$12 sps:$4 sm:$0xff]   ;;  %v851_v54 = vld [vmem:[%s1114_s1 + $0x170] ss:$12 sps:$4 sm:$0xff]  }
  0x13   : > { %744 = vmatprep.subr.bf16.mxu1 %v881_v3  ;;  %v1065_v50 = vld [vmem:[#allocation2 + $0x8] sm:$0xff]  ;;  %v74_v57 = vsub.s32 0, %v1081_v56  ;;  %v70_v58 = vld [vmem:[%s1115_s2] sm:$0x7]  ;;  %v78_v59 = vsub.s32 1, %v1081_v56  ;;  %v82_v16 = vsub.s32 2, %v1081_v56 }
  0x14   : > { %v320_v52 = vpack.c.bf16 %v1065_v50, %v1065_v50  ;;  %v30_v62 = vld [vmem:[%s1092_s9] sm:$0xff]  ;;  %v31_v5 = vld [vmem:[%s1092_s9 + $0x8] sm:$0xff]  ;;  %s712_s13 = sshll.u32 %s878_s12, 3  ;;  %s26_s12 = sadd.s32 1, %s878_s12  }
  0x15   : > { %224 = vmatpush1.bf16.msra.mxu0 %v802_v14  ;;  %v75_v60 = vrot.slane %v70_v58, %v74_v57  ;;  %v79_v61 = vrot.slane %v70_v58, %v78_v59  ;;  %v682_v19 = vld [vmem:[%s1115_s2 + $0x3] sm:$0x7]  ;;  %s607_s16 = scalar_lea.vmem %s1116_s3, %s712_s13  ;;  %p23_p0 = scmp.ge.s32.totalorder %s26_s12, 8  }
  0x16   : > { %225 = vmatprep.subr.bf16.mxu0 %v803_v15  ;;  %745 = vmatpush3.bf16.msra.mxu1 %v825_v22  ;;  %v360_v22 = vrot.slane %v682_v19, %v74_v57 }
  0x17   : > { %746 = vmatprep.subr.bf16.mxu1 %v881_v3 }
  0x19   : > { %226 = vmatpush1.bf16.msra.mxu0 %v805_v17  ;;  %v83_v17 = vrot.slane %v70_v58, %v82_v16 }
  0x1a   : > { %227 = vmatprep.subr.bf16.mxu0 %v806_v18  ;;  %747 = vmatpush3.bf16.msra.mxu1 %v829_v26  ;;  %v364_v26 = vrot.slane %v682_v19, %v78_v59  ;;  %v35_v59 = vld [vmem:[%s1092_s9 + $0x28] sm:$0xff] }
  0x1b   : > { %748 = vmatprep.subr.bf16.mxu1 %v881_v3 }
  0x1d   : > { %228 = vmatpush1.bf16.msra.mxu0 %v808_v20 }
  0x1e   : > { %229 = vmatprep.subr.bf16.mxu0 %v810_v21  ;;  %749 = vmatpush3.bf16.msra.mxu1 %v833_v30 }
  0x1f   : > { %750 = vmatprep.subr.bf16.mxu1 %v881_v3 }
  0x21   : > { %230 = vmatpush1.bf16.msra.mxu0 %v812_v23 }
  0x22   : > { %500 = vmatprep.subr.bf16.mxu0 %v816_v25  ;;  %751 = vmatpush3.bf16.msra.mxu1 %v837_v33  ;;  %v32_v25 = vld [vmem:[%s1092_s9 + $0x10] sm:$0xff] }
  0x23   : > { %756 = vmatprep.subr.bf16.mxu1 %v881_v3 }
  0x24   : > { %248 = vmatmul.mubr.bf16.vlgmr.msra.gmra.mrb[0].mxu0 %v37_v27 }
  0x25   : > { %501 = vmatpush1.bf16.msra.mxu0 %v814_v28  ;;  %532 = vmatprep.mubr.bf16.mxu0 %v882_v4  ;;  %v33_v28 = vld [vmem:[%s1092_s9 + $0x18] sm:$0xff] }
  0x26   : > { %502 = vmatprep.subr.bf16.mxu0 %v820_v29  ;;  %753 = vmatmul.mubr.bf16.vlgmr.msra.gmra.mrb[0].mxu1 %v37_v27 }
  0x27   : > { %757 = vmatpush3.bf16.msra.mxu1 %v841_v36  ;;  %772 = vmatprep.mubr.msk.bf16.mxu1 %vm883_vm0, %v881_v3  ;;  %v34_v36 = vld [vmem:[%s1092_s9 + $0x20] sm:$0xff] }
  0x28   : > { %758 = vmatprep.subr.bf16.mxu1 %v881_v3 }
  0x29   : > { %503 = vmatpush1.bf16.msra.mxu0 %v818_v31 }
  0x2a   : > { %504 = vmatprep.subr.bf16.mxu0 %v824_v32 }
  0x2b   : > { %759 = vmatpush3.bf16.msra.mxu1 %v845_v39 }
  0x2c   : > { %760 = vmatprep.subr.bf16.mxu1 %v881_v3 }
  0x2d   : > { %505 = vmatpush1.bf16.msra.mxu0 %v822_v34 }
  0x2e   : > { %506 = vmatprep.subr.bf16.mxu0 %v828_v35 }
  0x2f   : > { %761 = vmatpush3.bf16.msra.mxu1 %v846_v42 }
  0x30   : > { %762 = vmatprep.subr.bf16.mxu1 %v881_v3 }
  0x31   : > { %507 = vmatpush1.bf16.msra.mxu0 %v826_v37 }
  0x32   : > { %508 = vmatprep.subr.bf16.mxu0 %v832_v38 }
  0x33   : > { %763 = vmatpush3.bf16.msra.mxu1 %v847_v45 }
  0x34   : > { %764 = vmatprep.subr.bf16.mxu1 %v881_v3 }
  0x35   : > { %509 = vmatpush1.bf16.msra.mxu0 %v830_v40 }
  0x36   : > { %510 = vmatprep.subr.bf16.mxu0 %v836_v41 }
  0x37   : > { %765 = vmatpush3.bf16.msra.mxu1 %v848_v48 }
  0x38   : > { %766 = vmatprep.subr.bf16.mxu1 %v881_v3 }
  0x39   : > { %511 = vmatpush1.bf16.msra.mxu0 %v834_v43 }
  0x3a   : > { %512 = vmatprep.subr.bf16.mxu0 %v840_v44 }
  0x3b   : > { %767 = vmatpush3.bf16.msra.mxu1 %v849_v51 }
  0x3c   : > { %768 = vmatprep.subr.bf16.mxu1 %v881_v3 }
  0x3d   : > { %513 = vmatpush1.bf16.msra.mxu0 %v838_v46 }
  0x3e   : > { %514 = vmatprep.subr.bf16.mxu0 %v844_v47 }
  0x3f   : > { %769 = vmatpush3.bf16.msra.mxu1 %v850_v53 }
  0x40   : > { %770 = vmatprep.subr.bf16.mxu1 %v881_v3 }
  0x41   : > { %515 = vmatpush1.bf16.msra.mxu0 %v842_v49 }
  0x43   : > { %771 = vmatpush3.bf16.msra.mxu1 %v851_v54  ;;  %v368_v54 = vrot.slane %v682_v19, %v82_v16 }
  0x44   : > { %533 = vmatmul.mubr.bf16.vlgmr.msra.gmra.mrb[4].mxu0 %v320_v52 }
  0x46   : > { %773 = vmatmul.mubr.bf16.vlgmr.msra.gmra.mrb[4].mxu1 %v320_v52 }
  0xf7   : > { %v249_v63 = vpop.f32.mrb[0].mxu0 }
  0xf8   : > { %v250_v0 = vadd.f32 %v249_v63, %v75_v60  ;;  %v251_v1 = vpop.f32.mrb[1].mxu0 }
  0xf9   : > { %v252_v2 = vadd.f32 %v251_v1, %v79_v61  ;;  %v253_v3 = vpop.f32.mrb[2].mxu0  ;;  %v290_v9 = vpop.f32.mrb[0].mxu1 }
  0xfa   : > { %v296_v4 = vadd.f32 %v250_v0, %v30_v62  ;;  %v254_v6 = vpop.f32.mrb[3].mxu0  ;;  %v754_v11 = vpop.f32.mrb[1].mxu1  ;;  %v291_v21 = vadd.f32 %v290_v9, %v83_v17 }
  0xfb   : > { %v303_v8 = vadd.f32 %v252_v2, %v31_v5  ;;  %v293_v12 = vpop.f32.mrb[2].mxu1 }
  0xfc   : > { %v648_v7 = vmul.f32 -1.442695, %v296_v4  ;;  %v755_v13 = vpop.f32.mrb[3].mxu1 }
  0xfd   : > { %v649_v10 = vmul.f32 -1.442695, %v303_v8 }
  0xfe   : > { %852 = vpow2.f32 %v648_v7 }
  0xff   : > { %854 = vpow2.f32 %v649_v10 }
 0x108   : > { %v853_v14 = vpop.eup %852 }
 0x109   : > { %v300_v15 = vadd.f32 1.0, %v853_v14  ;;  %v855_v18 = vpop.eup %854 }
 0x10a   : > { %v307_v20 = vadd.f32 1.0, %v855_v18 }
 0x10b   : > { %856 = vrcp.f32 %v300_v15 }
 0x10c   : > { %858 = vrcp.f32 %v307_v20 }
 0x115   : > { %v857_v23 = vpop.eup %856 }
 0x116   : > { %v310_v27 = vmul.f32 %v857_v23, %v291_v21  ;;  %v859_v40 = vpop.eup %858 }
 0x117   : > { %v534_v29 = vpop.f32.mrb[4].mxu0  ;;  %v313_v45 = vsub.f32 1.0, %v859_v40  ;;  %v315_v48 = vmul.f32 %v859_v40, %v979_v24 }
 0x118   : > { %v311_v30 = vadd.f32 %v310_v27, %v32_v25  ;;  %v535_v31 = vadd.f32 %v534_v29, %v360_v22  ;;  %v536_v32 = vpop.f32.mrb[5].mxu0 }
 0x119   : > { %v537_v33 = vadd.f32 %v536_v32, %v364_v26  ;;  %v538_v34 = vpop.f32.mrb[6].mxu0  ;;  %v575_v41 = vpop.f32.mrb[4].mxu1 }
 0x11a   : > { %860 = vtanh.f32 %v311_v30  ;;  %v581_v35 = vadd.f32 %v535_v31, %v33_v28  ;;  %v539_v37 = vpop.f32.mrb[7].mxu0  ;;  %v774_v43 = vpop.f32.mrb[5].mxu1  ;;  %v576_v57 = vadd.f32 %v575_v41, %v368_v54 }
 0x11b   : > { %v588_v39 = vadd.f32 %v537_v33, %v34_v36  ;;  %v578_v44 = vpop.f32.mrb[6].mxu1 }
 0x11c   : > { %v707_v38 = vmul.f32 -1.442695, %v581_v35  ;;  %v775_v46 = vpop.f32.mrb[7].mxu1 }
 0x11d   : > { %v708_v42 = vmul.f32 -1.442695, %v588_v39 }
 0x11e   : > { %862 = vpow2.f32 %v707_v38 }
 0x11f   : > { %864 = vpow2.f32 %v708_v42 }
 0x124   : > { %v861_v47 = vpop.eup %860 }
 0x125   : > { %v314_v49 = vmul.f32 %v861_v47, %v313_v45 }
 0x127   : > { %v316_v51 = vadd.f32 %v315_v48, %v314_v49 }
 0x128   : > { %v863_v52 = vpop.eup %862 }
 0x129   : > { %317 = vst [vmem:[#allocation2] sm:$0xff] %v316_v51  ;;  %v585_v53 = vadd.f32 1.0, %v863_v52  ;;  %v865_v55 = vpop.eup %864 }
 0x12a   : > { %v592_v56 = vadd.f32 1.0, %v865_v55 }
 0x12b   : > { %866 = vrcp.f32 %v585_v53 }
 0x12c   : > { %868 = vrcp.f32 %v592_v56 }
 0x135   : > { %v867_v58 = vpop.eup %866 }
 0x136   : > { %v595_v60 = vmul.f32 %v867_v58, %v576_v57  ;;  %v869_v62 = vpop.eup %868 }
 0x137   : > { %v598_v24 = vsub.f32 1.0, %v869_v62  ;;  %v600_v0 = vmul.f32 %v869_v62, %v1065_v50 }
 0x138   : > { %v596_v61 = vadd.f32 %v595_v60, %v35_v59 }
 0x13a   : > { %870 = vtanh.f32 %v596_v61 }
 0x144   : > { %v871_v63 = vpop.eup %870 }
 0x145   : > { %v599_v1 = vmul.f32 %v871_v63, %v598_v24  ;;  %25 = sbr.rel (!%p23_p0) target bundleno = 2 (0x2), region = 48 }
 0x147   : > { %v601_v2 = vadd.f32 %v600_v0, %v599_v1 }
 0x149   : > { %602 = vst [vmem:[#allocation2 + $0x8] sm:$0xff] %v601_v2  ;;  %v716_v3 = vpack.c.bf16 %v601_v2, %v316_v51 }
 0x14b   : > { %717 = vst [vmem:[%s607_s16] sm:$0xff] %v716_v3  }

// kernel: _lambda_.43
= control target key start
LH: loop header
LB: loop body
LE: loop exit
PB: predicated region body
PF: predicated region fallthrough
CT: control target
= control target key end

     0   :  { %s1202_s15 = smov 0   ;;  %s1204_s16 = smov 0   ;;  %s1423_s0 = inlined_call_operand.vmem [shape: bf16[24,128], index: 0, kind: input, shape index: {}]   ;;  %s1424_s1 = inlined_call_operand.vmem [shape: bf16[128,1024], index: 1, kind: input, shape index: {}]   ;;  %s1425_s2 = inlined_call_operand.vmem [shape: f32[1,1024], index: 2, kind: input, shape index: {}]   ;;  %s1426_s3 = inlined_call_operand.vmem [shape: f32[1,1024], index: 3, kind: input, shape index: {}]   ;;  %s1427_s4 = inlined_call_operand.vmem [shape: f32[24,1024], index: 4, kind: output, shape index: {}]  }
   0x1   :  { %s1206_s17 = smov 0   ;;  %s1208_s18 = smov 0  }
   0x2   :  { %s1210_s19 = smov 0  }
   0x3 LB: > { %s29_s20 = sadd.s32 1, %s1170_s18  ;;  %s992_s21 = sadd.s32 4294967295, %s1174_s19   ;;  %s1174_s19 = sphi %s1210_s19, %s14_s19   ;;  %s1170_s18 = sphi %s1208_s18, %s1432_s18   ;;  %s1166_s17 = sphi %s1206_s17, %s1431_s17   ;;  %s1162_s16 = sphi %s1204_s16, %s1430_s16   ;;  %s1158_s15 = sphi %s1202_s15, %s1429_s15  }
   0x4   : > { %p31_p0 = scmp.ge.s32.totalorder %s29_s20, 2  ;;  %p77_p1 = scmp.ne.s32.totalorder %s1162_s16, %s1158_s15 }
   0x5   : > { %p78_p2 = scmp.eq.s32.totalorder %s1174_s19, 0  ;;  %p161_p4 = scmp.eq.s32.totalorder %s992_s21, 1 }
   0x6   : > { %s1434_s20 = smov (%p31_p0, %s29_s20), 0  ;;  %s70_s23 = sadd.s32 1, %s1162_s16 }
   0x7   : > { %p79_p3 = por %p78_p2, %p77_p1  ;;  %s66_s22 = ssub.s32 %s1170_s18, %s1434_s20 }
   0x8   : > { %p68_p5 = scmp.eq.s32.totalorder %s66_s22, 0  ;;  %p1237_p6 = por %p161_p4, %p77_p1 }
   0x9   : > { %p996_p7 = scmp.ge.s32.totalorder %s1174_s19, 2 }
   0xa   : > { %s1242_s25 = scalar_select %p68_p5, %s1162_s16, %s70_s23  }
   0xb   : > { %195 = sbr.rel (%p996_p7) target bundleno = 38 (0x26), region = 20 }
  0x12   : > { %198 = sbr.rel (!%p79_p3) target bundleno = 38 (0x26), region = 24  ;;  %s200_s26 = sand.u32 (%p79_p3), 1, %s1162_s16  }
  0x13   : > { %s1042_s27 = sshll.u32 (%p79_p3), %s1170_s18, 4  ;;  %s997_s28 = sshll.u32 (%p79_p3), %s200_s26, 8 }
  0x14   : > { %s1250_s5 = scalar_lea.vmem (%p79_p3), %s1424_s1, %s1042_s27  ;;  %s1255_s6 = scalar_lea.vmem (%p79_p3), [#allocation3], %s997_s28 }
  0x15   : > { %v221_v0 = vld [vmem:[%s1250_s5] sm:$0xff] (%p79_p3)  ;;  %v223_v1 = vld [vmem:[%s1250_s5 + $0x8] sm:$0xff] (%p79_p3) }
  0x16   : > { %v225_v2 = vld [vmem:[%s1250_s5 + $0x20] sm:$0xff] (%p79_p3)  ;;  %222 = vst [vmem:[%s1255_s6] sm:$0xff] (%p79_p3), %v221_v0  ;;  %224 = vst [vmem:[%s1255_s6 + $0x8] sm:$0xff] (%p79_p3), %v223_v1  ;;  %v227_v3 = vld [vmem:[%s1250_s5 + $0x28] sm:$0xff] (%p79_p3) }
  0x17   : > { %226 = vst [vmem:[%s1255_s6 + $0x10] sm:$0xff] (%p79_p3), %v225_v2  ;;  %v229_v4 = vld [vmem:[%s1250_s5 + $0x40] sm:$0xff] (%p79_p3)  ;;  %v231_v5 = vld [vmem:[%s1250_s5 + $0x48] sm:$0xff] (%p79_p3)  ;;  %228 = vst [vmem:[%s1255_s6 + $0x18] sm:$0xff] (%p79_p3), %v227_v3 }
  0x18   : > { %230 = vst [vmem:[%s1255_s6 + $0x20] sm:$0xff] (%p79_p3), %v229_v4  ;;  %232 = vst [vmem:[%s1255_s6 + $0x28] sm:$0xff] (%p79_p3), %v231_v5  ;;  %v233_v6 = vld [vmem:[%s1250_s5 + $0x60] sm:$0xff] (%p79_p3)  ;;  %v235_v7 = vld [vmem:[%s1250_s5 + $0x68] sm:$0xff] (%p79_p3) }
  0x19   : > { %v237_v8 = vld [vmem:[%s1250_s5 + $0x80] sm:$0xff]  ;;  %234 = vst [vmem:[%s1255_s6 + $0x30] sm:$0xff] %v233_v6  ;;  %236 = vst [vmem:[%s1255_s6 + $0x38] sm:$0xff] %v235_v7  ;;  %v239_v9 = vld [vmem:[%s1250_s5 + $0x88] sm:$0xff] }
  0x1a   : > { %238 = vst [vmem:[%s1255_s6 + $0x40] sm:$0xff] %v237_v8  ;;  %v241_v10 = vld [vmem:[%s1250_s5 + $0xa0] sm:$0xff]  ;;  %v243_v11 = vld [vmem:[%s1250_s5 + $0xa8] sm:$0xff]  ;;  %240 = vst [vmem:[%s1255_s6 + $0x48] sm:$0xff] %v239_v9 }
  0x1b   : > { %242 = vst [vmem:[%s1255_s6 + $0x50] sm:$0xff] %v241_v10  ;;  %244 = vst [vmem:[%s1255_s6 + $0x58] sm:$0xff] %v243_v11  ;;  %v245_v12 = vld [vmem:[%s1250_s5 + $0xc0] sm:$0xff]  ;;  %v247_v13 = vld [vmem:[%s1250_s5 + $0xc8] sm:$0xff] }
  0x1c   : > { %v249_v14 = vld [vmem:[%s1250_s5 + $0xe0] sm:$0xff]  ;;  %246 = vst [vmem:[%s1255_s6 + $0x60] sm:$0xff] %v245_v12  ;;  %248 = vst [vmem:[%s1255_s6 + $0x68] sm:$0xff] %v247_v13  ;;  %v251_v15 = vld [vmem:[%s1250_s5 + $0xe8] sm:$0xff] }
  0x1d   : > { %250 = vst [vmem:[%s1255_s6 + $0x70] sm:$0xff] %v249_v14  ;;  %v253_v16 = vld [vmem:[%s1250_s5 + $0x100] sm:$0xff]  ;;  %v255_v17 = vld [vmem:[%s1250_s5 + $0x108] sm:$0xff]  ;;  %252 = vst [vmem:[%s1255_s6 + $0x78] sm:$0xff] %v251_v15 }
  0x1e   : > { %254 = vst [vmem:[%s1255_s6 + $0x80] sm:$0xff] %v253_v16  ;;  %256 = vst [vmem:[%s1255_s6 + $0x88] sm:$0xff] %v255_v17  ;;  %v257_v18 = vld [vmem:[%s1250_s5 + $0x120] sm:$0xff]  ;;  %v259_v19 = vld [vmem:[%s1250_s5 + $0x128] sm:$0xff] }
  0x1f   : > { %v261_v20 = vld [vmem:[%s1250_s5 + $0x140] sm:$0xff]  ;;  %258 = vst [vmem:[%s1255_s6 + $0x90] sm:$0xff] %v257_v18  ;;  %260 = vst [vmem:[%s1255_s6 + $0x98] sm:$0xff] %v259_v19  ;;  %v263_v21 = vld [vmem:[%s1250_s5 + $0x148] sm:$0xff] }
  0x20   : > { %262 = vst [vmem:[%s1255_s6 + $0xa0] sm:$0xff] %v261_v20  ;;  %v265_v22 = vld [vmem:[%s1250_s5 + $0x160] sm:$0xff]  ;;  %v267_v23 = vld [vmem:[%s1250_s5 + $0x168] sm:$0xff]  ;;  %264 = vst [vmem:[%s1255_s6 + $0xa8] sm:$0xff] %v263_v21 }
  0x21   : > { %266 = vst [vmem:[%s1255_s6 + $0xb0] sm:$0xff] %v265_v22  ;;  %268 = vst [vmem:[%s1255_s6 + $0xb8] sm:$0xff] %v267_v23  ;;  %v269_v24 = vld [vmem:[%s1250_s5 + $0x180] sm:$0xff]  ;;  %v271_v25 = vld [vmem:[%s1250_s5 + $0x188] sm:$0xff] }
  0x22   : > { %v273_v26 = vld [vmem:[%s1250_s5 + $0x1a0] sm:$0xff]  ;;  %270 = vst [vmem:[%s1255_s6 + $0xc0] sm:$0xff] %v269_v24  ;;  %272 = vst [vmem:[%s1255_s6 + $0xc8] sm:$0xff] %v271_v25  ;;  %v275_v27 = vld [vmem:[%s1250_s5 + $0x1a8] sm:$0xff] }
  0x23   : > { %274 = vst [vmem:[%s1255_s6 + $0xd0] sm:$0xff] %v273_v26  ;;  %v277_v28 = vld [vmem:[%s1250_s5 + $0x1c0] sm:$0xff]  ;;  %v279_v29 = vld [vmem:[%s1250_s5 + $0x1c8] sm:$0xff]  ;;  %276 = vst [vmem:[%s1255_s6 + $0xd8] sm:$0xff] %v275_v27 }
  0x24   : > { %278 = vst [vmem:[%s1255_s6 + $0xe0] sm:$0xff] %v277_v28  ;;  %280 = vst [vmem:[%s1255_s6 + $0xe8] sm:$0xff] %v279_v29  ;;  %v281_v30 = vld [vmem:[%s1250_s5 + $0x1e0] sm:$0xff]  ;;  %v283_v31 = vld [vmem:[%s1250_s5 + $0x1e8] sm:$0xff] }
  0x25   : > { %282 = vst [vmem:[%s1255_s6 + $0xf0] sm:$0xff] %v281_v30  ;;  %284 = vst [vmem:[%s1255_s6 + $0xf8] sm:$0xff] %v283_v31 }
  0x26 PF: > { %p1000_p8 = scmp.ge.s32.totalorder %s1174_s19, 1  ;;  %p305_p9 = scmp.lt.s32.totalorder %s1174_s19, 3 }
  0x28   : > { %p306_p10 = pnand %p1000_p8, %p305_p9 }
  0x29   : > { %s312_s7 = sand.u32 (!%p306_p10), 1, %s1158_s15   ;;  %v1176_v32 = vmov (!%p306_p10), 0   ;;  %v1134_v1 = vld [vmem:[%s1423_s0] sm:$0xff] (!%p306_p10)   ;;  %v1135_v2 = vld [vmem:[%s1423_s0 + $0x8] ss:$0 sps:$4 sm:$0xff] (!%p306_p10)   ;;  %s1002_s14 = sshll.u32 (!%p306_p10), %s1166_s17, 2  ;;  %v752_v3 = vlaneseq (!%p306_p10) }
  0x2a   : > { %309 = sbr.rel (%p306_p10) target bundleno = 311 (0x137), region = 55  ;;  %s1001_s8 = sshll.u32 (!%p306_p10), %s312_s7, 8  ;;  %641 = vmatprep.mubr.bf16.mxu0 (!%p306_p10), %v1176_v32  ;;  %692 = vmatprep.mubr.bf16.mxu1 (!%p306_p10), %v1176_v32 }
  0x2b   : > { %s1325_s9 = scalar_lea.vmem (!%p306_p10), [#allocation3], %s1001_s8  ;;  %p364_p11 = scmp.lt.s32.totalorder (!%p306_p10), %s1002_s14, 7  ;;  %v753_v4 = vshrl.u32 (!%p306_p10), %v752_v3, 7 }
  0x2c   : > { %v1086_v33 = vld [vmem:[%s1325_s9 + $0x4] ss:$16 sps:$4 sm:$0xff] (!%p306_p10)   ;;  %v1088_v34 = vld [vmem:[%s1325_s9 + $0xc] ss:$16 sps:$4 sm:$0xff] (!%p306_p10)   ;;  %v1090_v35 = vld [vmem:[%s1325_s9] ss:$16 sps:$4 sm:$0xff] (!%p306_p10)  }
  0x2d   : > { %609 = vmatprep.subr.bf16.mxu0 (!%p306_p10), %v1086_v33  ;;  %v1091_v36 = vld [vmem:[%s1325_s9 + $0x8] ss:$16 sps:$4 sm:$0xff] (!%p306_p10)   ;;  %660 = vmatprep.subr.bf16.mxu1 (!%p306_p10), %v1088_v34  ;;  %v1092_v37 = vld [vmem:[%s1325_s9 + $0x24] ss:$16 sps:$4 sm:$0xff] (!%p306_p10)   ;;  %v1094_v38 = vld [vmem:[%s1325_s9 + $0x2c] ss:$16 sps:$4 sm:$0xff] (!%p306_p10)  }
  0x2e   : > { %610 = vmatpush1.bf16.msra.mxu0 (!%p306_p10), %v1090_v35  ;;  %661 = vmatpush1.bf16.msra.mxu1 (!%p306_p10), %v1091_v36  ;;  %v1096_v39 = vld [vmem:[%s1325_s9 + $0x20] ss:$16 sps:$4 sm:$0xff] (!%p306_p10)   ;;  %v1097_v40 = vld [vmem:[%s1325_s9 + $0x28] ss:$16 sps:$4 sm:$0xff] (!%p306_p10)   ;;  %v1098_v41 = vld [vmem:[%s1325_s9 + $0x44] ss:$16 sps:$4 sm:$0xff] (!%p306_p10)  }
  0x2f   : > { %611 = vmatprep.subr.bf16.mxu0 (!%p306_p10), %v1092_v37  ;;  %662 = vmatprep.subr.bf16.mxu1 (!%p306_p10), %v1094_v38  ;;  %v1100_v42 = vld [vmem:[%s1325_s9 + $0x4c] ss:$16 sps:$4 sm:$0xff] (!%p306_p10)   ;;  %v1102_v43 = vld [vmem:[%s1325_s9 + $0x40] ss:$16 sps:$4 sm:$0xff] (!%p306_p10)   ;;  %v1103_v44 = vld [vmem:[%s1325_s9 + $0x48] ss:$16 sps:$4 sm:$0xff] (!%p306_p10)  }
  0x30   : > { %v1104_v45 = vld [vmem:[%s1325_s9 + $0x64] ss:$16 sps:$4 sm:$0xff] (!%p306_p10)   ;;  %v1106_v46 = vld [vmem:[%s1325_s9 + $0x6c] ss:$16 sps:$4 sm:$0xff] (!%p306_p10)   ;;  %v1108_v47 = vld [vmem:[%s1325_s9 + $0x60] ss:$16 sps:$4 sm:$0xff] (!%p306_p10)  }
  0x31   : > { %v1109_v48 = vld [vmem:[%s1325_s9 + $0x68] ss:$16 sps:$4 sm:$0xff]   ;;  %v1110_v49 = vld [vmem:[%s1325_s9 + $0x84] ss:$16 sps:$4 sm:$0xff]   ;;  %v1112_v50 = vld [vmem:[%s1325_s9 + $0x8c] ss:$16 sps:$4 sm:$0xff]  }
  0x32   : > { %612 = vmatpush1.bf16.msra.mxu0 %v1096_v39  ;;  %663 = vmatpush1.bf16.msra.mxu1 %v1097_v40  ;;  %v1114_v51 = vld [vmem:[%s1325_s9 + $0x80] ss:$16 sps:$4 sm:$0xff]   ;;  %v1115_v52 = vld [vmem:[%s1325_s9 + $0x88] ss:$16 sps:$4 sm:$0xff]   ;;  %v1116_v53 = vld [vmem:[%s1325_s9 + $0xa4] ss:$16 sps:$4 sm:$0xff]  }
  0x33   : > { %613 = vmatprep.subr.bf16.mxu0 %v1098_v41  ;;  %664 = vmatprep.subr.bf16.mxu1 %v1100_v42  ;;  %v1118_v54 = vld [vmem:[%s1325_s9 + $0xac] ss:$16 sps:$4 sm:$0xff]   ;;  %v1120_v55 = vld [vmem:[%s1325_s9 + $0xa0] ss:$16 sps:$4 sm:$0xff]   ;;  %v1121_v56 = vld [vmem:[%s1325_s9 + $0xa8] ss:$16 sps:$4 sm:$0xff]  }
  0x34   : > { %v1122_v57 = vld [vmem:[%s1325_s9 + $0xc4] ss:$16 sps:$4 sm:$0xff]   ;;  %v1124_v58 = vld [vmem:[%s1325_s9 + $0xcc] ss:$16 sps:$4 sm:$0xff]   ;;  %v1126_v59 = vld [vmem:[%s1325_s9 + $0xc0] ss:$16 sps:$4 sm:$0xff]  }
  0x35   : > { %v1127_v60 = vld [vmem:[%s1325_s9 + $0xc8] ss:$16 sps:$4 sm:$0xff]   ;;  %v1128_v61 = vld [vmem:[%s1325_s9 + $0xe4] ss:$16 sps:$4 sm:$0xff]   ;;  %v1130_v62 = vld [vmem:[%s1325_s9 + $0xec] ss:$16 sps:$4 sm:$0xff]  }
  0x36   : > { %614 = vmatpush1.bf16.msra.mxu0 %v1102_v43  ;;  %665 = vmatpush1.bf16.msra.mxu1 %v1103_v44  ;;  %v1132_v63 = vld [vmem:[%s1325_s9 + $0xe0] ss:$16 sps:$4 sm:$0xff]   ;;  %v1133_v0 = vld [vmem:[%s1325_s9 + $0xe8] ss:$16 sps:$4 sm:$0xff]   ;;  %s1436_s14 = smov (!%p364_p11, %s1002_s14), 7  ;;  %v754_v5 = vsub.s32 0, %v753_v4 }
  0x37   : > { %615 = vmatprep.subr.bf16.mxu0 %v1104_v45  ;;  %666 = vmatprep.subr.bf16.mxu1 %v1106_v46  ;;  %s366_s23 = scalar_lea.vmem %s1425_s2, %s1436_s14  ;;  %s371_s28 = scalar_lea.vmem %s1426_s3, %s1436_s14  ;;  %v762_v6 = vsub.s32 2, %v753_v4  ;;  %v758_v8 = vsub.s32 1, %v753_v4  ;;  %v766_v9 = vsub.s32 3, %v753_v4 }
  0x38   : > { %v750_v7 = vld [vmem:[%s366_s23] sm:$0xf]  ;;  %s1044_s29 = smul.u32 96, %s312_s7  ;;  %s1043_s30 = sshll.u32 (%p1237_p6), %s1166_s17, 5 }
  0x39   : > { %v784_v10 = vld [vmem:[%s371_s28] sm:$0xf]  ;;  %v755_v11 = vrot.slane %v750_v7, %v754_v5  ;;  %v763_v12 = vrot.slane %v750_v7, %v762_v6  ;;  %v759_v13 = vrot.slane %v750_v7, %v758_v8  ;;  %v767_v14 = vrot.slane %v750_v7, %v766_v9  ;;  %s842_s7 = scalar_lea.vmem (%p1237_p6), %s1427_s4, %s1043_s30 }
  0x3a   : > { %616 = vmatpush1.bf16.msra.mxu0 %v1108_v47  ;;  %667 = vmatpush1.bf16.msra.mxu1 %v1109_v48  ;;  %v789_v15 = vrot.slane %v784_v10, %v754_v5  ;;  %v797_v16 = vrot.slane %v784_v10, %v762_v6  ;;  %v793_v19 = vrot.slane %v784_v10, %v758_v8  ;;  %s1376_s15 = scalar_lea.vmem [#allocation4], %s1044_s29 }
  0x3b   : > { %617 = vmatprep.subr.bf16.mxu0 %v1110_v49  ;;  %668 = vmatprep.subr.bf16.mxu1 %v1112_v50  ;;  %v801_v20 = vrot.slane %v784_v10, %v766_v9 }
  0x3e   : > { %618 = vmatpush1.bf16.msra.mxu0 %v1114_v51  ;;  %669 = vmatpush1.bf16.msra.mxu1 %v1115_v52 }
  0x3f   : > { %619 = vmatprep.subr.bf16.mxu0 %v1116_v53  ;;  %670 = vmatprep.subr.bf16.mxu1 %v1118_v54 }
  0x42   : > { %620 = vmatpush1.bf16.msra.mxu0 %v1120_v55  ;;  %671 = vmatpush1.bf16.msra.mxu1 %v1121_v56 }
  0x43   : > { %621 = vmatprep.subr.bf16.mxu0 %v1122_v57  ;;  %672 = vmatprep.subr.bf16.mxu1 %v1124_v58 }
  0x46   : > { %622 = vmatpush1.bf16.msra.mxu0 %v1126_v59  ;;  %673 = vmatpush1.bf16.msra.mxu1 %v1127_v60 }
  0x47   : > { %623 = vmatprep.subr.bf16.mxu0 %v1128_v61  ;;  %674 = vmatprep.subr.bf16.mxu1 %v1130_v62 }
  0x4a   : > { %624 = vmatpush1.bf16.msra.mxu0 %v1132_v63  ;;  %675 = vmatpush1.bf16.msra.mxu1 %v1133_v0 }
  0x4d   : > { %642 = vmatmul.mubr.bf16.vlgmr.msra.gmra.mrb[0].mxu0 %v1134_v1  ;;  %693 = vmatmul.mubr.bf16.vlgmr.msra.gmra.mrb[0].mxu1 %v1134_v1 }
  0x4e   : > { %651 = vmatprep.mubr.bf16.mxu0 %v1176_v32  ;;  %702 = vmatprep.mubr.bf16.mxu1 %v1176_v32 }
  0x55   : > { %652 = vmatmul.mubr.bf16.gmra.mrb[4].mxu0 %v1135_v2  ;;  %703 = vmatmul.mubr.bf16.gmra.mrb[4].mxu1 %v1135_v2 }
 0x120   : > { %v643_v17 = vpop.f32.mrb[0].mxu0  ;;  %v694_v18 = vpop.f32.mrb[0].mxu1 }
 0x121   : > { %v772_v21 = vmul.f32 %v755_v11, %v643_v17  ;;  %v774_v22 = vmul.f32 %v763_v12, %v694_v18  ;;  %v645_v23 = vpop.f32.mrb[1].mxu0  ;;  %v696_v24 = vpop.f32.mrb[1].mxu1 }
 0x122   : > { %v773_v25 = vmul.f32 %v759_v13, %v645_v23  ;;  %v775_v26 = vmul.f32 %v767_v14, %v696_v24  ;;  %v647_v27 = vpop.f32.mrb[2].mxu0  ;;  %v698_v28 = vpop.f32.mrb[2].mxu1 }
 0x123   : > { %v806_v29 = vadd.f32 %v789_v15, %v772_v21  ;;  %v808_v30 = vadd.f32 %v797_v16, %v774_v22  ;;  %v776_v31 = vmul.f32 %v755_v11, %v647_v27  ;;  %v778_v32 = vmul.f32 %v763_v12, %v698_v28  ;;  %v649_v33 = vpop.f32.mrb[3].mxu0  ;;  %v700_v34 = vpop.f32.mrb[3].mxu1 }
 0x124   : > { %v807_v35 = vadd.f32 %v793_v19, %v773_v25  ;;  %v809_v36 = vadd.f32 %v801_v20, %v775_v26  ;;  %v777_v37 = vmul.f32 %v759_v13, %v649_v33  ;;  %v779_v38 = vmul.f32 %v767_v14, %v700_v34 }
 0x125   : > { %818 = vst [vmem:[%s1376_s15] sm:$0xff] %v806_v29  ;;  %820 = vst [vmem:[%s1376_s15 + $0x10] sm:$0xff] %v808_v30  ;;  %v810_v39 = vadd.f32 %v789_v15, %v776_v31  ;;  %v812_v40 = vadd.f32 %v797_v16, %v778_v32 }
 0x126   : > { %819 = vst [vmem:[%s1376_s15 + $0x8] sm:$0xff] %v807_v35  ;;  %821 = vst [vmem:[%s1376_s15 + $0x18] sm:$0xff] %v809_v36  ;;  %v811_v41 = vadd.f32 %v793_v19, %v777_v37  ;;  %v813_v42 = vadd.f32 %v801_v20, %v779_v38 }
 0x127   : > { %822 = vst [vmem:[%s1376_s15 + $0x20] sm:$0xff] %v810_v39  ;;  %824 = vst [vmem:[%s1376_s15 + $0x30] sm:$0xff] %v812_v40 }
 0x128   : > { %823 = vst [vmem:[%s1376_s15 + $0x28] sm:$0xff] %v811_v41  ;;  %825 = vst [vmem:[%s1376_s15 + $0x38] sm:$0xff] %v813_v42  ;;  %v653_v43 = vpop.f32.mrb[4].mxu0  ;;  %v704_v44 = vpop.f32.mrb[4].mxu1  ;;  %836 = sbr.rel (!%p1237_p6) target bundleno = 311 (0x137), region = 71 }
 0x129   : > { %v780_v45 = vmul.f32 %v755_v11, %v653_v43  ;;  %v782_v46 = vmul.f32 %v763_v12, %v704_v44  ;;  %v655_v47 = vpop.f32.mrb[5].mxu0  ;;  %v706_v48 = vpop.f32.mrb[5].mxu1 }
 0x12a   : > { %v781_v49 = vmul.f32 %v759_v13, %v655_v47  ;;  %v783_v50 = vmul.f32 %v767_v14, %v706_v48  ;;  %v657_v51 = vpop.f32.mrb[6].mxu0  ;;  %v708_v52 = vpop.f32.mrb[6].mxu1 }
 0x12b   : > { %v814_v53 = vadd.f32 %v789_v15, %v780_v45  ;;  %v816_v54 = vadd.f32 %v797_v16, %v782_v46  ;;  %v658_v55 = vpop.f32.mrb[7].mxu0  ;;  %v709_v56 = vpop.f32.mrb[7].mxu1 }
 0x12c   : > { %v815_v57 = vadd.f32 %v793_v19, %v781_v49  ;;  %v817_v58 = vadd.f32 %v801_v20, %v783_v50  ;;  %v855_v59 = vld [vmem:[%s1376_s15] sm:$0xff] (%p1237_p6)  ;;  %v859_v61 = vld [vmem:[%s1376_s15 + $0x10] sm:$0xff] (%p1237_p6) }
 0x12d   : > { %826 = vst [vmem:[%s1376_s15 + $0x40] sm:$0xff] %v814_v53  ;;  %828 = vst [vmem:[%s1376_s15 + $0x50] sm:$0xff] %v816_v54  ;;  %v857_v60 = vld [vmem:[%s1376_s15 + $0x8] sm:$0xff] (%p1237_p6)  ;;  %v861_v62 = vld [vmem:[%s1376_s15 + $0x18] sm:$0xff] (%p1237_p6) }
 0x12e   : > { %827 = vst [vmem:[%s1376_s15 + $0x48] sm:$0xff] %v815_v57  ;;  %829 = vst [vmem:[%s1376_s15 + $0x58] sm:$0xff] %v817_v58  ;;  %v863_v63 = vld [vmem:[%s1376_s15 + $0x20] sm:$0xff] (%p1237_p6)  ;;  %v867_v1 = vld [vmem:[%s1376_s15 + $0x30] sm:$0xff] (%p1237_p6) }
 0x12f   : > { %v865_v0 = vld [vmem:[%s1376_s15 + $0x28] sm:$0xff]  ;;  %856 = vst [vmem:[%s842_s7] sm:$0xff] %v855_v59  ;;  %858 = vst [vmem:[%s842_s7 + $0x8] sm:$0xff] %v857_v60  ;;  %v869_v2 = vld [vmem:[%s1376_s15 + $0x38] sm:$0xff] }
 0x130   : > { %860 = vst [vmem:[%s842_s7 + $0x10] sm:$0xff] %v859_v61  ;;  %862 = vst [vmem:[%s842_s7 + $0x18] sm:$0xff] %v861_v62 }
 0x131   : > { %864 = vst [vmem:[%s842_s7 + $0x40] sm:$0xff] %v863_v63  ;;  %866 = vst [vmem:[%s842_s7 + $0x48] sm:$0xff] %v865_v0 }
 0x132   : > { %868 = vst [vmem:[%s842_s7 + $0x50] sm:$0xff] %v867_v1  ;;  %870 = vst [vmem:[%s842_s7 + $0x58] sm:$0xff] %v869_v2 }
 0x134   : > { %v871_v3 = vld [vmem:[%s1376_s15 + $0x40] sm:$0xff]  ;;  %v875_v5 = vld [vmem:[%s1376_s15 + $0x50] sm:$0xff] }
 0x135   : > { %872 = vst [vmem:[%s842_s7 + $0x80] sm:$0xff] %v871_v3  ;;  %v873_v4 = vld [vmem:[%s1376_s15 + $0x48] sm:$0xff]  ;;  %v877_v6 = vld [vmem:[%s1376_s15 + $0x58] sm:$0xff]  ;;  %876 = vst [vmem:[%s842_s7 + $0x90] sm:$0xff] %v875_v5 }
 0x136   : > { %874 = vst [vmem:[%s842_s7 + $0x88] sm:$0xff] %v873_v4  ;;  %878 = vst [vmem:[%s842_s7 + $0x98] sm:$0xff] %v877_v6 }
 0x137 PF: > { %s14_s19 = sadd.s32 1, %s1174_s19   ;;  %s1429_s15 = smov %s1162_s16 }
 0x138   : > { %p11_p12 = scmp.ge.s32.totalorder %s14_s19, 4   ;;  %s1430_s16 = smov %s1242_s25 }
 0x139   : > { %s1431_s17 = smov %s1170_s18  ;;  %s1432_s18 = smov %s1434_s20 }
 0x13a   :  { %13 = sbr.rel (!%p11_p12) target bundleno = 3 (0x3), region = 134 }

// kernel: _lambda_.44
= control target key start
LH: loop header
LB: loop body
LE: loop exit
PB: predicated region body
PF: predicated region fallthrough
CT: control target
= control target key end

     0   :  { %v925_v0 = vmov 0.0   ;;  %s942_s9 = smov 0   ;;  %s1164_s0 = inlined_call_operand.vmem [shape: f32[12,2,8,512], index: 0, kind: input, shape index: {}]   ;;  %s1165_s1 = inlined_call_operand.vmem [shape: bf16[2,128,512], index: 1, kind: input, shape index: {}]   ;;  %s1166_s2 = inlined_call_operand.vmem [shape: bf16[12,2,8,128], index: 2, kind: output, shape index: {}]  }
   0x1   :  { %16 = vst [vmem:[#allocation2] sm:$0xff] %v925_v0  ;;  %17 = vst [vmem:[#allocation2 + $0x8] sm:$0xff] %v925_v0 }
   0x2   :  { %18 = vst [vmem:[#allocation3] sm:$0xff] %v925_v0  ;;  %19 = vst [vmem:[#allocation3 + $0x8] sm:$0xff] %v925_v0 }
   0x3 LB: > { %v789_v1 = vld [vmem:[%s1165_s1 + $0x4] ss:$16 sps:$4 sm:$0xff]   ;;  %v791_v2 = vld [vmem:[%s1165_s1] ss:$16 sps:$4 sm:$0xff]   ;;  %v926_v3 = vmov 0   ;;  %s772_s30 = sshll.u32 %s923_s9, 6  ;;  %s923_s9 = sphi %s942_s9, %s25_s9  }
   0x4   : > { %264 = vmatprep.mubr.bf16.mxu0 %v926_v3  ;;  %305 = vmatprep.mubr.bf16.mxu1 %v926_v3  ;;  %v792_v4 = vld [vmem:[%s1165_s1 + $0x24] ss:$16 sps:$4 sm:$0xff]   ;;  %v794_v5 = vld [vmem:[%s1165_s1 + $0x20] ss:$16 sps:$4 sm:$0xff]   ;;  %v800_v7 = vld [vmem:[%s1165_s1 + $0xc] ss:$16 sps:$4 sm:$0xff]   ;;  %s1147_s5 = scalar_lea.vmem %s1164_s0, %s772_s30 }
   0x5   : > { %232 = vmatprep.subr.bf16.mxu0 %v789_v1  ;;  %v795_v6 = vld [vmem:[%s1165_s1 + $0x44] ss:$16 sps:$4 sm:$0xff]   ;;  %v803_v8 = vld [vmem:[%s1165_s1 + $0x8] ss:$16 sps:$4 sm:$0xff]   ;;  %v797_v9 = vld [vmem:[%s1165_s1 + $0x40] ss:$16 sps:$4 sm:$0xff]   ;;  %273 = vmatprep.subr.bf16.mxu1 %v800_v7 }
   0x6   : > { %233 = vmatpush1.bf16.msra.mxu0 %v791_v2  ;;  %v798_v10 = vld [vmem:[%s1165_s1 + $0x64] ss:$16 sps:$4 sm:$0xff]   ;;  %274 = vmatpush1.bf16.msra.mxu1 %v803_v8  ;;  %v806_v11 = vld [vmem:[%s1165_s1 + $0x2c] ss:$16 sps:$4 sm:$0xff]   ;;  %v809_v12 = vld [vmem:[%s1165_s1 + $0x28] ss:$16 sps:$4 sm:$0xff]  }
   0x7   : > { %234 = vmatprep.subr.bf16.mxu0 %v792_v4  ;;  %275 = vmatprep.subr.bf16.mxu1 %v806_v11  ;;  %v802_v13 = vld [vmem:[%s1165_s1 + $0x60] ss:$16 sps:$4 sm:$0xff]   ;;  %v804_v14 = vld [vmem:[%s1165_s1 + $0x84] ss:$16 sps:$4 sm:$0xff]   ;;  %v812_v15 = vld [vmem:[%s1165_s1 + $0x4c] ss:$16 sps:$4 sm:$0xff]  }
   0x8   : > { %v815_v16 = vld [vmem:[%s1165_s1 + $0x48] ss:$16 sps:$4 sm:$0xff]   ;;  %v818_v17 = vld [vmem:[%s1165_s1 + $0x6c] ss:$16 sps:$4 sm:$0xff]   ;;  %v808_v18 = vld [vmem:[%s1165_s1 + $0x80] ss:$16 sps:$4 sm:$0xff]  }
   0x9   : > { %v810_v19 = vld [vmem:[%s1165_s1 + $0xa4] ss:$16 sps:$4 sm:$0xff]   ;;  %v821_v20 = vld [vmem:[%s1165_s1 + $0x68] ss:$16 sps:$4 sm:$0xff]   ;;  %v824_v21 = vld [vmem:[%s1165_s1 + $0x8c] ss:$16 sps:$4 sm:$0xff]  }
   0xa   : > { %235 = vmatpush1.bf16.msra.mxu0 %v794_v5  ;;  %276 = vmatpush1.bf16.msra.mxu1 %v809_v12  ;;  %v814_v22 = vld [vmem:[%s1165_s1 + $0xa0] ss:$16 sps:$4 sm:$0xff]   ;;  %v816_v23 = vld [vmem:[%s1165_s1 + $0xc4] ss:$16 sps:$4 sm:$0xff]   ;;  %v827_v24 = vld [vmem:[%s1165_s1 + $0x88] ss:$16 sps:$4 sm:$0xff]  }
   0xb   : > { %236 = vmatprep.subr.bf16.mxu0 %v795_v6  ;;  %277 = vmatprep.subr.bf16.mxu1 %v812_v15  ;;  %v828_v25 = vld [vmem:[%s1165_s1 + $0xac] ss:$16 sps:$4 sm:$0xff]   ;;  %v820_v26 = vld [vmem:[%s1165_s1 + $0xc0] ss:$16 sps:$4 sm:$0xff]   ;;  %v822_v27 = vld [vmem:[%s1165_s1 + $0xe4] ss:$16 sps:$4 sm:$0xff]  }
   0xc   : > { %v833_v28 = vld [vmem:[%s1165_s1 + $0xa8] ss:$16 sps:$4 sm:$0xff]   ;;  %v834_v29 = vld [vmem:[%s1165_s1 + $0xcc] ss:$16 sps:$4 sm:$0xff]   ;;  %v826_v30 = vld [vmem:[%s1165_s1 + $0xe0] ss:$16 sps:$4 sm:$0xff]  }
   0xd   : > { %v37_v31 = vld [vmem:[#allocation2] sm:$0xff]  ;;  %v839_v33 = vld [vmem:[%s1165_s1 + $0xc8] ss:$16 sps:$4 sm:$0xff]   ;;  %v840_v34 = vld [vmem:[%s1165_s1 + $0xec] ss:$16 sps:$4 sm:$0xff]   ;;  %s773_s6 = sshll.u32 %s923_s9, 3 }
   0xe   : > { %237 = vmatpush1.bf16.msra.mxu0 %v797_v9  ;;  %278 = vmatpush1.bf16.msra.mxu1 %v815_v16  ;;  %v832_v32 = vld [vmem:[%s1165_s1 + $0x104] ss:$16 sps:$4 sm:$0xff]   ;;  %v39_v35 = vpack.c.bf16 %v37_v31, %v37_v31  ;;  %v830_v36 = vld [vmem:[%s1165_s1 + $0x100] ss:$16 sps:$4 sm:$0xff]   ;;  %v845_v38 = vld [vmem:[%s1165_s1 + $0xe8] ss:$16 sps:$4 sm:$0xff]   ;;  %s650_s10 = scalar_lea.vmem %s1166_s2, %s773_s6 }
   0xf   : > { %238 = vmatprep.subr.bf16.mxu0 %v798_v10  ;;  %279 = vmatprep.subr.bf16.mxu1 %v818_v17  ;;  %v838_v37 = vld [vmem:[%s1165_s1 + $0x124] ss:$16 sps:$4 sm:$0xff]   ;;  %v851_v39 = vld [vmem:[%s1165_s1 + $0x10c] ss:$16 sps:$4 sm:$0xff]   ;;  %v836_v40 = vld [vmem:[%s1165_s1 + $0x120] ss:$16 sps:$4 sm:$0xff]  }
  0x10   : > { %v844_v41 = vld [vmem:[%s1165_s1 + $0x144] ss:$16 sps:$4 sm:$0xff]   ;;  %v849_v42 = vld [vmem:[%s1165_s1 + $0x108] ss:$16 sps:$4 sm:$0xff]   ;;  %v857_v43 = vld [vmem:[%s1165_s1 + $0x12c] ss:$16 sps:$4 sm:$0xff]  }
  0x11   : > { %v842_v44 = vld [vmem:[%s1165_s1 + $0x140] ss:$16 sps:$4 sm:$0xff]   ;;  %v848_v45 = vld [vmem:[%s1165_s1 + $0x164] ss:$16 sps:$4 sm:$0xff]   ;;  %v855_v46 = vld [vmem:[%s1165_s1 + $0x128] ss:$16 sps:$4 sm:$0xff]  }
  0x12   : > { %239 = vmatpush1.bf16.msra.mxu0 %v802_v13  ;;  %280 = vmatpush1.bf16.msra.mxu1 %v821_v20  ;;  %v863_v47 = vld [vmem:[%s1165_s1 + $0x14c] ss:$16 sps:$4 sm:$0xff]   ;;  %v846_v48 = vld [vmem:[%s1165_s1 + $0x160] ss:$16 sps:$4 sm:$0xff]   ;;  %v854_v49 = vld [vmem:[%s1165_s1 + $0x184] ss:$16 sps:$4 sm:$0xff]  }
  0x13   : > { %240 = vmatprep.subr.bf16.mxu0 %v804_v14  ;;  %281 = vmatprep.subr.bf16.mxu1 %v824_v21  ;;  %v861_v50 = vld [vmem:[%s1165_s1 + $0x148] ss:$16 sps:$4 sm:$0xff]   ;;  %v869_v51 = vld [vmem:[%s1165_s1 + $0x16c] ss:$16 sps:$4 sm:$0xff]   ;;  %v852_v52 = vld [vmem:[%s1165_s1 + $0x180] ss:$16 sps:$4 sm:$0xff]  }
  0x14   : > { %v860_v53 = vld [vmem:[%s1165_s1 + $0x1a4] ss:$16 sps:$4 sm:$0xff]   ;;  %v867_v54 = vld [vmem:[%s1165_s1 + $0x168] ss:$16 sps:$4 sm:$0xff]   ;;  %v875_v55 = vld [vmem:[%s1165_s1 + $0x18c] ss:$16 sps:$4 sm:$0xff]  }
  0x15   : > { %v858_v56 = vld [vmem:[%s1165_s1 + $0x1a0] ss:$16 sps:$4 sm:$0xff]   ;;  %v866_v57 = vld [vmem:[%s1165_s1 + $0x1c4] ss:$16 sps:$4 sm:$0xff]   ;;  %v873_v58 = vld [vmem:[%s1165_s1 + $0x188] ss:$16 sps:$4 sm:$0xff]  }
  0x16   : > { %241 = vmatpush1.bf16.msra.mxu0 %v808_v18  ;;  %282 = vmatpush1.bf16.msra.mxu1 %v827_v24  ;;  %v878_v59 = vld [vmem:[%s1165_s1 + $0x1ac] ss:$16 sps:$4 sm:$0xff]   ;;  %v864_v60 = vld [vmem:[%s1165_s1 + $0x1c0] ss:$16 sps:$4 sm:$0xff]   ;;  %v872_v61 = vld [vmem:[%s1165_s1 + $0x1e4] ss:$16 sps:$4 sm:$0xff]  }
  0x17   : > { %242 = vmatprep.subr.bf16.mxu0 %v810_v19  ;;  %283 = vmatprep.subr.bf16.mxu1 %v828_v25  ;;  %v876_v62 = vld [vmem:[%s1165_s1 + $0x1a8] ss:$16 sps:$4 sm:$0xff]   ;;  %v881_v63 = vld [vmem:[%s1165_s1 + $0x1cc] ss:$16 sps:$4 sm:$0xff]   ;;  %v870_v0 = vld [vmem:[%s1165_s1 + $0x1e0] ss:$16 sps:$4 sm:$0xff]  }
  0x18   : > { %v341_v1 = vld [vmem:[#allocation2 + $0x8] sm:$0xff]  ;;  %v29_v6 = vld [vmem:[%s1147_s5] sm:$0xff]  ;;  %v32_v16 = vld [vmem:[%s1147_s5 + $0x18] sm:$0xff]  ;;  %s25_s9 = sadd.s32 1, %s923_s9  }
  0x19   : > { %v879_v2 = vld [vmem:[%s1165_s1 + $0x1c8] ss:$16 sps:$4 sm:$0xff]   ;;  %v344_v4 = vpack.c.bf16 %v341_v1, %v341_v1  ;;  %v38_v31 = vld [vmem:[#allocation3] sm:$0xff]  ;;  %p22_p0 = scmp.ge.s32.totalorder %s25_s9, 12  }
  0x1a   : > { %243 = vmatpush1.bf16.msra.mxu0 %v814_v22  ;;  %284 = vmatpush1.bf16.msra.mxu1 %v833_v28  ;;  %v882_v5 = vld [vmem:[%s1165_s1 + $0x1e8] ss:$16 sps:$4 sm:$0xff]   ;;  %v31_v22 = vld [vmem:[%s1147_s5 + $0x10] sm:$0xff] }
  0x1b   : > { %244 = vmatprep.subr.bf16.mxu0 %v816_v23  ;;  %285 = vmatprep.subr.bf16.mxu1 %v834_v29  ;;  %v30_v7 = vld [vmem:[%s1147_s5 + $0x8] sm:$0xff] }
  0x1e   : > { %245 = vmatpush1.bf16.msra.mxu0 %v820_v26  ;;  %286 = vmatpush1.bf16.msra.mxu1 %v839_v33 }
  0x1f   : > { %246 = vmatprep.subr.bf16.mxu0 %v822_v27  ;;  %287 = vmatprep.subr.bf16.mxu1 %v840_v34 }
  0x22   : > { %247 = vmatpush1.bf16.msra.mxu0 %v826_v30  ;;  %288 = vmatpush1.bf16.msra.mxu1 %v845_v38  ;;  %v34_v38 = vld [vmem:[%s1147_s5 + $0x28] sm:$0xff] }
  0x23   : > { %538 = vmatprep.subr.bf16.mxu0 %v832_v32  ;;  %579 = vmatprep.subr.bf16.mxu1 %v851_v39 }
  0x25   : > { %265 = vmatmul.mubr.bf16.vlgmr.msra.gmra.mrb[0].mxu0 %v39_v35  ;;  %306 = vmatmul.mubr.bf16.vlgmr.msra.gmra.mrb[0].mxu1 %v39_v35 }
  0x26   : > { %539 = vmatpush1.bf16.msra.mxu0 %v830_v36  ;;  %570 = vmatprep.mubr.bf16.mxu0 %v926_v3 }
  0x27   : > { %540 = vmatprep.subr.bf16.mxu0 %v838_v37  ;;  %580 = vmatpush1.bf16.msra.mxu1 %v849_v42  ;;  %v33_v37 = vld [vmem:[%s1147_s5 + $0x20] sm:$0xff] }
  0x28   : > { %581 = vmatprep.subr.bf16.mxu1 %v857_v43  ;;  %611 = vmatprep.mubr.bf16.mxu1 %v926_v3  ;;  %v884_v3 = vld [vmem:[%s1165_s1 + $0x1ec] ss:$16 sps:$4 sm:$0xff]  }
  0x2a   : > { %541 = vmatpush1.bf16.msra.mxu0 %v836_v40 }
  0x2b   : > { %542 = vmatprep.subr.bf16.mxu0 %v844_v41  ;;  %582 = vmatpush1.bf16.msra.mxu1 %v855_v46 }
  0x2c   : > { %583 = vmatprep.subr.bf16.mxu1 %v863_v47 }
  0x2e   : > { %543 = vmatpush1.bf16.msra.mxu0 %v842_v44 }
  0x2f   : > { %544 = vmatprep.subr.bf16.mxu0 %v848_v45  ;;  %584 = vmatpush1.bf16.msra.mxu1 %v861_v50 }
  0x30   : > { %585 = vmatprep.subr.bf16.mxu1 %v869_v51 }
  0x32   : > { %545 = vmatpush1.bf16.msra.mxu0 %v846_v48  ;;  %v36_v48 = vld [vmem:[%s1147_s5 + $0x38] sm:$0xff] }
  0x33   : > { %546 = vmatprep.subr.bf16.mxu0 %v854_v49  ;;  %586 = vmatpush1.bf16.msra.mxu1 %v867_v54  ;;  %v35_v54 = vld [vmem:[%s1147_s5 + $0x30] sm:$0xff] }
  0x34   : > { %587 = vmatprep.subr.bf16.mxu1 %v875_v55 }
  0x36   : > { %547 = vmatpush1.bf16.msra.mxu0 %v852_v52 }
  0x37   : > { %548 = vmatprep.subr.bf16.mxu0 %v860_v53  ;;  %588 = vmatpush1.bf16.msra.mxu1 %v873_v58 }
  0x38   : > { %589 = vmatprep.subr.bf16.mxu1 %v878_v59 }
  0x3a   : > { %549 = vmatpush1.bf16.msra.mxu0 %v858_v56 }
  0x3b   : > { %550 = vmatprep.subr.bf16.mxu0 %v866_v57  ;;  %590 = vmatpush1.bf16.msra.mxu1 %v876_v62 }
  0x3c   : > { %591 = vmatprep.subr.bf16.mxu1 %v881_v63 }
  0x3e   : > { %551 = vmatpush1.bf16.msra.mxu0 %v864_v60 }
  0x3f   : > { %552 = vmatprep.subr.bf16.mxu0 %v872_v61  ;;  %592 = vmatpush1.bf16.msra.mxu1 %v879_v2  ;;  %v343_v2 = vld [vmem:[#allocation3 + $0x8] sm:$0xff] }
  0x40   : > { %593 = vmatprep.subr.bf16.mxu1 %v884_v3 }
  0x42   : > { %553 = vmatpush1.bf16.msra.mxu0 %v870_v0 }
  0x43   : > { %594 = vmatpush1.bf16.msra.mxu1 %v882_v5 }
  0x45   : > { %571 = vmatmul.mubr.bf16.vlgmr.msra.gmra.mrb[4].mxu0 %v344_v4 }
  0x46   : > { %612 = vmatmul.mubr.bf16.vlgmr.msra.gmra.mrb[4].mxu1 %v344_v4 }
  0xf8   : > { %v266_v8 = vpop.f32.mrb[0].mxu0  ;;  %v307_v17 = vpop.f32.mrb[0].mxu1 }
  0xf9   : > { %v267_v9 = vadd.f32 %v266_v8, %v29_v6  ;;  %v268_v10 = vpop.f32.mrb[1].mxu0  ;;  %v309_v18 = vpop.f32.mrb[1].mxu1  ;;  %v308_v24 = vadd.f32 %v307_v17, %v31_v22 }
  0xfa   : > { %v269_v11 = vadd.f32 %v268_v10, %v30_v7  ;;  %v270_v12 = vpop.f32.mrb[2].mxu0  ;;  %v310_v19 = vadd.f32 %v309_v18, %v32_v16  ;;  %v311_v20 = vpop.f32.mrb[2].mxu1 }
  0xfb   : > { %v700_v13 = vmul.f32 -1.442695, %v267_v9  ;;  %v271_v14 = vpop.f32.mrb[3].mxu0  ;;  %v312_v21 = vpop.f32.mrb[3].mxu1 }
  0xfc   : > { %v701_v15 = vmul.f32 -1.442695, %v269_v11  ;;  %v702_v23 = vmul.f32 -1.442695, %v310_v19 }
  0xfd   : > { %885 = vpow2.f32 %v700_v13 }
  0xfe   : > { %887 = vpow2.f32 %v701_v15 }
  0xff   : > { %889 = vpow2.f32 %v702_v23 }
 0x100   : > { %891 = vtanh.f32 %v308_v24 }
 0x107   : > { %v886_v25 = vpop.eup %885 }
 0x108   : > { %v888_v26 = vpop.eup %887  ;;  %v317_v27 = vadd.f32 1.0, %v886_v25 }
 0x109   : > { %v323_v28 = vadd.f32 1.0, %v888_v26  ;;  %v890_v29 = vpop.eup %889 }
 0x10a   : > { %893 = vrcp.f32 %v317_v27  ;;  %v892_v30 = vpop.eup %891  ;;  %v330_v33 = vadd.f32 1.0, %v890_v29 }
 0x10b   : > { %895 = vrcp.f32 %v323_v28 }
 0x10c   : > { %897 = vrcp.f32 %v330_v33 }
 0x114   : > { %v894_v32 = vpop.eup %893 }
 0x115   : > { %v896_v34 = vpop.eup %895  ;;  %v334_v35 = vmul.f32 %v894_v32, %v892_v30 }
 0x116   : > { %v333_v36 = vmul.f32 %v896_v34, %v38_v31  ;;  %v898_v55 = vpop.eup %897 }
 0x118   : > { %v335_v39 = vadd.f32 %v334_v35, %v333_v36  ;;  %v572_v40 = vpop.f32.mrb[4].mxu0 }
 0x119   : > { %v573_v41 = vadd.f32 %v572_v40, %v33_v37  ;;  %v574_v42 = vpop.f32.mrb[5].mxu0  ;;  %v613_v49 = vpop.f32.mrb[4].mxu1 }
 0x11a   : > { %899 = vtanh.f32 %v335_v39  ;;  %339 = vst [vmem:[#allocation3] sm:$0xff] %v335_v39  ;;  %v575_v43 = vadd.f32 %v574_v42, %v34_v38  ;;  %v576_v44 = vpop.f32.mrb[6].mxu0  ;;  %v615_v50 = vpop.f32.mrb[5].mxu1  ;;  %v614_v58 = vadd.f32 %v613_v49, %v35_v54 }
 0x11b   : > { %v767_v45 = vmul.f32 -1.442695, %v573_v41  ;;  %v577_v46 = vpop.f32.mrb[7].mxu0  ;;  %v616_v51 = vadd.f32 %v615_v50, %v36_v48  ;;  %v617_v52 = vpop.f32.mrb[6].mxu1 }
 0x11c   : > { %v768_v47 = vmul.f32 -1.442695, %v575_v43  ;;  %v618_v53 = vpop.f32.mrb[7].mxu1 }
 0x11d   : > { %901 = vpow2.f32 %v767_v45  ;;  %v769_v56 = vmul.f32 -1.442695, %v616_v51 }
 0x11e   : > { %903 = vpow2.f32 %v768_v47 }
 0x11f   : > { %905 = vpow2.f32 %v769_v56 }
 0x120   : > { %907 = vtanh.f32 %v614_v58 }
 0x124   : > { %v900_v57 = vpop.eup %899 }
 0x125   : > { %v337_v59 = vmul.f32 %v900_v57, %v898_v55 }
 0x127   : > { %v902_v60 = vpop.eup %901  ;;  %338 = vst [vmem:[#allocation2] sm:$0xff] %v337_v59 }
 0x128   : > { %v904_v61 = vpop.eup %903  ;;  %v623_v62 = vadd.f32 1.0, %v902_v60 }
 0x129   : > { %v629_v63 = vadd.f32 1.0, %v904_v61  ;;  %v906_v0 = vpop.eup %905 }
 0x12a   : > { %909 = vrcp.f32 %v623_v62  ;;  %v908_v1 = vpop.eup %907  ;;  %v636_v4 = vadd.f32 1.0, %v906_v0 }
 0x12b   : > { %911 = vrcp.f32 %v629_v63 }
 0x12c   : > { %913 = vrcp.f32 %v636_v4 }
 0x134   : > { %v910_v3 = vpop.eup %909 }
 0x135   : > { %v912_v5 = vpop.eup %911  ;;  %v640_v6 = vmul.f32 %v910_v3, %v908_v1 }
 0x136   : > { %v639_v7 = vmul.f32 %v912_v5, %v343_v2  ;;  %v914_v9 = vpop.eup %913 }
 0x138   : > { %v641_v8 = vadd.f32 %v640_v6, %v639_v7 }
 0x13a   : > { %915 = vtanh.f32 %v641_v8  ;;  %645 = vst [vmem:[#allocation3 + $0x8] sm:$0xff] %v641_v8 }
 0x143   :  { %24 = sbr.rel (!%p22_p0) target bundleno = 3 (0x3), region = 44 }
 0x144   : > { %v916_v10 = vpop.eup %915 }
 0x145   : > { %v643_v11 = vmul.f32 %v916_v10, %v914_v9 }
 0x147   : > { %644 = vst [vmem:[#allocation2 + $0x8] sm:$0xff] %v643_v11  ;;  %v777_v12 = vpack.c.bf16 %v643_v11, %v337_v59 }
 0x149   : > { %778 = vst [vmem:[%s650_s10] sm:$0xff] %v777_v12  }

// kernel: _lambda_.45
= control target key start
LH: loop header
LB: loop body
LE: loop exit
PB: predicated region body
PF: predicated region fallthrough
CT: control target
= control target key end

     0   :  { %s314_s1 = inlined_call_operand.vmem [shape: bf16[128,128], index: 1, kind: input, shape index: {}]   ;;  %s315_s0 = inlined_call_operand.vmem [shape: bf16[24,128], index: 0, kind: input, shape index: {}]   ;;  %s316_s2 = inlined_call_operand.vmem [shape: f32[1,128], index: 2, kind: input, shape index: {}]   ;;  %s317_s3 = inlined_call_operand.vmem [shape: f32[1,128], index: 3, kind: input, shape index: {}]   ;;  %s318_s4 = inlined_call_operand.vmem [shape: f32[24,128], index: 4, kind: output, shape index: {}]  }
   0x1   :  { %v234_v0 = vld [vmem:[%s314_s1] sm:$0xff]   ;;  %v235_v1 = vld [vmem:[%s314_s1 + $0x8] sm:$0xff]   ;;  %v236_v2 = vld [vmem:[%s314_s1 + $0x10] sm:$0xff]  }
   0x2   :  { %214 = vmatprep.subr.bf16.mxu0 %v234_v0  ;;  %v237_v3 = vld [vmem:[%s314_s1 + $0x18] sm:$0xff]   ;;  %v242_v4 = vld [vmem:[%s315_s0] sm:$0xff]   ;;  %v239_v6 = vld [vmem:[%s314_s1 + $0x28] sm:$0xff]  }
   0x3   :  { %215 = vmatpush3.bf16.msra.mxu0 %v234_v0  ;;  %230 = vmatprep.mubr.bf16.mxu0 %v242_v4  ;;  %v238_v5 = vld [vmem:[%s314_s1 + $0x20] sm:$0xff]   ;;  %v240_v7 = vld [vmem:[%s314_s1 + $0x30] sm:$0xff]   ;;  %v241_v8 = vld [vmem:[%s314_s1 + $0x38] sm:$0xff]  }
   0x4   :  { %216 = vmatprep.subr.bf16.mxu0 %v235_v1  ;;  %v243_v9 = vld [vmem:[%s315_s0 + $0x8] ss:$0 sps:$4 sm:$0xff]   ;;  %v202_v10 = vld [vmem:[%s316_s2] ss:$0 sm:$0xff] }
   0x5   :  { %v203_v12 = vld [vmem:[%s317_s3] ss:$0 sm:$0xff] }
   0x7   :  { %217 = vmatpush3.bf16.msra.mxu0 %v235_v1 }
   0x8   :  { %218 = vmatprep.subr.bf16.mxu0 %v236_v2 }
   0xb   :  { %219 = vmatpush3.bf16.msra.mxu0 %v236_v2 }
   0xc   :  { %220 = vmatprep.subr.bf16.mxu0 %v237_v3 }
   0xf   :  { %221 = vmatpush3.bf16.msra.mxu0 %v237_v3 }
  0x10   :  { %222 = vmatprep.subr.bf16.mxu0 %v238_v5 }
  0x13   :  { %223 = vmatpush3.bf16.msra.mxu0 %v238_v5 }
  0x14   :  { %224 = vmatprep.subr.bf16.mxu0 %v239_v6 }
  0x17   :  { %225 = vmatpush3.bf16.msra.mxu0 %v239_v6 }
  0x18   :  { %226 = vmatprep.subr.bf16.mxu0 %v240_v7 }
  0x1b   :  { %227 = vmatpush3.bf16.msra.mxu0 %v240_v7 }
  0x1c   :  { %228 = vmatprep.subr.bf16.mxu0 %v241_v8 }
  0x1f   :  { %229 = vmatpush3.bf16.msra.mxu0 %v241_v8 }
  0x22   :  { %231 = vmatmul.mubr.bf16.vlgmr.msra.gmra.mrb[0].mxu0 %v243_v9 }
  0xf5   :  { %v232_v11 = vpop.f32.mrb[0].mxu0 }
  0xf6   :  { %v174_v13 = vmul.f32 %v232_v11, %v202_v10  ;;  %v139_v14 = vpop.f32.mrb[1].mxu0 }
  0xf7   :  { %v172_v15 = vmul.f32 %v202_v10, %v139_v14  ;;  %v233_v16 = vpop.f32.mrb[2].mxu0 }
  0xf8   :  { %v184_v17 = vadd.f32 %v203_v12, %v174_v13  ;;  %v142_v18 = vpop.f32.mrb[3].mxu0 }
  0xf9   :  { %v182_v19 = vadd.f32 %v203_v12, %v172_v15  ;;  %v173_v20 = vmul.f32 %v202_v10, %v142_v18 }
  0xfa   :  { %187 = vst [vmem:[%s318_s4 + $0x10] sm:$0xff] %v184_v17 }
  0xfb   :  { %185 = vst [vmem:[%s318_s4] sm:$0xff] %v182_v19  ;;  %v183_v21 = vadd.f32 %v203_v12, %v173_v20 }
  0xfd   :  { %186 = vst [vmem:[%s318_s4 + $0x8] sm:$0xff] %v183_v21 }

// kernel: _lambda_.46
= control target key start
LH: loop header
LB: loop body
LE: loop exit
PB: predicated region body
PF: predicated region fallthrough
CT: control target
= control target key end

     0   :  { %s1254_s15 = smov 0   ;;  %s1256_s16 = smov 0   ;;  %s1446_s0 = inlined_call_operand.vmem [shape: bf16[2,24,128], index: 0, kind: input, shape index: {}]   ;;  %s1447_s1 = inlined_call_operand.vmem [shape: bf16[4,128,128], index: 1, kind: input, shape index: {}]   ;;  %s1448_s2 = inlined_call_operand.vmem [shape: f32[1,128], index: 2, kind: input, shape index: {}]   ;;  %s1449_s3 = inlined_call_operand.vmem [shape: f32[1,128], index: 3, kind: input, shape index: {}]   ;;  %s1450_s4 = inlined_call_operand.vmem [shape: bf16[2,16,128], index: 4, kind: output, shape index: {}]  }
   0x1   :  { %s1258_s17 = smov 0  }
   0x2 LB: > { %s26_s18 = sadd.s32 1, %s1221_s16  ;;  %p910_p0 = scmp.ge.s32.totalorder %s1225_s17, 1  ;;  %s1225_s17 = sphi %s1258_s17, %s14_s17   ;;  %s1221_s16 = sphi %s1256_s16, %s1452_s16   ;;  %s1217_s15 = sphi %s1254_s15, %s1451_s15  }
   0x3   : > { %p28_p1 = scmp.ge.s32.totalorder %s26_s18, 2  ;;  %p201_p2 = scmp.lt.s32.totalorder %s1225_s17, 3 }
   0x5   : > { %s1454_s18 = smov (%p28_p1, %s26_s18), 0  ;;  %p202_p3 = pnand %p910_p0, %p201_p2 }
   0x6   : > { %v1166_v0 = vld [vmem:[%s1447_s1 + $0x40] sm:$0xff] (!%p202_p3)   ;;  %v1227_v1 = vmov (!%p202_p3), 0.0   ;;  %v1168_v3 = vld [vmem:[%s1447_s1 + $0x48] sm:$0xff] (!%p202_p3)   ;;  %vm1228_vm0 = vmmov (!%p202_p3), 0   ;;  %p240_p4 = scmp.lt.s32.totalorder (!%p202_p3), %s1217_s15, 1  ;;  %v1170_v5 = vld [vmem:[%s1447_s1 + $0x50] sm:$0xff] (!%p202_p3)  }
   0x7   : > { %205 = sbr.rel (%p202_p3) target bundleno = 297 (0x129), region = 36  ;;  %1049 = vmatprep.subr.bf16.mxu1 (!%p202_p3), %v1227_v1  ;;  %1089 = vmatprep.subr.bf16.mxu0 (!%p202_p3), %v1227_v1  ;;  %v1167_v2 = vld [vmem:[%s1447_s1 + $0x80] sm:$0xff] (!%p202_p3)   ;;  %v1169_v4 = vld [vmem:[%s1447_s1 + $0x88] sm:$0xff] (!%p202_p3)   ;;  %v1171_v6 = vld [vmem:[%s1447_s1 + $0x90] sm:$0xff] (!%p202_p3)   ;;  %vm310_vm1 = vsmask.f32 (!%p202_p3), 7424 }
   0x8   : > { %1050 = vmatpush3.bf16.msra.mxu1 (!%p202_p3), %v1166_v0  ;;  %1065 = vmatprep.mubr.msk.bf16.mxu1 (!%p202_p3), %vm1228_vm0, %v1227_v1  ;;  %v1172_v7 = vld [vmem:[%s1447_s1 + $0x58] sm:$0xff] (!%p202_p3)   ;;  %v1174_v9 = vld [vmem:[%s1447_s1 + $0x60] sm:$0xff] (!%p202_p3)   ;;  %v1176_v15 = vld [vmem:[%s1447_s1 + $0x68] sm:$0xff] (!%p202_p3)   ;;  %vm529_vm2 = vcmask (!%p202_p3), 1046528   ;;  %vm646_vm3 = vsmask.f32 (!%p202_p3), 6400 }
   0x9   : > { %1090 = vmatpush3.bf16.msra.mxu0 (!%p202_p3), %v1167_v2  ;;  %1051 = vmatprep.subr.bf16.mxu1 (!%p202_p3), %v1227_v1  ;;  %v1173_v8 = vld [vmem:[%s1447_s1 + $0x98] sm:$0xff] (!%p202_p3)   ;;  %v1175_v10 = vld [vmem:[%s1447_s1 + $0xa0] sm:$0xff] (!%p202_p3)   ;;  %v1177_v16 = vld [vmem:[%s1447_s1 + $0xa8] sm:$0xff] (!%p202_p3)  }
   0xa   : > { %1091 = vmatprep.subr.bf16.mxu0 (!%p202_p3), %v1227_v1  ;;  %1105 = vmatprep.mubr.msk.bf16.mxu0 (!%p202_p3), %vm1228_vm0, %v1227_v1  ;;  %v1178_v19 = vld [vmem:[%s1447_s1 + $0x70] sm:$0xff] (!%p202_p3)   ;;  %v1180_v25 = vld [vmem:[%s1447_s1 + $0x78] sm:$0xff] (!%p202_p3)   ;;  %v1184_v32 = vld [vmem:[%s1447_s1] sm:$0xff] (!%p202_p3)  }
   0xb   : > { %v1179_v23 = vld [vmem:[%s1447_s1 + $0xb0] sm:$0xff] (!%p202_p3)   ;;  %v1181_v26 = vld [vmem:[%s1447_s1 + $0xb8] sm:$0xff] (!%p202_p3)   ;;  %v1186_v34 = vld [vmem:[%s1447_s1 + $0xc0] sm:$0xff] (!%p202_p3)  }
   0xc   : > { %1052 = vmatpush3.bf16.msra.mxu1 (!%p202_p3), %v1168_v3  ;;  %v1187_v35 = vld [vmem:[%s1447_s1 + $0x8] sm:$0xff] (!%p202_p3)   ;;  %v1189_v37 = vld [vmem:[%s1447_s1 + $0x10] sm:$0xff] (!%p202_p3)   ;;  %v1191_v39 = vld [vmem:[%s1447_s1 + $0x18] sm:$0xff] (!%p202_p3)  }
   0xd   : > { %1092 = vmatpush3.bf16.msra.mxu0 (!%p202_p3), %v1169_v4  ;;  %1053 = vmatprep.subr.bf16.mxu1 (!%p202_p3), %v1227_v1  ;;  %v1188_v36 = vld [vmem:[%s1447_s1 + $0xc8] sm:$0xff] (!%p202_p3)   ;;  %v1190_v38 = vld [vmem:[%s1447_s1 + $0xd0] sm:$0xff] (!%p202_p3)   ;;  %v1192_v40 = vld [vmem:[%s1447_s1 + $0xd8] sm:$0xff] (!%p202_p3)  }
   0xe   : > { %s1456_s15 = smov (!%p240_p4, %s1217_s15), 1  ;;  %1093 = vmatprep.subr.bf16.mxu0 %v1227_v1  ;;  %v1193_v41 = vld [vmem:[%s1447_s1 + $0x20] sm:$0xff]   ;;  %v1195_v44 = vld [vmem:[%s1447_s1 + $0x28] sm:$0xff]   ;;  %v1197_v50 = vld [vmem:[%s1447_s1 + $0x30] sm:$0xff]  }
   0xf   : > { %s1139_s5 = smul.u32 12, %s1456_s15  ;;  %v1194_v42 = vld [vmem:[%s1447_s1 + $0xe0] sm:$0xff]   ;;  %v1196_v45 = vld [vmem:[%s1447_s1 + $0xe8] sm:$0xff]   ;;  %v1198_v51 = vld [vmem:[%s1447_s1 + $0xf0] sm:$0xff]   ;;  %s1005_s26 = sshll.u32 %s1456_s15, 3 }
  0x10   : > { %1054 = vmatpush3.bf16.msra.mxu1 %v1170_v5  ;;  %v1199_v56 = vld [vmem:[%s1447_s1 + $0x38] sm:$0xff]   ;;  %v999_v5 = vld [vmem:[%s1448_s2] ss:$0 sm:$0xff]  ;;  %s262_s29 = scalar_lea.vmem %s1450_s4, %s1005_s26 }
  0x11   : > { %1094 = vmatpush3.bf16.msra.mxu0 %v1171_v6  ;;  %1055 = vmatprep.subr.bf16.mxu1 %v1227_v1  ;;  %s1314_s12 = scalar_lea.vmem %s1446_s0, %s1139_s5  ;;  %v1200_v57 = vld [vmem:[%s1447_s1 + $0xf8] sm:$0xff]  }
  0x12   : > { %1095 = vmatprep.subr.bf16.mxu0 %v1227_v1  ;;  %v282_v11 = vld [vmem:[%s1314_s12] sm:$0xf]  ;;  %v283_v12 = vld [vmem:[%s1314_s12 + $0x4] sm:$0xf] }
  0x13   : > { %v930_v13 = vcombine.low %v282_v11, %v283_v12  ;;  %v1183_v14 = vld [vmem:[%s1314_s12 + $0x8] ss:$0 sps:$4 sm:$0x11]   ;;  %v508_v18 = vld [vmem:[%s1314_s12] sm:$0xe] }
  0x14   : > { %1056 = vmatpush3.bf16.msra.mxu1 %v1172_v7  ;;  %v319_v22 = vshll.u32 %v1183_v14, 16  ;;  %v1343_v24 = vcombine.low %v508_v18, %v283_v12  ;;  %v531_v30 = vrot.slane %v1183_v14, 1  ;;  %v1202_v43 = vld [vmem:[%s1314_s12 + $0x8] ss:$0 sps:$4 sm:$0x33]   ;;  %v1201_v60 = vld [vmem:[%s1314_s12] sm:$0xff]  }
  0x15   : > { %1096 = vmatpush3.bf16.msra.mxu0 %v1173_v8  ;;  %1057 = vmatprep.subr.bf16.mxu1 %v1227_v1  ;;  %v314_v17 = vshll.u32 %v930_v13, 16  ;;  %v312_v20 = vshrl.u32 %v930_v13, 16  ;;  %v656_v48 = vshrl.u32 %v1202_v43, 16  ;;  %v659_v49 = vshll.u32 %v1202_v43, 16  ;;  %v1000_v12 = vld [vmem:[%s1449_s3] ss:$0 sm:$0xff] }
  0x16   : > { %1097 = vmatprep.subr.bf16.mxu0 %v1227_v1  ;;  %v321_v28 = vrot.slane %v319_v22, 1  ;;  %v530_v29 = vrot.slane %v1343_v24, 1  ;;  %v648_v46 = vshrl.u32 %v1343_v24, 16  ;;  %v651_v47 = vshll.u32 %v1343_v24, 16 }
  0x17   : > { %v316_v21 = vrot.slane %v314_v17, 1  ;;  %v658_v54 = vrot.slane %v656_v48, 1  ;;  %v661_v55 = vrot.slane %v659_v49, 2 }
  0x18   : > { %1058 = vmatpush3.bf16.msra.mxu1 %v1174_v9  ;;  %v532_v33 = vsel %vm529_vm2, %v530_v29, %v531_v30  ;;  %v650_v52 = vrot.slane %v648_v46, 1  ;;  %v653_v53 = vrot.slane %v651_v47, 2 }
  0x19   : > { %1098 = vmatpush3.bf16.msra.mxu0 %v1175_v10  ;;  %1059 = vmatprep.subr.bf16.mxu1 %v1227_v1  ;;  %v317_v27 = vor.u32 %v316_v21, %v312_v20  ;;  %v662_v59 = vor.u32 %v661_v55, %v658_v54 }
  0x1a   : > { %1099 = vmatprep.subr.bf16.mxu0 %v1227_v1  ;;  %v654_v58 = vor.u32 %v653_v53, %v650_v52 }
  0x1b   : > { %v322_v31 = vsel %vm310_vm1, %v317_v27, %v321_v28 }
  0x1c   : > { %1060 = vmatpush3.bf16.msra.mxu1 %v1176_v15  ;;  %v663_v61 = vsel %vm646_vm3, %v654_v58, %v662_v59 }
  0x1d   : > { %1100 = vmatpush3.bf16.msra.mxu0 %v1177_v16  ;;  %1061 = vmatprep.subr.bf16.mxu1 %v1227_v1 }
  0x1e   : > { %1101 = vmatprep.subr.bf16.mxu0 %v1227_v1 }
  0x20   : > { %1062 = vmatpush3.bf16.msra.mxu1 %v1178_v19 }
  0x21   : > { %1102 = vmatpush3.bf16.msra.mxu0 %v1179_v23  ;;  %1063 = vmatprep.subr.bf16.mxu1 %v1227_v1 }
  0x22   : > { %1103 = vmatprep.subr.bf16.mxu0 %v1227_v1 }
  0x24   : > { %1064 = vmatpush3.bf16.msra.mxu1 %v1180_v25 }
  0x25   : > { %1104 = vmatpush3.bf16.msra.mxu0 %v1181_v26  ;;  %1069 = vmatprep.subr.bf16.mxu1 %v1227_v1 }
  0x26   : > { %1109 = vmatprep.subr.bf16.mxu0 %v1227_v1 }
  0x27   : > { %1066 = vmatmul.mubr.bf16.vlgmr.msra.gmra.mrb[0].mxu1 %v322_v31 }
  0x28   : > { %1070 = vmatpush3.bf16.msra.mxu1 %v1184_v32  ;;  %1106 = vmatmul.mubr.bf16.vlgmr.msra.gmra.mrb[0].mxu0 %v532_v33 }
  0x29   : > { %1110 = vmatpush3.bf16.msra.mxu0 %v1186_v34  ;;  %1071 = vmatprep.subr.bf16.mxu1 %v1227_v1 }
  0x2a   : > { %1111 = vmatprep.subr.bf16.mxu0 %v1227_v1  ;;  %1085 = vmatprep.mubr.msk.bf16.mxu1 %vm1228_vm0, %v1227_v1 }
  0x2b   : > { %1125 = vmatprep.mubr.msk.bf16.mxu0 %vm1228_vm0, %v1227_v1 }
  0x2c   : > { %1072 = vmatpush3.bf16.msra.mxu1 %v1187_v35 }
  0x2d   : > { %1112 = vmatpush3.bf16.msra.mxu0 %v1188_v36  ;;  %1073 = vmatprep.subr.bf16.mxu1 %v1227_v1 }
  0x2e   : > { %1113 = vmatprep.subr.bf16.mxu0 %v1227_v1 }
  0x30   : > { %1074 = vmatpush3.bf16.msra.mxu1 %v1189_v37 }
  0x31   : > { %1114 = vmatpush3.bf16.msra.mxu0 %v1190_v38  ;;  %1075 = vmatprep.subr.bf16.mxu1 %v1227_v1 }
  0x32   : > { %1115 = vmatprep.subr.bf16.mxu0 %v1227_v1 }
  0x34   : > { %1076 = vmatpush3.bf16.msra.mxu1 %v1191_v39 }
  0x35   : > { %1116 = vmatpush3.bf16.msra.mxu0 %v1192_v40  ;;  %1077 = vmatprep.subr.bf16.mxu1 %v1227_v1 }
  0x36   : > { %1117 = vmatprep.subr.bf16.mxu0 %v1227_v1 }
  0x38   : > { %1078 = vmatpush3.bf16.msra.mxu1 %v1193_v41 }
  0x39   : > { %1118 = vmatpush3.bf16.msra.mxu0 %v1194_v42  ;;  %1079 = vmatprep.subr.bf16.mxu1 %v1227_v1 }
  0x3a   : > { %1119 = vmatprep.subr.bf16.mxu0 %v1227_v1 }
  0x3c   : > { %1080 = vmatpush3.bf16.msra.mxu1 %v1195_v44 }
  0x3d   : > { %1120 = vmatpush3.bf16.msra.mxu0 %v1196_v45  ;;  %1081 = vmatprep.subr.bf16.mxu1 %v1227_v1 }
  0x3e   : > { %1121 = vmatprep.subr.bf16.mxu0 %v1227_v1 }
  0x40   : > { %1082 = vmatpush3.bf16.msra.mxu1 %v1197_v50 }
  0x41   : > { %1122 = vmatpush3.bf16.msra.mxu0 %v1198_v51  ;;  %1083 = vmatprep.subr.bf16.mxu1 %v1227_v1 }
  0x42   : > { %1123 = vmatprep.subr.bf16.mxu0 %v1227_v1 }
  0x44   : > { %1084 = vmatpush3.bf16.msra.mxu1 %v1199_v56 }
  0x45   : > { %1124 = vmatpush3.bf16.msra.mxu0 %v1200_v57 }
  0x47   : > { %1086 = vmatmul.mubr.bf16.vlgmr.msra.gmra.mrb[0].mxu1 %v1201_v60 }
  0x48   : > { %1126 = vmatmul.mubr.bf16.vlgmr.msra.gmra.mrb[0].mxu0 %v663_v61 }
 0x11a   : > { %v501_v62 = vpop.f32.mrb[0].mxu1 }
 0x11b   : > { %v747_v63 = vpop.f32.mrb[0].mxu0  ;;  %v1087_v0 = vpop.f32.mrb[1].mxu1 }
 0x11c   : > { %v1129_v2 = vadd.f32 %v747_v63, %v501_v62  ;;  %v1127_v3 = vpop.f32.mrb[1].mxu0  ;;  %v504_v4 = vpop.f32.mrb[2].mxu1 }
 0x11d   : > { %v750_v6 = vpop.f32.mrb[2].mxu0  ;;  %v1088_v1 = vpop.f32.mrb[3].mxu1 }
 0x11e   : > { %v756_v7 = vmax.f32 %v1129_v2, 0.0  ;;  %v1130_v8 = vadd.f32 %v750_v6, %v504_v4  ;;  %v1128_v9 = vpop.f32.mrb[3].mxu0 }
 0x120   : > { %v765_v10 = vmul.f32 %v999_v5, %v756_v7  ;;  %v757_v11 = vmax.f32 %v1130_v8, 0.0 }
 0x122   : > { %v766_v13 = vmul.f32 %v999_v5, %v757_v11  ;;  %v774_v14 = vadd.f32 %v1000_v12, %v765_v10 }
 0x124   : > { %v775_v15 = vadd.f32 %v1000_v12, %v766_v13 }
 0x126   : > { %v1011_v16 = vpack.c.bf16 %v775_v15, %v774_v14 }
 0x128   : > { %1012 = vst [vmem:[%s262_s29] sm:$0xff] %v1011_v16  }
 0x129 PF: > { %s14_s17 = sadd.s32 1, %s1225_s17   ;;  %s1451_s15 = smov %s1221_s16 }
 0x12a   : > { %p11_p5 = scmp.ge.s32.totalorder %s14_s17, 4   ;;  %s1452_s16 = smov %s1454_s18 }
 0x12c   :  { %13 = sbr.rel (!%p11_p5) target bundleno = 2 (0x2), region = 78 }

// kernel: _lambda_.47
= control target key start
LH: loop header
LB: loop body
LE: loop exit
PB: predicated region body
PF: predicated region fallthrough
CT: control target
= control target key end

     0   :  { %s1056_s15 = smov 0   ;;  %s1058_s16 = smov 0   ;;  %s1208_s0 = inlined_call_operand.vmem [shape: bf16[2,24,128], index: 0, kind: input, shape index: {}]   ;;  %s1209_s1 = inlined_call_operand.vmem [shape: bf16[3,128,128], index: 1, kind: input, shape index: {}]   ;;  %s1210_s2 = inlined_call_operand.vmem [shape: f32[1,128], index: 2, kind: input, shape index: {}]   ;;  %s1211_s3 = inlined_call_operand.vmem [shape: f32[1,128], index: 3, kind: input, shape index: {}]   ;;  %s1212_s4 = inlined_call_operand.vmem [shape: bf16[2,16,128], index: 4, kind: output, shape index: {}]  }
   0x1   :  { %s1060_s17 = smov 0  }
   0x2 LB: > { %s26_s18 = sadd.s32 1, %s1023_s16  ;;  %p779_p0 = scmp.ge.s32.totalorder %s1027_s17, 1  ;;  %s1027_s17 = sphi %s1060_s17, %s14_s17   ;;  %s1023_s16 = sphi %s1058_s16, %s1214_s16   ;;  %s1019_s15 = sphi %s1056_s15, %s1213_s15  }
   0x3   : > { %p28_p1 = scmp.ge.s32.totalorder %s26_s18, 2  ;;  %p201_p2 = scmp.lt.s32.totalorder %s1027_s17, 3 }
   0x5   : > { %s1216_s18 = smov (%p28_p1, %s26_s18), 0  ;;  %p202_p3 = pnand %p779_p0, %p201_p2 }
   0x6   : > { %v977_v0 = vld [vmem:[%s1209_s1] sm:$0xff] (!%p202_p3)   ;;  %v1029_v1 = vmov (!%p202_p3), 0.0   ;;  %v978_v2 = vld [vmem:[%s1209_s1 + $0x8] sm:$0xff] (!%p202_p3)   ;;  %vm1030_vm0 = vmmov (!%p202_p3), 0   ;;  %p240_p4 = scmp.lt.s32.totalorder (!%p202_p3), %s1019_s15, 1  ;;  %v979_v3 = vld [vmem:[%s1209_s1 + $0x10] sm:$0xff] (!%p202_p3)  }
   0x7   : > { %205 = sbr.rel (%p202_p3) target bundleno = 296 (0x128), region = 36  ;;  %904 = vmatprep.subr.bf16.mxu0 (!%p202_p3), %v1029_v1  ;;  %884 = vmatprep.subr.bf16.mxu1 (!%p202_p3), %v1029_v1  ;;  %v985_v4 = vld [vmem:[%s1209_s1 + $0x40] sm:$0xff] (!%p202_p3)   ;;  %v980_v5 = vld [vmem:[%s1209_s1 + $0x18] sm:$0xff] (!%p202_p3)   ;;  %v988_v6 = vld [vmem:[%s1209_s1 + $0x48] sm:$0xff] (!%p202_p3)   ;;  %vm310_vm1 = vsmask.f32 (!%p202_p3), 7424 }
   0x8   : > { %905 = vmatpush3.bf16.msra.mxu0 (!%p202_p3), %v977_v0  ;;  %920 = vmatprep.mubr.msk.bf16.mxu0 (!%p202_p3), %vm1030_vm0, %v1029_v1  ;;  %v981_v7 = vld [vmem:[%s1209_s1 + $0x20] sm:$0xff] (!%p202_p3)   ;;  %v990_v8 = vld [vmem:[%s1209_s1 + $0x50] sm:$0xff] (!%p202_p3)   ;;  %v982_v9 = vld [vmem:[%s1209_s1 + $0x28] sm:$0xff] (!%p202_p3)   ;;  %vm529_vm2 = vcmask (!%p202_p3), 1046528  }
   0x9   : > { %906 = vmatprep.subr.bf16.mxu0 (!%p202_p3), %v1029_v1  ;;  %900 = vmatprep.mubr.msk.bf16.mxu1 (!%p202_p3), %vm1030_vm0, %v1029_v1  ;;  %v992_v10 = vld [vmem:[%s1209_s1 + $0x58] sm:$0xff] (!%p202_p3)   ;;  %v983_v11 = vld [vmem:[%s1209_s1 + $0x30] sm:$0xff] (!%p202_p3)   ;;  %v994_v12 = vld [vmem:[%s1209_s1 + $0x60] sm:$0xff] (!%p202_p3)  }
   0xa   : > { %885 = vmatpush3.bf16.msra.mxu1 (!%p202_p3), %v985_v4  ;;  %v984_v15 = vld [vmem:[%s1209_s1 + $0x38] sm:$0xff] (!%p202_p3)   ;;  %v996_v18 = vld [vmem:[%s1209_s1 + $0x68] sm:$0xff] (!%p202_p3)   ;;  %v987_v21 = vld [vmem:[%s1209_s1 + $0x80] sm:$0xff] (!%p202_p3)  }
   0xb   : > { %886 = vmatprep.subr.bf16.mxu1 (!%p202_p3), %v1029_v1  ;;  %v998_v22 = vld [vmem:[%s1209_s1 + $0x70] sm:$0xff] (!%p202_p3)   ;;  %v989_v26 = vld [vmem:[%s1209_s1 + $0x88] sm:$0xff] (!%p202_p3)   ;;  %v1000_v27 = vld [vmem:[%s1209_s1 + $0x78] sm:$0xff] (!%p202_p3)  }
   0xc   : > { %907 = vmatpush3.bf16.msra.mxu0 (!%p202_p3), %v978_v2  ;;  %v991_v30 = vld [vmem:[%s1209_s1 + $0x90] sm:$0xff] (!%p202_p3)   ;;  %v993_v32 = vld [vmem:[%s1209_s1 + $0x98] sm:$0xff] (!%p202_p3)   ;;  %v995_v33 = vld [vmem:[%s1209_s1 + $0xa0] sm:$0xff] (!%p202_p3)  }
   0xd   : > { %908 = vmatprep.subr.bf16.mxu0 (!%p202_p3), %v1029_v1  ;;  %v997_v34 = vld [vmem:[%s1209_s1 + $0xa8] sm:$0xff] (!%p202_p3)   ;;  %v999_v36 = vld [vmem:[%s1209_s1 + $0xb0] sm:$0xff] (!%p202_p3)   ;;  %v1003_v38 = vld [vmem:[%s1209_s1 + $0xb8] sm:$0xff] (!%p202_p3)  }
   0xe   : > { %s1218_s15 = smov (!%p240_p4, %s1019_s15), 1  ;;  %887 = vmatpush3.bf16.msra.mxu1 %v988_v6  ;;  %v843_v49 = vld [vmem:[%s1210_s2] ss:$0 sm:$0xff] }
   0xf   : > { %s950_s25 = smul.u32 12, %s1218_s15  ;;  %888 = vmatprep.subr.bf16.mxu1 %v1029_v1  ;;  %v844_v56 = vld [vmem:[%s1211_s3] ss:$0 sm:$0xff]  ;;  %s849_s6 = sshll.u32 %s1218_s15, 3 }
  0x10   : > { %909 = vmatpush3.bf16.msra.mxu0 %v979_v3  ;;  %s262_s9 = scalar_lea.vmem %s1212_s4, %s849_s6 }
  0x11   : > { %s1100_s30 = scalar_lea.vmem %s1208_s0, %s950_s25  ;;  %910 = vmatprep.subr.bf16.mxu0 %v1029_v1 }
  0x12   : > { %889 = vmatpush3.bf16.msra.mxu1 %v990_v8  ;;  %v282_v13 = vld [vmem:[%s1100_s30] sm:$0xf]  ;;  %v283_v14 = vld [vmem:[%s1100_s30 + $0x4] sm:$0xf] }
  0x13   : > { %890 = vmatprep.subr.bf16.mxu1 %v1029_v1  ;;  %v799_v16 = vcombine.low %v282_v13, %v283_v14  ;;  %v1002_v17 = vld [vmem:[%s1100_s30 + $0x8] ss:$0 sps:$4 sm:$0x11]   ;;  %v986_v20 = vld [vmem:[%s1100_s30] sm:$0xff]  }
  0x14   : > { %911 = vmatpush3.bf16.msra.mxu0 %v980_v5  ;;  %v319_v25 = vshll.u32 %v1002_v17, 16  ;;  %v508_v35 = vld [vmem:[%s1100_s30] sm:$0xe]  ;;  %v531_v40 = vrot.slane %v1002_v17, 1 }
  0x15   : > { %912 = vmatprep.subr.bf16.mxu0 %v1029_v1  ;;  %v314_v19 = vshll.u32 %v799_v16, 16  ;;  %v312_v23 = vshrl.u32 %v799_v16, 16  ;;  %v834_v37 = vcombine.low %v508_v35, %v283_v14 }
  0x16   : > { %891 = vmatpush3.bf16.msra.mxu1 %v992_v10  ;;  %v321_v29 = vrot.slane %v319_v25, 1 }
  0x17   : > { %892 = vmatprep.subr.bf16.mxu1 %v1029_v1  ;;  %v316_v24 = vrot.slane %v314_v19, 1  ;;  %v530_v39 = vrot.slane %v834_v37, 1 }
  0x18   : > { %913 = vmatpush3.bf16.msra.mxu0 %v981_v7 }
  0x19   : > { %914 = vmatprep.subr.bf16.mxu0 %v1029_v1  ;;  %v317_v28 = vor.u32 %v316_v24, %v312_v23  ;;  %v532_v41 = vsel %vm529_vm2, %v530_v39, %v531_v40 }
  0x1a   : > { %893 = vmatpush3.bf16.msra.mxu1 %v994_v12 }
  0x1b   : > { %894 = vmatprep.subr.bf16.mxu1 %v1029_v1  ;;  %v322_v31 = vsel %vm310_vm1, %v317_v28, %v321_v29 }
  0x1c   : > { %915 = vmatpush3.bf16.msra.mxu0 %v982_v9 }
  0x1d   : > { %916 = vmatprep.subr.bf16.mxu0 %v1029_v1 }
  0x1e   : > { %895 = vmatpush3.bf16.msra.mxu1 %v996_v18 }
  0x1f   : > { %896 = vmatprep.subr.bf16.mxu1 %v1029_v1 }
  0x20   : > { %917 = vmatpush3.bf16.msra.mxu0 %v983_v11 }
  0x21   : > { %918 = vmatprep.subr.bf16.mxu0 %v1029_v1 }
  0x22   : > { %897 = vmatpush3.bf16.msra.mxu1 %v998_v22 }
  0x23   : > { %898 = vmatprep.subr.bf16.mxu1 %v1029_v1 }
  0x24   : > { %919 = vmatpush3.bf16.msra.mxu0 %v984_v15 }
  0x25   : > { %924 = vmatprep.subr.bf16.mxu0 %v1029_v1 }
  0x26   : > { %899 = vmatpush3.bf16.msra.mxu1 %v1000_v27 }
  0x27   : > { %921 = vmatmul.mubr.bf16.vlgmr.msra.gmra.mrb[0].mxu0 %v986_v20 }
  0x28   : > { %925 = vmatpush3.bf16.msra.mxu0 %v987_v21  ;;  %940 = vmatprep.mubr.msk.bf16.mxu0 %vm1030_vm0, %v1029_v1 }
  0x29   : > { %926 = vmatprep.subr.bf16.mxu0 %v1029_v1  ;;  %901 = vmatmul.mubr.bf16.vlgmr.msra.gmra.mrb[0].mxu1 %v322_v31 }
  0x2c   : > { %927 = vmatpush3.bf16.msra.mxu0 %v989_v26 }
  0x2d   : > { %928 = vmatprep.subr.bf16.mxu0 %v1029_v1 }
  0x30   : > { %929 = vmatpush3.bf16.msra.mxu0 %v991_v30 }
  0x31   : > { %930 = vmatprep.subr.bf16.mxu0 %v1029_v1 }
  0x34   : > { %931 = vmatpush3.bf16.msra.mxu0 %v993_v32 }
  0x35   : > { %932 = vmatprep.subr.bf16.mxu0 %v1029_v1 }
  0x38   : > { %933 = vmatpush3.bf16.msra.mxu0 %v995_v33 }
  0x39   : > { %934 = vmatprep.subr.bf16.mxu0 %v1029_v1 }
  0x3c   : > { %935 = vmatpush3.bf16.msra.mxu0 %v997_v34 }
  0x3d   : > { %936 = vmatprep.subr.bf16.mxu0 %v1029_v1 }
  0x40   : > { %937 = vmatpush3.bf16.msra.mxu0 %v999_v36 }
  0x41   : > { %938 = vmatprep.subr.bf16.mxu0 %v1029_v1 }
  0x44   : > { %939 = vmatpush3.bf16.msra.mxu0 %v1003_v38 }
  0x47   : > { %941 = vmatmul.mubr.bf16.vlgmr.msra.gmra.mrb[0].mxu0 %v532_v41 }
  0xfc   : > { %v406_v42 = vpop.f32.mrb[0].mxu1 }
  0xfd   : > { %v902_v43 = vpop.f32.mrb[1].mxu1 }
  0xfe   : > { %v409_v44 = vpop.f32.mrb[2].mxu1 }
  0xff   : > { %v903_v45 = vpop.f32.mrb[3].mxu1 }
 0x11a   : > { %v616_v46 = vpop.f32.mrb[0].mxu0 }
 0x11b   : > { %v944_v47 = vadd.f32 %v616_v46, %v406_v42  ;;  %v942_v48 = vpop.f32.mrb[1].mxu0 }
 0x11c   : > { %v619_v50 = vpop.f32.mrb[2].mxu0 }
 0x11d   : > { %v625_v51 = vmax.f32 %v944_v47, 0.0  ;;  %v945_v52 = vadd.f32 %v619_v50, %v409_v44  ;;  %v943_v53 = vpop.f32.mrb[3].mxu0 }
 0x11f   : > { %v634_v54 = vmul.f32 %v843_v49, %v625_v51  ;;  %v626_v55 = vmax.f32 %v945_v52, 0.0 }
 0x121   : > { %v635_v57 = vmul.f32 %v843_v49, %v626_v55  ;;  %v643_v58 = vadd.f32 %v844_v56, %v634_v54 }
 0x123   : > { %v644_v59 = vadd.f32 %v844_v56, %v635_v57 }
 0x125   : > { %v855_v60 = vpack.c.bf16 %v644_v59, %v643_v58 }
 0x127   : > { %856 = vst [vmem:[%s262_s9] sm:$0xff] %v855_v60  }
 0x128 PF: > { %s14_s17 = sadd.s32 1, %s1027_s17   ;;  %s1213_s15 = smov %s1023_s16 }
 0x129   : > { %p11_p5 = scmp.ge.s32.totalorder %s14_s17, 4   ;;  %s1214_s16 = smov %s1216_s18 }
 0x12b   :  { %13 = sbr.rel (!%p11_p5) target bundleno = 2 (0x2), region = 77 }

// kernel: _lambda_.48
= control target key start
LH: loop header
LB: loop body
LE: loop exit
PB: predicated region body
PF: predicated region fallthrough
CT: control target
= control target key end

     0   :  { %s1054_s15 = smov 0   ;;  %s1056_s16 = smov 0   ;;  %s1206_s0 = inlined_call_operand.vmem [shape: bf16[2,24,128], index: 0, kind: input, shape index: {}]   ;;  %s1207_s1 = inlined_call_operand.vmem [shape: bf16[3,128,128], index: 1, kind: input, shape index: {}]   ;;  %s1208_s2 = inlined_call_operand.vmem [shape: f32[1,128], index: 2, kind: input, shape index: {}]   ;;  %s1209_s3 = inlined_call_operand.vmem [shape: f32[1,128], index: 3, kind: input, shape index: {}]   ;;  %s1210_s4 = inlined_call_operand.vmem [shape: bf16[2,16,128], index: 4, kind: output, shape index: {}]  }
   0x1   :  { %s1058_s17 = smov 0  }
   0x2 LB: > { %s26_s18 = sadd.s32 1, %s1021_s16  ;;  %p777_p0 = scmp.ge.s32.totalorder %s1025_s17, 1  ;;  %s1025_s17 = sphi %s1058_s17, %s14_s17   ;;  %s1021_s16 = sphi %s1056_s16, %s1212_s16   ;;  %s1017_s15 = sphi %s1054_s15, %s1211_s15  }
   0x3   : > { %p28_p1 = scmp.ge.s32.totalorder %s26_s18, 2  ;;  %p201_p2 = scmp.lt.s32.totalorder %s1025_s17, 3 }
   0x5   : > { %s1214_s18 = smov (%p28_p1, %s26_s18), 0  ;;  %p202_p3 = pnand %p777_p0, %p201_p2 }
   0x6   : > { %v975_v0 = vld [vmem:[%s1207_s1] sm:$0xff] (!%p202_p3)   ;;  %v1027_v1 = vmov (!%p202_p3), 0.0   ;;  %v976_v2 = vld [vmem:[%s1207_s1 + $0x8] sm:$0xff] (!%p202_p3)   ;;  %vm1028_vm0 = vmmov (!%p202_p3), 0   ;;  %p240_p4 = scmp.lt.s32.totalorder (!%p202_p3), %s1017_s15, 1  ;;  %v977_v3 = vld [vmem:[%s1207_s1 + $0x10] sm:$0xff] (!%p202_p3)  }
   0x7   : > { %205 = sbr.rel (%p202_p3) target bundleno = 294 (0x126), region = 36  ;;  %902 = vmatprep.subr.bf16.mxu0 (!%p202_p3), %v1027_v1  ;;  %882 = vmatprep.subr.bf16.mxu1 (!%p202_p3), %v1027_v1  ;;  %v983_v4 = vld [vmem:[%s1207_s1 + $0x40] sm:$0xff] (!%p202_p3)   ;;  %v978_v5 = vld [vmem:[%s1207_s1 + $0x18] sm:$0xff] (!%p202_p3)   ;;  %v986_v6 = vld [vmem:[%s1207_s1 + $0x48] sm:$0xff] (!%p202_p3)   ;;  %vm310_vm1 = vsmask.f32 (!%p202_p3), 7424 }
   0x8   : > { %903 = vmatpush3.bf16.msra.mxu0 (!%p202_p3), %v975_v0  ;;  %918 = vmatprep.mubr.msk.bf16.mxu0 (!%p202_p3), %vm1028_vm0, %v1027_v1  ;;  %v979_v7 = vld [vmem:[%s1207_s1 + $0x20] sm:$0xff] (!%p202_p3)   ;;  %v988_v8 = vld [vmem:[%s1207_s1 + $0x50] sm:$0xff] (!%p202_p3)   ;;  %v980_v9 = vld [vmem:[%s1207_s1 + $0x28] sm:$0xff] (!%p202_p3)   ;;  %vm529_vm2 = vcmask (!%p202_p3), 1046528  }
   0x9   : > { %904 = vmatprep.subr.bf16.mxu0 (!%p202_p3), %v1027_v1  ;;  %898 = vmatprep.mubr.msk.bf16.mxu1 (!%p202_p3), %vm1028_vm0, %v1027_v1  ;;  %v990_v10 = vld [vmem:[%s1207_s1 + $0x58] sm:$0xff] (!%p202_p3)   ;;  %v981_v11 = vld [vmem:[%s1207_s1 + $0x30] sm:$0xff] (!%p202_p3)   ;;  %v992_v12 = vld [vmem:[%s1207_s1 + $0x60] sm:$0xff] (!%p202_p3)  }
   0xa   : > { %883 = vmatpush3.bf16.msra.mxu1 (!%p202_p3), %v983_v4  ;;  %v982_v15 = vld [vmem:[%s1207_s1 + $0x38] sm:$0xff] (!%p202_p3)   ;;  %v994_v18 = vld [vmem:[%s1207_s1 + $0x68] sm:$0xff] (!%p202_p3)   ;;  %v985_v21 = vld [vmem:[%s1207_s1 + $0x80] sm:$0xff] (!%p202_p3)  }
   0xb   : > { %884 = vmatprep.subr.bf16.mxu1 (!%p202_p3), %v1027_v1  ;;  %v996_v22 = vld [vmem:[%s1207_s1 + $0x70] sm:$0xff] (!%p202_p3)   ;;  %v987_v26 = vld [vmem:[%s1207_s1 + $0x88] sm:$0xff] (!%p202_p3)   ;;  %v998_v27 = vld [vmem:[%s1207_s1 + $0x78] sm:$0xff] (!%p202_p3)  }
   0xc   : > { %905 = vmatpush3.bf16.msra.mxu0 (!%p202_p3), %v976_v2  ;;  %v989_v30 = vld [vmem:[%s1207_s1 + $0x90] sm:$0xff] (!%p202_p3)   ;;  %v991_v32 = vld [vmem:[%s1207_s1 + $0x98] sm:$0xff] (!%p202_p3)   ;;  %v993_v33 = vld [vmem:[%s1207_s1 + $0xa0] sm:$0xff] (!%p202_p3)  }
   0xd   : > { %906 = vmatprep.subr.bf16.mxu0 (!%p202_p3), %v1027_v1  ;;  %v995_v34 = vld [vmem:[%s1207_s1 + $0xa8] sm:$0xff] (!%p202_p3)   ;;  %v997_v36 = vld [vmem:[%s1207_s1 + $0xb0] sm:$0xff] (!%p202_p3)   ;;  %v1001_v38 = vld [vmem:[%s1207_s1 + $0xb8] sm:$0xff] (!%p202_p3)  }
   0xe   : > { %s1216_s15 = smov (!%p240_p4, %s1017_s15), 1  ;;  %885 = vmatpush3.bf16.msra.mxu1 %v986_v6  ;;  %v841_v47 = vld [vmem:[%s1208_s2] ss:$0 sm:$0xff] }
   0xf   : > { %s948_s25 = smul.u32 12, %s1216_s15  ;;  %886 = vmatprep.subr.bf16.mxu1 %v1027_v1  ;;  %v842_v54 = vld [vmem:[%s1209_s3] ss:$0 sm:$0xff]  ;;  %s847_s6 = sshll.u32 %s1216_s15, 3 }
  0x10   : > { %907 = vmatpush3.bf16.msra.mxu0 %v977_v3  ;;  %s262_s9 = scalar_lea.vmem %s1210_s4, %s847_s6 }
  0x11   : > { %s1098_s30 = scalar_lea.vmem %s1206_s0, %s948_s25  ;;  %908 = vmatprep.subr.bf16.mxu0 %v1027_v1 }
  0x12   : > { %887 = vmatpush3.bf16.msra.mxu1 %v988_v8  ;;  %v282_v13 = vld [vmem:[%s1098_s30] sm:$0xf]  ;;  %v283_v14 = vld [vmem:[%s1098_s30 + $0x4] sm:$0xf] }
  0x13   : > { %888 = vmatprep.subr.bf16.mxu1 %v1027_v1  ;;  %v797_v16 = vcombine.low %v282_v13, %v283_v14  ;;  %v1000_v17 = vld [vmem:[%s1098_s30 + $0x8] ss:$0 sps:$4 sm:$0x11]   ;;  %v984_v20 = vld [vmem:[%s1098_s30] sm:$0xff]  }
  0x14   : > { %909 = vmatpush3.bf16.msra.mxu0 %v978_v5  ;;  %v319_v25 = vshll.u32 %v1000_v17, 16  ;;  %v508_v35 = vld [vmem:[%s1098_s30] sm:$0xe]  ;;  %v531_v40 = vrot.slane %v1000_v17, 1 }
  0x15   : > { %910 = vmatprep.subr.bf16.mxu0 %v1027_v1  ;;  %v314_v19 = vshll.u32 %v797_v16, 16  ;;  %v312_v23 = vshrl.u32 %v797_v16, 16  ;;  %v832_v37 = vcombine.low %v508_v35, %v283_v14 }
  0x16   : > { %889 = vmatpush3.bf16.msra.mxu1 %v990_v10  ;;  %v321_v29 = vrot.slane %v319_v25, 1 }
  0x17   : > { %890 = vmatprep.subr.bf16.mxu1 %v1027_v1  ;;  %v316_v24 = vrot.slane %v314_v19, 1  ;;  %v530_v39 = vrot.slane %v832_v37, 1 }
  0x18   : > { %911 = vmatpush3.bf16.msra.mxu0 %v979_v7 }
  0x19   : > { %912 = vmatprep.subr.bf16.mxu0 %v1027_v1  ;;  %v317_v28 = vor.u32 %v316_v24, %v312_v23  ;;  %v532_v41 = vsel %vm529_vm2, %v530_v39, %v531_v40 }
  0x1a   : > { %891 = vmatpush3.bf16.msra.mxu1 %v992_v12 }
  0x1b   : > { %892 = vmatprep.subr.bf16.mxu1 %v1027_v1  ;;  %v322_v31 = vsel %vm310_vm1, %v317_v28, %v321_v29 }
  0x1c   : > { %913 = vmatpush3.bf16.msra.mxu0 %v980_v9 }
  0x1d   : > { %914 = vmatprep.subr.bf16.mxu0 %v1027_v1 }
  0x1e   : > { %893 = vmatpush3.bf16.msra.mxu1 %v994_v18 }
  0x1f   : > { %894 = vmatprep.subr.bf16.mxu1 %v1027_v1 }
  0x20   : > { %915 = vmatpush3.bf16.msra.mxu0 %v981_v11 }
  0x21   : > { %916 = vmatprep.subr.bf16.mxu0 %v1027_v1 }
  0x22   : > { %895 = vmatpush3.bf16.msra.mxu1 %v996_v22 }
  0x23   : > { %896 = vmatprep.subr.bf16.mxu1 %v1027_v1 }
  0x24   : > { %917 = vmatpush3.bf16.msra.mxu0 %v982_v15 }
  0x25   : > { %922 = vmatprep.subr.bf16.mxu0 %v1027_v1 }
  0x26   : > { %897 = vmatpush3.bf16.msra.mxu1 %v998_v27 }
  0x27   : > { %919 = vmatmul.mubr.bf16.vlgmr.msra.gmra.mrb[0].mxu0 %v984_v20 }
  0x28   : > { %923 = vmatpush3.bf16.msra.mxu0 %v985_v21  ;;  %938 = vmatprep.mubr.msk.bf16.mxu0 %vm1028_vm0, %v1027_v1 }
  0x29   : > { %924 = vmatprep.subr.bf16.mxu0 %v1027_v1  ;;  %899 = vmatmul.mubr.bf16.vlgmr.msra.gmra.mrb[0].mxu1 %v322_v31 }
  0x2c   : > { %925 = vmatpush3.bf16.msra.mxu0 %v987_v26 }
  0x2d   : > { %926 = vmatprep.subr.bf16.mxu0 %v1027_v1 }
  0x30   : > { %927 = vmatpush3.bf16.msra.mxu0 %v989_v30 }
  0x31   : > { %928 = vmatprep.subr.bf16.mxu0 %v1027_v1 }
  0x34   : > { %929 = vmatpush3.bf16.msra.mxu0 %v991_v32 }
  0x35   : > { %930 = vmatprep.subr.bf16.mxu0 %v1027_v1 }
  0x38   : > { %931 = vmatpush3.bf16.msra.mxu0 %v993_v33 }
  0x39   : > { %932 = vmatprep.subr.bf16.mxu0 %v1027_v1 }
  0x3c   : > { %933 = vmatpush3.bf16.msra.mxu0 %v995_v34 }
  0x3d   : > { %934 = vmatprep.subr.bf16.mxu0 %v1027_v1 }
  0x40   : > { %935 = vmatpush3.bf16.msra.mxu0 %v997_v36 }
  0x41   : > { %936 = vmatprep.subr.bf16.mxu0 %v1027_v1 }
  0x44   : > { %937 = vmatpush3.bf16.msra.mxu0 %v1001_v38 }
  0x47   : > { %939 = vmatmul.mubr.bf16.vlgmr.msra.gmra.mrb[0].mxu0 %v532_v41 }
  0xfc   : > { %v406_v42 = vpop.f32.mrb[0].mxu1 }
  0xfd   : > { %v900_v43 = vpop.f32.mrb[1].mxu1 }
  0xfe   : > { %v409_v44 = vpop.f32.mrb[2].mxu1 }
  0xff   : > { %v901_v45 = vpop.f32.mrb[3].mxu1 }
 0x11a   : > { %v616_v46 = vpop.f32.mrb[0].mxu0 }
 0x11b   : > { %v942_v48 = vadd.f32 %v616_v46, %v406_v42  ;;  %v940_v49 = vpop.f32.mrb[1].mxu0 }
 0x11c   : > { %v619_v50 = vpop.f32.mrb[2].mxu0 }
 0x11d   : > { %v632_v51 = vmul.f32 %v942_v48, %v841_v47  ;;  %v943_v52 = vadd.f32 %v619_v50, %v409_v44  ;;  %v941_v53 = vpop.f32.mrb[3].mxu0 }
 0x11f   : > { %v633_v55 = vmul.f32 %v943_v52, %v841_v47  ;;  %v641_v56 = vadd.f32 %v842_v54, %v632_v51 }
 0x121   : > { %v642_v57 = vadd.f32 %v842_v54, %v633_v55 }
 0x123   : > { %v853_v58 = vpack.c.bf16 %v642_v57, %v641_v56 }
 0x125   : > { %854 = vst [vmem:[%s262_s9] sm:$0xff] %v853_v58  }
 0x126 PF: > { %s14_s17 = sadd.s32 1, %s1025_s17   ;;  %s1211_s15 = smov %s1021_s16 }
 0x127   : > { %p11_p5 = scmp.ge.s32.totalorder %s14_s17, 4   ;;  %s1212_s16 = smov %s1214_s18 }
 0x129   :  { %13 = sbr.rel (!%p11_p5) target bundleno = 2 (0x2), region = 77 }

// kernel: _lambda_.49
= control target key start
LH: loop header
LB: loop body
LE: loop exit
PB: predicated region body
PF: predicated region fallthrough
CT: control target
= control target key end

     0   :  { %s335_s1 = inlined_call_operand.vmem [shape: bf16[128,128], index: 1, kind: input, shape index: {}]   ;;  %s336_s0 = inlined_call_operand.vmem [shape: bf16[24,128], index: 0, kind: input, shape index: {}]   ;;  %s337_s2 = inlined_call_operand.vmem [shape: f32[1,128], index: 2, kind: input, shape index: {}]   ;;  %s338_s3 = inlined_call_operand.vmem [shape: f32[1,128], index: 3, kind: input, shape index: {}]   ;;  %s339_s4 = inlined_call_operand.vmem [shape: bf16[24,128], index: 4, kind: output, shape index: {}]  }
   0x1   :  { %v258_v0 = vld [vmem:[%s335_s1] sm:$0xff]   ;;  %v259_v1 = vld [vmem:[%s335_s1 + $0x8] sm:$0xff]   ;;  %v260_v2 = vld [vmem:[%s335_s1 + $0x10] sm:$0xff]  }
   0x2   :  { %238 = vmatprep.subr.bf16.mxu0 %v258_v0  ;;  %v261_v3 = vld [vmem:[%s335_s1 + $0x18] sm:$0xff]   ;;  %v266_v4 = vld [vmem:[%s336_s0] sm:$0xff]   ;;  %v263_v6 = vld [vmem:[%s335_s1 + $0x28] sm:$0xff]  }
   0x3   :  { %239 = vmatpush3.bf16.msra.mxu0 %v258_v0  ;;  %254 = vmatprep.mubr.bf16.mxu0 %v266_v4  ;;  %v262_v5 = vld [vmem:[%s335_s1 + $0x20] sm:$0xff]   ;;  %v264_v7 = vld [vmem:[%s335_s1 + $0x30] sm:$0xff]   ;;  %v265_v8 = vld [vmem:[%s335_s1 + $0x38] sm:$0xff]  }
   0x4   :  { %240 = vmatprep.subr.bf16.mxu0 %v259_v1  ;;  %v267_v9 = vld [vmem:[%s336_s0 + $0x8] ss:$0 sps:$4 sm:$0xff]   ;;  %v215_v10 = vld [vmem:[%s337_s2] ss:$0 sm:$0xff] }
   0x5   :  { %v216_v12 = vld [vmem:[%s338_s3] ss:$0 sm:$0xff] }
   0x7   :  { %241 = vmatpush3.bf16.msra.mxu0 %v259_v1 }
   0x8   :  { %242 = vmatprep.subr.bf16.mxu0 %v260_v2 }
   0xb   :  { %243 = vmatpush3.bf16.msra.mxu0 %v260_v2 }
   0xc   :  { %244 = vmatprep.subr.bf16.mxu0 %v261_v3 }
   0xf   :  { %245 = vmatpush3.bf16.msra.mxu0 %v261_v3 }
  0x10   :  { %246 = vmatprep.subr.bf16.mxu0 %v262_v5 }
  0x13   :  { %247 = vmatpush3.bf16.msra.mxu0 %v262_v5 }
  0x14   :  { %248 = vmatprep.subr.bf16.mxu0 %v263_v6 }
  0x17   :  { %249 = vmatpush3.bf16.msra.mxu0 %v263_v6 }
  0x18   :  { %250 = vmatprep.subr.bf16.mxu0 %v264_v7 }
  0x1b   :  { %251 = vmatpush3.bf16.msra.mxu0 %v264_v7 }
  0x1c   :  { %252 = vmatprep.subr.bf16.mxu0 %v265_v8 }
  0x1f   :  { %253 = vmatpush3.bf16.msra.mxu0 %v265_v8 }
  0x22   :  { %255 = vmatmul.mubr.bf16.vlgmr.msra.gmra.mrb[0].mxu0 %v267_v9 }
  0xf5   :  { %v256_v11 = vpop.f32.mrb[0].mxu0 }
  0xf6   :  { %v174_v13 = vmul.f32 %v256_v11, %v215_v10  ;;  %v139_v14 = vpop.f32.mrb[1].mxu0 }
  0xf7   :  { %v172_v15 = vmul.f32 %v215_v10, %v139_v14  ;;  %v257_v16 = vpop.f32.mrb[2].mxu0 }
  0xf8   :  { %v184_v17 = vadd.f32 %v216_v12, %v174_v13  ;;  %v142_v18 = vpop.f32.mrb[3].mxu0 }
  0xf9   :  { %v173_v19 = vmul.f32 %v215_v10, %v142_v18  ;;  %v182_v21 = vadd.f32 %v216_v12, %v172_v15 }
  0xfa   :  { %v222_v20 = vpack.c.bf16 %v184_v17, %v184_v17 }
  0xfb   :  { %v183_v22 = vadd.f32 %v216_v12, %v173_v19 }
  0xfc   :  { %200 = vst [vmem:[%s339_s4 + $0x8] sm:$0xf] %v222_v20 }
  0xfd   :  { %v226_v23 = vpack.c.bf16 %v183_v22, %v182_v21 }
  0xff   :  { %227 = vst [vmem:[%s339_s4] sm:$0xff] %v226_v23  }

// kernel: _lambda_.51
= control target key start
LH: loop header
LB: loop body
LE: loop exit
PB: predicated region body
PF: predicated region fallthrough
CT: control target
= control target key end

     0   :  { %s964_s15 = smov 0   ;;  %s966_s16 = smov 0   ;;  %s1089_s0 = inlined_call_operand.vmem [shape: bf16[24,128], index: 0, kind: input, shape index: {}]   ;;  %s1090_s1 = inlined_call_operand.vmem [shape: bf16[128,768], index: 1, kind: input, shape index: {}]   ;;  %s1091_s2 = inlined_call_operand.vmem [shape: f32[1,768], index: 2, kind: input, shape index: {}]   ;;  %s1092_s3 = inlined_call_operand.vmem [shape: f32[1,768], index: 3, kind: input, shape index: {}]   ;;  %s1093_s4 = inlined_call_operand.vmem [shape: f32[24,768], index: 4, kind: output, shape index: {}]  }
   0x1   :  { %s968_s17 = smov 0   ;;  %s970_s18 = smov 0  }
   0x2   :  { %s972_s19 = smov 0  }
   0x3 LB: > { %s29_s20 = sadd.s32 1, %s932_s18  ;;  %s778_s21 = sadd.s32 4294967295, %s936_s19   ;;  %s936_s19 = sphi %s972_s19, %s14_s19   ;;  %s932_s18 = sphi %s970_s18, %s1098_s18   ;;  %s928_s17 = sphi %s968_s17, %s1097_s17   ;;  %s924_s16 = sphi %s966_s16, %s1096_s16   ;;  %s920_s15 = sphi %s964_s15, %s1095_s15  }
   0x4   : > { %p31_p0 = scmp.ge.s32.totalorder %s29_s20, 3  ;;  %p77_p1 = scmp.ne.s32.totalorder %s924_s16, %s920_s15 }
   0x5   : > { %p78_p2 = scmp.eq.s32.totalorder %s936_s19, 0  ;;  %p161_p4 = scmp.eq.s32.totalorder %s778_s21, 2 }
   0x6   : > { %s1100_s20 = smov (%p31_p0, %s29_s20), 0  ;;  %s70_s23 = sadd.s32 1, %s924_s16 }
   0x7   : > { %p79_p3 = por %p78_p2, %p77_p1  ;;  %s66_s22 = ssub.s32 %s932_s18, %s1100_s20 }
   0x8   : > { %p68_p5 = scmp.eq.s32.totalorder %s66_s22, 0  ;;  %p999_p6 = por %p161_p4, %p77_p1 }
   0x9   : > { %p782_p7 = scmp.ge.s32.totalorder %s936_s19, 3 }
   0xa   : > { %s1004_s25 = scalar_select %p68_p5, %s924_s16, %s70_s23  }
   0xb   : > { %195 = sbr.rel (%p782_p7) target bundleno = 30 (0x1e), region = 20 }
  0x12   : > { %198 = sbr.rel (!%p79_p3) target bundleno = 30 (0x1e), region = 24  ;;  %s200_s26 = sand.u32 (%p79_p3), 1, %s924_s16  }
  0x13   : > { %s812_s27 = sshll.u32 (%p79_p3), %s932_s18, 3  ;;  %s783_s28 = sshll.u32 (%p79_p3), %s200_s26, 7 }
  0x14   : > { %s1012_s5 = scalar_lea.vmem (%p79_p3), %s1090_s1, %s812_s27  ;;  %s202_s6 = scalar_lea.vmem (%p79_p3), [#allocation3], %s783_s28 }
  0x15   : > { %v266_v0 = vld [vmem:[%s1012_s5] sm:$0xff] (%p79_p3)  ;;  %v268_v1 = vld [vmem:[%s1012_s5 + $0x18] sm:$0xff] (%p79_p3)  ;;  %v270_v2 = vld [vmem:[%s1012_s5 + $0x30] sm:$0xff] (%p79_p3) }
  0x16   : > { %267 = vst [vmem:[%s202_s6] sm:$0xff] (%p79_p3), %v266_v0  ;;  %269 = vst [vmem:[%s202_s6 + $0x8] sm:$0xff] (%p79_p3), %v268_v1  ;;  %v272_v3 = vld [vmem:[%s1012_s5 + $0x48] sm:$0xff] (%p79_p3)  ;;  %v274_v4 = vld [vmem:[%s1012_s5 + $0x60] sm:$0xff] (%p79_p3) }
  0x17   : > { %271 = vst [vmem:[%s202_s6 + $0x10] sm:$0xff] (%p79_p3), %v270_v2  ;;  %v276_v5 = vld [vmem:[%s1012_s5 + $0x78] sm:$0xff] (%p79_p3)  ;;  %273 = vst [vmem:[%s202_s6 + $0x18] sm:$0xff] (%p79_p3), %v272_v3  ;;  %v278_v6 = vld [vmem:[%s1012_s5 + $0x90] sm:$0xff] (%p79_p3) }
  0x18   : > { %275 = vst [vmem:[%s202_s6 + $0x20] sm:$0xff] (%p79_p3), %v274_v4  ;;  %277 = vst [vmem:[%s202_s6 + $0x28] sm:$0xff] (%p79_p3), %v276_v5  ;;  %v280_v7 = vld [vmem:[%s1012_s5 + $0xa8] sm:$0xff] (%p79_p3)  ;;  %v282_v8 = vld [vmem:[%s1012_s5 + $0xc0] sm:$0xff] (%p79_p3) }
  0x19   : > { %279 = vst [vmem:[%s202_s6 + $0x30] sm:$0xff] %v278_v6  ;;  %281 = vst [vmem:[%s202_s6 + $0x38] sm:$0xff] %v280_v7  ;;  %v284_v9 = vld [vmem:[%s1012_s5 + $0xd8] sm:$0xff]  ;;  %v286_v10 = vld [vmem:[%s1012_s5 + $0xf0] sm:$0xff] }
  0x1a   : > { %283 = vst [vmem:[%s202_s6 + $0x40] sm:$0xff] %v282_v8  ;;  %v288_v11 = vld [vmem:[%s1012_s5 + $0x108] sm:$0xff]  ;;  %285 = vst [vmem:[%s202_s6 + $0x48] sm:$0xff] %v284_v9  ;;  %v290_v12 = vld [vmem:[%s1012_s5 + $0x120] sm:$0xff] }
  0x1b   : > { %287 = vst [vmem:[%s202_s6 + $0x50] sm:$0xff] %v286_v10  ;;  %289 = vst [vmem:[%s202_s6 + $0x58] sm:$0xff] %v288_v11  ;;  %v292_v13 = vld [vmem:[%s1012_s5 + $0x138] sm:$0xff]  ;;  %v294_v14 = vld [vmem:[%s1012_s5 + $0x150] sm:$0xff] }
  0x1c   : > { %291 = vst [vmem:[%s202_s6 + $0x60] sm:$0xff] %v290_v12  ;;  %293 = vst [vmem:[%s202_s6 + $0x68] sm:$0xff] %v292_v13  ;;  %v296_v15 = vld [vmem:[%s1012_s5 + $0x168] sm:$0xff] }
  0x1d   : > { %295 = vst [vmem:[%s202_s6 + $0x70] sm:$0xff] %v294_v14  ;;  %297 = vst [vmem:[%s202_s6 + $0x78] sm:$0xff] %v296_v15 }
  0x1e PF: > { %p786_p8 = scmp.ge.s32.totalorder %s936_s19, 1  ;;  %p318_p9 = scmp.lt.s32.totalorder %s936_s19, 4 }
  0x20   : > { %p319_p10 = pnand %p786_p8, %p318_p9 }
  0x21   : > { %s325_s7 = sand.u32 (!%p319_p10), 1, %s920_s15   ;;  %v938_v16 = vmov (!%p319_p10), 0   ;;  %v896_v33 = vld [vmem:[%s1089_s0] sm:$0xff] (!%p319_p10)   ;;  %v897_v34 = vld [vmem:[%s1089_s0 + $0x8] ss:$0 sps:$4 sm:$0xff] (!%p319_p10)   ;;  %s788_s14 = sshll.u32 (!%p319_p10), %s928_s17, 1  ;;  %v588_v35 = vlaneseq (!%p319_p10) }
  0x22   : > { %322 = sbr.rel (%p319_p10) target bundleno = 297 (0x129), region = 70  ;;  %s787_s8 = sshll.u32 (!%p319_p10), %s325_s7, 7  ;;  %546 = vmatprep.mubr.bf16.mxu0 (!%p319_p10), %v938_v16  ;;  %556 = vmatprep.mubr.bf16.mxu1 (!%p319_p10), %v938_v16 }
  0x23   : > { %s1035_s9 = scalar_lea.vmem (!%p319_p10), [#allocation3], %s787_s8  ;;  %p377_p11 = scmp.lt.s32.totalorder (!%p319_p10), %s788_s14, 5  ;;  %v589_v36 = vshrl.u32 (!%p319_p10), %v588_v35, 7 }
  0x24   : > { %v872_v17 = vld [vmem:[%s1035_s9 + $0x4] ss:$8 sps:$4 sm:$0xff] (!%p319_p10)   ;;  %v874_v18 = vld [vmem:[%s1035_s9] ss:$8 sps:$4 sm:$0xff] (!%p319_p10)   ;;  %v875_v19 = vld [vmem:[%s1035_s9 + $0x14] ss:$8 sps:$4 sm:$0xff] (!%p319_p10)  }
  0x25   : > { %514 = vmatprep.subr.bf16.mxu0 (!%p319_p10), %v872_v17  ;;  %814 = vmatprep.subr.bf16.mxu1 (!%p319_p10), %v872_v17  ;;  %v877_v20 = vld [vmem:[%s1035_s9 + $0x10] ss:$8 sps:$4 sm:$0xff] (!%p319_p10)   ;;  %v878_v21 = vld [vmem:[%s1035_s9 + $0x24] ss:$8 sps:$4 sm:$0xff] (!%p319_p10)   ;;  %v880_v22 = vld [vmem:[%s1035_s9 + $0x20] ss:$8 sps:$4 sm:$0xff] (!%p319_p10)  }
  0x26   : > { %515 = vmatpush1.bf16.msra.mxu0 (!%p319_p10), %v874_v18  ;;  %822 = vmatpush1.bf16.msra.mxu1 (!%p319_p10), %v874_v18  ;;  %v881_v23 = vld [vmem:[%s1035_s9 + $0x34] ss:$8 sps:$4 sm:$0xff] (!%p319_p10)   ;;  %v883_v24 = vld [vmem:[%s1035_s9 + $0x30] ss:$8 sps:$4 sm:$0xff] (!%p319_p10)   ;;  %v884_v25 = vld [vmem:[%s1035_s9 + $0x44] ss:$8 sps:$4 sm:$0xff] (!%p319_p10)  }
  0x27   : > { %516 = vmatprep.subr.bf16.mxu0 (!%p319_p10), %v875_v19  ;;  %815 = vmatprep.subr.bf16.mxu1 (!%p319_p10), %v875_v19  ;;  %v886_v26 = vld [vmem:[%s1035_s9 + $0x40] ss:$8 sps:$4 sm:$0xff] (!%p319_p10)   ;;  %v887_v27 = vld [vmem:[%s1035_s9 + $0x54] ss:$8 sps:$4 sm:$0xff] (!%p319_p10)   ;;  %v889_v28 = vld [vmem:[%s1035_s9 + $0x50] ss:$8 sps:$4 sm:$0xff] (!%p319_p10)  }
  0x28   : > { %v890_v29 = vld [vmem:[%s1035_s9 + $0x64] ss:$8 sps:$4 sm:$0xff] (!%p319_p10)   ;;  %v892_v30 = vld [vmem:[%s1035_s9 + $0x60] ss:$8 sps:$4 sm:$0xff] (!%p319_p10)   ;;  %v893_v31 = vld [vmem:[%s1035_s9 + $0x74] ss:$8 sps:$4 sm:$0xff] (!%p319_p10)  }
  0x29   : > { %v895_v32 = vld [vmem:[%s1035_s9 + $0x70] ss:$8 sps:$4 sm:$0xff]   ;;  %s1102_s14 = smov (!%p377_p11, %s788_s14), 5  ;;  %v590_v37 = vsub.s32 0, %v589_v36  ;;  %v594_v39 = vsub.s32 1, %v589_v36  ;;  %s830_s29 = smul.u32 48, %s325_s7 }
  0x2a   : > { %517 = vmatpush1.bf16.msra.mxu0 %v877_v20  ;;  %823 = vmatpush1.bf16.msra.mxu1 %v877_v20  ;;  %s379_s23 = scalar_lea.vmem %s1091_s2, %s1102_s14  ;;  %s384_s28 = scalar_lea.vmem %s1092_s3, %s1102_s14 }
  0x2b   : > { %518 = vmatprep.subr.bf16.mxu0 %v878_v21  ;;  %816 = vmatprep.subr.bf16.mxu1 %v878_v21  ;;  %v586_v38 = vld [vmem:[%s379_s23] sm:$0x3]  ;;  %s364_s15 = scalar_lea.vmem [#allocation4], %s830_s29  ;;  %s813_s30 = sshll.u32 (%p999_p6), %s928_s17, 4 }
  0x2c   : > { %v604_v40 = vld [vmem:[%s384_s28] sm:$0x3]  ;;  %v591_v41 = vrot.slane %v586_v38, %v590_v37  ;;  %v595_v42 = vrot.slane %v586_v38, %v594_v39  ;;  %s640_s7 = scalar_lea.vmem (%p999_p6), %s1093_s4, %s813_s30 }
  0x2d   : > { %v609_v43 = vrot.slane %v604_v40, %v590_v37  ;;  %v613_v46 = vrot.slane %v604_v40, %v594_v39 }
  0x2e   : > { %519 = vmatpush1.bf16.msra.mxu0 %v880_v22  ;;  %824 = vmatpush1.bf16.msra.mxu1 %v880_v22 }
  0x2f   : > { %520 = vmatprep.subr.bf16.mxu0 %v881_v23  ;;  %817 = vmatprep.subr.bf16.mxu1 %v881_v23 }
  0x32   : > { %521 = vmatpush1.bf16.msra.mxu0 %v883_v24  ;;  %825 = vmatpush1.bf16.msra.mxu1 %v883_v24 }
  0x33   : > { %522 = vmatprep.subr.bf16.mxu0 %v884_v25  ;;  %818 = vmatprep.subr.bf16.mxu1 %v884_v25 }
  0x36   : > { %523 = vmatpush1.bf16.msra.mxu0 %v886_v26  ;;  %826 = vmatpush1.bf16.msra.mxu1 %v886_v26 }
  0x37   : > { %524 = vmatprep.subr.bf16.mxu0 %v887_v27  ;;  %819 = vmatprep.subr.bf16.mxu1 %v887_v27 }
  0x3a   : > { %525 = vmatpush1.bf16.msra.mxu0 %v889_v28  ;;  %827 = vmatpush1.bf16.msra.mxu1 %v889_v28 }
  0x3b   : > { %526 = vmatprep.subr.bf16.mxu0 %v890_v29  ;;  %820 = vmatprep.subr.bf16.mxu1 %v890_v29 }
  0x3e   : > { %527 = vmatpush1.bf16.msra.mxu0 %v892_v30  ;;  %828 = vmatpush1.bf16.msra.mxu1 %v892_v30 }
  0x3f   : > { %528 = vmatprep.subr.bf16.mxu0 %v893_v31  ;;  %821 = vmatprep.subr.bf16.mxu1 %v893_v31 }
  0x42   : > { %529 = vmatpush1.bf16.msra.mxu0 %v895_v32  ;;  %829 = vmatpush1.bf16.msra.mxu1 %v895_v32 }
  0x45   : > { %547 = vmatmul.mubr.bf16.vlgmr.msra.gmra.mrb[0].mxu0 %v896_v33  ;;  %557 = vmatmul.mubr.bf16.vlgmr.msra.gmra.mrb[0].mxu1 %v897_v34 }
 0x118   : > { %v548_v44 = vpop.f32.mrb[0].mxu0  ;;  %v558_v45 = vpop.f32.mrb[0].mxu1 }
 0x119   : > { %v598_v47 = vmul.f32 %v591_v41, %v548_v44  ;;  %v602_v48 = vmul.f32 %v591_v41, %v558_v45  ;;  %v550_v49 = vpop.f32.mrb[1].mxu0  ;;  %v560_v50 = vpop.f32.mrb[1].mxu1 }
 0x11a   : > { %v599_v51 = vmul.f32 %v595_v42, %v550_v49  ;;  %v603_v52 = vmul.f32 %v595_v42, %v560_v50  ;;  %v552_v53 = vpop.f32.mrb[2].mxu0  ;;  %v562_v54 = vpop.f32.mrb[2].mxu1  ;;  %634 = sbr.rel (!%p999_p6) target bundleno = 297 (0x129), region = 86 }
 0x11b   : > { %v616_v55 = vadd.f32 %v609_v43, %v598_v47  ;;  %v620_v56 = vadd.f32 %v609_v43, %v602_v48  ;;  %v600_v57 = vmul.f32 %v591_v41, %v552_v53  ;;  %v554_v58 = vpop.f32.mrb[3].mxu0  ;;  %v563_v59 = vpop.f32.mrb[3].mxu1 }
 0x11c   : > { %v617_v60 = vadd.f32 %v613_v46, %v599_v51  ;;  %v621_v61 = vadd.f32 %v613_v46, %v603_v52  ;;  %v601_v62 = vmul.f32 %v595_v42, %v554_v58 }
 0x11d   : > { %622 = vst [vmem:[%s364_s15] sm:$0xff] %v616_v55  ;;  %626 = vst [vmem:[%s364_s15 + $0x20] sm:$0xff] %v620_v56  ;;  %v618_v63 = vadd.f32 %v609_v43, %v600_v57 }
 0x11e   : > { %623 = vst [vmem:[%s364_s15 + $0x8] sm:$0xff] %v617_v60  ;;  %627 = vst [vmem:[%s364_s15 + $0x28] sm:$0xff] %v621_v61  ;;  %v619_v0 = vadd.f32 %v613_v46, %v601_v62 }
 0x11f   : > { %624 = vst [vmem:[%s364_s15 + $0x10] sm:$0xff] %v618_v63 }
 0x120   : > { %625 = vst [vmem:[%s364_s15 + $0x18] sm:$0xff] %v619_v0 }
 0x124   : > { %v653_v1 = vld [vmem:[%s364_s15] sm:$0xff] }
 0x125   : > { %v655_v2 = vld [vmem:[%s364_s15 + $0x8] sm:$0xff]  ;;  %v661_v5 = vld [vmem:[%s364_s15 + $0x20] sm:$0xff]  ;;  %654 = vst [vmem:[%s640_s7] sm:$0xff] %v653_v1 }
 0x126   : > { %v657_v3 = vld [vmem:[%s364_s15 + $0x10] sm:$0xff]  ;;  %v663_v6 = vld [vmem:[%s364_s15 + $0x28] sm:$0xff]  ;;  %656 = vst [vmem:[%s640_s7 + $0x8] sm:$0xff] %v655_v2  ;;  %662 = vst [vmem:[%s640_s7 + $0x60] sm:$0xff] %v661_v5 }
 0x127   : > { %v659_v4 = vld [vmem:[%s364_s15 + $0x18] sm:$0xff]  ;;  %658 = vst [vmem:[%s640_s7 + $0x30] sm:$0xff] %v657_v3  ;;  %664 = vst [vmem:[%s640_s7 + $0x68] sm:$0xff] %v663_v6 }
 0x128   : > { %660 = vst [vmem:[%s640_s7 + $0x38] sm:$0xff] %v659_v4 }
 0x129 PF: > { %s14_s19 = sadd.s32 1, %s936_s19   ;;  %s1095_s15 = smov %s924_s16 }
 0x12a   : > { %p11_p12 = scmp.ge.s32.totalorder %s14_s19, 5   ;;  %s1096_s16 = smov %s1004_s25 }
 0x12b   : > { %s1097_s17 = smov %s932_s18  ;;  %s1098_s18 = smov %s1100_s20 }
 0x12c   :  { %13 = sbr.rel (!%p11_p12) target bundleno = 3 (0x3), region = 149 }

// kernel: _lambda_.50
= control target key start
LH: loop header
LB: loop body
LE: loop exit
PB: predicated region body
PF: predicated region fallthrough
CT: control target
= control target key end

     0   :  { %v583_v1 = vmov 0   ;;  %v39_v36 = vlaneseq  ;;  %s740_s1 = inlined_call_operand.vmem [shape: bf16[2,128,256], index: 1, kind: input, shape index: {}]   ;;  %s741_s0 = inlined_call_operand.vmem [shape: bf16[24,128], index: 0, kind: input, shape index: {}]   ;;  %s742_s2 = inlined_call_operand.vmem [shape: f32[2,1,256], index: 2, kind: input, shape index: {}]   ;;  %s743_s3 = inlined_call_operand.vmem [shape: bf16[24,128], index: 3, kind: output, shape index: {}]  }
   0x1   :  { %v508_v0 = vld [vmem:[%s740_s1 + $0x4] ss:$8 sps:$4 sm:$0xff]   ;;  %171 = vmatprep.mubr.bf16.mxu0 %v583_v1  ;;  %367 = vmatprep.mubr.bf16.mxu1 %v583_v1  ;;  %v510_v2 = vld [vmem:[%s740_s1] ss:$8 sps:$4 sm:$0xff]   ;;  %v511_v3 = vld [vmem:[%s740_s1 + $0x14] ss:$8 sps:$4 sm:$0xff]  }
   0x2   :  { %139 = vmatprep.subr.bf16.mxu0 %v508_v0  ;;  %v513_v4 = vld [vmem:[%s740_s1 + $0x10] ss:$8 sps:$4 sm:$0xff]   ;;  %v514_v5 = vld [vmem:[%s740_s1 + $0x24] ss:$8 sps:$4 sm:$0xff]   ;;  %v516_v6 = vld [vmem:[%s740_s1 + $0x20] ss:$8 sps:$4 sm:$0xff]  }
   0x3   :  { %140 = vmatpush1.bf16.msra.mxu0 %v510_v2  ;;  %v517_v7 = vld [vmem:[%s740_s1 + $0x34] ss:$8 sps:$4 sm:$0xff]   ;;  %v519_v8 = vld [vmem:[%s740_s1 + $0x30] ss:$8 sps:$4 sm:$0xff]   ;;  %v520_v9 = vld [vmem:[%s740_s1 + $0x44] ss:$8 sps:$4 sm:$0xff]  }
   0x4   :  { %141 = vmatprep.subr.bf16.mxu0 %v511_v3  ;;  %v522_v10 = vld [vmem:[%s740_s1 + $0x40] ss:$8 sps:$4 sm:$0xff]   ;;  %v523_v11 = vld [vmem:[%s740_s1 + $0x54] ss:$8 sps:$4 sm:$0xff]   ;;  %v525_v12 = vld [vmem:[%s740_s1 + $0x50] ss:$8 sps:$4 sm:$0xff]  }
   0x5   :  { %v526_v13 = vld [vmem:[%s740_s1 + $0x64] ss:$8 sps:$4 sm:$0xff]   ;;  %v528_v14 = vld [vmem:[%s740_s1 + $0x60] ss:$8 sps:$4 sm:$0xff]   ;;  %v529_v15 = vld [vmem:[%s740_s1 + $0x74] ss:$8 sps:$4 sm:$0xff]  }
   0x6   :  { %v531_v16 = vld [vmem:[%s740_s1 + $0x70] ss:$8 sps:$4 sm:$0xff]   ;;  %v657_v17 = vld [vmem:[%s741_s0] sm:$0xff]   ;;  %v664_v18 = vld [vmem:[%s741_s0 + $0x8] sm:$0xf]  ;;  %v716_v37 = vshrl.u32 %v39_v36, 7 }
   0x7   :  { %142 = vmatpush1.bf16.msra.mxu0 %v513_v4  ;;  %v440_v19 = vcombine.low %v664_v18, %v664_v18  ;;  %v534_v20 = vld [vmem:[%s740_s1 + $0x84] ss:$8 sps:$4 sm:$0xff]   ;;  %v536_v21 = vld [vmem:[%s740_s1 + $0x80] ss:$8 sps:$4 sm:$0xff]   ;;  %v537_v22 = vld [vmem:[%s740_s1 + $0x94] ss:$8 sps:$4 sm:$0xff]   ;;  %v18_v2 = vunpack.c.l.bf16 %v657_v17 }
   0x8   :  { %143 = vmatprep.subr.bf16.mxu0 %v514_v5  ;;  %335 = vmatprep.subr.bf16.mxu1 %v534_v20  ;;  %v539_v23 = vld [vmem:[%s740_s1 + $0x90] ss:$8 sps:$4 sm:$0xff]   ;;  %v540_v24 = vld [vmem:[%s740_s1 + $0xa4] ss:$8 sps:$4 sm:$0xff]   ;;  %v542_v25 = vld [vmem:[%s740_s1 + $0xa0] ss:$8 sps:$4 sm:$0xff]   ;;  %v19_v5 = vunpack.c.h.bf16 %v657_v17 }
   0x9   :  { %336 = vmatpush1.bf16.msra.mxu1 %v536_v21  ;;  %v543_v26 = vld [vmem:[%s740_s1 + $0xb4] ss:$8 sps:$4 sm:$0xff]   ;;  %v545_v27 = vld [vmem:[%s740_s1 + $0xb0] ss:$8 sps:$4 sm:$0xff]   ;;  %v546_v28 = vld [vmem:[%s740_s1 + $0xc4] ss:$8 sps:$4 sm:$0xff]  }
   0xa   :  { %337 = vmatprep.subr.bf16.mxu1 %v537_v22  ;;  %v548_v29 = vld [vmem:[%s740_s1 + $0xc0] ss:$8 sps:$4 sm:$0xff]   ;;  %v549_v30 = vld [vmem:[%s740_s1 + $0xd4] ss:$8 sps:$4 sm:$0xff]   ;;  %v551_v31 = vld [vmem:[%s740_s1 + $0xd0] ss:$8 sps:$4 sm:$0xff]  }
   0xb   :  { %144 = vmatpush1.bf16.msra.mxu0 %v516_v6  ;;  %v552_v32 = vld [vmem:[%s740_s1 + $0xe4] ss:$8 sps:$4 sm:$0xff]   ;;  %v554_v33 = vld [vmem:[%s740_s1 + $0xe0] ss:$8 sps:$4 sm:$0xff]   ;;  %v555_v34 = vld [vmem:[%s740_s1 + $0xf4] ss:$8 sps:$4 sm:$0xff]  }
   0xc   :  { %145 = vmatprep.subr.bf16.mxu0 %v517_v7  ;;  %v557_v35 = vld [vmem:[%s740_s1 + $0xf0] ss:$8 sps:$4 sm:$0xff]   ;;  %v45_v38 = vsub.s32 1, %v716_v37  ;;  %v37_v39 = vld [vmem:[%s742_s2] sm:$0x3]  ;;  %v41_v56 = vsub.s32 0, %v716_v37 }
   0xd   :  { %338 = vmatpush1.bf16.msra.mxu1 %v539_v23 }
   0xe   :  { %339 = vmatprep.subr.bf16.mxu1 %v540_v24  ;;  %v46_v40 = vrot.slane %v37_v39, %v45_v38  ;;  %v42_v60 = vrot.slane %v37_v39, %v41_v56 }
   0xf   :  { %146 = vmatpush1.bf16.msra.mxu0 %v519_v8 }
  0x10   :  { %147 = vmatprep.subr.bf16.mxu0 %v520_v9 }
  0x11   :  { %340 = vmatpush1.bf16.msra.mxu1 %v542_v25 }
  0x12   :  { %341 = vmatprep.subr.bf16.mxu1 %v543_v26 }
  0x13   :  { %148 = vmatpush1.bf16.msra.mxu0 %v522_v10 }
  0x14   :  { %149 = vmatprep.subr.bf16.mxu0 %v523_v11 }
  0x15   :  { %342 = vmatpush1.bf16.msra.mxu1 %v545_v27  ;;  %v476_v27 = vld [vmem:[%s742_s2 + $0x2] sm:$0x3] }
  0x16   :  { %343 = vmatprep.subr.bf16.mxu1 %v546_v28  ;;  %v252_v28 = vrot.slane %v476_v27, %v45_v38 }
  0x17   :  { %150 = vmatpush1.bf16.msra.mxu0 %v525_v12 }
  0x18   :  { %151 = vmatprep.subr.bf16.mxu0 %v526_v13 }
  0x19   :  { %344 = vmatpush1.bf16.msra.mxu1 %v548_v29 }
  0x1a   :  { %345 = vmatprep.subr.bf16.mxu1 %v549_v30 }
  0x1b   :  { %152 = vmatpush1.bf16.msra.mxu0 %v528_v14 }
  0x1c   :  { %153 = vmatprep.subr.bf16.mxu0 %v529_v15 }
  0x1d   :  { %346 = vmatpush1.bf16.msra.mxu1 %v551_v31 }
  0x1e   :  { %347 = vmatprep.subr.bf16.mxu1 %v552_v32 }
  0x1f   :  { %154 = vmatpush1.bf16.msra.mxu0 %v531_v16  ;;  %v20_v16 = vunpack.c.l.bf16 %v664_v18 }
  0x21   :  { %348 = vmatpush1.bf16.msra.mxu1 %v554_v33 }
  0x22   :  { %172 = vmatmul.mubr.bf16.vlgmr.msra.gmra.mrb[0].mxu0 %v657_v17  ;;  %349 = vmatprep.subr.bf16.mxu1 %v555_v34 }
  0x23   :  { %181 = vmatprep.mubr.bf16.mxu0 %v583_v1 }
  0x25   :  { %350 = vmatpush1.bf16.msra.mxu1 %v557_v35 }
  0x2a   :  { %182 = vmatmul.mubr.bf16.gmra.mrb[4].mxu0 %v440_v19 }
  0xf5   :  { %v173_v41 = vpop.f32.mrb[0].mxu0 }
  0xf6   :  { %v175_v42 = vpop.f32.mrb[1].mxu0  ;;  %v174_v62 = vadd.f32 %v173_v41, %v42_v60 }
  0xf7   :  { %v176_v43 = vadd.f32 %v175_v42, %v46_v40  ;;  %v177_v44 = vpop.f32.mrb[2].mxu0 }
  0xf8   :  { %v179_v45 = vpop.f32.mrb[3].mxu0  ;;  %v178_v0 = vadd.f32 %v177_v44, %v42_v60  ;;  %v208_v3 = vmax.f32 %v174_v62, 0.0 }
  0xf9   :  { %v457_v46 = vmul.f32 -1.442695, %v176_v43  ;;  %v180_v47 = vadd.f32 %v179_v45, %v46_v40 }
  0xfa   :  { %v209_v6 = vmax.f32 %v178_v0, 0.0 }
  0xfb   :  { %559 = vpow2.f32 %v457_v46  ;;  %v458_v48 = vmul.f32 -1.442695, %v180_v47  ;;  %v248_v46 = vrot.slane %v476_v27, %v41_v56 }
  0xfd   :  { %561 = vpow2.f32 %v458_v48  ;;  %v183_v49 = vpop.f32.mrb[4].mxu0 }
  0xfe   :  { %v185_v50 = vpop.f32.mrb[5].mxu0  ;;  %v184_v10 = vadd.f32 %v183_v49, %v42_v60 }
  0xff   :  { %v186_v51 = vadd.f32 %v185_v50, %v46_v40  ;;  %v187_v52 = vpop.f32.mrb[6].mxu0 }
 0x100   :  { %v188_v53 = vpop.f32.mrb[7].mxu0  ;;  %v210_v19 = vmax.f32 %v184_v10, 0.0 }
 0x101   :  { %v459_v54 = vmul.f32 -1.442695, %v186_v51 }
 0x103   :  { %563 = vpow2.f32 %v459_v54 }
 0x105   :  { %v560_v55 = vpop.eup %559 }
 0x106   :  { %v199_v57 = vadd.f32 1.0, %v560_v55 }
 0x107   :  { %v562_v58 = vpop.eup %561 }
 0x108   :  { %565 = vrcp.f32 %v199_v57  ;;  %v200_v59 = vadd.f32 1.0, %v562_v58 }
 0x10a   :  { %567 = vrcp.f32 %v200_v59 }
 0x10d   :  { %v564_v61 = vpop.eup %563 }
 0x10e   :  { %v201_v63 = vadd.f32 1.0, %v564_v61 }
 0x110   :  { %569 = vrcp.f32 %v201_v63 }
 0x112   :  { %v566_v4 = vpop.eup %565 }
 0x113   :  { %v211_v7 = vmul.f32 %v566_v4, %v208_v3  ;;  %v214_v8 = vsub.f32 1.0, %v566_v4 }
 0x114   :  { %v568_v9 = vpop.eup %567 }
 0x115   :  { %v212_v11 = vmul.f32 %v568_v9, %v209_v6  ;;  %v215_v12 = vsub.f32 1.0, %v568_v9  ;;  %v217_v13 = vmul.f32 %v214_v8, %v18_v2 }
 0x117   :  { %v218_v14 = vmul.f32 %v215_v12, %v19_v5  ;;  %v220_v15 = vadd.f32 %v217_v13, %v211_v7 }
 0x119   :  { %v221_v20 = vadd.f32 %v218_v14, %v212_v11 }
 0x11a   :  { %v570_v21 = vpop.eup %569 }
 0x11b   :  { %v223_v22 = vpack.c.bf16 %v221_v20, %v220_v15  ;;  %v213_v23 = vmul.f32 %v570_v21, %v210_v19  ;;  %v216_v24 = vsub.f32 1.0, %v570_v21 }
 0x11d   :  { %368 = vmatmul.mubr.bf16.vlgmr.msra.gmra.mrb[0].mxu1 %v223_v22  ;;  %v219_v17 = vmul.f32 %v216_v24, %v20_v16 }
 0x11e   :  { %377 = vmatprep.mubr.bf16.mxu1 %v583_v1 }
 0x11f   :  { %v222_v25 = vadd.f32 %v219_v17, %v213_v23 }
 0x121   :  { %v224_v26 = vpack.c.bf16 %v222_v25, %v222_v25 }
 0x125   :  { %378 = vmatmul.mubr.bf16.gmra.mrb[4].mxu1 %v224_v26 }
 0x1f0   :  { %v369_v29 = vpop.f32.mrb[0].mxu1 }
 0x1f1   :  { %v371_v18 = vpop.f32.mrb[1].mxu1  ;;  %v370_v48 = vadd.f32 %v369_v29, %v248_v46 }
 0x1f2   :  { %v372_v30 = vadd.f32 %v371_v18, %v252_v28  ;;  %v373_v31 = vpop.f32.mrb[2].mxu1 }
 0x1f3   :  { %v375_v32 = vpop.f32.mrb[3].mxu1  ;;  %v374_v50 = vadd.f32 %v373_v31, %v248_v46  ;;  %v404_v51 = vmax.f32 %v370_v48, 0.0 }
 0x1f4   :  { %v493_v33 = vmul.f32 -1.442695, %v372_v30  ;;  %v376_v34 = vadd.f32 %v375_v32, %v252_v28 }
 0x1f5   :  { %v405_v55 = vmax.f32 %v374_v50, 0.0 }
 0x1f6   :  { %571 = vpow2.f32 %v493_v33  ;;  %v494_v35 = vmul.f32 -1.442695, %v376_v34 }
 0x1f8   :  { %573 = vpow2.f32 %v494_v35  ;;  %v379_v36 = vpop.f32.mrb[4].mxu1 }
 0x1f9   :  { %v381_v1 = vpop.f32.mrb[5].mxu1  ;;  %v380_v61 = vadd.f32 %v379_v36, %v248_v46 }
 0x1fa   :  { %v382_v39 = vadd.f32 %v381_v1, %v252_v28  ;;  %v383_v40 = vpop.f32.mrb[6].mxu1 }
 0x1fb   :  { %v384_v41 = vpop.f32.mrb[7].mxu1  ;;  %v406_v56 = vmax.f32 %v380_v61, 0.0 }
 0x1fc   :  { %v495_v42 = vmul.f32 -1.442695, %v382_v39 }
 0x1fe   :  { %575 = vpow2.f32 %v495_v42 }
 0x200   :  { %v572_v43 = vpop.eup %571 }
 0x201   :  { %v395_v44 = vadd.f32 1.0, %v572_v43 }
 0x202   :  { %v574_v38 = vpop.eup %573 }
 0x203   :  { %577 = vrcp.f32 %v395_v44  ;;  %v396_v45 = vadd.f32 1.0, %v574_v38 }
 0x205   :  { %579 = vrcp.f32 %v396_v45 }
 0x208   :  { %v576_v47 = vpop.eup %575 }
 0x209   :  { %v397_v49 = vadd.f32 1.0, %v576_v47 }
 0x20b   :  { %581 = vrcp.f32 %v397_v49 }
 0x20d   :  { %v578_v52 = vpop.eup %577 }
 0x20e   :  { %v407_v53 = vmul.f32 %v578_v52, %v404_v51  ;;  %v410_v54 = vsub.f32 1.0, %v578_v52 }
 0x20f   :  { %v580_v57 = vpop.eup %579 }
 0x210   :  { %v413_v58 = vmul.f32 %v410_v54, %v220_v15  ;;  %v408_v59 = vmul.f32 %v580_v57, %v405_v55  ;;  %v411_v60 = vsub.f32 1.0, %v580_v57 }
 0x212   :  { %v416_v62 = vadd.f32 %v413_v58, %v407_v53  ;;  %v414_v63 = vmul.f32 %v411_v60, %v221_v20 }
 0x214   :  { %v417_v37 = vadd.f32 %v414_v63, %v408_v59 }
 0x215   :  { %v582_v0 = vpop.eup %581 }
 0x216   :  { %v505_v2 = vpack.c.bf16 %v417_v37, %v416_v62  ;;  %v409_v3 = vmul.f32 %v582_v0, %v406_v56  ;;  %v412_v4 = vsub.f32 1.0, %v582_v0 }
 0x218   :  { %v415_v5 = vmul.f32 %v412_v4, %v222_v25  ;;  %506 = vst [vmem:[%s743_s3] sm:$0xff] %v505_v2  }
 0x21a   :  { %v418_v6 = vadd.f32 %v415_v5, %v409_v3 }
 0x21c   :  { %v501_v7 = vpack.c.bf16 %v418_v6, %v418_v6 }
 0x21e   :  { %434 = vst [vmem:[%s743_s3 + $0x8] sm:$0xf] %v501_v7 }

// kernel: _lambda_.52
= control target key start
LH: loop header
LB: loop body
LE: loop exit
PB: predicated region body
PF: predicated region fallthrough
CT: control target
= control target key end

     0   :  { %v880_v0 = vmov 0.0   ;;  %s904_s12 = smov 0   ;;  %s1113_s0 = inlined_call_operand.vmem [shape: f32[12,2,8,384], index: 0, kind: input, shape index: {}]   ;;  %s1114_s1 = inlined_call_operand.vmem [shape: bf16[2,128,384], index: 1, kind: input, shape index: {}]   ;;  %s1115_s2 = inlined_call_operand.vmem [shape: f32[2,1,384], index: 2, kind: input, shape index: {}]   ;;  %s1116_s3 = inlined_call_operand.vmem [shape: bf16[12,2,8,128], index: 3, kind: output, shape index: {}]  }
   0x1   :  { %19 = vst [vmem:[#allocation2] sm:$0xff] %v880_v0  ;;  %20 = vst [vmem:[#allocation2 + $0x8] sm:$0xff] %v880_v0 }
   0x2 LB: > { %v788_v1 = vld [vmem:[%s1114_s1 + $0x4] ss:$12 sps:$4 sm:$0xff]   ;;  %v790_v2 = vld [vmem:[%s1114_s1] ss:$12 sps:$4 sm:$0xff]   ;;  %v881_v3 = vmov 0.0   ;;  %v882_v4 = vmov 0   ;;  %v72_v55 = vlaneseq  ;;  %s878_s12 = sphi %s904_s12, %s26_s12  }
   0x3   : > { %736 = vmatprep.subr.bf16.mxu1 %v881_v3  ;;  %247 = vmatprep.mubr.bf16.mxu0 %v882_v4  ;;  %v791_v5 = vld [vmem:[%s1114_s1 + $0x1c] ss:$12 sps:$4 sm:$0xff]   ;;  %vm883_vm0 = vmmov 0   ;;  %v793_v6 = vld [vmem:[%s1114_s1 + $0x18] ss:$12 sps:$4 sm:$0xff]   ;;  %s711_s4 = smul.u32 48, %s878_s12 }
   0x4   : > { %215 = vmatprep.subr.bf16.mxu0 %v788_v1  ;;  %752 = vmatprep.mubr.msk.bf16.mxu1 %vm883_vm0, %v881_v3  ;;  %v794_v7 = vld [vmem:[%s1114_s1 + $0x34] ss:$12 sps:$4 sm:$0xff]   ;;  %v796_v8 = vld [vmem:[%s1114_s1 + $0x30] ss:$12 sps:$4 sm:$0xff]   ;;  %v797_v9 = vld [vmem:[%s1114_s1 + $0x4c] ss:$12 sps:$4 sm:$0xff]  }
   0x5   : > { %216 = vmatpush1.bf16.msra.mxu0 %v790_v2  ;;  %v809_v10 = vld [vmem:[%s1114_s1 + $0x8] ss:$12 sps:$4 sm:$0xff]   ;;  %v800_v12 = vld [vmem:[%s1114_s1 + $0x64] ss:$12 sps:$4 sm:$0xff]   ;;  %v813_v13 = vld [vmem:[%s1114_s1 + $0x20] ss:$12 sps:$4 sm:$0xff]   ;;  %s1092_s9 = scalar_lea.vmem %s1113_s0, %s711_s4 }
   0x6   : > { %217 = vmatprep.subr.bf16.mxu0 %v791_v5  ;;  %v799_v11 = vld [vmem:[%s1114_s1 + $0x48] ss:$12 sps:$4 sm:$0xff]   ;;  %737 = vmatpush3.bf16.msra.mxu1 %v809_v10  ;;  %v802_v14 = vld [vmem:[%s1114_s1 + $0x60] ss:$12 sps:$4 sm:$0xff]   ;;  %v817_v16 = vld [vmem:[%s1114_s1 + $0x38] ss:$12 sps:$4 sm:$0xff]  }
   0x7   : > { %738 = vmatprep.subr.bf16.mxu1 %v881_v3  ;;  %v803_v15 = vld [vmem:[%s1114_s1 + $0x7c] ss:$12 sps:$4 sm:$0xff]   ;;  %v805_v17 = vld [vmem:[%s1114_s1 + $0x78] ss:$12 sps:$4 sm:$0xff]   ;;  %v806_v18 = vld [vmem:[%s1114_s1 + $0x94] ss:$12 sps:$4 sm:$0xff]  }
   0x8   : > { %v821_v19 = vld [vmem:[%s1114_s1 + $0x50] ss:$12 sps:$4 sm:$0xff]   ;;  %v810_v21 = vld [vmem:[%s1114_s1 + $0xac] ss:$12 sps:$4 sm:$0xff]   ;;  %v825_v22 = vld [vmem:[%s1114_s1 + $0x68] ss:$12 sps:$4 sm:$0xff]  }
   0x9   : > { %218 = vmatpush1.bf16.msra.mxu0 %v793_v6  ;;  %v808_v20 = vld [vmem:[%s1114_s1 + $0x90] ss:$12 sps:$4 sm:$0xff]   ;;  %v812_v23 = vld [vmem:[%s1114_s1 + $0xa8] ss:$12 sps:$4 sm:$0xff]   ;;  %v979_v24 = vld [vmem:[#allocation2] sm:$0xff]  ;;  %v1081_v56 = vshrl.u32 %v72_v55, 7 }
   0xa   : > { %219 = vmatprep.subr.bf16.mxu0 %v794_v7  ;;  %739 = vmatpush3.bf16.msra.mxu1 %v813_v13  ;;  %v816_v25 = vld [vmem:[%s1114_s1 + $0xc4] ss:$12 sps:$4 sm:$0xff]   ;;  %v829_v26 = vld [vmem:[%s1114_s1 + $0x80] ss:$12 sps:$4 sm:$0xff]   ;;  %v37_v27 = vpack.c.bf16 %v979_v24, %v979_v24  ;;  %v820_v29 = vld [vmem:[%s1114_s1 + $0xdc] ss:$12 sps:$4 sm:$0xff]  }
   0xb   : > { %740 = vmatprep.subr.bf16.mxu1 %v881_v3  ;;  %v814_v28 = vld [vmem:[%s1114_s1 + $0xc0] ss:$12 sps:$4 sm:$0xff]   ;;  %v833_v30 = vld [vmem:[%s1114_s1 + $0x98] ss:$12 sps:$4 sm:$0xff]   ;;  %v837_v33 = vld [vmem:[%s1114_s1 + $0xb0] ss:$12 sps:$4 sm:$0xff]  }
   0xc   : > { %v818_v31 = vld [vmem:[%s1114_s1 + $0xd8] ss:$12 sps:$4 sm:$0xff]   ;;  %v824_v32 = vld [vmem:[%s1114_s1 + $0xf4] ss:$12 sps:$4 sm:$0xff]   ;;  %v822_v34 = vld [vmem:[%s1114_s1 + $0xf0] ss:$12 sps:$4 sm:$0xff]  }
   0xd   : > { %220 = vmatpush1.bf16.msra.mxu0 %v796_v8  ;;  %v828_v35 = vld [vmem:[%s1114_s1 + $0x10c] ss:$12 sps:$4 sm:$0xff]   ;;  %v841_v36 = vld [vmem:[%s1114_s1 + $0xc8] ss:$12 sps:$4 sm:$0xff]   ;;  %v832_v38 = vld [vmem:[%s1114_s1 + $0x124] ss:$12 sps:$4 sm:$0xff]  }
   0xe   : > { %221 = vmatprep.subr.bf16.mxu0 %v797_v9  ;;  %741 = vmatpush3.bf16.msra.mxu1 %v817_v16  ;;  %v826_v37 = vld [vmem:[%s1114_s1 + $0x108] ss:$12 sps:$4 sm:$0xff]   ;;  %v845_v39 = vld [vmem:[%s1114_s1 + $0xe0] ss:$12 sps:$4 sm:$0xff]   ;;  %v846_v42 = vld [vmem:[%s1114_s1 + $0xf8] ss:$12 sps:$4 sm:$0xff]  }
   0xf   : > { %742 = vmatprep.subr.bf16.mxu1 %v881_v3  ;;  %v830_v40 = vld [vmem:[%s1114_s1 + $0x120] ss:$12 sps:$4 sm:$0xff]   ;;  %v836_v41 = vld [vmem:[%s1114_s1 + $0x13c] ss:$12 sps:$4 sm:$0xff]   ;;  %v834_v43 = vld [vmem:[%s1114_s1 + $0x138] ss:$12 sps:$4 sm:$0xff]  }
  0x10   : > { %v840_v44 = vld [vmem:[%s1114_s1 + $0x154] ss:$12 sps:$4 sm:$0xff]   ;;  %v847_v45 = vld [vmem:[%s1114_s1 + $0x110] ss:$12 sps:$4 sm:$0xff]   ;;  %v844_v47 = vld [vmem:[%s1114_s1 + $0x16c] ss:$12 sps:$4 sm:$0xff]  }
  0x11   : > { %222 = vmatpush1.bf16.msra.mxu0 %v799_v11  ;;  %v838_v46 = vld [vmem:[%s1114_s1 + $0x150] ss:$12 sps:$4 sm:$0xff]   ;;  %v848_v48 = vld [vmem:[%s1114_s1 + $0x128] ss:$12 sps:$4 sm:$0xff]   ;;  %v849_v51 = vld [vmem:[%s1114_s1 + $0x140] ss:$12 sps:$4 sm:$0xff]  }
  0x12   : > { %223 = vmatprep.subr.bf16.mxu0 %v800_v12  ;;  %743 = vmatpush3.bf16.msra.mxu1 %v821_v19  ;;  %v842_v49 = vld [vmem:[%s1114_s1 + $0x168] ss:$12 sps:$4 sm:$0xff]   ;;  %v850_v53 = vld [vmem:[%s1114_s1 + $0x158] ss:$12 sps:$4 sm:$0xff]   ;;  %v851_v54 = vld [vmem:[%s1114_s1 + $0x170] ss:$12 sps:$4 sm:$0xff]  }
  0x13   : > { %744 = vmatprep.subr.bf16.mxu1 %v881_v3  ;;  %v1065_v50 = vld [vmem:[#allocation2 + $0x8] sm:$0xff]  ;;  %v74_v57 = vsub.s32 0, %v1081_v56  ;;  %v70_v58 = vld [vmem:[%s1115_s2] sm:$0x7]  ;;  %v78_v59 = vsub.s32 1, %v1081_v56  ;;  %v82_v16 = vsub.s32 2, %v1081_v56 }
  0x14   : > { %v320_v52 = vpack.c.bf16 %v1065_v50, %v1065_v50  ;;  %v30_v62 = vld [vmem:[%s1092_s9] sm:$0xff]  ;;  %v31_v5 = vld [vmem:[%s1092_s9 + $0x8] sm:$0xff]  ;;  %s712_s13 = sshll.u32 %s878_s12, 3  ;;  %s26_s12 = sadd.s32 1, %s878_s12  }
  0x15   : > { %224 = vmatpush1.bf16.msra.mxu0 %v802_v14  ;;  %v75_v60 = vrot.slane %v70_v58, %v74_v57  ;;  %v79_v61 = vrot.slane %v70_v58, %v78_v59  ;;  %v682_v19 = vld [vmem:[%s1115_s2 + $0x3] sm:$0x7]  ;;  %s607_s16 = scalar_lea.vmem %s1116_s3, %s712_s13  ;;  %p23_p0 = scmp.ge.s32.totalorder %s26_s12, 12  }
  0x16   : > { %225 = vmatprep.subr.bf16.mxu0 %v803_v15  ;;  %745 = vmatpush3.bf16.msra.mxu1 %v825_v22  ;;  %v360_v22 = vrot.slane %v682_v19, %v74_v57 }
  0x17   : > { %746 = vmatprep.subr.bf16.mxu1 %v881_v3 }
  0x19   : > { %226 = vmatpush1.bf16.msra.mxu0 %v805_v17  ;;  %v83_v17 = vrot.slane %v70_v58, %v82_v16 }
  0x1a   : > { %227 = vmatprep.subr.bf16.mxu0 %v806_v18  ;;  %747 = vmatpush3.bf16.msra.mxu1 %v829_v26  ;;  %v364_v26 = vrot.slane %v682_v19, %v78_v59  ;;  %v35_v59 = vld [vmem:[%s1092_s9 + $0x28] sm:$0xff] }
  0x1b   : > { %748 = vmatprep.subr.bf16.mxu1 %v881_v3 }
  0x1d   : > { %228 = vmatpush1.bf16.msra.mxu0 %v808_v20 }
  0x1e   : > { %229 = vmatprep.subr.bf16.mxu0 %v810_v21  ;;  %749 = vmatpush3.bf16.msra.mxu1 %v833_v30 }
  0x1f   : > { %750 = vmatprep.subr.bf16.mxu1 %v881_v3 }
  0x21   : > { %230 = vmatpush1.bf16.msra.mxu0 %v812_v23 }
  0x22   : > { %500 = vmatprep.subr.bf16.mxu0 %v816_v25  ;;  %751 = vmatpush3.bf16.msra.mxu1 %v837_v33  ;;  %v32_v25 = vld [vmem:[%s1092_s9 + $0x10] sm:$0xff] }
  0x23   : > { %756 = vmatprep.subr.bf16.mxu1 %v881_v3 }
  0x24   : > { %248 = vmatmul.mubr.bf16.vlgmr.msra.gmra.mrb[0].mxu0 %v37_v27 }
  0x25   : > { %501 = vmatpush1.bf16.msra.mxu0 %v814_v28  ;;  %532 = vmatprep.mubr.bf16.mxu0 %v882_v4  ;;  %v33_v28 = vld [vmem:[%s1092_s9 + $0x18] sm:$0xff] }
  0x26   : > { %502 = vmatprep.subr.bf16.mxu0 %v820_v29  ;;  %753 = vmatmul.mubr.bf16.vlgmr.msra.gmra.mrb[0].mxu1 %v37_v27 }
  0x27   : > { %757 = vmatpush3.bf16.msra.mxu1 %v841_v36  ;;  %772 = vmatprep.mubr.msk.bf16.mxu1 %vm883_vm0, %v881_v3  ;;  %v34_v36 = vld [vmem:[%s1092_s9 + $0x20] sm:$0xff] }
  0x28   : > { %758 = vmatprep.subr.bf16.mxu1 %v881_v3 }
  0x29   : > { %503 = vmatpush1.bf16.msra.mxu0 %v818_v31 }
  0x2a   : > { %504 = vmatprep.subr.bf16.mxu0 %v824_v32 }
  0x2b   : > { %759 = vmatpush3.bf16.msra.mxu1 %v845_v39 }
  0x2c   : > { %760 = vmatprep.subr.bf16.mxu1 %v881_v3 }
  0x2d   : > { %505 = vmatpush1.bf16.msra.mxu0 %v822_v34 }
  0x2e   : > { %506 = vmatprep.subr.bf16.mxu0 %v828_v35 }
  0x2f   : > { %761 = vmatpush3.bf16.msra.mxu1 %v846_v42 }
  0x30   : > { %762 = vmatprep.subr.bf16.mxu1 %v881_v3 }
  0x31   : > { %507 = vmatpush1.bf16.msra.mxu0 %v826_v37 }
  0x32   : > { %508 = vmatprep.subr.bf16.mxu0 %v832_v38 }
  0x33   : > { %763 = vmatpush3.bf16.msra.mxu1 %v847_v45 }
  0x34   : > { %764 = vmatprep.subr.bf16.mxu1 %v881_v3 }
  0x35   : > { %509 = vmatpush1.bf16.msra.mxu0 %v830_v40 }
  0x36   : > { %510 = vmatprep.subr.bf16.mxu0 %v836_v41 }
  0x37   : > { %765 = vmatpush3.bf16.msra.mxu1 %v848_v48 }
  0x38   : > { %766 = vmatprep.subr.bf16.mxu1 %v881_v3 }
  0x39   : > { %511 = vmatpush1.bf16.msra.mxu0 %v834_v43 }
  0x3a   : > { %512 = vmatprep.subr.bf16.mxu0 %v840_v44 }
  0x3b   : > { %767 = vmatpush3.bf16.msra.mxu1 %v849_v51 }
  0x3c   : > { %768 = vmatprep.subr.bf16.mxu1 %v881_v3 }
  0x3d   : > { %513 = vmatpush1.bf16.msra.mxu0 %v838_v46 }
  0x3e   : > { %514 = vmatprep.subr.bf16.mxu0 %v844_v47 }
  0x3f   : > { %769 = vmatpush3.bf16.msra.mxu1 %v850_v53 }
  0x40   : > { %770 = vmatprep.subr.bf16.mxu1 %v881_v3 }
  0x41   : > { %515 = vmatpush1.bf16.msra.mxu0 %v842_v49 }
  0x43   : > { %771 = vmatpush3.bf16.msra.mxu1 %v851_v54  ;;  %v368_v54 = vrot.slane %v682_v19, %v82_v16 }
  0x44   : > { %533 = vmatmul.mubr.bf16.vlgmr.msra.gmra.mrb[4].mxu0 %v320_v52 }
  0x46   : > { %773 = vmatmul.mubr.bf16.vlgmr.msra.gmra.mrb[4].mxu1 %v320_v52 }
  0xf7   : > { %v249_v63 = vpop.f32.mrb[0].mxu0 }
  0xf8   : > { %v250_v0 = vadd.f32 %v249_v63, %v75_v60  ;;  %v251_v1 = vpop.f32.mrb[1].mxu0 }
  0xf9   : > { %v252_v2 = vadd.f32 %v251_v1, %v79_v61  ;;  %v253_v3 = vpop.f32.mrb[2].mxu0  ;;  %v290_v9 = vpop.f32.mrb[0].mxu1 }
  0xfa   : > { %v296_v4 = vadd.f32 %v250_v0, %v30_v62  ;;  %v254_v6 = vpop.f32.mrb[3].mxu0  ;;  %v754_v11 = vpop.f32.mrb[1].mxu1  ;;  %v291_v21 = vadd.f32 %v290_v9, %v83_v17 }
  0xfb   : > { %v303_v8 = vadd.f32 %v252_v2, %v31_v5  ;;  %v293_v12 = vpop.f32.mrb[2].mxu1 }
  0xfc   : > { %v648_v7 = vmul.f32 -1.442695, %v296_v4  ;;  %v755_v13 = vpop.f32.mrb[3].mxu1 }
  0xfd   : > { %v649_v10 = vmul.f32 -1.442695, %v303_v8 }
  0xfe   : > { %852 = vpow2.f32 %v648_v7 }
  0xff   : > { %854 = vpow2.f32 %v649_v10 }
 0x108   : > { %v853_v14 = vpop.eup %852 }
 0x109   : > { %v300_v15 = vadd.f32 1.0, %v853_v14  ;;  %v855_v18 = vpop.eup %854 }
 0x10a   : > { %v307_v20 = vadd.f32 1.0, %v855_v18 }
 0x10b   : > { %856 = vrcp.f32 %v300_v15 }
 0x10c   : > { %858 = vrcp.f32 %v307_v20 }
 0x115   : > { %v857_v23 = vpop.eup %856 }
 0x116   : > { %v310_v27 = vmul.f32 %v857_v23, %v291_v21  ;;  %v859_v40 = vpop.eup %858 }
 0x117   : > { %v534_v29 = vpop.f32.mrb[4].mxu0  ;;  %v313_v45 = vsub.f32 1.0, %v859_v40  ;;  %v315_v48 = vmul.f32 %v859_v40, %v979_v24 }
 0x118   : > { %v311_v30 = vadd.f32 %v310_v27, %v32_v25  ;;  %v535_v31 = vadd.f32 %v534_v29, %v360_v22  ;;  %v536_v32 = vpop.f32.mrb[5].mxu0 }
 0x119   : > { %v537_v33 = vadd.f32 %v536_v32, %v364_v26  ;;  %v538_v34 = vpop.f32.mrb[6].mxu0  ;;  %v575_v41 = vpop.f32.mrb[4].mxu1 }
 0x11a   : > { %860 = vtanh.f32 %v311_v30  ;;  %v581_v35 = vadd.f32 %v535_v31, %v33_v28  ;;  %v539_v37 = vpop.f32.mrb[7].mxu0  ;;  %v774_v43 = vpop.f32.mrb[5].mxu1  ;;  %v576_v57 = vadd.f32 %v575_v41, %v368_v54 }
 0x11b   : > { %v588_v39 = vadd.f32 %v537_v33, %v34_v36  ;;  %v578_v44 = vpop.f32.mrb[6].mxu1 }
 0x11c   : > { %v707_v38 = vmul.f32 -1.442695, %v581_v35  ;;  %v775_v46 = vpop.f32.mrb[7].mxu1 }
 0x11d   : > { %v708_v42 = vmul.f32 -1.442695, %v588_v39 }
 0x11e   : > { %862 = vpow2.f32 %v707_v38 }
 0x11f   : > { %864 = vpow2.f32 %v708_v42 }
 0x124   : > { %v861_v47 = vpop.eup %860 }
 0x125   : > { %v314_v49 = vmul.f32 %v861_v47, %v313_v45 }
 0x127   : > { %v316_v51 = vadd.f32 %v315_v48, %v314_v49 }
 0x128   : > { %v863_v52 = vpop.eup %862 }
 0x129   : > { %317 = vst [vmem:[#allocation2] sm:$0xff] %v316_v51  ;;  %v585_v53 = vadd.f32 1.0, %v863_v52  ;;  %v865_v55 = vpop.eup %864 }
 0x12a   : > { %v592_v56 = vadd.f32 1.0, %v865_v55 }
 0x12b   : > { %866 = vrcp.f32 %v585_v53 }
 0x12c   : > { %868 = vrcp.f32 %v592_v56 }
 0x135   : > { %v867_v58 = vpop.eup %866 }
 0x136   : > { %v595_v60 = vmul.f32 %v867_v58, %v576_v57  ;;  %v869_v62 = vpop.eup %868 }
 0x137   : > { %v598_v24 = vsub.f32 1.0, %v869_v62  ;;  %v600_v0 = vmul.f32 %v869_v62, %v1065_v50 }
 0x138   : > { %v596_v61 = vadd.f32 %v595_v60, %v35_v59 }
 0x13a   : > { %870 = vtanh.f32 %v596_v61 }
 0x144   : > { %v871_v63 = vpop.eup %870 }
 0x145   : > { %v599_v1 = vmul.f32 %v871_v63, %v598_v24  ;;  %25 = sbr.rel (!%p23_p0) target bundleno = 2 (0x2), region = 48 }
 0x147   : > { %v601_v2 = vadd.f32 %v600_v0, %v599_v1 }
 0x149   : > { %602 = vst [vmem:[#allocation2 + $0x8] sm:$0xff] %v601_v2  ;;  %v716_v3 = vpack.c.bf16 %v601_v2, %v316_v51 }
 0x14b   : > { %717 = vst [vmem:[%s607_s16] sm:$0xff] %v716_v3  }

// kernel: _lambda_.27
= control target key start
LH: loop header
LB: loop body
LE: loop exit
PB: predicated region body
PF: predicated region fallthrough
CT: control target
= control target key end

     0   :  { %s1363_s15 = smov 0   ;;  %s1365_s16 = smov 0   ;;  %s1584_s0 = inlined_call_operand.vmem [shape: bf16[2,16,128], index: 0, kind: input, shape index: {}]   ;;  %s1585_s1 = inlined_call_operand.vmem [shape: bf16[5,128,128], index: 1, kind: input, shape index: {}]   ;;  %s1586_s2 = inlined_call_operand.vmem [shape: f32[1,128], index: 2, kind: input, shape index: {}]   ;;  %s1587_s3 = inlined_call_operand.vmem [shape: f32[1,128], index: 3, kind: input, shape index: {}]   ;;  %s1588_s4 = inlined_call_operand.vmem [shape: bf16[2,8,128], index: 4, kind: output, shape index: {}]  }
   0x1   :  { %s1367_s17 = smov 0  }
   0x2 LB: > { %s26_s18 = sadd.s32 1, %s1330_s16  ;;  %p967_p0 = scmp.ge.s32.totalorder %s1334_s17, 1  ;;  %s1334_s17 = sphi %s1367_s17, %s14_s17   ;;  %s1330_s16 = sphi %s1365_s16, %s1590_s16   ;;  %s1326_s15 = sphi %s1363_s15, %s1589_s15  }
   0x3   : > { %p28_p1 = scmp.ge.s32.totalorder %s26_s18, 2  ;;  %p201_p2 = scmp.lt.s32.totalorder %s1334_s17, 3 }
   0x5   : > { %s1592_s18 = smov (%p28_p1, %s26_s18), 0  ;;  %p202_p3 = pnand %p967_p0, %p201_p2 }
   0x6   : > { %v1268_v0 = vld [vmem:[%s1585_s1 + $0x40] sm:$0xff] (!%p202_p3)   ;;  %v1336_v1 = vmov (!%p202_p3), 0.0   ;;  %v1270_v3 = vld [vmem:[%s1585_s1 + $0x48] sm:$0xff] (!%p202_p3)   ;;  %vm1337_vm0 = vmmov (!%p202_p3), 0   ;;  %p239_p4 = scmp.lt.s32.totalorder (!%p202_p3), %s1326_s15, 1  ;;  %v1272_v5 = vld [vmem:[%s1585_s1 + $0x50] sm:$0xff] (!%p202_p3)  }
   0x7   : > { %205 = sbr.rel (%p202_p3) target bundleno = 327 (0x147), region = 36  ;;  %1129 = vmatprep.subr.bf16.mxu1 (!%p202_p3), %v1336_v1  ;;  %1169 = vmatprep.subr.bf16.mxu0 (!%p202_p3), %v1336_v1  ;;  %v1269_v2 = vld [vmem:[%s1585_s1 + $0x80] sm:$0xff] (!%p202_p3)   ;;  %v1271_v4 = vld [vmem:[%s1585_s1 + $0x88] sm:$0xff] (!%p202_p3)   ;;  %v1273_v6 = vld [vmem:[%s1585_s1 + $0x90] sm:$0xff] (!%p202_p3)  }
   0x8   : > { %1130 = vmatpush3.bf16.msra.mxu1 (!%p202_p3), %v1268_v0  ;;  %1145 = vmatprep.mubr.msk.bf16.mxu1 (!%p202_p3), %vm1337_vm0, %v1336_v1  ;;  %v1274_v7 = vld [vmem:[%s1585_s1 + $0x58] sm:$0xff] (!%p202_p3)   ;;  %v1276_v9 = vld [vmem:[%s1585_s1 + $0x60] sm:$0xff] (!%p202_p3)   ;;  %v1278_v14 = vld [vmem:[%s1585_s1 + $0x68] sm:$0xff] (!%p202_p3)  }
   0x9   : > { %1170 = vmatpush3.bf16.msra.mxu0 (!%p202_p3), %v1269_v2  ;;  %1131 = vmatprep.subr.bf16.mxu1 (!%p202_p3), %v1336_v1  ;;  %v1275_v8 = vld [vmem:[%s1585_s1 + $0x98] sm:$0xff] (!%p202_p3)   ;;  %v1277_v10 = vld [vmem:[%s1585_s1 + $0xa0] sm:$0xff] (!%p202_p3)   ;;  %v1279_v15 = vld [vmem:[%s1585_s1 + $0xa8] sm:$0xff] (!%p202_p3)  }
   0xa   : > { %1171 = vmatprep.subr.bf16.mxu0 (!%p202_p3), %v1336_v1  ;;  %1185 = vmatprep.mubr.msk.bf16.mxu0 (!%p202_p3), %vm1337_vm0, %v1336_v1  ;;  %v1280_v16 = vld [vmem:[%s1585_s1 + $0x70] sm:$0xff] (!%p202_p3)   ;;  %v1282_v22 = vld [vmem:[%s1585_s1 + $0x78] sm:$0xff] (!%p202_p3)   ;;  %v1285_v26 = vld [vmem:[%s1585_s1] sm:$0xff] (!%p202_p3)  }
   0xb   : > { %v1281_v18 = vld [vmem:[%s1585_s1 + $0xb0] sm:$0xff] (!%p202_p3)   ;;  %v1283_v24 = vld [vmem:[%s1585_s1 + $0xb8] sm:$0xff] (!%p202_p3)   ;;  %v1288_v28 = vld [vmem:[%s1585_s1 + $0xc0] sm:$0xff] (!%p202_p3)  }
   0xc   : > { %1132 = vmatpush3.bf16.msra.mxu1 (!%p202_p3), %v1270_v3  ;;  %v1289_v29 = vld [vmem:[%s1585_s1 + $0x8] sm:$0xff] (!%p202_p3)   ;;  %v1291_v31 = vld [vmem:[%s1585_s1 + $0x10] sm:$0xff] (!%p202_p3)   ;;  %v1293_v33 = vld [vmem:[%s1585_s1 + $0x18] sm:$0xff] (!%p202_p3)  }
   0xd   : > { %1172 = vmatpush3.bf16.msra.mxu0 (!%p202_p3), %v1271_v4  ;;  %1133 = vmatprep.subr.bf16.mxu1 (!%p202_p3), %v1336_v1  ;;  %v1290_v30 = vld [vmem:[%s1585_s1 + $0xc8] sm:$0xff] (!%p202_p3)   ;;  %v1292_v32 = vld [vmem:[%s1585_s1 + $0xd0] sm:$0xff] (!%p202_p3)   ;;  %v1294_v34 = vld [vmem:[%s1585_s1 + $0xd8] sm:$0xff] (!%p202_p3)  }
   0xe   : > { %s1594_s15 = smov (!%p239_p4, %s1326_s15), 1  ;;  %1173 = vmatprep.subr.bf16.mxu0 %v1336_v1  ;;  %v1295_v35 = vld [vmem:[%s1585_s1 + $0x20] sm:$0xff]   ;;  %v1297_v39 = vld [vmem:[%s1585_s1 + $0x28] sm:$0xff]   ;;  %v1299_v43 = vld [vmem:[%s1585_s1 + $0x30] sm:$0xff]  }
   0xf   : > { %s1083_s7 = sshll.u32 %s1594_s15, 3  ;;  %v1296_v37 = vld [vmem:[%s1585_s1 + $0xe0] sm:$0xff]   ;;  %v1298_v40 = vld [vmem:[%s1585_s1 + $0xe8] sm:$0xff]   ;;  %v1300_v44 = vld [vmem:[%s1585_s1 + $0xf0] sm:$0xff]   ;;  %s970_s21 = sshll.u32 %s1594_s15, 2 }
  0x10   : > { %1134 = vmatpush3.bf16.msra.mxu1 %v1272_v5  ;;  %s1423_s12 = scalar_lea.vmem %s1584_s0, %s1083_s7  ;;  %v1301_v47 = vld [vmem:[%s1585_s1 + $0x38] sm:$0xff]   ;;  %v1303_v51 = vld [vmem:[%s1585_s1 + $0x100] sm:$0xff]   ;;  %v1304_v52 = vld [vmem:[%s1585_s1 + $0x108] sm:$0xff]   ;;  %s260_s24 = scalar_lea.vmem %s1588_s4, %s970_s21 }
  0x11   : > { %1174 = vmatpush3.bf16.msra.mxu0 %v1273_v6  ;;  %1135 = vmatprep.subr.bf16.mxu1 %v1336_v1  ;;  %v279_v11 = vld [vmem:[%s1423_s12] sm:$0xf]  ;;  %v280_v12 = vld [vmem:[%s1423_s12 + $0x4] sm:$0x1]  ;;  %v1302_v48 = vld [vmem:[%s1585_s1 + $0xf8] sm:$0xff]  }
  0x12   : > { %1175 = vmatprep.subr.bf16.mxu0 %v1336_v1  ;;  %v987_v13 = vcombine.low %v279_v11, %v280_v12  ;;  %v487_v19 = vld [vmem:[%s1423_s12] sm:$0xe]  ;;  %v599_v36 = vld [vmem:[%s1423_s12 + $0x4] sm:$0x3]  ;;  %v1305_v53 = vld [vmem:[%s1585_s1 + $0x110] sm:$0xff]  }
  0x13   : > { %v1020_v23 = vcombine.low %v487_v19, %v280_v12  ;;  %v1045_v38 = vcombine.low %v487_v19, %v599_v36  ;;  %v262_v49 = vld [vmem:[%s1423_s12] sm:$0xf]  ;;  %v1306_v54 = vld [vmem:[%s1585_s1 + $0x118] sm:$0xff]   ;;  %v1308_v56 = vld [vmem:[%s1585_s1 + $0x128] sm:$0xff]  }
  0x14   : > { %1136 = vmatpush3.bf16.msra.mxu1 %v1274_v7  ;;  %v306_v17 = vshll.u32 %v987_v13, 16  ;;  %v304_v20 = vshrl.u32 %v987_v13, 16  ;;  %v1307_v55 = vld [vmem:[%s1585_s1 + $0x120] sm:$0xff]   ;;  %v1309_v57 = vld [vmem:[%s1585_s1 + $0x130] sm:$0xff]   ;;  %v1310_v60 = vld [vmem:[%s1585_s1 + $0x138] sm:$0xff]  }
  0x15   : > { %1176 = vmatpush3.bf16.msra.mxu0 %v1275_v8  ;;  %1137 = vmatprep.subr.bf16.mxu1 %v1336_v1  ;;  %v508_v27 = vrot.slane %v1020_v23, 1  ;;  %v621_v41 = vshrl.u32 %v1045_v38, 16  ;;  %v624_v42 = vshll.u32 %v1045_v38, 16  ;;  %v718_v58 = vld [vmem:[%s1423_s12] sm:$0xc] }
  0x16   : > { %1177 = vmatprep.subr.bf16.mxu0 %v1336_v1  ;;  %v308_v21 = vrot.slane %v306_v17, 1  ;;  %v1070_v59 = vcombine.low %v718_v58, %v599_v36  ;;  %v1079_v6 = vld [vmem:[%s1586_s2] ss:$0 sm:$0xff] }
  0x17   : > { %v623_v45 = vrot.slane %v621_v41, 1  ;;  %v626_v46 = vrot.slane %v624_v42, 2 }
  0x18   : > { %1138 = vmatpush3.bf16.msra.mxu1 %v1276_v9  ;;  %v309_v25 = vor.u32 %v308_v21, %v304_v20  ;;  %v739_v61 = vrot.slane %v1070_v59, 2 }
  0x19   : > { %1178 = vmatpush3.bf16.msra.mxu0 %v1277_v10  ;;  %1139 = vmatprep.subr.bf16.mxu1 %v1336_v1  ;;  %v627_v50 = vor.u32 %v626_v46, %v623_v45 }
  0x1a   : > { %1179 = vmatprep.subr.bf16.mxu0 %v1336_v1 }
  0x1c   : > { %1140 = vmatpush3.bf16.msra.mxu1 %v1278_v14 }
  0x1d   : > { %1180 = vmatpush3.bf16.msra.mxu0 %v1279_v15  ;;  %1141 = vmatprep.subr.bf16.mxu1 %v1336_v1 }
  0x1e   : > { %1181 = vmatprep.subr.bf16.mxu0 %v1336_v1 }
  0x20   : > { %1142 = vmatpush3.bf16.msra.mxu1 %v1280_v16 }
  0x21   : > { %1182 = vmatpush3.bf16.msra.mxu0 %v1281_v18  ;;  %1143 = vmatprep.subr.bf16.mxu1 %v1336_v1 }
  0x22   : > { %1183 = vmatprep.subr.bf16.mxu0 %v1336_v1 }
  0x24   : > { %1144 = vmatpush3.bf16.msra.mxu1 %v1282_v22 }
  0x25   : > { %1184 = vmatpush3.bf16.msra.mxu0 %v1283_v24  ;;  %1149 = vmatprep.subr.bf16.mxu1 %v1336_v1 }
  0x26   : > { %1189 = vmatprep.subr.bf16.mxu0 %v1336_v1 }
  0x27   : > { %1146 = vmatmul.mubr.bf16.vlgmr.msra.gmra.mrb[0].mxu1 %v309_v25 }
  0x28   : > { %1150 = vmatpush3.bf16.msra.mxu1 %v1285_v26  ;;  %1186 = vmatmul.mubr.bf16.vlgmr.msra.gmra.mrb[0].mxu0 %v508_v27 }
  0x29   : > { %1190 = vmatpush3.bf16.msra.mxu0 %v1288_v28  ;;  %1151 = vmatprep.subr.bf16.mxu1 %v1336_v1 }
  0x2a   : > { %1191 = vmatprep.subr.bf16.mxu0 %v1336_v1  ;;  %1165 = vmatprep.mubr.msk.bf16.mxu1 %vm1337_vm0, %v1336_v1 }
  0x2b   : > { %1205 = vmatprep.mubr.msk.bf16.mxu0 %vm1337_vm0, %v1336_v1 }
  0x2c   : > { %1152 = vmatpush3.bf16.msra.mxu1 %v1289_v29 }
  0x2d   : > { %1192 = vmatpush3.bf16.msra.mxu0 %v1290_v30  ;;  %1153 = vmatprep.subr.bf16.mxu1 %v1336_v1 }
  0x2e   : > { %1193 = vmatprep.subr.bf16.mxu0 %v1336_v1 }
  0x30   : > { %1154 = vmatpush3.bf16.msra.mxu1 %v1291_v31 }
  0x31   : > { %1194 = vmatpush3.bf16.msra.mxu0 %v1292_v32  ;;  %1155 = vmatprep.subr.bf16.mxu1 %v1336_v1 }
  0x32   : > { %1195 = vmatprep.subr.bf16.mxu0 %v1336_v1 }
  0x34   : > { %1156 = vmatpush3.bf16.msra.mxu1 %v1293_v33 }
  0x35   : > { %1196 = vmatpush3.bf16.msra.mxu0 %v1294_v34  ;;  %1157 = vmatprep.subr.bf16.mxu1 %v1336_v1 }
  0x36   : > { %1197 = vmatprep.subr.bf16.mxu0 %v1336_v1 }
  0x38   : > { %1158 = vmatpush3.bf16.msra.mxu1 %v1295_v35 }
  0x39   : > { %1198 = vmatpush3.bf16.msra.mxu0 %v1296_v37  ;;  %1159 = vmatprep.subr.bf16.mxu1 %v1336_v1 }
  0x3a   : > { %1199 = vmatprep.subr.bf16.mxu0 %v1336_v1 }
  0x3c   : > { %1160 = vmatpush3.bf16.msra.mxu1 %v1297_v39 }
  0x3d   : > { %1200 = vmatpush3.bf16.msra.mxu0 %v1298_v40  ;;  %1161 = vmatprep.subr.bf16.mxu1 %v1336_v1 }
  0x3e   : > { %1201 = vmatprep.subr.bf16.mxu0 %v1336_v1 }
  0x40   : > { %1162 = vmatpush3.bf16.msra.mxu1 %v1299_v43 }
  0x41   : > { %1202 = vmatpush3.bf16.msra.mxu0 %v1300_v44  ;;  %1163 = vmatprep.subr.bf16.mxu1 %v1336_v1 }
  0x42   : > { %1203 = vmatprep.subr.bf16.mxu0 %v1336_v1 }
  0x44   : > { %1164 = vmatpush3.bf16.msra.mxu1 %v1301_v47 }
  0x45   : > { %1204 = vmatpush3.bf16.msra.mxu0 %v1302_v48 }
  0x46   : > { %1209 = vmatprep.subr.bf16.mxu0 %v1336_v1 }
  0x47   : > { %1166 = vmatmul.mubr.bf16.vlgmr.msra.gmra.mrb[0].mxu1 %v262_v49 }
  0x48   : > { %1206 = vmatmul.mubr.bf16.vlgmr.msra.gmra.mrb[0].mxu0 %v627_v50 }
  0x49   : > { %1210 = vmatpush3.bf16.msra.mxu0 %v1303_v51  ;;  %1225 = vmatprep.mubr.msk.bf16.mxu0 %vm1337_vm0, %v1336_v1 }
  0x4a   : > { %1211 = vmatprep.subr.bf16.mxu0 %v1336_v1 }
  0x4d   : > { %1212 = vmatpush3.bf16.msra.mxu0 %v1304_v52 }
  0x4e   : > { %1213 = vmatprep.subr.bf16.mxu0 %v1336_v1 }
  0x51   : > { %1214 = vmatpush3.bf16.msra.mxu0 %v1305_v53 }
  0x52   : > { %1215 = vmatprep.subr.bf16.mxu0 %v1336_v1 }
  0x55   : > { %1216 = vmatpush3.bf16.msra.mxu0 %v1306_v54 }
  0x56   : > { %1217 = vmatprep.subr.bf16.mxu0 %v1336_v1 }
  0x59   : > { %1218 = vmatpush3.bf16.msra.mxu0 %v1307_v55 }
  0x5a   : > { %1219 = vmatprep.subr.bf16.mxu0 %v1336_v1 }
  0x5d   : > { %1220 = vmatpush3.bf16.msra.mxu0 %v1308_v56 }
  0x5e   : > { %1221 = vmatprep.subr.bf16.mxu0 %v1336_v1 }
  0x61   : > { %1222 = vmatpush3.bf16.msra.mxu0 %v1309_v57 }
  0x62   : > { %1223 = vmatprep.subr.bf16.mxu0 %v1336_v1  ;;  %v1080_v1 = vld [vmem:[%s1587_s3] ss:$0 sm:$0xff] }
  0x65   : > { %1224 = vmatpush3.bf16.msra.mxu0 %v1310_v60 }
  0x68   : > { %1226 = vmatmul.mubr.bf16.vlgmr.msra.gmra.mrb[0].mxu0 %v739_v61 }
 0x11a   : > { %v481_v62 = vpop.f32.mrb[0].mxu1 }
 0x11b   : > { %v1167_v63 = vpop.f32.mrb[1].mxu1 }
 0x11c   : > { %v484_v0 = vpop.f32.mrb[2].mxu1 }
 0x11d   : > { %v1168_v2 = vpop.f32.mrb[3].mxu1 }
 0x13b   : > { %v823_v3 = vpop.f32.mrb[0].mxu0 }
 0x13c   : > { %v1229_v4 = vadd.f32 %v823_v3, %v481_v62  ;;  %v1227_v5 = vpop.f32.mrb[1].mxu0 }
 0x13d   : > { %v826_v7 = vpop.f32.mrb[2].mxu0 }
 0x13e   : > { %v830_v8 = vmax.f32 %v1229_v4, 0.0  ;;  %v1228_v9 = vpop.f32.mrb[3].mxu0 }
 0x140   : > { %v838_v10 = vmul.f32 %v1079_v6, %v830_v8 }
 0x142   : > { %v846_v11 = vadd.f32 %v1080_v1, %v838_v10 }
 0x144   : > { %v847_v12 = vpack.c.bf16 %v846_v11, %v846_v11 }
 0x146   : > { %848 = vst [vmem:[%s260_s24] sm:$0xf] %v847_v12 }
 0x147 PF: > { %s14_s17 = sadd.s32 1, %s1334_s17   ;;  %s1589_s15 = smov %s1330_s16 }
 0x148   : > { %p11_p5 = scmp.ge.s32.totalorder %s14_s17, 4   ;;  %s1590_s16 = smov %s1592_s18 }
 0x14a   :  { %13 = sbr.rel (!%p11_p5) target bundleno = 2 (0x2), region = 79 }

</bundles_post_ra>
